<compile_context>
chip_gen: v6e
topology: v6e:2x2x1
jax: 0.10.0
libtpu: 0.0.40
codegen_flags: <defaults>
</compile_context>

<pallas_src>
import jax
import jax.numpy as jnp
from jax import lax
from jax.experimental import pallas as pl
from jax.experimental.pallas import tpu as pltpu

EPS = 1e-5  # PyTorch BatchNorm2d default


# ----------------------------- kernel helpers -------------------------------

def _pad_into_scratch(pad_ref, val, B, H, W, C):
    """Write `val` (B, H, W, C) into pad_ref's interior; zero only the 1-px halo."""
    pad_ref[:, 1:1 + H, 1:1 + W, :] = val
    zrow = jnp.zeros((B, 1, W + 2, C), jnp.float32)
    zcol = jnp.zeros((B, H + 2, 1, C), jnp.float32)
    pad_ref[:, 0:1, :, :] = zrow
    pad_ref[:, H + 1:H + 2, :, :] = zrow
    pad_ref[:, :, 0:1, :] = zcol
    pad_ref[:, :, W + 1:W + 2, :] = zcol


def _im2col_bf16(pad_ref, B, H, W, C):
    """Build the (B*H*W, 9*C) im2col matrix (bf16) from the padded scratch."""
    M = B * H * W
    taps = []
    for dy in range(3):
        for dx in range(3):
            taps.append(pad_ref[:, dy:dy + H, dx:dx + W, :]
                        .reshape(M, C).astype(jnp.bfloat16))
    return jnp.concatenate(taps, axis=-1)  # (M, 9*C)


# ------------------------------- kernels ------------------------------------

def _make_conv_kernel(B, H, W, Cin, Cout, apply_bn_relu):
    """3x3 same-pad conv as a single im2col matmul.

    If apply_bn_relu, the (host-folded) BN affine + ReLU of the *previous*
    layer is fused onto the input first.  Emits bf16 activations plus per-block
    (sum, sumsq) partial BN statistics (reduced across blocks host-side)."""

    def kernel(*args):
        if apply_bn_relu:
            x_ref, sc_ref, sh_ref, w_ref, y_ref, stats_ref, pad_s = args
        else:
            x_ref, w_ref, y_ref, stats_ref, pad_s = args

        x = x_ref[...].astype(jnp.float32)                       # (B, H, W, Cin)
        if apply_bn_relu:
            x = jnp.maximum(x * sc_ref[...] + sh_ref[...], 0.0)  # folded BN + ReLU
        _pad_into_scratch(pad_s, x, B, H, W, Cin)

        col = _im2col_bf16(pad_s, B, H, W, Cin)                  # (M, 9*Cin) bf16
        y = jnp.dot(col, w_ref[...], preferred_element_type=jnp.float32)  # (M, Cout)

        # per-block partial BN statistics (f32), reduced across blocks on host
        stats_ref[0, 0:1, :] = jnp.sum(y, axis=0, keepdims=True)
        stats_ref[0, 1:2, :] = jnp.sum(y * y, axis=0, keepdims=True)
        y_ref[...] = y.reshape(B, H, W, Cout).astype(y_ref.dtype)

    return kernel


def _make_output_kernel(B, H, W, Cin, Cout, use_1x1conv):
    M = B * H * W

    def kernel(y2_ref, x_ref, sc_ref, sh_ref, *rest):
        if use_1x1conv:
            w3_ref, b3_ref, out_ref = rest
        else:
            (out_ref,) = rest
        # BN2 affine (folded host-side into scale/shift)
        z = y2_ref[...].astype(jnp.float32) * sc_ref[...] + sh_ref[...]
        if use_1x1conv:
            skip = jnp.dot(x_ref[...].reshape(M, Cin).astype(jnp.bfloat16),
                           w3_ref[...], preferred_element_type=jnp.float32)
            skip = (skip + b3_ref[...]).reshape(B, H, W, Cout)
        else:
            skip = x_ref[...]
        out_ref[...] = jnp.maximum(z + skip, 0.0)

    return kernel


# ------------------------------- wrapper -------------------------------------

def _bn_affine(stats, gamma, beta, count):
    """Fold batch mean/var (from per-block sum/sumsq) + gamma/beta into (scale, shift)."""
    s = jnp.sum(stats[:, 0, :], axis=0, keepdims=True)      # (1, C)
    ss = jnp.sum(stats[:, 1, :], axis=0, keepdims=True)     # (1, C)
    mean = s / count
    var = ss / count - mean * mean                           # biased variance
    scale = gamma * lax.rsqrt(var + EPS)
    shift = beta - mean * scale
    return scale, shift


def _residual_forward(x_nchw, params, use_1x1conv=False, stride=1, block_n=1):
    """Pallas implementation of Residual.forward. x_nchw: (N, Cin, H, W)."""
    assert stride == 1  # TODO(synk): strided (downsampling) path not implemented
    N, Cin, H, W = x_nchw.shape
    Cout = params["w1"].shape[-1]
    if not use_1x1conv:
        assert Cin == Cout, "identity skip requires Cin == Cout"
    assert N % block_n == 0
    B = block_n
    G = N // B
    NP = N * H * W

    # NHWC; TODO(synk): NCHW<->NHWC transposes are an extra HBM round trip, kept
    # only because the public API mirrors PyTorch's NCHW.
    x = jnp.transpose(x_nchw, (0, 2, 3, 1)).astype(jnp.float32)

    # Pre-fold 3x3 HWIO weights into im2col form (9*Cin, Cout); bf16 MXU operands.
    w1 = params["w1"].reshape(9 * Cin, Cout).astype(jnp.bfloat16)
    w2 = params["w2"].reshape(9 * Cout, Cout).astype(jnp.bfloat16)
    # conv biases b1/b2 intentionally unused: they cancel under train-mode BN.

    cparams = pltpu.CompilerParams(
        dimension_semantics=("parallel",),      # shard batch across TCs (v7x)
        vmem_limit_bytes=48 * 1024 * 1024)      # raise toward ~100MiB on v5e/v6e
                                                # when using larger block_n

    img_x = pl.BlockSpec((B, H, W, Cin), lambda i: (i, 0, 0, 0))
    img_y = pl.BlockSpec((B, H, W, Cout), lambda i: (i, 0, 0, 0))
    stats_spec = pl.BlockSpec((1, 2, Cout), lambda i: (i, 0, 0))
    vec_spec = pl.BlockSpec((1, Cout), lambda i: (0, 0))

    # ---- pass 1: conv1 (single im2col matmul) + per-block BN1 statistics ----
    y1, st1 = pl.pallas_call(
        _make_conv_kernel(B, H, W, Cin, Cout, apply_bn_relu=False),
        grid=(G,),
        in_specs=[img_x, pl.BlockSpec((9 * Cin, Cout), lambda i: (0, 0))],
        out_specs=(img_y, stats_spec),
        out_shape=(jax.ShapeDtypeStruct((N, H, W, Cout), jnp.bfloat16),
                   jax.ShapeDtypeStruct((G, 2, Cout), jnp.float32)),
        scratch_shapes=[pltpu.VMEM((B, H + 2, W + 2, Cin), jnp.float32)],
        compiler_params=cparams,
        cost_estimate=pl.CostEstimate(
            flops=2 * NP * 9 * Cin * Cout,
            transcendentals=0,
            bytes_accessed=4 * NP * Cin + 2 * NP * Cout
                           + 2 * 9 * Cin * Cout + 4 * G * 2 * Cout),
    )(x, w1)

    scale1, shift1 = _bn_affine(st1, params["g1"], params["be1"], NP)

    # ---- pass 2: folded BN1 + ReLU + conv2 + per-block BN2 statistics -------
    y2, st2 = pl.pallas_call(
        _make_conv_kernel(B, H, W, Cout, Cout, apply_bn_relu=True),
        grid=(G,),
        in_specs=[img_y, vec_spec, vec_spec,
                  pl.BlockSpec((9 * Cout, Cout), lambda i: (0, 0))],
        out_specs=(img_y, stats_spec),
        out_shape=(jax.ShapeDtypeStruct((N, H, W, Cout), jnp.bfloat16),
                   jax.ShapeDtypeStruct((G, 2, Cout), jnp.float32)),
        scratch_shapes=[pltpu.VMEM((B, H + 2, W + 2, Cout), jnp.float32)],
        compiler_params=cparams,
        cost_estimate=pl.CostEstimate(
            flops=2 * NP * 9 * Cout * Cout + 4 * NP * Cout,
            transcendentals=0,
            bytes_accessed=2 * NP * Cout + 2 * NP * Cout
                           + 2 * 9 * Cout * Cout + 4 * G * 2 * Cout),
    )(y1, scale1, shift1, w2)

    scale2, shift2 = _bn_affine(st2, params["g2"], params["be2"], NP)

    # ---- pass 3: folded BN2 + skip (identity or 1x1 conv) + ReLU ------------
    inputs = [y2, x, scale2, shift2]
    in_specs = [img_y, img_x, vec_spec, vec_spec]
    flops3 = 4 * NP * Cout
    if use_1x1conv:
        inputs += [params["w3"].astype(jnp.bfloat16), params["b3"]]
        in_specs += [pl.BlockSpec((Cin, Cout), lambda i: (0, 0)), vec_spec]
        flops3 += 2 * NP * Cin * Cout

    out = pl.pallas_call(
        _make_output_kernel(B, H, W, Cin, Cout, use_1x1conv),
        grid=(G,),
        in_specs=in_specs,
        out_specs=img_y,
        out_shape=jax.ShapeDtypeStruct((N, H, W, Cout), jnp.float32),
        compiler_params=cparams,
        cost_estimate=pl.CostEstimate(
            flops=flops3, transcendentals=0,
            bytes_accessed=2 * NP * Cout + 4 * NP * Cin + 4 * NP * Cout),
    )(*inputs)

    return jnp.transpose(out, (0, 3, 1, 2))  # back to NCHW


residual_forward = jax.jit(_residual_forward,
                           static_argnames=("use_1x1conv", "stride", "block_n"))


# --------------------------- pure-JAX reference ------------------------------

def residual_reference(x_nchw, params, use_1x1conv=False):
    def conv(x, w, b):
        y = lax.conv_general_dilated(
            x, w, window_strides=(1, 1), padding="SAME",
            dimension_numbers=("NHWC", "HWIO", "NHWC"))
        return y + b.reshape(1, 1, 1, -1)

    def bn(y, g, be):
        mean = jnp.mean(y, axis=(0, 1, 2), keepdims=True)
        var = jnp.mean((y - mean) ** 2, axis=(0, 1, 2), keepdims=True)
        return (y - mean) / jnp.sqrt(var + EPS) * g.reshape(1, 1, 1, -1) \
            + be.reshape(1, 1, 1, -1)

    x = jnp.transpose(x_nchw, (0, 2, 3, 1)).astype(jnp.float32)
    y = jax.nn.relu(bn(conv(x, params["w1"], params["b1"]),
                       params["g1"], params["be1"]))
    y = bn(conv(y, params["w2"], params["b2"]), params["g2"], params["be2"])
    skip = x
    if use_1x1conv:
        w3 = params["w3"].reshape(1, 1, *params["w3"].shape)
        skip = conv(x, w3, params["b3"])
    out = jax.nn.relu(y + skip)
    return jnp.transpose(out, (0, 3, 1, 2))


def make_params(key, Cin, Cout, use_1x1conv=False):
    ks = jax.random.split(key, 6)
    p = {
        # conv weights stored HWIO (kh, kw, Cin, Cout); PyTorch's OIHW is a transpose.
        "w1": 0.1 * jax.random.normal(ks[0], (3, 3, Cin, Cout), jnp.float32),
        "b1": 0.05 * jax.random.normal(ks[1], (1, Cout), jnp.float32),
        "g1": jnp.ones((1, Cout), jnp.float32),    # BN weight default = 1
        "be1": jnp.zeros((1, Cout), jnp.float32),  # BN bias default = 0
        "w2": 0.1 * jax.random.normal(ks[2], (3, 3, Cout, Cout), jnp.float32),
        "b2": 0.05 * jax.random.normal(ks[3], (1, Cout), jnp.float32),
        "g2": jnp.ones((1, Cout), jnp.float32),
        "be2": jnp.zeros((1, Cout), jnp.float32),
    }
    if use_1x1conv:
        p["w3"] = 0.1 * jax.random.normal(ks[4], (Cin, Cout), jnp.float32)
        p["b3"] = 0.05 * jax.random.normal(ks[5], (1, Cout), jnp.float32)
    return p


if __name__ == "__main__":
    N, Cin, Cout, H, W = 2, 4, 4, 16, 16
    key = jax.random.PRNGKey(0)
    kx, kp, kp2 = jax.random.split(key, 3)

    x = jax.random.normal(kx, (N, Cin, H, W), jnp.float32)

    # Tolerances are bf16-aware: MXU operands and intermediates are bfloat16.
    ATOL = RTOL = 6e-2

    # identity-skip block; exercises multi-image blocking (block_n=2)
    params = make_params(kp, Cin, Cout, use_1x1conv=False)
    out = jax.block_until_ready(
        residual_forward(x, params, use_1x1conv=False, block_n=2))
    ref = residual_reference(x, params, use_1x1conv=False)
    assert out.shape == (N, Cout, H, W)
    assert jnp.allclose(out, ref, atol=ATOL, rtol=RTOL), \
        f"max abs diff {float(jnp.max(jnp.abs(out - ref)))}"

    # 1x1-conv skip block with channel expansion; per-image blocking (block_n=1)
    Cout2 = 8
    params2 = make_params(kp2, Cin, Cout2, use_1x1conv=True)
    out2 = jax.block_until_ready(
        residual_forward(x, params2, use_1x1conv=True, block_n=1))
    ref2 = residual_reference(x, params2, use_1x1conv=True)
    assert out2.shape == (N, Cout2, H, W)
    assert jnp.allclose(out2, ref2, atol=ATOL, rtol=RTOL), \
        f"max abs diff {float(jnp.max(jnp.abs(out2 - ref2)))}"

    print("KERNEL_OK")
</pallas_src>

<mosaic_0001>
module attributes {stable_mosaic.version = 11 : i64} {
  func.func @kernel(%arg0: i32, %arg1: memref<2x16x16x4xf32, #tpu.memory_space<vmem>>, %arg2: memref<36x4xbf16, #tpu.memory_space<vmem>>, %arg3: memref<2x16x16x4xbf16, #tpu.memory_space<vmem>>, %arg4: memref<1x2x4xf32, #tpu.memory_space<vmem>>, %arg5: memref<2x18x18x4xf32, #tpu.memory_space<vmem>>) attributes {dimension_semantics = [#tpu.dimension_semantics<parallel>], iteration_bounds = array<i64: 1>, scalar_prefetch = 0 : i64, scratch_operands = 1 : i64, tpu.core_type = #tpu.core_type<tc>, window_params = [{transform_indices = @transform_0, window_bounds = array<i64: 2, 16, 16, 4>}, {pipeline_mode = #tpu.pipeline_mode<synchronous>, transform_indices = @transform_1, window_bounds = array<i64: 36, 4>}, {transform_indices = @transform_2, window_bounds = array<i64: 2, 16, 16, 4>}, {transform_indices = @transform_3, window_bounds = array<i64: 1, 2, 4>}]} {
    %c0 = arith.constant 0 : index
    %c0_0 = arith.constant 0 : index
    %c0_1 = arith.constant 0 : index
    %c0_2 = arith.constant 0 : index
    %0 = vector.load %arg1[%c0, %c0_0, %c0_1, %c0_2] : memref<2x16x16x4xf32, #tpu.memory_space<vmem>>, vector<2x16x16x4xf32>
    %c0_3 = arith.constant 0 : index
    %c1 = arith.constant 1 : index
    %c1_4 = arith.constant 1 : index
    %c0_5 = arith.constant 0 : index
    %1 = vector.load %arg5[%c0_3, %c1, %c1_4, %c0_5] : memref<2x18x18x4xf32, #tpu.memory_space<vmem>>, vector<2x16x16x4xf32>
    tpu.vector_store %arg5[%c0_3, %c1, %c1_4, %c0_5], %0 {strides = array<i32>} : memref<2x18x18x4xf32, #tpu.memory_space<vmem>>, vector<2x16x16x4xf32>,
    %cst = arith.constant 0.000000e+00 : f32
    %2 = vector.broadcast %cst : f32 to vector<2x1x18x4xf32>
    %cst_6 = arith.constant 0.000000e+00 : f32
    %3 = vector.broadcast %cst_6 : f32 to vector<2x18x1x4xf32>
    %c0_7 = arith.constant 0 : index
    %c0_8 = arith.constant 0 : index
    %c0_9 = arith.constant 0 : index
    %c0_10 = arith.constant 0 : index
    %4 = vector.load %arg5[%c0_7, %c0_8, %c0_9, %c0_10] : memref<2x18x18x4xf32, #tpu.memory_space<vmem>>, vector<2x1x18x4xf32>
    tpu.vector_store %arg5[%c0_7, %c0_8, %c0_9, %c0_10], %2 {strides = array<i32>} : memref<2x18x18x4xf32, #tpu.memory_space<vmem>>, vector<2x1x18x4xf32>,
    %c0_11 = arith.constant 0 : index
    %c17 = arith.constant 17 : index
    %c0_12 = arith.constant 0 : index
    %c0_13 = arith.constant 0 : index
    %5 = vector.load %arg5[%c0_11, %c17, %c0_12, %c0_13] : memref<2x18x18x4xf32, #tpu.memory_space<vmem>>, vector<2x1x18x4xf32>
    tpu.vector_store %arg5[%c0_11, %c17, %c0_12, %c0_13], %2 {strides = array<i32>} : memref<2x18x18x4xf32, #tpu.memory_space<vmem>>, vector<2x1x18x4xf32>,
    %c0_14 = arith.constant 0 : index
    %c0_15 = arith.constant 0 : index
    %c0_16 = arith.constant 0 : index
    %c0_17 = arith.constant 0 : index
    %6 = vector.load %arg5[%c0_14, %c0_15, %c0_16, %c0_17] : memref<2x18x18x4xf32, #tpu.memory_space<vmem>>, vector<2x18x1x4xf32>
    tpu.vector_store %arg5[%c0_14, %c0_15, %c0_16, %c0_17], %3 {strides = array<i32>} : memref<2x18x18x4xf32, #tpu.memory_space<vmem>>, vector<2x18x1x4xf32>,
    %c0_18 = arith.constant 0 : index
    %c0_19 = arith.constant 0 : index
    %c17_20 = arith.constant 17 : index
    %c0_21 = arith.constant 0 : index
    %7 = vector.load %arg5[%c0_18, %c0_19, %c17_20, %c0_21] : memref<2x18x18x4xf32, #tpu.memory_space<vmem>>, vector<2x18x1x4xf32>
    tpu.vector_store %arg5[%c0_18, %c0_19, %c17_20, %c0_21], %3 {strides = array<i32>} : memref<2x18x18x4xf32, #tpu.memory_space<vmem>>, vector<2x18x1x4xf32>,
    %c0_22 = arith.constant 0 : index
    %c0_23 = arith.constant 0 : index
    %c0_24 = arith.constant 0 : index
    %c0_25 = arith.constant 0 : index
    %8 = vector.load %arg5[%c0_22, %c0_23, %c0_24, %c0_25] : memref<2x18x18x4xf32, #tpu.memory_space<vmem>>, vector<2x16x16x4xf32>
    %9 = vector.shape_cast %8 : vector<2x16x16x4xf32> to vector<512x4xf32>
    %10 = arith.truncf %9 : vector<512x4xf32> to vector<512x4xbf16>
    %c0_26 = arith.constant 0 : index
    %c0_27 = arith.constant 0 : index
    %c1_28 = arith.constant 1 : index
    %c0_29 = arith.constant 0 : index
    %11 = vector.load %arg5[%c0_26, %c0_27, %c1_28, %c0_29] : memref<2x18x18x4xf32, #tpu.memory_space<vmem>>, vector<2x16x16x4xf32>
    %12 = vector.shape_cast %11 : vector<2x16x16x4xf32> to vector<512x4xf32>
    %13 = arith.truncf %12 : vector<512x4xf32> to vector<512x4xbf16>
    %c0_30 = arith.constant 0 : index
    %c0_31 = arith.constant 0 : index
    %c2 = arith.constant 2 : index
    %c0_32 = arith.constant 0 : index
    %14 = vector.load %arg5[%c0_30, %c0_31, %c2, %c0_32] : memref<2x18x18x4xf32, #tpu.memory_space<vmem>>, vector<2x16x16x4xf32>
    %15 = vector.shape_cast %14 : vector<2x16x16x4xf32> to vector<512x4xf32>
    %16 = arith.truncf %15 : vector<512x4xf32> to vector<512x4xbf16>
    %c0_33 = arith.constant 0 : index
    %c1_34 = arith.constant 1 : index
    %c0_35 = arith.constant 0 : index
    %c0_36 = arith.constant 0 : index
    %17 = vector.load %arg5[%c0_33, %c1_34, %c0_35, %c0_36] : memref<2x18x18x4xf32, #tpu.memory_space<vmem>>, vector<2x16x16x4xf32>
    %18 = vector.shape_cast %17 : vector<2x16x16x4xf32> to vector<512x4xf32>
    %19 = arith.truncf %18 : vector<512x4xf32> to vector<512x4xbf16>
    %c0_37 = arith.constant 0 : index
    %c1_38 = arith.constant 1 : index
    %c1_39 = arith.constant 1 : index
    %c0_40 = arith.constant 0 : index
    %20 = vector.load %arg5[%c0_37, %c1_38, %c1_39, %c0_40] : memref<2x18x18x4xf32, #tpu.memory_space<vmem>>, vector<2x16x16x4xf32>
    %21 = vector.shape_cast %20 : vector<2x16x16x4xf32> to vector<512x4xf32>
    %22 = arith.truncf %21 : vector<512x4xf32> to vector<512x4xbf16>
    %c0_41 = arith.constant 0 : index
    %c1_42 = arith.constant 1 : index
    %c2_43 = arith.constant 2 : index
    %c0_44 = arith.constant 0 : index
    %23 = vector.load %arg5[%c0_41, %c1_42, %c2_43, %c0_44] : memref<2x18x18x4xf32, #tpu.memory_space<vmem>>, vector<2x16x16x4xf32>
    %24 = vector.shape_cast %23 : vector<2x16x16x4xf32> to vector<512x4xf32>
    %25 = arith.truncf %24 : vector<512x4xf32> to vector<512x4xbf16>
    %c0_45 = arith.constant 0 : index
    %c2_46 = arith.constant 2 : index
    %c0_47 = arith.constant 0 : index
    %c0_48 = arith.constant 0 : index
    %26 = vector.load %arg5[%c0_45, %c2_46, %c0_47, %c0_48] : memref<2x18x18x4xf32, #tpu.memory_space<vmem>>, vector<2x16x16x4xf32>
    %27 = vector.shape_cast %26 : vector<2x16x16x4xf32> to vector<512x4xf32>
    %28 = arith.truncf %27 : vector<512x4xf32> to vector<512x4xbf16>
    %c0_49 = arith.constant 0 : index
    %c2_50 = arith.constant 2 : index
    %c1_51 = arith.constant 1 : index
    %c0_52 = arith.constant 0 : index
    %29 = vector.load %arg5[%c0_49, %c2_50, %c1_51, %c0_52] : memref<2x18x18x4xf32, #tpu.memory_space<vmem>>, vector<2x16x16x4xf32>
    %30 = vector.shape_cast %29 : vector<2x16x16x4xf32> to vector<512x4xf32>
    %31 = arith.truncf %30 : vector<512x4xf32> to vector<512x4xbf16>
    %c0_53 = arith.constant 0 : index
    %c2_54 = arith.constant 2 : index
    %c2_55 = arith.constant 2 : index
    %c0_56 = arith.constant 0 : index
    %32 = vector.load %arg5[%c0_53, %c2_54, %c2_55, %c0_56] : memref<2x18x18x4xf32, #tpu.memory_space<vmem>>, vector<2x16x16x4xf32>
    %33 = vector.shape_cast %32 : vector<2x16x16x4xf32> to vector<512x4xf32>
    %34 = arith.truncf %33 : vector<512x4xf32> to vector<512x4xbf16>
    %35 = tpu.concatenate %10, %13, %16, %19, %22, %25, %28, %31, %34 in 1 : vector<512x4xbf16>, vector<512x4xbf16>, vector<512x4xbf16>, vector<512x4xbf16>, vector<512x4xbf16>, vector<512x4xbf16>, vector<512x4xbf16>, vector<512x4xbf16>, vector<512x4xbf16> -> vector<512x36xbf16>
    %c0_57 = arith.constant 0 : index
    %c0_58 = arith.constant 0 : index
    %36 = vector.load %arg2[%c0_57, %c0_58] : memref<36x4xbf16, #tpu.memory_space<vmem>>, vector<36x4xbf16>
    %cst_59 = arith.constant dense<0.000000e+00> : vector<512x4xf32>
    %37 = tpu.matmul %35, %36, %cst_59 {dimension_numbers = #tpu.dot_dimension_numbers<[1], [0], [0], [1], [0, 0, 1, 1], [], []>} : vector<512x36xbf16>, vector<36x4xbf16>, vector<512x4xf32> -> vector<512x4xf32>
    %cst_60 = arith.constant dense<0.000000e+00> : vector<4xf32>
    %38 = vector.multi_reduction <add>, %37, %cst_60 [0] : vector<512x4xf32> to vector<4xf32>
    %39 = vector.shape_cast %38 : vector<4xf32> to vector<1x4xf32>
    %c0_61 = arith.constant 0 : index
    %c0_62 = arith.constant 0 : index
    %c0_63 = arith.constant 0 : index
    %40 = vector.load %arg4[%c0_61, %c0_62, %c0_63] : memref<1x2x4xf32, #tpu.memory_space<vmem>>, vector<1x1x4xf32>
    %41 = vector.shape_cast %40 : vector<1x1x4xf32> to vector<1x4xf32>
    %42 = vector.shape_cast %39 : vector<1x4xf32> to vector<1x1x4xf32>
    tpu.vector_store %arg4[%c0_61, %c0_62, %c0_63], %42 {strides = array<i32>} : memref<1x2x4xf32, #tpu.memory_space<vmem>>, vector<1x1x4xf32>,
    %43 = arith.mulf %37, %37 : vector<512x4xf32>
    %cst_64 = arith.constant dense<0.000000e+00> : vector<4xf32>
    %44 = vector.multi_reduction <add>, %43, %cst_64 [0] : vector<512x4xf32> to vector<4xf32>
    %45 = vector.shape_cast %44 : vector<4xf32> to vector<1x4xf32>
    %c0_65 = arith.constant 0 : index
    %c1_66 = arith.constant 1 : index
    %c0_67 = arith.constant 0 : index
    %46 = vector.load %arg4[%c0_65, %c1_66, %c0_67] : memref<1x2x4xf32, #tpu.memory_space<vmem>>, vector<1x1x4xf32>
    %47 = vector.shape_cast %46 : vector<1x1x4xf32> to vector<1x4xf32>
    %48 = vector.shape_cast %45 : vector<1x4xf32> to vector<1x1x4xf32>
    tpu.vector_store %arg4[%c0_65, %c1_66, %c0_67], %48 {strides = array<i32>} : memref<1x2x4xf32, #tpu.memory_space<vmem>>, vector<1x1x4xf32>,
    %49 = vector.shape_cast %37 : vector<512x4xf32> to vector<2x16x16x4xf32>
    %50 = arith.truncf %49 : vector<2x16x16x4xf32> to vector<2x16x16x4xbf16>
    %c0_68 = arith.constant 0 : index
    %c0_69 = arith.constant 0 : index
    %c0_70 = arith.constant 0 : index
    %c0_71 = arith.constant 0 : index
    %51 = vector.load %arg3[%c0_68, %c0_69, %c0_70, %c0_71] : memref<2x16x16x4xbf16, #tpu.memory_space<vmem>>, vector<2x16x16x4xbf16>
    tpu.vector_store %arg3[%c0_68, %c0_69, %c0_70, %c0_71], %50 {strides = array<i32>} : memref<2x16x16x4xbf16, #tpu.memory_space<vmem>>, vector<2x16x16x4xbf16>,
    return
  }
  func.func @transform_0(%arg0: i32) -> (i32, i32, i32, i32) {
    %c0_i32 = arith.constant 0 : i32
    %c0_i32_0 = arith.constant 0 : i32
    %c0_i32_1 = arith.constant 0 : i32
    %c0_i32_2 = arith.constant 0 : i32
    return %arg0, %c0_i32, %c0_i32_0, %c0_i32_1 : i32, i32, i32, i32
  }
  func.func @transform_1(%arg0: i32) -> (i32, i32) {
    %c0_i32 = arith.constant 0 : i32
    %c0_i32_0 = arith.constant 0 : i32
    %c0_i32_1 = arith.constant 0 : i32
    return %c0_i32, %c0_i32_0 : i32, i32
  }
  func.func @transform_2(%arg0: i32) -> (i32, i32, i32, i32) {
    %c0_i32 = arith.constant 0 : i32
    %c0_i32_0 = arith.constant 0 : i32
    %c0_i32_1 = arith.constant 0 : i32
    %c0_i32_2 = arith.constant 0 : i32
    return %arg0, %c0_i32, %c0_i32_0, %c0_i32_1 : i32, i32, i32, i32
  }
  func.func @transform_3(%arg0: i32) -> (i32, i32, i32) {
    %c0_i32 = arith.constant 0 : i32
    %c0_i32_0 = arith.constant 0 : i32
    %c0_i32_1 = arith.constant 0 : i32
    return %arg0, %c0_i32, %c0_i32_0 : i32, i32, i32
  }
}

module attributes {stable_mosaic.version = 11 : i64} {
  func.func @kernel(%arg0: i32, %arg1: memref<2x16x16x4xbf16, #tpu.memory_space<vmem>>, %arg2: memref<1x4xf32, #tpu.memory_space<vmem>>, %arg3: memref<1x4xf32, #tpu.memory_space<vmem>>, %arg4: memref<36x4xbf16, #tpu.memory_space<vmem>>, %arg5: memref<2x16x16x4xbf16, #tpu.memory_space<vmem>>, %arg6: memref<1x2x4xf32, #tpu.memory_space<vmem>>, %arg7: memref<2x18x18x4xf32, #tpu.memory_space<vmem>>) attributes {dimension_semantics = [#tpu.dimension_semantics<parallel>], iteration_bounds = array<i64: 1>, scalar_prefetch = 0 : i64, scratch_operands = 1 : i64, tpu.core_type = #tpu.core_type<tc>, window_params = [{transform_indices = @transform_0, window_bounds = array<i64: 2, 16, 16, 4>}, {pipeline_mode = #tpu.pipeline_mode<synchronous>, transform_indices = @transform_1, window_bounds = array<i64: 1, 4>}, {pipeline_mode = #tpu.pipeline_mode<synchronous>, transform_indices = @transform_2, window_bounds = array<i64: 1, 4>}, {pipeline_mode = #tpu.pipeline_mode<synchronous>, transform_indices = @transform_3, window_bounds = array<i64: 36, 4>}, {transform_indices = @transform_4, window_bounds = array<i64: 2, 16, 16, 4>}, {transform_indices = @transform_5, window_bounds = array<i64: 1, 2, 4>}]} {
    %c0 = arith.constant 0 : index
    %c0_0 = arith.constant 0 : index
    %c0_1 = arith.constant 0 : index
    %c0_2 = arith.constant 0 : index
    %0 = vector.load %arg1[%c0, %c0_0, %c0_1, %c0_2] : memref<2x16x16x4xbf16, #tpu.memory_space<vmem>>, vector<2x16x16x4xbf16>
    %1 = arith.extf %0 : vector<2x16x16x4xbf16> to vector<2x16x16x4xf32>
    %c0_3 = arith.constant 0 : index
    %c0_4 = arith.constant 0 : index
    %2 = vector.load %arg2[%c0_3, %c0_4] : memref<1x4xf32, #tpu.memory_space<vmem>>, vector<1x4xf32>
    %3 = vector.shape_cast %2 : vector<1x4xf32> to vector<1x1x1x4xf32>
    %4 = vector.broadcast %3 : vector<1x1x1x4xf32> to vector<2x16x16x4xf32>
    %5 = arith.mulf %1, %4 : vector<2x16x16x4xf32>
    %c0_5 = arith.constant 0 : index
    %c0_6 = arith.constant 0 : index
    %6 = vector.load %arg3[%c0_5, %c0_6] : memref<1x4xf32, #tpu.memory_space<vmem>>, vector<1x4xf32>
    %7 = vector.shape_cast %6 : vector<1x4xf32> to vector<1x1x1x4xf32>
    %8 = vector.broadcast %7 : vector<1x1x1x4xf32> to vector<2x16x16x4xf32>
    %9 = arith.addf %5, %8 : vector<2x16x16x4xf32>
    %cst = arith.constant 0.000000e+00 : f32
    %10 = vector.broadcast %cst : f32 to vector<2x16x16x4xf32>
    %11 = arith.maximumf %9, %10 : vector<2x16x16x4xf32>
    %c0_7 = arith.constant 0 : index
    %c1 = arith.constant 1 : index
    %c1_8 = arith.constant 1 : index
    %c0_9 = arith.constant 0 : index
    %12 = vector.load %arg7[%c0_7, %c1, %c1_8, %c0_9] : memref<2x18x18x4xf32, #tpu.memory_space<vmem>>, vector<2x16x16x4xf32>
    tpu.vector_store %arg7[%c0_7, %c1, %c1_8, %c0_9], %11 {strides = array<i32>} : memref<2x18x18x4xf32, #tpu.memory_space<vmem>>, vector<2x16x16x4xf32>,
    %cst_10 = arith.constant 0.000000e+00 : f32
    %13 = vector.broadcast %cst_10 : f32 to vector<2x1x18x4xf32>
    %cst_11 = arith.constant 0.000000e+00 : f32
    %14 = vector.broadcast %cst_11 : f32 to vector<2x18x1x4xf32>
    %c0_12 = arith.constant 0 : index
    %c0_13 = arith.constant 0 : index
    %c0_14 = arith.constant 0 : index
    %c0_15 = arith.constant 0 : index
    %15 = vector.load %arg7[%c0_12, %c0_13, %c0_14, %c0_15] : memref<2x18x18x4xf32, #tpu.memory_space<vmem>>, vector<2x1x18x4xf32>
    tpu.vector_store %arg7[%c0_12, %c0_13, %c0_14, %c0_15], %13 {strides = array<i32>} : memref<2x18x18x4xf32, #tpu.memory_space<vmem>>, vector<2x1x18x4xf32>,
    %c0_16 = arith.constant 0 : index
    %c17 = arith.constant 17 : index
    %c0_17 = arith.constant 0 : index
    %c0_18 = arith.constant 0 : index
    %16 = vector.load %arg7[%c0_16, %c17, %c0_17, %c0_18] : memref<2x18x18x4xf32, #tpu.memory_space<vmem>>, vector<2x1x18x4xf32>
    tpu.vector_store %arg7[%c0_16, %c17, %c0_17, %c0_18], %13 {strides = array<i32>} : memref<2x18x18x4xf32, #tpu.memory_space<vmem>>, vector<2x1x18x4xf32>,
    %c0_19 = arith.constant 0 : index
    %c0_20 = arith.constant 0 : index
    %c0_21 = arith.constant 0 : index
    %c0_22 = arith.constant 0 : index
    %17 = vector.load %arg7[%c0_19, %c0_20, %c0_21, %c0_22] : memref<2x18x18x4xf32, #tpu.memory_space<vmem>>, vector<2x18x1x4xf32>
    tpu.vector_store %arg7[%c0_19, %c0_20, %c0_21, %c0_22], %14 {strides = array<i32>} : memref<2x18x18x4xf32, #tpu.memory_space<vmem>>, vector<2x18x1x4xf32>,
    %c0_23 = arith.constant 0 : index
    %c0_24 = arith.constant 0 : index
    %c17_25 = arith.constant 17 : index
    %c0_26 = arith.constant 0 : index
    %18 = vector.load %arg7[%c0_23, %c0_24, %c17_25, %c0_26] : memref<2x18x18x4xf32, #tpu.memory_space<vmem>>, vector<2x18x1x4xf32>
    tpu.vector_store %arg7[%c0_23, %c0_24, %c17_25, %c0_26], %14 {strides = array<i32>} : memref<2x18x18x4xf32, #tpu.memory_space<vmem>>, vector<2x18x1x4xf32>,
    %c0_27 = arith.constant 0 : index
    %c0_28 = arith.constant 0 : index
    %c0_29 = arith.constant 0 : index
    %c0_30 = arith.constant 0 : index
    %19 = vector.load %arg7[%c0_27, %c0_28, %c0_29, %c0_30] : memref<2x18x18x4xf32, #tpu.memory_space<vmem>>, vector<2x16x16x4xf32>
    %20 = vector.shape_cast %19 : vector<2x16x16x4xf32> to vector<512x4xf32>
    %21 = arith.truncf %20 : vector<512x4xf32> to vector<512x4xbf16>
    %c0_31 = arith.constant 0 : index
    %c0_32 = arith.constant 0 : index
    %c1_33 = arith.constant 1 : index
    %c0_34 = arith.constant 0 : index
    %22 = vector.load %arg7[%c0_31, %c0_32, %c1_33, %c0_34] : memref<2x18x18x4xf32, #tpu.memory_space<vmem>>, vector<2x16x16x4xf32>
    %23 = vector.shape_cast %22 : vector<2x16x16x4xf32> to vector<512x4xf32>
    %24 = arith.truncf %23 : vector<512x4xf32> to vector<512x4xbf16>
    %c0_35 = arith.constant 0 : index
    %c0_36 = arith.constant 0 : index
    %c2 = arith.constant 2 : index
    %c0_37 = arith.constant 0 : index
    %25 = vector.load %arg7[%c0_35, %c0_36, %c2, %c0_37] : memref<2x18x18x4xf32, #tpu.memory_space<vmem>>, vector<2x16x16x4xf32>
    %26 = vector.shape_cast %25 : vector<2x16x16x4xf32> to vector<512x4xf32>
    %27 = arith.truncf %26 : vector<512x4xf32> to vector<512x4xbf16>
    %c0_38 = arith.constant 0 : index
    %c1_39 = arith.constant 1 : index
    %c0_40 = arith.constant 0 : index
    %c0_41 = arith.constant 0 : index
    %28 = vector.load %arg7[%c0_38, %c1_39, %c0_40, %c0_41] : memref<2x18x18x4xf32, #tpu.memory_space<vmem>>, vector<2x16x16x4xf32>
    %29 = vector.shape_cast %28 : vector<2x16x16x4xf32> to vector<512x4xf32>
    %30 = arith.truncf %29 : vector<512x4xf32> to vector<512x4xbf16>
    %c0_42 = arith.constant 0 : index
    %c1_43 = arith.constant 1 : index
    %c1_44 = arith.constant 1 : index
    %c0_45 = arith.constant 0 : index
    %31 = vector.load %arg7[%c0_42, %c1_43, %c1_44, %c0_45] : memref<2x18x18x4xf32, #tpu.memory_space<vmem>>, vector<2x16x16x4xf32>
    %32 = vector.shape_cast %31 : vector<2x16x16x4xf32> to vector<512x4xf32>
    %33 = arith.truncf %32 : vector<512x4xf32> to vector<512x4xbf16>
    %c0_46 = arith.constant 0 : index
    %c1_47 = arith.constant 1 : index
    %c2_48 = arith.constant 2 : index
    %c0_49 = arith.constant 0 : index
    %34 = vector.load %arg7[%c0_46, %c1_47, %c2_48, %c0_49] : memref<2x18x18x4xf32, #tpu.memory_space<vmem>>, vector<2x16x16x4xf32>
    %35 = vector.shape_cast %34 : vector<2x16x16x4xf32> to vector<512x4xf32>
    %36 = arith.truncf %35 : vector<512x4xf32> to vector<512x4xbf16>
    %c0_50 = arith.constant 0 : index
    %c2_51 = arith.constant 2 : index
    %c0_52 = arith.constant 0 : index
    %c0_53 = arith.constant 0 : index
    %37 = vector.load %arg7[%c0_50, %c2_51, %c0_52, %c0_53] : memref<2x18x18x4xf32, #tpu.memory_space<vmem>>, vector<2x16x16x4xf32>
    %38 = vector.shape_cast %37 : vector<2x16x16x4xf32> to vector<512x4xf32>
    %39 = arith.truncf %38 : vector<512x4xf32> to vector<512x4xbf16>
    %c0_54 = arith.constant 0 : index
    %c2_55 = arith.constant 2 : index
    %c1_56 = arith.constant 1 : index
    %c0_57 = arith.constant 0 : index
    %40 = vector.load %arg7[%c0_54, %c2_55, %c1_56, %c0_57] : memref<2x18x18x4xf32, #tpu.memory_space<vmem>>, vector<2x16x16x4xf32>
    %41 = vector.shape_cast %40 : vector<2x16x16x4xf32> to vector<512x4xf32>
    %42 = arith.truncf %41 : vector<512x4xf32> to vector<512x4xbf16>
    %c0_58 = arith.constant 0 : index
    %c2_59 = arith.constant 2 : index
    %c2_60 = arith.constant 2 : index
    %c0_61 = arith.constant 0 : index
    %43 = vector.load %arg7[%c0_58, %c2_59, %c2_60, %c0_61] : memref<2x18x18x4xf32, #tpu.memory_space<vmem>>, vector<2x16x16x4xf32>
    %44 = vector.shape_cast %43 : vector<2x16x16x4xf32> to vector<512x4xf32>
    %45 = arith.truncf %44 : vector<512x4xf32> to vector<512x4xbf16>
    %46 = tpu.concatenate %21, %24, %27, %30, %33, %36, %39, %42, %45 in 1 : vector<512x4xbf16>, vector<512x4xbf16>, vector<512x4xbf16>, vector<512x4xbf16>, vector<512x4xbf16>, vector<512x4xbf16>, vector<512x4xbf16>, vector<512x4xbf16>, vector<512x4xbf16> -> vector<512x36xbf16>
    %c0_62 = arith.constant 0 : index
    %c0_63 = arith.constant 0 : index
    %47 = vector.load %arg4[%c0_62, %c0_63] : memref<36x4xbf16, #tpu.memory_space<vmem>>, vector<36x4xbf16>
    %cst_64 = arith.constant dense<0.000000e+00> : vector<512x4xf32>
    %48 = tpu.matmul %46, %47, %cst_64 {dimension_numbers = #tpu.dot_dimension_numbers<[1], [0], [0], [1], [0, 0, 1, 1], [], []>} : vector<512x36xbf16>, vector<36x4xbf16>, vector<512x4xf32> -> vector<512x4xf32>
    %cst_65 = arith.constant dense<0.000000e+00> : vector<4xf32>
    %49 = vector.multi_reduction <add>, %48, %cst_65 [0] : vector<512x4xf32> to vector<4xf32>
    %50 = vector.shape_cast %49 : vector<4xf32> to vector<1x4xf32>
    %c0_66 = arith.constant 0 : index
    %c0_67 = arith.constant 0 : index
    %c0_68 = arith.constant 0 : index
    %51 = vector.load %arg6[%c0_66, %c0_67, %c0_68] : memref<1x2x4xf32, #tpu.memory_space<vmem>>, vector<1x1x4xf32>
    %52 = vector.shape_cast %51 : vector<1x1x4xf32> to vector<1x4xf32>
    %53 = vector.shape_cast %50 : vector<1x4xf32> to vector<1x1x4xf32>
    tpu.vector_store %arg6[%c0_66, %c0_67, %c0_68], %53 {strides = array<i32>} : memref<1x2x4xf32, #tpu.memory_space<vmem>>, vector<1x1x4xf32>,
    %54 = arith.mulf %48, %48 : vector<512x4xf32>
    %cst_69 = arith.constant dense<0.000000e+00> : vector<4xf32>
    %55 = vector.multi_reduction <add>, %54, %cst_69 [0] : vector<512x4xf32> to vector<4xf32>
    %56 = vector.shape_cast %55 : vector<4xf32> to vector<1x4xf32>
    %c0_70 = arith.constant 0 : index
    %c1_71 = arith.constant 1 : index
    %c0_72 = arith.constant 0 : index
    %57 = vector.load %arg6[%c0_70, %c1_71, %c0_72] : memref<1x2x4xf32, #tpu.memory_space<vmem>>, vector<1x1x4xf32>
    %58 = vector.shape_cast %57 : vector<1x1x4xf32> to vector<1x4xf32>
    %59 = vector.shape_cast %56 : vector<1x4xf32> to vector<1x1x4xf32>
    tpu.vector_store %arg6[%c0_70, %c1_71, %c0_72], %59 {strides = array<i32>} : memref<1x2x4xf32, #tpu.memory_space<vmem>>, vector<1x1x4xf32>,
    %60 = vector.shape_cast %48 : vector<512x4xf32> to vector<2x16x16x4xf32>
    %61 = arith.truncf %60 : vector<2x16x16x4xf32> to vector<2x16x16x4xbf16>
    %c0_73 = arith.constant 0 : index
    %c0_74 = arith.constant 0 : index
    %c0_75 = arith.constant 0 : index
    %c0_76 = arith.constant 0 : index
    %62 = vector.load %arg5[%c0_73, %c0_74, %c0_75, %c0_76] : memref<2x16x16x4xbf16, #tpu.memory_space<vmem>>, vector<2x16x16x4xbf16>
    tpu.vector_store %arg5[%c0_73, %c0_74, %c0_75, %c0_76], %61 {strides = array<i32>} : memref<2x16x16x4xbf16, #tpu.memory_space<vmem>>, vector<2x16x16x4xbf16>,
    return
  }
  func.func @transform_0(%arg0: i32) -> (i32, i32, i32, i32) {
    %c0_i32 = arith.constant 0 : i32
    %c0_i32_0 = arith.constant 0 : i32
    %c0_i32_1 = arith.constant 0 : i32
    %c0_i32_2 = arith.constant 0 : i32
    return %arg0, %c0_i32, %c0_i32_0, %c0_i32_1 : i32, i32, i32, i32
  }
  func.func @transform_1(%arg0: i32) -> (i32, i32) {
    %c0_i32 = arith.constant 0 : i32
    %c0_i32_0 = arith.constant 0 : i32
    %c0_i32_1 = arith.constant 0 : i32
    return %c0_i32, %c0_i32_0 : i32, i32
  }
  func.func @transform_2(%arg0: i32) -> (i32, i32) {
    %c0_i32 = arith.constant 0 : i32
    %c0_i32_0 = arith.constant 0 : i32
    %c0_i32_1 = arith.constant 0 : i32
    return %c0_i32, %c0_i32_0 : i32, i32
  }
  func.func @transform_3(%arg0: i32) -> (i32, i32) {
    %c0_i32 = arith.constant 0 : i32
    %c0_i32_0 = arith.constant 0 : i32
    %c0_i32_1 = arith.constant 0 : i32
    return %c0_i32, %c0_i32_0 : i32, i32
  }
  func.func @transform_4(%arg0: i32) -> (i32, i32, i32, i32) {
    %c0_i32 = arith.constant 0 : i32
    %c0_i32_0 = arith.constant 0 : i32
    %c0_i32_1 = arith.constant 0 : i32
    %c0_i32_2 = arith.constant 0 : i32
    return %arg0, %c0_i32, %c0_i32_0, %c0_i32_1 : i32, i32, i32, i32
  }
  func.func @transform_5(%arg0: i32) -> (i32, i32, i32) {
    %c0_i32 = arith.constant 0 : i32
    %c0_i32_0 = arith.constant 0 : i32
    %c0_i32_1 = arith.constant 0 : i32
    return %arg0, %c0_i32, %c0_i32_0 : i32, i32, i32
  }
}

module attributes {stable_mosaic.version = 11 : i64} {
  func.func @kernel(%arg0: i32, %arg1: memref<2x16x16x4xbf16, #tpu.memory_space<vmem>>, %arg2: memref<2x16x16x4xf32, #tpu.memory_space<vmem>>, %arg3: memref<1x4xf32, #tpu.memory_space<vmem>>, %arg4: memref<1x4xf32, #tpu.memory_space<vmem>>, %arg5: memref<2x16x16x4xf32, #tpu.memory_space<vmem>>) attributes {dimension_semantics = [#tpu.dimension_semantics<parallel>], iteration_bounds = array<i64: 1>, scalar_prefetch = 0 : i64, scratch_operands = 0 : i64, tpu.core_type = #tpu.core_type<tc>, window_params = [{transform_indices = @transform_0, window_bounds = array<i64: 2, 16, 16, 4>}, {transform_indices = @transform_1, window_bounds = array<i64: 2, 16, 16, 4>}, {pipeline_mode = #tpu.pipeline_mode<synchronous>, transform_indices = @transform_2, window_bounds = array<i64: 1, 4>}, {pipeline_mode = #tpu.pipeline_mode<synchronous>, transform_indices = @transform_3, window_bounds = array<i64: 1, 4>}, {transform_indices = @transform_4, window_bounds = array<i64: 2, 16, 16, 4>}]} {
    %c0 = arith.constant 0 : index
    %c0_0 = arith.constant 0 : index
    %c0_1 = arith.constant 0 : index
    %c0_2 = arith.constant 0 : index
    %0 = vector.load %arg1[%c0, %c0_0, %c0_1, %c0_2] : memref<2x16x16x4xbf16, #tpu.memory_space<vmem>>, vector<2x16x16x4xbf16>
    %1 = arith.extf %0 : vector<2x16x16x4xbf16> to vector<2x16x16x4xf32>
    %c0_3 = arith.constant 0 : index
    %c0_4 = arith.constant 0 : index
    %2 = vector.load %arg3[%c0_3, %c0_4] : memref<1x4xf32, #tpu.memory_space<vmem>>, vector<1x4xf32>
    %3 = vector.shape_cast %2 : vector<1x4xf32> to vector<1x1x1x4xf32>
    %4 = vector.broadcast %3 : vector<1x1x1x4xf32> to vector<2x16x16x4xf32>
    %5 = arith.mulf %1, %4 : vector<2x16x16x4xf32>
    %c0_5 = arith.constant 0 : index
    %c0_6 = arith.constant 0 : index
    %6 = vector.load %arg4[%c0_5, %c0_6] : memref<1x4xf32, #tpu.memory_space<vmem>>, vector<1x4xf32>
    %7 = vector.shape_cast %6 : vector<1x4xf32> to vector<1x1x1x4xf32>
    %8 = vector.broadcast %7 : vector<1x1x1x4xf32> to vector<2x16x16x4xf32>
    %9 = arith.addf %5, %8 : vector<2x16x16x4xf32>
    %c0_7 = arith.constant 0 : index
    %c0_8 = arith.constant 0 : index
    %c0_9 = arith.constant 0 : index
    %c0_10 = arith.constant 0 : index
    %10 = vector.load %arg2[%c0_7, %c0_8, %c0_9, %c0_10] : memref<2x16x16x4xf32, #tpu.memory_space<vmem>>, vector<2x16x16x4xf32>
    %11 = arith.addf %9, %10 : vector<2x16x16x4xf32>
    %cst = arith.constant 0.000000e+00 : f32
    %12 = vector.broadcast %cst : f32 to vector<2x16x16x4xf32>
    %13 = arith.maximumf %11, %12 : vector<2x16x16x4xf32>
    %c0_11 = arith.constant 0 : index
    %c0_12 = arith.constant 0 : index
    %c0_13 = arith.constant 0 : index
    %c0_14 = arith.constant 0 : index
    %14 = vector.load %arg5[%c0_11, %c0_12, %c0_13, %c0_14] : memref<2x16x16x4xf32, #tpu.memory_space<vmem>>, vector<2x16x16x4xf32>
    tpu.vector_store %arg5[%c0_11, %c0_12, %c0_13, %c0_14], %13 {strides = array<i32>} : memref<2x16x16x4xf32, #tpu.memory_space<vmem>>, vector<2x16x16x4xf32>,
    return
  }
  func.func @transform_0(%arg0: i32) -> (i32, i32, i32, i32) {
    %c0_i32 = arith.constant 0 : i32
    %c0_i32_0 = arith.constant 0 : i32
    %c0_i32_1 = arith.constant 0 : i32
    %c0_i32_2 = arith.constant 0 : i32
    return %arg0, %c0_i32, %c0_i32_0, %c0_i32_1 : i32, i32, i32, i32
  }
  func.func @transform_1(%arg0: i32) -> (i32, i32, i32, i32) {
    %c0_i32 = arith.constant 0 : i32
    %c0_i32_0 = arith.constant 0 : i32
    %c0_i32_1 = arith.constant 0 : i32
    %c0_i32_2 = arith.constant 0 : i32
    return %arg0, %c0_i32, %c0_i32_0, %c0_i32_1 : i32, i32, i32, i32
  }
  func.func @transform_2(%arg0: i32) -> (i32, i32) {
    %c0_i32 = arith.constant 0 : i32
    %c0_i32_0 = arith.constant 0 : i32
    %c0_i32_1 = arith.constant 0 : i32
    return %c0_i32, %c0_i32_0 : i32, i32
  }
  func.func @transform_3(%arg0: i32) -> (i32, i32) {
    %c0_i32 = arith.constant 0 : i32
    %c0_i32_0 = arith.constant 0 : i32
    %c0_i32_1 = arith.constant 0 : i32
    return %c0_i32, %c0_i32_0 : i32, i32
  }
  func.func @transform_4(%arg0: i32) -> (i32, i32, i32, i32) {
    %c0_i32 = arith.constant 0 : i32
    %c0_i32_0 = arith.constant 0 : i32
    %c0_i32_1 = arith.constant 0 : i32
    %c0_i32_2 = arith.constant 0 : i32
    return %arg0, %c0_i32, %c0_i32_0, %c0_i32_1 : i32, i32, i32, i32
  }
}

</mosaic_0001>

<bundles_post_ra>
// kernel: _residual_forward.5
= control target key start
LH: loop header
LB: loop body
LE: loop exit
PB: predicated region body
PF: predicated region fallthrough
CT: control target
= control target key end

     0   :  { %vm479_vm0 = vcmask 31744   ;;  %s1416_s0 = inlined_call_operand.vmem [shape: bf16[2,16,16,4], index: 0, kind: input, shape index: {}]   ;;  %s1417_s2 = inlined_call_operand.vmem [shape: f32[1,4], index: 2, kind: input, shape index: {}]   ;;  %s1418_s3 = inlined_call_operand.vmem [shape: f32[1,4], index: 3, kind: input, shape index: {}]   ;;  %s1419_s1 = inlined_call_operand.vmem [shape: f32[2,16,16,4], index: 1, kind: input, shape index: {}]   ;;  %s1420_s4 = inlined_call_operand.vmem [shape: f32[2,16,16,4], index: 4, kind: output, shape index: {}]  }
   0x1   :  { %v551_v0 = vld [vmem:[%s1416_s0] sm:$0xff]   ;;  %v678_v4 = vld [vmem:[%s1416_s0 + $0x8] sm:$0xff]   ;;  %v679_v8 = vld [vmem:[%s1416_s0 + $0x10] sm:$0xff]  }
   0x2   :  { %v740_v1 = vld [vmem:[%s1417_s2] ss:$0 sm:$0xff]  ;;  %v552_v2 = vunpack.c.l.bf16 %v551_v0  ;;  %v553_v3 = vunpack.c.h.bf16 %v551_v0  ;;  %v556_v6 = vunpack.c.l.bf16 %v678_v4  ;;  %v557_v7 = vunpack.c.h.bf16 %v678_v4  ;;  %v680_v13 = vld [vmem:[%s1416_s0 + $0x18] sm:$0xff]   ;;  %v288_v15 = vld [vmem:[%s1419_s1 + $0x8] sm:$0xff] }
   0x3   :  { %v748_v5 = vld [vmem:[%s1418_s3] ss:$0 sm:$0xff]  ;;  %v560_v11 = vunpack.c.l.bf16 %v679_v8  ;;  %v561_v12 = vunpack.c.h.bf16 %v679_v8  ;;  %v564_v18 = vunpack.c.l.bf16 %v680_v13  ;;  %v565_v19 = vunpack.c.h.bf16 %v680_v13  ;;  %v289_v22 = vld [vmem:[%s1419_s1 + $0x10] sm:$0xff]  ;;  %v290_v23 = vld [vmem:[%s1419_s1 + $0x18] sm:$0xff] }
   0x4   :  { %v152_v9 = vmul.f32 %v552_v2, %v740_v1  ;;  %v153_v10 = vmul.f32 %v553_v3, %v740_v1  ;;  %v287_v14 = vld [vmem:[%s1419_s1] sm:$0xff]  ;;  %v154_v16 = vmul.f32 %v556_v6, %v740_v1  ;;  %v155_v17 = vmul.f32 %v557_v7, %v740_v1  ;;  %v292_v29 = vld [vmem:[%s1419_s1 + $0x28] sm:$0xff]  ;;  %v293_v36 = vld [vmem:[%s1419_s1 + $0x30] sm:$0xff] }
   0x5   :  { %v156_v24 = vmul.f32 %v560_v11, %v740_v1  ;;  %v157_v25 = vmul.f32 %v561_v12, %v740_v1  ;;  %v291_v28 = vld [vmem:[%s1419_s1 + $0x20] sm:$0xff]  ;;  %v158_v30 = vmul.f32 %v564_v18, %v740_v1  ;;  %v159_v31 = vmul.f32 %v565_v19, %v740_v1  ;;  %v294_v37 = vld [vmem:[%s1419_s1 + $0x38] sm:$0xff]  ;;  %v682_v47 = vld [vmem:[%s1416_s0 + $0x28] sm:$0xff]  }
   0x6   :  { %v223_v20 = vadd.f32 %v748_v5, %v152_v9  ;;  %v224_v21 = vadd.f32 %v748_v5, %v153_v10  ;;  %v225_v26 = vadd.f32 %v748_v5, %v154_v16  ;;  %v226_v27 = vadd.f32 %v748_v5, %v155_v17  ;;  %v681_v42 = vld [vmem:[%s1416_s0 + $0x20] sm:$0xff]   ;;  %v683_v52 = vld [vmem:[%s1416_s0 + $0x30] sm:$0xff]   ;;  %v684_v57 = vld [vmem:[%s1416_s0 + $0x38] sm:$0xff]  }
   0x7   :  { %v227_v34 = vadd.f32 %v748_v5, %v156_v24  ;;  %v228_v35 = vadd.f32 %v748_v5, %v157_v25  ;;  %v229_v40 = vadd.f32 %v748_v5, %v158_v30  ;;  %v230_v41 = vadd.f32 %v748_v5, %v159_v31  ;;  %v295_v3 = vld [vmem:[%s1419_s1 + $0x40] sm:$0xff]  ;;  %v296_v4 = vld [vmem:[%s1419_s1 + $0x48] sm:$0xff]  ;;  %v297_v12 = vld [vmem:[%s1419_s1 + $0x50] sm:$0xff] }
   0x8   :  { %v351_v32 = vadd.f32 %v287_v14, %v223_v20  ;;  %v352_v33 = vadd.f32 %v288_v15, %v224_v21  ;;  %v353_v38 = vadd.f32 %v289_v22, %v225_v26  ;;  %v354_v39 = vadd.f32 %v290_v23, %v226_v27  ;;  %v298_v13 = vld [vmem:[%s1419_s1 + $0x58] sm:$0xff]  ;;  %v299_v18 = vld [vmem:[%s1419_s1 + $0x60] sm:$0xff]  ;;  %v300_v19 = vld [vmem:[%s1419_s1 + $0x68] sm:$0xff] }
   0x9   :  { %v355_v45 = vadd.f32 %v291_v28, %v227_v34  ;;  %v356_v46 = vadd.f32 %v292_v29, %v228_v35  ;;  %v357_v50 = vadd.f32 %v293_v36, %v229_v40  ;;  %v358_v51 = vadd.f32 %v294_v37, %v230_v41  ;;  %v301_v26 = vld [vmem:[%s1419_s1 + $0x70] sm:$0xff]  ;;  %v302_v27 = vld [vmem:[%s1419_s1 + $0x78] sm:$0xff]  ;;  %v686_v37 = vld [vmem:[%s1416_s0 + $0x48] sm:$0xff]  }
   0xa   :  { %v415_v43 = vmax.f32 %v351_v32, 0.0  ;;  %v416_v44 = vmax.f32 %v352_v33, 0.0  ;;  %v417_v48 = vmax.f32 %v353_v38, 0.0  ;;  %v418_v49 = vmax.f32 %v354_v39, 0.0  ;;  %v685_v32 = vld [vmem:[%s1416_s0 + $0x40] sm:$0xff]  }
   0xb   :  { %v419_v53 = vmax.f32 %v355_v45, 0.0  ;;  %v420_v54 = vmax.f32 %v356_v46, 0.0  ;;  %v568_v55 = vunpack.c.l.bf16 %v681_v42  ;;  %v569_v56 = vunpack.c.h.bf16 %v681_v42  ;;  %v687_v42 = vld [vmem:[%s1416_s0 + $0x50] sm:$0xff]  }
   0xc   :  { %480 = vst.msk [vmem:[%s1420_s4] sm:$0xff] %vm479_vm0, %v415_v43  ;;  %481 = vst.msk [vmem:[%s1420_s4 + $0x8] sm:$0xff] %vm479_vm0, %v416_v44  ;;  %v421_v58 = vmax.f32 %v357_v50, 0.0  ;;  %v422_v59 = vmax.f32 %v358_v51, 0.0  ;;  %v572_v60 = vunpack.c.l.bf16 %v682_v47  ;;  %v573_v61 = vunpack.c.h.bf16 %v682_v47  ;;  %v688_v47 = vld [vmem:[%s1416_s0 + $0x58] sm:$0xff]  }
   0xd   :  { %482 = vst.msk [vmem:[%s1420_s4 + $0x10] sm:$0xff] %vm479_vm0, %v417_v48  ;;  %483 = vst.msk [vmem:[%s1420_s4 + $0x18] sm:$0xff] %vm479_vm0, %v418_v49  ;;  %v160_v62 = vmul.f32 %v568_v55, %v740_v1  ;;  %v161_v63 = vmul.f32 %v569_v56, %v740_v1  ;;  %v576_v0 = vunpack.c.l.bf16 %v683_v52  ;;  %v577_v2 = vunpack.c.h.bf16 %v683_v52  ;;  %v303_v56 = vld [vmem:[%s1419_s1 + $0x80] sm:$0xff] }
   0xe   :  { %484 = vst.msk [vmem:[%s1420_s4 + $0x20] sm:$0xff] %vm479_vm0, %v419_v53  ;;  %485 = vst.msk [vmem:[%s1420_s4 + $0x28] sm:$0xff] %vm479_vm0, %v420_v54  ;;  %v162_v6 = vmul.f32 %v572_v60, %v740_v1  ;;  %v163_v7 = vmul.f32 %v573_v61, %v740_v1  ;;  %v580_v8 = vunpack.c.l.bf16 %v684_v57  ;;  %v581_v9 = vunpack.c.h.bf16 %v684_v57  ;;  %v304_v57 = vld [vmem:[%s1419_s1 + $0x88] sm:$0xff] }
   0xf   :  { %486 = vst.msk [vmem:[%s1420_s4 + $0x30] sm:$0xff] %vm479_vm0, %v421_v58  ;;  %487 = vst.msk [vmem:[%s1420_s4 + $0x38] sm:$0xff] %vm479_vm0, %v422_v59  ;;  %v231_v10 = vadd.f32 %v748_v5, %v160_v62  ;;  %v232_v11 = vadd.f32 %v748_v5, %v161_v63  ;;  %v164_v14 = vmul.f32 %v576_v0, %v740_v1  ;;  %v584_v45 = vunpack.c.l.bf16 %v685_v32  ;;  %v305_v0 = vld [vmem:[%s1419_s1 + $0x90] sm:$0xff] }
  0x10   :  { %v165_v15 = vmul.f32 %v577_v2, %v740_v1  ;;  %v233_v16 = vadd.f32 %v748_v5, %v162_v6  ;;  %v234_v17 = vadd.f32 %v748_v5, %v163_v7  ;;  %v166_v20 = vmul.f32 %v580_v8, %v740_v1  ;;  %v306_v2 = vld [vmem:[%s1419_s1 + $0x98] sm:$0xff]  ;;  %v307_v8 = vld [vmem:[%s1419_s1 + $0xa0] sm:$0xff] }
  0x11   :  { %v167_v21 = vmul.f32 %v581_v9, %v740_v1  ;;  %v359_v22 = vadd.f32 %v295_v3, %v231_v10  ;;  %v360_v23 = vadd.f32 %v296_v4, %v232_v11  ;;  %v235_v24 = vadd.f32 %v748_v5, %v164_v14  ;;  %v308_v9 = vld [vmem:[%s1419_s1 + $0xa8] sm:$0xff] }
  0x12   :  { %v236_v25 = vadd.f32 %v748_v5, %v165_v15  ;;  %v361_v28 = vadd.f32 %v297_v12, %v233_v16  ;;  %v362_v29 = vadd.f32 %v298_v13, %v234_v17  ;;  %v237_v30 = vadd.f32 %v748_v5, %v166_v20  ;;  %v309_v16 = vld [vmem:[%s1419_s1 + $0xb0] sm:$0xff]  ;;  %v310_v17 = vld [vmem:[%s1419_s1 + $0xb8] sm:$0xff] }
  0x13   :  { %v238_v31 = vadd.f32 %v748_v5, %v167_v21  ;;  %v423_v33 = vmax.f32 %v359_v22, 0.0  ;;  %v424_v34 = vmax.f32 %v360_v23, 0.0  ;;  %v363_v35 = vadd.f32 %v299_v18, %v235_v24  ;;  %v689_v22 = vld [vmem:[%s1416_s0 + $0x60] sm:$0xff]  }
  0x14   :  { %v364_v36 = vadd.f32 %v300_v19, %v236_v25  ;;  %v425_v38 = vmax.f32 %v361_v28, 0.0  ;;  %v426_v39 = vmax.f32 %v362_v29, 0.0  ;;  %v365_v40 = vadd.f32 %v301_v26, %v237_v30 }
  0x15   :  { %v366_v41 = vadd.f32 %v302_v27, %v238_v31  ;;  %488 = vst.msk [vmem:[%s1420_s4 + $0x40] sm:$0xff] %vm479_vm0, %v423_v33  ;;  %489 = vst.msk [vmem:[%s1420_s4 + $0x48] sm:$0xff] %vm479_vm0, %v424_v34  ;;  %v427_v43 = vmax.f32 %v363_v35, 0.0  ;;  %v585_v46 = vunpack.c.h.bf16 %v685_v32  ;;  %v588_v50 = vunpack.c.l.bf16 %v686_v37  ;;  %v690_v27 = vld [vmem:[%s1416_s0 + $0x68] sm:$0xff]   ;;  %v691_v32 = vld [vmem:[%s1416_s0 + $0x70] sm:$0xff]  }
  0x16   :  { %v428_v44 = vmax.f32 %v364_v36, 0.0  ;;  %490 = vst.msk [vmem:[%s1420_s4 + $0x50] sm:$0xff] %vm479_vm0, %v425_v38  ;;  %491 = vst.msk [vmem:[%s1420_s4 + $0x58] sm:$0xff] %vm479_vm0, %v426_v39  ;;  %v429_v48 = vmax.f32 %v365_v40, 0.0  ;;  %v589_v51 = vunpack.c.h.bf16 %v686_v37  ;;  %v168_v52 = vmul.f32 %v584_v45, %v740_v1  ;;  %v692_v37 = vld [vmem:[%s1416_s0 + $0x78] sm:$0xff]  }
  0x17   :  { %v430_v49 = vmax.f32 %v366_v41, 0.0  ;;  %492 = vst.msk [vmem:[%s1420_s4 + $0x60] sm:$0xff] %vm479_vm0, %v427_v43  ;;  %v169_v53 = vmul.f32 %v585_v46, %v740_v1  ;;  %v592_v54 = vunpack.c.l.bf16 %v687_v42  ;;  %v593_v55 = vunpack.c.h.bf16 %v687_v42  ;;  %v311_v46 = vld [vmem:[%s1419_s1 + $0xc0] sm:$0xff] }
  0x18   :  { %493 = vst.msk [vmem:[%s1420_s4 + $0x68] sm:$0xff] %vm479_vm0, %v428_v44  ;;  %494 = vst.msk [vmem:[%s1420_s4 + $0x70] sm:$0xff] %vm479_vm0, %v429_v48  ;;  %v170_v58 = vmul.f32 %v588_v50, %v740_v1  ;;  %v171_v59 = vmul.f32 %v589_v51, %v740_v1  ;;  %v596_v60 = vunpack.c.l.bf16 %v688_v47  ;;  %v597_v61 = vunpack.c.h.bf16 %v688_v47  ;;  %v312_v47 = vld [vmem:[%s1419_s1 + $0xc8] sm:$0xff] }
  0x19   :  { %495 = vst.msk [vmem:[%s1420_s4 + $0x78] sm:$0xff] %vm479_vm0, %v430_v49  ;;  %v239_v62 = vadd.f32 %v748_v5, %v168_v52  ;;  %v240_v63 = vadd.f32 %v748_v5, %v169_v53  ;;  %v172_v3 = vmul.f32 %v592_v54, %v740_v1  ;;  %v173_v4 = vmul.f32 %v593_v55, %v740_v1  ;;  %v313_v54 = vld [vmem:[%s1419_s1 + $0xd0] sm:$0xff]  ;;  %v314_v55 = vld [vmem:[%s1419_s1 + $0xd8] sm:$0xff] }
  0x1a   :  { %v241_v6 = vadd.f32 %v748_v5, %v170_v58  ;;  %v242_v7 = vadd.f32 %v748_v5, %v171_v59  ;;  %v174_v10 = vmul.f32 %v596_v60, %v740_v1  ;;  %v175_v11 = vmul.f32 %v597_v61, %v740_v1  ;;  %v315_v60 = vld [vmem:[%s1419_s1 + $0xe0] sm:$0xff]  ;;  %v316_v61 = vld [vmem:[%s1419_s1 + $0xe8] sm:$0xff] }
  0x1b   :  { %v367_v12 = vadd.f32 %v303_v56, %v239_v62  ;;  %v368_v13 = vadd.f32 %v304_v57, %v240_v63  ;;  %v243_v14 = vadd.f32 %v748_v5, %v172_v3  ;;  %v244_v15 = vadd.f32 %v748_v5, %v173_v4 }
  0x1c   :  { %v369_v18 = vadd.f32 %v305_v0, %v241_v6  ;;  %v370_v19 = vadd.f32 %v306_v2, %v242_v7  ;;  %v245_v20 = vadd.f32 %v748_v5, %v174_v10  ;;  %v246_v21 = vadd.f32 %v748_v5, %v175_v11  ;;  %v317_v6 = vld [vmem:[%s1419_s1 + $0xf0] sm:$0xff]  ;;  %v318_v7 = vld [vmem:[%s1419_s1 + $0xf8] sm:$0xff] }
  0x1d   :  { %v431_v23 = vmax.f32 %v367_v12, 0.0  ;;  %v432_v24 = vmax.f32 %v368_v13, 0.0  ;;  %v371_v25 = vadd.f32 %v307_v8, %v243_v14  ;;  %v372_v26 = vadd.f32 %v308_v9, %v244_v15  ;;  %v693_v12 = vld [vmem:[%s1416_s0 + $0x80] sm:$0xff]  }
  0x1e   :  { %v433_v28 = vmax.f32 %v369_v18, 0.0  ;;  %v434_v29 = vmax.f32 %v370_v19, 0.0  ;;  %v373_v30 = vadd.f32 %v309_v16, %v245_v20  ;;  %v374_v31 = vadd.f32 %v310_v17, %v246_v21  ;;  %v694_v17 = vld [vmem:[%s1416_s0 + $0x88] sm:$0xff]  }
  0x1f   :  { %496 = vst.msk [vmem:[%s1420_s4 + $0x80] sm:$0xff] %vm479_vm0, %v431_v23  ;;  %497 = vst.msk [vmem:[%s1420_s4 + $0x88] sm:$0xff] %vm479_vm0, %v432_v24  ;;  %v435_v33 = vmax.f32 %v371_v25, 0.0  ;;  %v436_v34 = vmax.f32 %v372_v26, 0.0  ;;  %v600_v35 = vunpack.c.l.bf16 %v689_v22  ;;  %v601_v36 = vunpack.c.h.bf16 %v689_v22  ;;  %v695_v22 = vld [vmem:[%s1416_s0 + $0x90] sm:$0xff]  }
  0x20   :  { %498 = vst.msk [vmem:[%s1420_s4 + $0x90] sm:$0xff] %vm479_vm0, %v433_v28  ;;  %499 = vst.msk [vmem:[%s1420_s4 + $0x98] sm:$0xff] %vm479_vm0, %v434_v29  ;;  %v437_v38 = vmax.f32 %v373_v30, 0.0  ;;  %v438_v39 = vmax.f32 %v374_v31, 0.0  ;;  %v604_v40 = vunpack.c.l.bf16 %v690_v27  ;;  %v605_v41 = vunpack.c.h.bf16 %v690_v27  ;;  %v696_v27 = vld [vmem:[%s1416_s0 + $0x98] sm:$0xff]  }
  0x21   :  { %500 = vst.msk [vmem:[%s1420_s4 + $0xa0] sm:$0xff] %vm479_vm0, %v435_v33  ;;  %501 = vst.msk [vmem:[%s1420_s4 + $0xa8] sm:$0xff] %vm479_vm0, %v436_v34  ;;  %v176_v42 = vmul.f32 %v600_v35, %v740_v1  ;;  %v177_v43 = vmul.f32 %v601_v36, %v740_v1  ;;  %v608_v44 = vunpack.c.l.bf16 %v691_v32  ;;  %v609_v45 = vunpack.c.h.bf16 %v691_v32  ;;  %v319_v36 = vld [vmem:[%s1419_s1 + $0x100] sm:$0xff] }
  0x22   :  { %502 = vst.msk [vmem:[%s1420_s4 + $0xb0] sm:$0xff] %vm479_vm0, %v437_v38  ;;  %503 = vst.msk [vmem:[%s1420_s4 + $0xb8] sm:$0xff] %vm479_vm0, %v438_v39  ;;  %v178_v48 = vmul.f32 %v604_v40, %v740_v1  ;;  %v179_v49 = vmul.f32 %v605_v41, %v740_v1  ;;  %v612_v50 = vunpack.c.l.bf16 %v692_v37  ;;  %v613_v51 = vunpack.c.h.bf16 %v692_v37  ;;  %v320_v37 = vld [vmem:[%s1419_s1 + $0x108] sm:$0xff] }
  0x23   :  { %v247_v52 = vadd.f32 %v748_v5, %v176_v42  ;;  %v248_v53 = vadd.f32 %v748_v5, %v177_v43  ;;  %v180_v56 = vmul.f32 %v608_v44, %v740_v1  ;;  %v181_v57 = vmul.f32 %v609_v45, %v740_v1  ;;  %v321_v44 = vld [vmem:[%s1419_s1 + $0x110] sm:$0xff]  ;;  %v322_v45 = vld [vmem:[%s1419_s1 + $0x118] sm:$0xff] }
  0x24   :  { %v249_v58 = vadd.f32 %v748_v5, %v178_v48  ;;  %v250_v59 = vadd.f32 %v748_v5, %v179_v49  ;;  %v182_v62 = vmul.f32 %v612_v50, %v740_v1  ;;  %v183_v63 = vmul.f32 %v613_v51, %v740_v1  ;;  %v323_v50 = vld [vmem:[%s1419_s1 + $0x120] sm:$0xff]  ;;  %v324_v51 = vld [vmem:[%s1419_s1 + $0x128] sm:$0xff] }
  0x25   :  { %v375_v0 = vadd.f32 %v311_v46, %v247_v52  ;;  %v376_v2 = vadd.f32 %v312_v47, %v248_v53  ;;  %v251_v3 = vadd.f32 %v748_v5, %v180_v56  ;;  %v252_v4 = vadd.f32 %v748_v5, %v181_v57 }
  0x26   :  { %v377_v8 = vadd.f32 %v313_v54, %v249_v58  ;;  %v378_v9 = vadd.f32 %v314_v55, %v250_v59  ;;  %v253_v10 = vadd.f32 %v748_v5, %v182_v62  ;;  %v254_v11 = vadd.f32 %v748_v5, %v183_v63  ;;  %v325_v58 = vld [vmem:[%s1419_s1 + $0x130] sm:$0xff]  ;;  %v326_v59 = vld [vmem:[%s1419_s1 + $0x138] sm:$0xff] }
  0x27   :  { %v439_v13 = vmax.f32 %v375_v0, 0.0  ;;  %v440_v14 = vmax.f32 %v376_v2, 0.0  ;;  %v379_v15 = vadd.f32 %v315_v60, %v251_v3  ;;  %v380_v16 = vadd.f32 %v316_v61, %v252_v4  ;;  %v697_v0 = vld [vmem:[%s1416_s0 + $0xa0] sm:$0xff]  }
  0x28   :  { %v441_v18 = vmax.f32 %v377_v8, 0.0  ;;  %v442_v19 = vmax.f32 %v378_v9, 0.0  ;;  %v381_v20 = vadd.f32 %v317_v6, %v253_v10  ;;  %v382_v21 = vadd.f32 %v318_v7, %v254_v11  ;;  %v698_v7 = vld [vmem:[%s1416_s0 + $0xa8] sm:$0xff]  }
  0x29   :  { %504 = vst.msk [vmem:[%s1420_s4 + $0xc0] sm:$0xff] %vm479_vm0, %v439_v13  ;;  %505 = vst.msk [vmem:[%s1420_s4 + $0xc8] sm:$0xff] %vm479_vm0, %v440_v14  ;;  %v443_v23 = vmax.f32 %v379_v15, 0.0  ;;  %v444_v24 = vmax.f32 %v380_v16, 0.0  ;;  %v616_v25 = vunpack.c.l.bf16 %v693_v12  ;;  %v617_v26 = vunpack.c.h.bf16 %v693_v12  ;;  %v699_v12 = vld [vmem:[%s1416_s0 + $0xb0] sm:$0xff]  }
  0x2a   :  { %506 = vst.msk [vmem:[%s1420_s4 + $0xd0] sm:$0xff] %vm479_vm0, %v441_v18  ;;  %507 = vst.msk [vmem:[%s1420_s4 + $0xd8] sm:$0xff] %vm479_vm0, %v442_v19  ;;  %v445_v28 = vmax.f32 %v381_v20, 0.0  ;;  %v446_v29 = vmax.f32 %v382_v21, 0.0  ;;  %v620_v30 = vunpack.c.l.bf16 %v694_v17  ;;  %v621_v31 = vunpack.c.h.bf16 %v694_v17  ;;  %v700_v17 = vld [vmem:[%s1416_s0 + $0xb8] sm:$0xff]  }
  0x2b   :  { %508 = vst.msk [vmem:[%s1420_s4 + $0xe0] sm:$0xff] %vm479_vm0, %v443_v23  ;;  %509 = vst.msk [vmem:[%s1420_s4 + $0xe8] sm:$0xff] %vm479_vm0, %v444_v24  ;;  %v184_v32 = vmul.f32 %v616_v25, %v740_v1  ;;  %v185_v33 = vmul.f32 %v617_v26, %v740_v1  ;;  %v624_v34 = vunpack.c.l.bf16 %v695_v22  ;;  %v625_v35 = vunpack.c.h.bf16 %v695_v22  ;;  %v327_v26 = vld [vmem:[%s1419_s1 + $0x140] sm:$0xff] }
  0x2c   :  { %510 = vst.msk [vmem:[%s1420_s4 + $0xf0] sm:$0xff] %vm479_vm0, %v445_v28  ;;  %511 = vst.msk [vmem:[%s1420_s4 + $0xf8] sm:$0xff] %vm479_vm0, %v446_v29  ;;  %v186_v38 = vmul.f32 %v620_v30, %v740_v1  ;;  %v187_v39 = vmul.f32 %v621_v31, %v740_v1  ;;  %v628_v40 = vunpack.c.l.bf16 %v696_v27  ;;  %v629_v41 = vunpack.c.h.bf16 %v696_v27  ;;  %v328_v27 = vld [vmem:[%s1419_s1 + $0x148] sm:$0xff] }
  0x2d   :  { %v255_v42 = vadd.f32 %v748_v5, %v184_v32  ;;  %v256_v43 = vadd.f32 %v748_v5, %v185_v33  ;;  %v188_v46 = vmul.f32 %v624_v34, %v740_v1  ;;  %v189_v47 = vmul.f32 %v625_v35, %v740_v1  ;;  %v329_v34 = vld [vmem:[%s1419_s1 + $0x150] sm:$0xff]  ;;  %v330_v35 = vld [vmem:[%s1419_s1 + $0x158] sm:$0xff] }
  0x2e   :  { %v257_v48 = vadd.f32 %v748_v5, %v186_v38  ;;  %v258_v49 = vadd.f32 %v748_v5, %v187_v39  ;;  %v190_v52 = vmul.f32 %v628_v40, %v740_v1  ;;  %v191_v53 = vmul.f32 %v629_v41, %v740_v1  ;;  %v331_v40 = vld [vmem:[%s1419_s1 + $0x160] sm:$0xff]  ;;  %v332_v41 = vld [vmem:[%s1419_s1 + $0x168] sm:$0xff] }
  0x2f   :  { %v383_v54 = vadd.f32 %v319_v36, %v255_v42  ;;  %v384_v55 = vadd.f32 %v320_v37, %v256_v43  ;;  %v259_v56 = vadd.f32 %v748_v5, %v188_v46  ;;  %v260_v57 = vadd.f32 %v748_v5, %v189_v47 }
  0x30   :  { %v385_v60 = vadd.f32 %v321_v44, %v257_v48  ;;  %v386_v61 = vadd.f32 %v322_v45, %v258_v49  ;;  %v261_v62 = vadd.f32 %v748_v5, %v190_v52  ;;  %v262_v63 = vadd.f32 %v748_v5, %v191_v53  ;;  %v333_v48 = vld [vmem:[%s1419_s1 + $0x170] sm:$0xff]  ;;  %v334_v49 = vld [vmem:[%s1419_s1 + $0x178] sm:$0xff] }
  0x31   :  { %v447_v2 = vmax.f32 %v383_v54, 0.0  ;;  %v448_v3 = vmax.f32 %v384_v55, 0.0  ;;  %v387_v4 = vadd.f32 %v323_v50, %v259_v56  ;;  %v388_v6 = vadd.f32 %v324_v51, %v260_v57  ;;  %v701_v54 = vld [vmem:[%s1416_s0 + $0xc0] sm:$0xff]  }
  0x32   :  { %v449_v8 = vmax.f32 %v385_v60, 0.0  ;;  %v450_v9 = vmax.f32 %v386_v61, 0.0  ;;  %v389_v10 = vadd.f32 %v325_v58, %v261_v62  ;;  %v390_v11 = vadd.f32 %v326_v59, %v262_v63  ;;  %v702_v59 = vld [vmem:[%s1416_s0 + $0xc8] sm:$0xff]  }
  0x33   :  { %512 = vst.msk [vmem:[%s1420_s4 + $0x100] sm:$0xff] %vm479_vm0, %v447_v2  ;;  %513 = vst.msk [vmem:[%s1420_s4 + $0x108] sm:$0xff] %vm479_vm0, %v448_v3  ;;  %v451_v13 = vmax.f32 %v387_v4, 0.0  ;;  %v452_v14 = vmax.f32 %v388_v6, 0.0  ;;  %v632_v15 = vunpack.c.l.bf16 %v697_v0  ;;  %v633_v16 = vunpack.c.h.bf16 %v697_v0  ;;  %v703_v0 = vld [vmem:[%s1416_s0 + $0xd0] sm:$0xff]  }
  0x34   :  { %514 = vst.msk [vmem:[%s1420_s4 + $0x110] sm:$0xff] %vm479_vm0, %v449_v8  ;;  %515 = vst.msk [vmem:[%s1420_s4 + $0x118] sm:$0xff] %vm479_vm0, %v450_v9  ;;  %v453_v18 = vmax.f32 %v389_v10, 0.0  ;;  %v454_v19 = vmax.f32 %v390_v11, 0.0  ;;  %v636_v20 = vunpack.c.l.bf16 %v698_v7  ;;  %v637_v21 = vunpack.c.h.bf16 %v698_v7  ;;  %v704_v7 = vld [vmem:[%s1416_s0 + $0xd8] sm:$0xff]  }
  0x35   :  { %516 = vst.msk [vmem:[%s1420_s4 + $0x120] sm:$0xff] %vm479_vm0, %v451_v13  ;;  %517 = vst.msk [vmem:[%s1420_s4 + $0x128] sm:$0xff] %vm479_vm0, %v452_v14  ;;  %v192_v22 = vmul.f32 %v632_v15, %v740_v1  ;;  %v193_v23 = vmul.f32 %v633_v16, %v740_v1  ;;  %v640_v24 = vunpack.c.l.bf16 %v699_v12  ;;  %v641_v25 = vunpack.c.h.bf16 %v699_v12  ;;  %v335_v16 = vld [vmem:[%s1419_s1 + $0x180] sm:$0xff] }
  0x36   :  { %518 = vst.msk [vmem:[%s1420_s4 + $0x130] sm:$0xff] %vm479_vm0, %v453_v18  ;;  %519 = vst.msk [vmem:[%s1420_s4 + $0x138] sm:$0xff] %vm479_vm0, %v454_v19  ;;  %v194_v28 = vmul.f32 %v636_v20, %v740_v1  ;;  %v195_v29 = vmul.f32 %v637_v21, %v740_v1  ;;  %v644_v30 = vunpack.c.l.bf16 %v700_v17  ;;  %v645_v31 = vunpack.c.h.bf16 %v700_v17  ;;  %v336_v17 = vld [vmem:[%s1419_s1 + $0x188] sm:$0xff] }
  0x37   :  { %v263_v32 = vadd.f32 %v748_v5, %v192_v22  ;;  %v264_v33 = vadd.f32 %v748_v5, %v193_v23  ;;  %v196_v36 = vmul.f32 %v640_v24, %v740_v1  ;;  %v197_v37 = vmul.f32 %v641_v25, %v740_v1  ;;  %v337_v24 = vld [vmem:[%s1419_s1 + $0x190] sm:$0xff]  ;;  %v338_v25 = vld [vmem:[%s1419_s1 + $0x198] sm:$0xff] }
  0x38   :  { %v265_v38 = vadd.f32 %v748_v5, %v194_v28  ;;  %v266_v39 = vadd.f32 %v748_v5, %v195_v29  ;;  %v198_v42 = vmul.f32 %v644_v30, %v740_v1  ;;  %v199_v43 = vmul.f32 %v645_v31, %v740_v1  ;;  %v339_v30 = vld [vmem:[%s1419_s1 + $0x1a0] sm:$0xff]  ;;  %v340_v31 = vld [vmem:[%s1419_s1 + $0x1a8] sm:$0xff] }
  0x39   :  { %v391_v44 = vadd.f32 %v327_v26, %v263_v32  ;;  %v392_v45 = vadd.f32 %v328_v27, %v264_v33  ;;  %v267_v46 = vadd.f32 %v748_v5, %v196_v36  ;;  %v268_v47 = vadd.f32 %v748_v5, %v197_v37 }
  0x3a   :  { %v393_v50 = vadd.f32 %v329_v34, %v265_v38  ;;  %v394_v51 = vadd.f32 %v330_v35, %v266_v39  ;;  %v269_v52 = vadd.f32 %v748_v5, %v198_v42  ;;  %v270_v53 = vadd.f32 %v748_v5, %v199_v43  ;;  %v341_v38 = vld [vmem:[%s1419_s1 + $0x1b0] sm:$0xff]  ;;  %v342_v39 = vld [vmem:[%s1419_s1 + $0x1b8] sm:$0xff] }
  0x3b   :  { %v455_v55 = vmax.f32 %v391_v44, 0.0  ;;  %v456_v56 = vmax.f32 %v392_v45, 0.0  ;;  %v395_v57 = vadd.f32 %v331_v40, %v267_v46  ;;  %v396_v58 = vadd.f32 %v332_v41, %v268_v47  ;;  %v705_v44 = vld [vmem:[%s1416_s0 + $0xe0] sm:$0xff]  }
  0x3c   :  { %v457_v60 = vmax.f32 %v393_v50, 0.0  ;;  %v458_v61 = vmax.f32 %v394_v51, 0.0  ;;  %v397_v62 = vadd.f32 %v333_v48, %v269_v52  ;;  %v398_v63 = vadd.f32 %v334_v49, %v270_v53  ;;  %v706_v49 = vld [vmem:[%s1416_s0 + $0xe8] sm:$0xff]  }
  0x3d   :  { %520 = vst.msk [vmem:[%s1420_s4 + $0x140] sm:$0xff] %vm479_vm0, %v455_v55  ;;  %521 = vst.msk [vmem:[%s1420_s4 + $0x148] sm:$0xff] %vm479_vm0, %v456_v56  ;;  %v459_v2 = vmax.f32 %v395_v57, 0.0  ;;  %v460_v3 = vmax.f32 %v396_v58, 0.0  ;;  %v648_v4 = vunpack.c.l.bf16 %v701_v54  ;;  %v649_v6 = vunpack.c.h.bf16 %v701_v54  ;;  %v707_v54 = vld [vmem:[%s1416_s0 + $0xf0] sm:$0xff]  }
  0x3e   :  { %522 = vst.msk [vmem:[%s1420_s4 + $0x150] sm:$0xff] %vm479_vm0, %v457_v60  ;;  %523 = vst.msk [vmem:[%s1420_s4 + $0x158] sm:$0xff] %vm479_vm0, %v458_v61  ;;  %v461_v8 = vmax.f32 %v397_v62, 0.0  ;;  %v462_v9 = vmax.f32 %v398_v63, 0.0  ;;  %v652_v10 = vunpack.c.l.bf16 %v702_v59  ;;  %v653_v11 = vunpack.c.h.bf16 %v702_v59  ;;  %v708_v59 = vld [vmem:[%s1416_s0 + $0xf8] sm:$0xff]  }
  0x3f   :  { %524 = vst.msk [vmem:[%s1420_s4 + $0x160] sm:$0xff] %vm479_vm0, %v459_v2  ;;  %525 = vst.msk [vmem:[%s1420_s4 + $0x168] sm:$0xff] %vm479_vm0, %v460_v3  ;;  %v200_v12 = vmul.f32 %v648_v4, %v740_v1  ;;  %v201_v13 = vmul.f32 %v649_v6, %v740_v1  ;;  %v656_v14 = vunpack.c.l.bf16 %v703_v0  ;;  %v657_v15 = vunpack.c.h.bf16 %v703_v0  ;;  %v343_v6 = vld [vmem:[%s1419_s1 + $0x1c0] sm:$0xff] }
  0x40   :  { %526 = vst.msk [vmem:[%s1420_s4 + $0x170] sm:$0xff] %vm479_vm0, %v461_v8  ;;  %527 = vst.msk [vmem:[%s1420_s4 + $0x178] sm:$0xff] %vm479_vm0, %v462_v9  ;;  %v202_v18 = vmul.f32 %v652_v10, %v740_v1  ;;  %v203_v19 = vmul.f32 %v653_v11, %v740_v1  ;;  %v660_v20 = vunpack.c.l.bf16 %v704_v7  ;;  %v661_v21 = vunpack.c.h.bf16 %v704_v7  ;;  %v344_v7 = vld [vmem:[%s1419_s1 + $0x1c8] sm:$0xff] }
  0x41   :  { %v271_v22 = vadd.f32 %v748_v5, %v200_v12  ;;  %v272_v23 = vadd.f32 %v748_v5, %v201_v13  ;;  %v204_v26 = vmul.f32 %v656_v14, %v740_v1  ;;  %v205_v27 = vmul.f32 %v657_v15, %v740_v1  ;;  %v345_v14 = vld [vmem:[%s1419_s1 + $0x1d0] sm:$0xff]  ;;  %v346_v15 = vld [vmem:[%s1419_s1 + $0x1d8] sm:$0xff] }
  0x42   :  { %v273_v28 = vadd.f32 %v748_v5, %v202_v18  ;;  %v274_v29 = vadd.f32 %v748_v5, %v203_v19  ;;  %v206_v32 = vmul.f32 %v660_v20, %v740_v1  ;;  %v207_v33 = vmul.f32 %v661_v21, %v740_v1  ;;  %v347_v20 = vld [vmem:[%s1419_s1 + $0x1e0] sm:$0xff]  ;;  %v348_v21 = vld [vmem:[%s1419_s1 + $0x1e8] sm:$0xff] }
  0x43   :  { %v399_v34 = vadd.f32 %v335_v16, %v271_v22  ;;  %v400_v35 = vadd.f32 %v336_v17, %v272_v23  ;;  %v275_v36 = vadd.f32 %v748_v5, %v204_v26  ;;  %v276_v37 = vadd.f32 %v748_v5, %v205_v27 }
  0x44   :  { %v401_v40 = vadd.f32 %v337_v24, %v273_v28  ;;  %v402_v41 = vadd.f32 %v338_v25, %v274_v29  ;;  %v277_v42 = vadd.f32 %v748_v5, %v206_v32  ;;  %v278_v43 = vadd.f32 %v748_v5, %v207_v33  ;;  %v349_v28 = vld [vmem:[%s1419_s1 + $0x1f0] sm:$0xff]  ;;  %v350_v29 = vld [vmem:[%s1419_s1 + $0x1f8] sm:$0xff] }
  0x45   :  { %v463_v45 = vmax.f32 %v399_v34, 0.0  ;;  %v464_v46 = vmax.f32 %v400_v35, 0.0  ;;  %v403_v47 = vadd.f32 %v339_v30, %v275_v36  ;;  %v404_v48 = vadd.f32 %v340_v31, %v276_v37 }
  0x46   :  { %v465_v50 = vmax.f32 %v401_v40, 0.0  ;;  %v466_v51 = vmax.f32 %v402_v41, 0.0  ;;  %v405_v52 = vadd.f32 %v341_v38, %v277_v42  ;;  %v406_v53 = vadd.f32 %v342_v39, %v278_v43 }
  0x47   :  { %528 = vst.msk [vmem:[%s1420_s4 + $0x180] sm:$0xff] %vm479_vm0, %v463_v45  ;;  %529 = vst.msk [vmem:[%s1420_s4 + $0x188] sm:$0xff] %vm479_vm0, %v464_v46  ;;  %v467_v55 = vmax.f32 %v403_v47, 0.0  ;;  %v468_v56 = vmax.f32 %v404_v48, 0.0  ;;  %v664_v57 = vunpack.c.l.bf16 %v705_v44  ;;  %v665_v58 = vunpack.c.h.bf16 %v705_v44 }
  0x48   :  { %530 = vst.msk [vmem:[%s1420_s4 + $0x190] sm:$0xff] %vm479_vm0, %v465_v50  ;;  %531 = vst.msk [vmem:[%s1420_s4 + $0x198] sm:$0xff] %vm479_vm0, %v466_v51  ;;  %v469_v60 = vmax.f32 %v405_v52, 0.0  ;;  %v470_v61 = vmax.f32 %v406_v53, 0.0  ;;  %v668_v62 = vunpack.c.l.bf16 %v706_v49  ;;  %v669_v63 = vunpack.c.h.bf16 %v706_v49 }
  0x49   :  { %532 = vst.msk [vmem:[%s1420_s4 + $0x1a0] sm:$0xff] %vm479_vm0, %v467_v55  ;;  %533 = vst.msk [vmem:[%s1420_s4 + $0x1a8] sm:$0xff] %vm479_vm0, %v468_v56  ;;  %v208_v0 = vmul.f32 %v664_v57, %v740_v1  ;;  %v209_v2 = vmul.f32 %v665_v58, %v740_v1  ;;  %v672_v3 = vunpack.c.l.bf16 %v707_v54  ;;  %v673_v4 = vunpack.c.h.bf16 %v707_v54 }
  0x4a   :  { %534 = vst.msk [vmem:[%s1420_s4 + $0x1b0] sm:$0xff] %vm479_vm0, %v469_v60  ;;  %535 = vst.msk [vmem:[%s1420_s4 + $0x1b8] sm:$0xff] %vm479_vm0, %v470_v61  ;;  %v210_v8 = vmul.f32 %v668_v62, %v740_v1  ;;  %v211_v9 = vmul.f32 %v669_v63, %v740_v1  ;;  %v676_v10 = vunpack.c.l.bf16 %v708_v59  ;;  %v677_v11 = vunpack.c.h.bf16 %v708_v59 }
  0x4b   :  { %v279_v12 = vadd.f32 %v748_v5, %v208_v0  ;;  %v280_v13 = vadd.f32 %v748_v5, %v209_v2  ;;  %v212_v16 = vmul.f32 %v672_v3, %v740_v1  ;;  %v213_v17 = vmul.f32 %v673_v4, %v740_v1 }
  0x4c   :  { %v281_v18 = vadd.f32 %v748_v5, %v210_v8  ;;  %v282_v19 = vadd.f32 %v748_v5, %v211_v9  ;;  %v214_v22 = vmul.f32 %v676_v10, %v740_v1  ;;  %v215_v23 = vmul.f32 %v677_v11, %v740_v1 }
  0x4d   :  { %v407_v24 = vadd.f32 %v343_v6, %v279_v12  ;;  %v408_v25 = vadd.f32 %v344_v7, %v280_v13  ;;  %v283_v26 = vadd.f32 %v748_v5, %v212_v16  ;;  %v284_v27 = vadd.f32 %v748_v5, %v213_v17 }
  0x4e   :  { %v409_v30 = vadd.f32 %v345_v14, %v281_v18  ;;  %v410_v31 = vadd.f32 %v346_v15, %v282_v19  ;;  %v285_v32 = vadd.f32 %v748_v5, %v214_v22  ;;  %v286_v1 = vadd.f32 %v748_v5, %v215_v23 }
  0x4f   :  { %v471_v33 = vmax.f32 %v407_v24, 0.0  ;;  %v472_v34 = vmax.f32 %v408_v25, 0.0  ;;  %v411_v35 = vadd.f32 %v347_v20, %v283_v26  ;;  %v412_v36 = vadd.f32 %v348_v21, %v284_v27 }
  0x50   :  { %v473_v37 = vmax.f32 %v409_v30, 0.0  ;;  %v474_v38 = vmax.f32 %v410_v31, 0.0  ;;  %v413_v39 = vadd.f32 %v349_v28, %v285_v32  ;;  %v414_v40 = vadd.f32 %v350_v29, %v286_v1 }
  0x51   :  { %536 = vst.msk [vmem:[%s1420_s4 + $0x1c0] sm:$0xff] %vm479_vm0, %v471_v33  ;;  %537 = vst.msk [vmem:[%s1420_s4 + $0x1c8] sm:$0xff] %vm479_vm0, %v472_v34  ;;  %v475_v41 = vmax.f32 %v411_v35, 0.0  ;;  %v476_v5 = vmax.f32 %v412_v36, 0.0 }
  0x52   :  { %538 = vst.msk [vmem:[%s1420_s4 + $0x1d0] sm:$0xff] %vm479_vm0, %v473_v37  ;;  %539 = vst.msk [vmem:[%s1420_s4 + $0x1d8] sm:$0xff] %vm479_vm0, %v474_v38  ;;  %v477_v42 = vmax.f32 %v413_v39, 0.0  ;;  %v478_v43 = vmax.f32 %v414_v40, 0.0 }
  0x53   :  { %540 = vst.msk [vmem:[%s1420_s4 + $0x1e0] sm:$0xff] %vm479_vm0, %v475_v41  ;;  %541 = vst.msk [vmem:[%s1420_s4 + $0x1e8] sm:$0xff] %vm479_vm0, %v476_v5 }
  0x54   :  { %542 = vst.msk [vmem:[%s1420_s4 + $0x1f0] sm:$0xff] %vm479_vm0, %v477_v42  ;;  %543 = vst.msk [vmem:[%s1420_s4 + $0x1f8] sm:$0xff] %vm479_vm0, %v478_v43 }

// kernel: _residual_forward.3
= control target key start
LH: loop header
LB: loop body
LE: loop exit
PB: predicated region body
PF: predicated region fallthrough
CT: control target
= control target key end

     0   :  { %vm79_vm0 = vcmask 31744   ;;  %vm146_vm1 = vcmask 25600   ;;  %vm158_vm2 = vcmask 24576   ;;  %v3742_v0 = vmov 0.0   ;;  %s3743_s29 = smov 4   ;;  %s3744_s27 = smov 8   ;;  %s5514_s0 = inlined_call_operand.vmem [shape: f32[2,16,16,4], index: 0, kind: input, shape index: {}]   ;;  %s5515_s1 = inlined_call_operand.vmem [shape: bf16[36,4], index: 1, kind: input, shape index: {}]   ;;  %s5516_s2 = inlined_call_operand.vmem [shape: bf16[2,16,16,4], index: 2, kind: output, shape index: {0}]   ;;  %s5517_s3 = inlined_call_operand.vmem [shape: f32[1,2,4], index: 3, kind: output, shape index: {1}]  }
   0x1   :  { %144 = vst.msk [vmem:[#allocation2] sm:$0xff] %vm79_vm0, %v3742_v0  ;;  %145 = vst.msk [vmem:[#allocation2 + $0x8] sm:$0xff] %vm79_vm0, %v3742_v0  ;;  %v16_v1 = vld [vmem:[%s5514_s0 + $0x10] sm:$0xff]  ;;  %v17_v2 = vld [vmem:[%s5514_s0 + $0x18] sm:$0xff]  ;;  %vm2500_vm3 = vcmask 1041408   ;;  %s3745_s5 = smov 12  }
   0x2   :  { %147 = vst.msk [vmem:[#allocation2 + $0x10] sm:$0x3] %vm146_vm1, %v3742_v0  ;;  %150 = vst.msk [vmem:[#allocation2 + $0x1c0] sm:$0x3] %vm146_vm1, %v3742_v0  ;;  %v14_v3 = vld [vmem:[%s5514_s0] sm:$0xff]  ;;  %v15_v4 = vld [vmem:[%s5514_s0 + $0x8] sm:$0xff] }
   0x3   :  { %148 = vst.msk [vmem:[#allocation2 + $0x1b0] sm:$0xff] %vm79_vm0, %v3742_v0  ;;  %149 = vst.msk [vmem:[#allocation2 + $0x1b8] sm:$0xff] %vm79_vm0, %v3742_v0  ;;  %v18_v5 = vld [vmem:[%s5514_s0 + $0x20] sm:$0xff]  ;;  %v19_v6 = vld [vmem:[%s5514_s0 + $0x28] sm:$0xff]  ;;  %s3746_s8 = smov 16   ;;  %s3747_s9 = smov 20  }
   0x4   :  { %152 = vst.msk [vmem:[#allocation2 + $0x198] sm:$0xff] %vm79_vm0, %v3742_v0  ;;  %153 = vst.msk [vmem:[#allocation2 + $0x1a0] sm:$0xff] %vm79_vm0, %v3742_v0  ;;  %v20_v7 = vld [vmem:[%s5514_s0 + $0x30] sm:$0xff]  ;;  %v21_v8 = vld [vmem:[%s5514_s0 + $0x38] sm:$0xff]  ;;  %s3749_s10 = smov 28   ;;  %s3750_s11 = smov 32  }
   0x5   :  { %154 = vst.msk [vmem:[#allocation2 + $0x1a8] sm:$0x3] %vm146_vm1, %v3742_v0  ;;  %157 = vst.msk [vmem:[#allocation2 + $0x358] sm:$0x3] %vm146_vm1, %v3742_v0  ;;  %v22_v9 = vld [vmem:[%s5514_s0 + $0x40] sm:$0xff]  ;;  %v23_v10 = vld [vmem:[%s5514_s0 + $0x48] sm:$0xff] }
   0x6   :  { %155 = vst.msk [vmem:[#allocation2 + $0x348] sm:$0xff] %vm79_vm0, %v3742_v0  ;;  %156 = vst.msk [vmem:[#allocation2 + $0x350] sm:$0xff] %vm79_vm0, %v3742_v0  ;;  %v24_v11 = vld [vmem:[%s5514_s0 + $0x50] sm:$0xff]  ;;  %v25_v12 = vld [vmem:[%s5514_s0 + $0x58] sm:$0xff]  ;;  %vm1960_vm4 = vcmask 64512   ;;  %vm2025_vm5 = vcmask 97280  }
   0x7   :  { %160 = vst.msk [vmem:[#allocation2 + $0x18] sm:$0x1] %vm158_vm2, %v3742_v0  ;;  %161 = vst.msk [vmem:[#allocation2 + $0x30] sm:$0x1] %vm158_vm2, %v3742_v0  ;;  %v26_v13 = vld [vmem:[%s5514_s0 + $0x60] sm:$0xff]  ;;  %v27_v14 = vld [vmem:[%s5514_s0 + $0x68] sm:$0xff] }
   0x8   :  { %162 = vst.msk [vmem:[#allocation2 + $0x48] sm:$0x1] %vm158_vm2, %v3742_v0  ;;  %163 = vst.msk [vmem:[#allocation2 + $0x60] sm:$0x1] %vm158_vm2, %v3742_v0  ;;  %v28_v15 = vld [vmem:[%s5514_s0 + $0x70] sm:$0xff]  ;;  %v29_v16 = vld [vmem:[%s5514_s0 + $0x78] sm:$0xff] }
   0x9   :  { %164 = vst.msk [vmem:[#allocation2 + $0x78] sm:$0x1] %vm158_vm2, %v3742_v0  ;;  %165 = vst.msk [vmem:[#allocation2 + $0x90] sm:$0x1] %vm158_vm2, %v3742_v0  ;;  %v30_v17 = vld [vmem:[%s5514_s0 + $0x80] sm:$0xff]  ;;  %v31_v18 = vld [vmem:[%s5514_s0 + $0x88] sm:$0xff] }
   0xa   :  { %166 = vst.msk [vmem:[#allocation2 + $0xa8] sm:$0x1] %vm158_vm2, %v3742_v0  ;;  %167 = vst.msk [vmem:[#allocation2 + $0xc0] sm:$0x1] %vm158_vm2, %v3742_v0  ;;  %v32_v19 = vld [vmem:[%s5514_s0 + $0x90] sm:$0xff]  ;;  %v33_v20 = vld [vmem:[%s5514_s0 + $0x98] sm:$0xff] }
   0xb   :  { %168 = vst.msk [vmem:[#allocation2 + $0xd8] sm:$0x1] %vm158_vm2, %v3742_v0  ;;  %169 = vst.msk [vmem:[#allocation2 + $0xf0] sm:$0x1] %vm158_vm2, %v3742_v0  ;;  %v34_v21 = vld [vmem:[%s5514_s0 + $0xa0] sm:$0xff]  ;;  %v328_v23 = vld [vmem:[#allocation2 + $0x9] sm:$0xff] }
   0xc   :  { %170 = vst.msk [vmem:[#allocation2 + $0x108] sm:$0x1] %vm158_vm2, %v3742_v0  ;;  %171 = vst.msk [vmem:[#allocation2 + $0x120] sm:$0x1] %vm158_vm2, %v3742_v0  ;;  %v327_v22 = vld [vmem:[#allocation2 + $0x1] sm:$0xff]  ;;  %v36_v45 = vld [vmem:[%s5514_s0 + $0xb0] sm:$0xff] }
   0xd   :  { %172 = vst.msk [vmem:[#allocation2 + $0x138] sm:$0x1] %vm158_vm2, %v3742_v0  ;;  %173 = vst.msk [vmem:[#allocation2 + $0x150] sm:$0x1] %vm158_vm2, %v3742_v0  ;;  %v35_v24 = vld [vmem:[%s5514_s0 + $0xa8] sm:$0xff]  ;;  %v391_v25 = vpack.c.bf16 %v328_v23, %v327_v22  ;;  %v37_v46 = vld [vmem:[%s5514_s0 + $0xb8] sm:$0xff] }
   0xe   :  { %174 = vst.msk [vmem:[#allocation2 + $0x168] sm:$0x1] %vm158_vm2, %v3742_v0  ;;  %175 = vst.msk [vmem:[#allocation2 + $0x180] sm:$0x1] %vm158_vm2, %v3742_v0  ;;  %v38_v47 = vld [vmem:[%s5514_s0 + $0xc0] sm:$0xff]  ;;  %v39_v48 = vld [vmem:[%s5514_s0 + $0xc8] sm:$0xff] }
   0xf   :  { %178 = vst.msk [vmem:[#allocation2 + $0x1c8] sm:$0x1] %vm158_vm2, %v3742_v0  ;;  %179 = vst.msk [vmem:[#allocation2 + $0x1e0] sm:$0x1] %vm158_vm2, %v3742_v0  ;;  %1128 = vrot.lane.b32.xlu0 %v391_v25, %s3743_s29  ;;  %v40_v49 = vld [vmem:[%s5514_s0 + $0xd0] sm:$0xff]  ;;  %v41_v52 = vld [vmem:[%s5514_s0 + $0xd8] sm:$0xff] }
  0x10   :  { %180 = vst.msk [vmem:[#allocation2 + $0x1f8] sm:$0x1] %vm158_vm2, %v3742_v0  ;;  %181 = vst.msk [vmem:[#allocation2 + $0x210] sm:$0x1] %vm158_vm2, %v3742_v0  ;;  %v42_v53 = vld [vmem:[%s5514_s0 + $0xe0] sm:$0xff]  ;;  %v43_v54 = vld [vmem:[%s5514_s0 + $0xe8] sm:$0xff] }
  0x11   :  { %182 = vst.msk [vmem:[#allocation2 + $0x228] sm:$0x1] %vm158_vm2, %v3742_v0  ;;  %183 = vst.msk [vmem:[#allocation2 + $0x240] sm:$0x1] %vm158_vm2, %v3742_v0  ;;  %v46_v58 = vld [vmem:[%s5514_s0 + $0x100] sm:$0xff]  ;;  %v47_v60 = vld [vmem:[%s5514_s0 + $0x108] sm:$0xff] }
  0x12   :  { %184 = vst.msk [vmem:[#allocation2 + $0x258] sm:$0x1] %vm158_vm2, %v3742_v0  ;;  %185 = vst.msk [vmem:[#allocation2 + $0x270] sm:$0x1] %vm158_vm2, %v3742_v0  ;;  %v48_v61 = vld [vmem:[%s5514_s0 + $0x110] sm:$0xff]  ;;  %v49_v62 = vld [vmem:[%s5514_s0 + $0x118] sm:$0xff] }
  0x13   :  { %186 = vst.msk [vmem:[#allocation2 + $0x288] sm:$0x1] %vm158_vm2, %v3742_v0  ;;  %187 = vst.msk [vmem:[#allocation2 + $0x2a0] sm:$0x1] %vm158_vm2, %v3742_v0  ;;  %v50_v63 = vld [vmem:[%s5514_s0 + $0x120] sm:$0xff]  ;;  %vm2090_vm6 = vcmask 130048  }
  0x14   :  { %188 = vst.msk [vmem:[#allocation2 + $0x2b8] sm:$0x1] %vm158_vm2, %v3742_v0  ;;  %189 = vst.msk [vmem:[#allocation2 + $0x2d0] sm:$0x1] %vm158_vm2, %v3742_v0  ;;  %vm2155_vm7 = vcmask 162816   ;;  %vm2220_vm8 = vcmask 195584  }
  0x15   :  { %190 = vst.msk [vmem:[#allocation2 + $0x2e8] sm:$0x1] %vm158_vm2, %v3742_v0  ;;  %191 = vst.msk [vmem:[#allocation2 + $0x300] sm:$0x1] %vm158_vm2, %v3742_v0  ;;  %vm2285_vm9 = vcmask 228352   ;;  %vm2350_vm10 = vcmask 261120  }
  0x16   :  { %192 = vst.msk [vmem:[#allocation2 + $0x318] sm:$0x1] %vm158_vm2, %v3742_v0  ;;  %193 = vst.msk [vmem:[#allocation2 + $0x330] sm:$0x1] %vm158_vm2, %v3742_v0  ;;  %vm2435_vm11 = vcmask 293888   ;;  %vm3381_vm12 = vcmask 27648  }
  0x17   :  { %196 = vst.msk [vmem:[#allocation2 + $0x29] sm:$0x1] %vm158_vm2, %v3742_v0  ;;  %197 = vst.msk [vmem:[#allocation2 + $0x41] sm:$0x1] %vm158_vm2, %v3742_v0 }
  0x18   :  { %198 = vst.msk [vmem:[#allocation2 + $0x59] sm:$0x1] %vm158_vm2, %v3742_v0  ;;  %199 = vst.msk [vmem:[#allocation2 + $0x71] sm:$0x1] %vm158_vm2, %v3742_v0 }
  0x19   :  { %200 = vst.msk [vmem:[#allocation2 + $0x89] sm:$0x1] %vm158_vm2, %v3742_v0  ;;  %201 = vst.msk [vmem:[#allocation2 + $0xa1] sm:$0x1] %vm158_vm2, %v3742_v0 }
  0x1a   :  { %202 = vst.msk [vmem:[#allocation2 + $0xb9] sm:$0x1] %vm158_vm2, %v3742_v0  ;;  %203 = vst.msk [vmem:[#allocation2 + $0xd1] sm:$0x1] %vm158_vm2, %v3742_v0 }
  0x1b   :  { %204 = vst.msk [vmem:[#allocation2 + $0xe9] sm:$0x1] %vm158_vm2, %v3742_v0  ;;  %205 = vst.msk [vmem:[#allocation2 + $0x101] sm:$0x1] %vm158_vm2, %v3742_v0 }
  0x1c   :  { %206 = vst.msk [vmem:[#allocation2 + $0x119] sm:$0x1] %vm158_vm2, %v3742_v0  ;;  %207 = vst.msk [vmem:[#allocation2 + $0x131] sm:$0x1] %vm158_vm2, %v3742_v0 }
  0x1d   :  { %208 = vst.msk [vmem:[#allocation2 + $0x149] sm:$0x1] %vm158_vm2, %v3742_v0  ;;  %209 = vst.msk [vmem:[#allocation2 + $0x161] sm:$0x1] %vm158_vm2, %v3742_v0 }
  0x1e   :  { %210 = vst.msk [vmem:[#allocation2 + $0x179] sm:$0x1] %vm158_vm2, %v3742_v0  ;;  %211 = vst.msk [vmem:[#allocation2 + $0x191] sm:$0x1] %vm158_vm2, %v3742_v0 }
  0x1f   :  { %214 = vst.msk [vmem:[#allocation2 + $0x1d9] sm:$0x1] %vm158_vm2, %v3742_v0  ;;  %215 = vst.msk [vmem:[#allocation2 + $0x1f1] sm:$0x1] %vm158_vm2, %v3742_v0 }
  0x20   :  { %216 = vst.msk [vmem:[#allocation2 + $0x209] sm:$0x1] %vm158_vm2, %v3742_v0  ;;  %217 = vst.msk [vmem:[#allocation2 + $0x221] sm:$0x1] %vm158_vm2, %v3742_v0 }
  0x21   :  { %218 = vst.msk [vmem:[#allocation2 + $0x239] sm:$0x1] %vm158_vm2, %v3742_v0  ;;  %219 = vst.msk [vmem:[#allocation2 + $0x251] sm:$0x1] %vm158_vm2, %v3742_v0 }
  0x22   :  { %220 = vst.msk [vmem:[#allocation2 + $0x269] sm:$0x1] %vm158_vm2, %v3742_v0  ;;  %221 = vst.msk [vmem:[#allocation2 + $0x281] sm:$0x1] %vm158_vm2, %v3742_v0 }
  0x23   :  { %222 = vst.msk [vmem:[#allocation2 + $0x299] sm:$0x1] %vm158_vm2, %v3742_v0  ;;  %223 = vst.msk [vmem:[#allocation2 + $0x2b1] sm:$0x1] %vm158_vm2, %v3742_v0 }
  0x24   :  { %224 = vst.msk [vmem:[#allocation2 + $0x2c9] sm:$0x1] %vm158_vm2, %v3742_v0  ;;  %225 = vst.msk [vmem:[#allocation2 + $0x2e1] sm:$0x1] %vm158_vm2, %v3742_v0 }
  0x25   :  { %226 = vst.msk [vmem:[#allocation2 + $0x2f9] sm:$0x1] %vm158_vm2, %v3742_v0  ;;  %227 = vst.msk [vmem:[#allocation2 + $0x311] sm:$0x1] %vm158_vm2, %v3742_v0 }
  0x26   :  { %228 = vst.msk [vmem:[#allocation2 + $0x329] sm:$0x1] %vm158_vm2, %v3742_v0  ;;  %229 = vst.msk [vmem:[#allocation2 + $0x341] sm:$0x1] %vm158_vm2, %v3742_v0 }
  0x27   :  { %195 = vst.msk [vmem:[#allocation2 + $0x11] sm:$0x1] %vm158_vm2, %v3742_v0  ;;  %159 = vst.msk [vmem:[#allocation2] sm:$0x1] %vm158_vm2, %v3742_v0 }
  0x28   :  { %82 = vst.msk [vmem:[#allocation2 + $0x31] sm:$0xff] %vm79_vm0, %v16_v1  ;;  %83 = vst.msk [vmem:[#allocation2 + $0x39] sm:$0xff] %vm79_vm0, %v17_v2  ;;  %v52_v1 = vld [vmem:[%s5514_s0 + $0x130] sm:$0xff]  ;;  %v53_v2 = vld [vmem:[%s5514_s0 + $0x138] sm:$0xff] }
  0x29   :  { %176 = vst.msk [vmem:[#allocation2 + $0x198] sm:$0x1] %vm158_vm2, %v3742_v0  ;;  %177 = vst.msk [vmem:[#allocation2 + $0x1b0] sm:$0x1] %vm158_vm2, %v3742_v0 }
  0x2a   :  { %194 = vst.msk [vmem:[#allocation2 + $0x348] sm:$0x1] %vm158_vm2, %v3742_v0  ;;  %212 = vst.msk [vmem:[#allocation2 + $0x1a9] sm:$0x1] %vm158_vm2, %v3742_v0 }
  0x2b   :  { %213 = vst.msk [vmem:[#allocation2 + $0x1c1] sm:$0x1] %vm158_vm2, %v3742_v0  ;;  %230 = vst.msk [vmem:[#allocation2 + $0x359] sm:$0x1] %vm158_vm2, %v3742_v0  ;;  %v51_v0 = vld [vmem:[%s5514_s0 + $0x128] sm:$0xff] }
  0x2c   :  { %80 = vst.msk [vmem:[#allocation2 + $0x19] sm:$0xff] %vm79_vm0, %v14_v3  ;;  %81 = vst.msk [vmem:[#allocation2 + $0x21] sm:$0xff] %vm79_vm0, %v15_v4  ;;  %v54_v3 = vld [vmem:[%s5514_s0 + $0x140] sm:$0xff]  ;;  %v55_v4 = vld [vmem:[%s5514_s0 + $0x148] sm:$0xff] }
  0x2d   :  { %84 = vst.msk [vmem:[#allocation2 + $0x49] sm:$0xff] %vm79_vm0, %v18_v5  ;;  %85 = vst.msk [vmem:[#allocation2 + $0x51] sm:$0xff] %vm79_vm0, %v19_v6  ;;  %v56_v6 = vld [vmem:[%s5514_s0 + $0x150] sm:$0xff] }
  0x2e   :  { %86 = vst.msk [vmem:[#allocation2 + $0x61] sm:$0xff] %vm79_vm0, %v20_v7  ;;  %87 = vst.msk [vmem:[#allocation2 + $0x69] sm:$0xff] %vm79_vm0, %v21_v8  ;;  %v57_v7 = vld [vmem:[%s5514_s0 + $0x158] sm:$0xff]  ;;  %v58_v8 = vld [vmem:[%s5514_s0 + $0x160] sm:$0xff] }
  0x2f   :  { %88 = vst.msk [vmem:[#allocation2 + $0x79] sm:$0xff] %vm79_vm0, %v22_v9  ;;  %89 = vst.msk [vmem:[#allocation2 + $0x81] sm:$0xff] %vm79_vm0, %v23_v10  ;;  %v331_v26 = vld [vmem:[#allocation2 + $0x31] sm:$0xff]  ;;  %v332_v27 = vld [vmem:[#allocation2 + $0x39] sm:$0xff] }
  0x30   :  { %90 = vst.msk [vmem:[#allocation2 + $0x91] sm:$0xff] %vm79_vm0, %v24_v11  ;;  %91 = vst.msk [vmem:[#allocation2 + $0x99] sm:$0xff] %vm79_vm0, %v25_v12  ;;  %v4023_v29 = vpack.c.bf16 %v332_v27, %v331_v26  ;;  %v59_v12 = vld [vmem:[%s5514_s0 + $0x168] sm:$0xff] }
  0x31   :  { %92 = vst.msk [vmem:[#allocation2 + $0xa9] sm:$0xff] %vm79_vm0, %v26_v13  ;;  %93 = vst.msk [vmem:[#allocation2 + $0xb1] sm:$0xff] %vm79_vm0, %v27_v14 }
  0x32   :  { %94 = vst.msk [vmem:[#allocation2 + $0xc1] sm:$0xff] %vm79_vm0, %v28_v15  ;;  %95 = vst.msk [vmem:[#allocation2 + $0xc9] sm:$0xff] %vm79_vm0, %v29_v16  ;;  %1132 = vrot.lane.b32.xlu1 %v4023_v29, %s3743_s29  ;;  %v60_v16 = vld [vmem:[%s5514_s0 + $0x170] sm:$0xff] }
  0x33   :  { %96 = vst.msk [vmem:[#allocation2 + $0xd9] sm:$0xff] %vm79_vm0, %v30_v17  ;;  %97 = vst.msk [vmem:[#allocation2 + $0xe1] sm:$0xff] %vm79_vm0, %v31_v18  ;;  %v329_v28 = vld [vmem:[#allocation2 + $0x19] sm:$0xff]  ;;  %v330_v30 = vld [vmem:[#allocation2 + $0x21] sm:$0xff] }
  0x34   :  { %98 = vst.msk [vmem:[#allocation2 + $0xf1] sm:$0xff] %vm79_vm0, %v32_v19  ;;  %99 = vst.msk [vmem:[#allocation2 + $0xf9] sm:$0xff] %vm79_vm0, %v33_v20  ;;  %v333_v31 = vld [vmem:[#allocation2 + $0x49] sm:$0xff]  ;;  %v334_v32 = vld [vmem:[#allocation2 + $0x51] sm:$0xff]  ;;  %v4026_v33 = vpack.c.bf16 %v330_v30, %v329_v28 }
  0x35   :  { %100 = vst.msk [vmem:[#allocation2 + $0x109] sm:$0xff] %vm79_vm0, %v34_v21  ;;  %101 = vst.msk [vmem:[#allocation2 + $0x111] sm:$0xff] %vm79_vm0, %v35_v24  ;;  %v4030_v34 = vpack.c.bf16 %v334_v32, %v333_v31  ;;  %v335_v35 = vld [vmem:[#allocation2 + $0x61] sm:$0xff]  ;;  %v336_v36 = vld [vmem:[#allocation2 + $0x69] sm:$0xff] }
  0x36   :  { %v337_v37 = vld [vmem:[#allocation2 + $0x79] sm:$0xff]  ;;  %v338_v38 = vld [vmem:[#allocation2 + $0x81] sm:$0xff]  ;;  %1130 = vrot.lane.b32.xlu0 %v4026_v33, %s3743_s29  ;;  %v4034_v39 = vpack.c.bf16 %v336_v36, %v335_v35  ;;  %102 = vst.msk [vmem:[#allocation2 + $0x121] sm:$0xff] %vm79_vm0, %v36_v45  ;;  %103 = vst.msk [vmem:[#allocation2 + $0x129] sm:$0xff] %vm79_vm0, %v37_v46 }
  0x37   :  { %v339_v40 = vld [vmem:[#allocation2 + $0x91] sm:$0xff]  ;;  %v340_v41 = vld [vmem:[#allocation2 + $0x99] sm:$0xff]  ;;  %1134 = vrot.lane.b32.xlu1 %v4030_v34, %s3743_s29  ;;  %v4038_v43 = vpack.c.bf16 %v338_v38, %v337_v37  ;;  %104 = vst.msk [vmem:[#allocation2 + $0x139] sm:$0xff] %vm79_vm0, %v38_v47  ;;  %105 = vst.msk [vmem:[#allocation2 + $0x141] sm:$0xff] %vm79_vm0, %v39_v48 }
  0x38   :  { %v341_v42 = vld [vmem:[#allocation2 + $0xa9] sm:$0xff]  ;;  %v342_v44 = vld [vmem:[#allocation2 + $0xb1] sm:$0xff]  ;;  %106 = vst.msk [vmem:[#allocation2 + $0x151] sm:$0xff] %vm79_vm0, %v40_v49  ;;  %v397_v55 = vpack.c.bf16 %v340_v41, %v339_v40  ;;  %107 = vst.msk [vmem:[#allocation2 + $0x159] sm:$0xff] %vm79_vm0, %v41_v52 }
  0x39   :  { %v343_v50 = vld [vmem:[#allocation2 + $0xc1] sm:$0xff]  ;;  %v344_v51 = vld [vmem:[#allocation2 + $0xc9] sm:$0xff]  ;;  %108 = vst.msk [vmem:[#allocation2 + $0x169] sm:$0xff] %vm79_vm0, %v42_v53  ;;  %109 = vst.msk [vmem:[#allocation2 + $0x171] sm:$0xff] %vm79_vm0, %v43_v54  ;;  %v398_v59 = vpack.c.bf16 %v342_v44, %v341_v42 }
  0x3a   :  { %1136 = vrot.lane.b32.xlu0 %v4034_v39, %s3743_s29  ;;  %v345_v56 = vld [vmem:[#allocation2 + $0xd9] sm:$0xff]  ;;  %v346_v57 = vld [vmem:[#allocation2 + $0xe1] sm:$0xff]  ;;  %112 = vst.msk [vmem:[#allocation2 + $0x1c9] sm:$0xff] %vm79_vm0, %v46_v58  ;;  %113 = vst.msk [vmem:[#allocation2 + $0x1d1] sm:$0xff] %vm79_vm0, %v47_v60  ;;  %v399_v5 = vpack.c.bf16 %v344_v51, %v343_v50 }
  0x3b   :  { %1138 = vrot.lane.b32.xlu1 %v4038_v43, %s3743_s29  ;;  %114 = vst.msk [vmem:[#allocation2 + $0x1e1] sm:$0xff] %vm79_vm0, %v48_v61  ;;  %115 = vst.msk [vmem:[#allocation2 + $0x1e9] sm:$0xff] %vm79_vm0, %v49_v62  ;;  %v400_v9 = vpack.c.bf16 %v346_v57, %v345_v56  ;;  %v347_v10 = vld [vmem:[#allocation2 + $0xf1] sm:$0xff]  ;;  %v348_v11 = vld [vmem:[#allocation2 + $0xf9] sm:$0xff] }
  0x3c   :  { %116 = vst.msk [vmem:[#allocation2 + $0x1f9] sm:$0xff] %vm79_vm0, %v50_v63  ;;  %117 = vst.msk [vmem:[#allocation2 + $0x201] sm:$0xff] %vm79_vm0, %v51_v0  ;;  %v349_v13 = vld [vmem:[#allocation2 + $0x109] sm:$0xff]  ;;  %v350_v14 = vld [vmem:[#allocation2 + $0x111] sm:$0xff]  ;;  %v401_v15 = vpack.c.bf16 %v348_v11, %v347_v10 }
  0x3d   :  { %118 = vst.msk [vmem:[#allocation2 + $0x211] sm:$0xff] %vm79_vm0, %v52_v1  ;;  %119 = vst.msk [vmem:[#allocation2 + $0x219] sm:$0xff] %vm79_vm0, %v53_v2  ;;  %v61_v17 = vld [vmem:[%s5514_s0 + $0x178] sm:$0xff]  ;;  %v402_v18 = vpack.c.bf16 %v350_v14, %v349_v13  ;;  %v351_v19 = vld [vmem:[#allocation2 + $0x121] sm:$0xff] }
  0x3e   :  { %1140 = vrot.lane.b32.xlu0 %v397_v55, %s3743_s29  ;;  %120 = vst.msk [vmem:[#allocation2 + $0x229] sm:$0xff] %vm79_vm0, %v54_v3  ;;  %121 = vst.msk [vmem:[#allocation2 + $0x231] sm:$0xff] %vm79_vm0, %v55_v4  ;;  %v352_v20 = vld [vmem:[#allocation2 + $0x129] sm:$0xff]  ;;  %v353_v21 = vld [vmem:[#allocation2 + $0x139] sm:$0xff] }
  0x3f   :  { %1142 = vrot.lane.b32.xlu1 %v398_v59, %s3743_s29  ;;  %122 = vst.msk [vmem:[#allocation2 + $0x241] sm:$0xff] %vm79_vm0, %v56_v6  ;;  %123 = vst.msk [vmem:[#allocation2 + $0x249] sm:$0xff] %vm79_vm0, %v57_v7  ;;  %v354_v22 = vld [vmem:[#allocation2 + $0x141] sm:$0xff]  ;;  %v403_v23 = vpack.c.bf16 %v352_v20, %v351_v19  ;;  %v355_v24 = vld [vmem:[#allocation2 + $0x151] sm:$0xff] }
  0x40   :  { %124 = vst.msk [vmem:[#allocation2 + $0x259] sm:$0xff] %vm79_vm0, %v58_v8  ;;  %125 = vst.msk [vmem:[#allocation2 + $0x261] sm:$0xff] %vm79_vm0, %v59_v12  ;;  %v356_v25 = vld [vmem:[#allocation2 + $0x159] sm:$0xff]  ;;  %v357_v26 = vld [vmem:[#allocation2 + $0x169] sm:$0xff]  ;;  %v404_v27 = vpack.c.bf16 %v354_v22, %v353_v21 }
  0x41   :  { %126 = vst.msk [vmem:[#allocation2 + $0x271] sm:$0xff] %vm79_vm0, %v60_v16  ;;  %127 = vst.msk [vmem:[#allocation2 + $0x279] sm:$0xff] %vm79_vm0, %v61_v17  ;;  %v358_v28 = vld [vmem:[#allocation2 + $0x171] sm:$0xff]  ;;  %v62_v30 = vld [vmem:[%s5514_s0 + $0x180] sm:$0xff]  ;;  %v405_v42 = vpack.c.bf16 %v356_v25, %v355_v24 }
  0x42   :  { %1144 = vrot.lane.b32.xlu0 %v399_v5, %s3743_s29  ;;  %v63_v31 = vld [vmem:[%s5514_s0 + $0x188] sm:$0xff]  ;;  %128 = vst.msk [vmem:[#allocation2 + $0x289] sm:$0xff] %vm79_vm0, %v62_v30  ;;  %v64_v32 = vld [vmem:[%s5514_s0 + $0x190] sm:$0xff]  ;;  %v65_v35 = vld [vmem:[%s5514_s0 + $0x198] sm:$0xff]  ;;  %v406_v47 = vpack.c.bf16 %v358_v28, %v357_v26 }
  0x43   :  { %1146 = vrot.lane.b32.xlu1 %v400_v9, %s3743_s29  ;;  %129 = vst.msk [vmem:[#allocation2 + $0x291] sm:$0xff] %vm79_vm0, %v63_v31  ;;  %v66_v36 = vld [vmem:[%s5514_s0 + $0x1a0] sm:$0xff]  ;;  %v359_v37 = vld [vmem:[#allocation2 + $0x1b1] sm:$0xff]  ;;  %130 = vst.msk [vmem:[#allocation2 + $0x2a1] sm:$0xff] %vm79_vm0, %v64_v32 }
  0x44   :  { %131 = vst.msk [vmem:[#allocation2 + $0x2a9] sm:$0xff] %vm79_vm0, %v65_v35  ;;  %v67_v38 = vld [vmem:[%s5514_s0 + $0x1a8] sm:$0xff]  ;;  %132 = vst.msk [vmem:[#allocation2 + $0x2b9] sm:$0xff] %vm79_vm0, %v66_v36  ;;  %v68_v40 = vld [vmem:[%s5514_s0 + $0x1b0] sm:$0xff] }
  0x45   :  { %v69_v41 = vld [vmem:[%s5514_s0 + $0x1b8] sm:$0xff]  ;;  %v361_v45 = vld [vmem:[#allocation2 + $0x1c9] sm:$0xff]  ;;  %133 = vst.msk [vmem:[#allocation2 + $0x2c1] sm:$0xff] %vm79_vm0, %v67_v38  ;;  %134 = vst.msk [vmem:[#allocation2 + $0x2d1] sm:$0xff] %vm79_vm0, %v68_v40 }
  0x46   :  { %1148 = vrot.lane.b32.xlu0 %v401_v15, %s3743_s29  ;;  %v360_v44 = vld [vmem:[#allocation2 + $0x1b9] sm:$0xff]  ;;  %135 = vst.msk [vmem:[#allocation2 + $0x2d9] sm:$0xff] %vm79_vm0, %v69_v41  ;;  %v71_v48 = vld [vmem:[%s5514_s0 + $0x1c8] sm:$0xff]  ;;  %v72_v49 = vld [vmem:[%s5514_s0 + $0x1d0] sm:$0xff] }
  0x47   :  { %1150 = vrot.lane.b32.xlu1 %v402_v18, %s3743_s29  ;;  %v70_v46 = vld [vmem:[%s5514_s0 + $0x1c0] sm:$0xff]  ;;  %v73_v50 = vld [vmem:[%s5514_s0 + $0x1d8] sm:$0xff]  ;;  %137 = vst.msk [vmem:[#allocation2 + $0x2f1] sm:$0xff] %vm79_vm0, %v71_v48  ;;  %138 = vst.msk [vmem:[#allocation2 + $0x301] sm:$0xff] %vm79_vm0, %v72_v49  ;;  %v407_v54 = vpack.c.bf16 %v360_v44, %v359_v37 }
  0x48   :  { %136 = vst.msk [vmem:[#allocation2 + $0x2e9] sm:$0xff] %vm79_vm0, %v70_v46  ;;  %v362_v51 = vld [vmem:[#allocation2 + $0x1d1] sm:$0xff]  ;;  %139 = vst.msk [vmem:[#allocation2 + $0x309] sm:$0xff] %vm79_vm0, %v73_v50  ;;  %v74_v52 = vld [vmem:[%s5514_s0 + $0x1e0] sm:$0xff] }
  0x49   :  { %v75_v53 = vld [vmem:[%s5514_s0 + $0x1e8] sm:$0xff]  ;;  %140 = vst.msk [vmem:[#allocation2 + $0x319] sm:$0xff] %vm79_vm0, %v74_v52  ;;  %v408_v55 = vpack.c.bf16 %v362_v51, %v361_v45  ;;  %v365_v58 = vld [vmem:[#allocation2 + $0x1f9] sm:$0xff]  ;;  %v367_v62 = vld [vmem:[#allocation2 + $0x211] sm:$0xff] }
  0x4a   :  { %1152 = vrot.lane.b32.xlu0 %v403_v23, %s3743_s29  ;;  %141 = vst.msk [vmem:[#allocation2 + $0x321] sm:$0xff] %vm79_vm0, %v75_v53  ;;  %v363_v56 = vld [vmem:[#allocation2 + $0x1e1] sm:$0xff]  ;;  %v364_v57 = vld [vmem:[#allocation2 + $0x1e9] sm:$0xff]  ;;  %v368_v63 = vld [vmem:[#allocation2 + $0x219] sm:$0xff] }
  0x4b   :  { %1154 = vrot.lane.b32.xlu1 %v404_v27, %s3743_s29  ;;  %v366_v59 = vld [vmem:[#allocation2 + $0x201] sm:$0xff]  ;;  %v409_v60 = vpack.c.bf16 %v364_v57, %v363_v56  ;;  %v369_v0 = vld [vmem:[#allocation2 + $0x229] sm:$0xff]  ;;  %v370_v1 = vld [vmem:[#allocation2 + $0x231] sm:$0xff]  ;;  %v411_v2 = vpack.c.bf16 %v368_v63, %v367_v62 }
  0x4c   :  { %v410_v61 = vpack.c.bf16 %v366_v59, %v365_v58  ;;  %v412_v3 = vpack.c.bf16 %v370_v1, %v369_v0  ;;  %v371_v4 = vld [vmem:[#allocation2 + $0x241] sm:$0xff]  ;;  %v372_v5 = vld [vmem:[#allocation2 + $0x249] sm:$0xff]  ;;  %v373_v6 = vld [vmem:[#allocation2 + $0x259] sm:$0xff] }
  0x4d   :  { %v374_v7 = vld [vmem:[#allocation2 + $0x261] sm:$0xff]  ;;  %v413_v8 = vpack.c.bf16 %v372_v5, %v371_v4  ;;  %v375_v10 = vld [vmem:[#allocation2 + $0x271] sm:$0xff]  ;;  %v376_v11 = vld [vmem:[#allocation2 + $0x279] sm:$0xff] }
  0x4e   :  { %1156 = vrot.lane.b32.xlu0 %v405_v42, %s3743_s29  ;;  %v414_v9 = vpack.c.bf16 %v374_v7, %v373_v6  ;;  %v377_v12 = vld [vmem:[#allocation2 + $0x289] sm:$0xff]  ;;  %v378_v13 = vld [vmem:[#allocation2 + $0x291] sm:$0xff]  ;;  %v415_v14 = vpack.c.bf16 %v376_v11, %v375_v10  ;;  %v379_v16 = vld [vmem:[#allocation2 + $0x2a1] sm:$0xff] }
  0x4f   :  { %1158 = vrot.lane.b32.xlu1 %v406_v47, %s3743_s29  ;;  %v416_v15 = vpack.c.bf16 %v378_v13, %v377_v12  ;;  %v380_v17 = vld [vmem:[#allocation2 + $0x2a9] sm:$0xff]  ;;  %v381_v18 = vld [vmem:[#allocation2 + $0x2b9] sm:$0xff]  ;;  %v382_v19 = vld [vmem:[#allocation2 + $0x2c1] sm:$0xff] }
  0x50   :  { %v417_v20 = vpack.c.bf16 %v380_v17, %v379_v16  ;;  %v418_v21 = vpack.c.bf16 %v382_v19, %v381_v18  ;;  %v383_v22 = vld [vmem:[#allocation2 + $0x2d1] sm:$0xff]  ;;  %v384_v23 = vld [vmem:[#allocation2 + $0x2d9] sm:$0xff]  ;;  %v385_v24 = vld [vmem:[#allocation2 + $0x2e9] sm:$0xff] }
  0x51   :  { %v386_v25 = vld [vmem:[#allocation2 + $0x2f1] sm:$0xff]  ;;  %v419_v26 = vpack.c.bf16 %v384_v23, %v383_v22  ;;  %v387_v28 = vld [vmem:[#allocation2 + $0x301] sm:$0xff]  ;;  %v388_v30 = vld [vmem:[#allocation2 + $0x309] sm:$0xff] }
  0x52   :  { %1160 = vrot.lane.b32.xlu0 %v407_v54, %s3743_s29  ;;  %v420_v27 = vpack.c.bf16 %v386_v25, %v385_v24  ;;  %v389_v31 = vld [vmem:[#allocation2 + $0x319] sm:$0xff]  ;;  %v390_v32 = vld [vmem:[#allocation2 + $0x321] sm:$0xff]  ;;  %v421_v35 = vpack.c.bf16 %v388_v30, %v387_v28  ;;  %v424_v38 = vld [vmem:[#allocation2 + $0xa] sm:$0xff] }
  0x53   :  { %1162 = vrot.lane.b32.xlu1 %v408_v55, %s3743_s29  ;;  %v422_v36 = vpack.c.bf16 %v390_v32, %v389_v31  ;;  %v423_v37 = vld [vmem:[#allocation2 + $0x2] sm:$0xff]  ;;  %v425_v40 = vld [vmem:[#allocation2 + $0x1a] sm:$0xff]  ;;  %v427_v45 = vld [vmem:[#allocation2 + $0x32] sm:$0xff] }
  0x54   :  { %v426_v41 = vld [vmem:[#allocation2 + $0x22] sm:$0xff]  ;;  %v487_v42 = vpack.c.bf16 %v424_v38, %v423_v37  ;;  %v428_v46 = vld [vmem:[#allocation2 + $0x3a] sm:$0xff]  ;;  %v429_v47 = vld [vmem:[#allocation2 + $0x4a] sm:$0xff] }
  0x55   :  { %v4222_v44 = vpack.c.bf16 %v426_v41, %v425_v40  ;;  %v430_v48 = vld [vmem:[#allocation2 + $0x52] sm:$0xff]  ;;  %v4225_v49 = vpack.c.bf16 %v428_v46, %v427_v45  ;;  %v431_v51 = vld [vmem:[#allocation2 + $0x62] sm:$0xff]  ;;  %v432_v52 = vld [vmem:[#allocation2 + $0x6a] sm:$0xff] }
  0x56   :  { %1164 = vrot.lane.b32.xlu0 %v409_v60, %s3743_s29  ;;  %v4229_v50 = vpack.c.bf16 %v430_v48, %v429_v47  ;;  %v433_v53 = vld [vmem:[#allocation2 + $0x7a] sm:$0xff]  ;;  %v434_v54 = vld [vmem:[#allocation2 + $0x82] sm:$0xff]  ;;  %v4233_v55 = vpack.c.bf16 %v432_v52, %v431_v51  ;;  %v435_v57 = vld [vmem:[#allocation2 + $0x92] sm:$0xff] }
  0x57   :  { %1166 = vrot.lane.b32.xlu1 %v410_v61, %s3743_s29  ;;  %v4237_v56 = vpack.c.bf16 %v434_v54, %v433_v53  ;;  %v436_v58 = vld [vmem:[#allocation2 + $0x9a] sm:$0xff]  ;;  %v437_v59 = vld [vmem:[#allocation2 + $0xaa] sm:$0xff]  ;;  %v438_v60 = vld [vmem:[#allocation2 + $0xb2] sm:$0xff] }
  0x58   :  { %v4241_v61 = vpack.c.bf16 %v436_v58, %v435_v57  ;;  %v4245_v62 = vpack.c.bf16 %v438_v60, %v437_v59  ;;  %v439_v63 = vld [vmem:[#allocation2 + $0xc2] sm:$0xff]  ;;  %v440_v0 = vld [vmem:[#allocation2 + $0xca] sm:$0xff]  ;;  %v441_v1 = vld [vmem:[#allocation2 + $0xda] sm:$0xff] }
  0x59   :  { %v443_v5 = vld [vmem:[#allocation2 + $0xf2] sm:$0xff]  ;;  %v444_v6 = vld [vmem:[#allocation2 + $0xfa] sm:$0xff]  ;;  %v445_v7 = vld [vmem:[#allocation2 + $0x10a] sm:$0xff] }
  0x5a   :  { %1168 = vrot.lane.b32.xlu0 %v411_v2, %s3743_s29  ;;  %v442_v2 = vld [vmem:[#allocation2 + $0xe2] sm:$0xff]  ;;  %v448_v12 = vld [vmem:[#allocation2 + $0x12a] sm:$0xff]  ;;  %v449_v13 = vld [vmem:[#allocation2 + $0x13a] sm:$0xff] }
  0x5b   :  { %1170 = vrot.lane.b32.xlu1 %v412_v3, %s3743_s29  ;;  %v4249_v3 = vpack.c.bf16 %v440_v0, %v439_v63  ;;  %v4253_v4 = vpack.c.bf16 %v442_v2, %v441_v1  ;;  %v447_v11 = vld [vmem:[#allocation2 + $0x122] sm:$0xff]  ;;  %v451_v17 = vld [vmem:[#allocation2 + $0x152] sm:$0xff]  ;;  %v452_v18 = vld [vmem:[#allocation2 + $0x15a] sm:$0xff] }
  0x5c   :  { %v453_v19 = vld [vmem:[#allocation2 + $0x16a] sm:$0xff]  ;;  %v455_v23 = vld [vmem:[#allocation2 + $0x1b2] sm:$0xff]  ;;  %v456_v24 = vld [vmem:[#allocation2 + $0x1ba] sm:$0xff] }
  0x5d   :  { %v457_v25 = vld [vmem:[#allocation2 + $0x1ca] sm:$0xff]  ;;  %v459_v30 = vld [vmem:[#allocation2 + $0x1e2] sm:$0xff]  ;;  %v461_v32 = vld [vmem:[#allocation2 + $0x1fa] sm:$0xff] }
  0x5e   :  { %1172 = vrot.lane.b32.xlu0 %v413_v8, %s3743_s29  ;;  %v446_v8 = vld [vmem:[#allocation2 + $0x112] sm:$0xff]  ;;  %v460_v31 = vld [vmem:[#allocation2 + $0x1ea] sm:$0xff]  ;;  %v464_v40 = vld [vmem:[#allocation2 + $0x21a] sm:$0xff] }
  0x5f   :  { %1174 = vrot.lane.b32.xlu1 %v414_v9, %s3743_s29  ;;  %v4257_v9 = vpack.c.bf16 %v444_v6, %v443_v5  ;;  %v4261_v10 = vpack.c.bf16 %v446_v8, %v445_v7  ;;  %v463_v38 = vld [vmem:[#allocation2 + $0x212] sm:$0xff]  ;;  %v465_v41 = vld [vmem:[#allocation2 + $0x22a] sm:$0xff]  ;;  %v520_v48 = vld [vmem:[#allocation2 + $0x20] sm:$0xff] }
  0x60   :  { %v507_v45 = vpack.c.bf16 %v464_v40, %v463_v38  ;;  %v519_v47 = vld [vmem:[#allocation2 + $0x18] sm:$0xff]  ;;  %v521_v51 = vld [vmem:[#allocation2 + $0x30] sm:$0xff]  ;;  %v3740_v59 = vld [vmem:[%s5515_s1 + $0x8] sm:$0xff]  }
  0x61   :  { %v522_v52 = vld [vmem:[#allocation2 + $0x38] sm:$0xff]  ;;  %v3739_v53 = vld [vmem:[%s5515_s1 + $0x10] ss:$0 sps:$4 sm:$0x33]   ;;  %v4279_v54 = vpack.c.bf16 %v520_v48, %v519_v47  ;;  %v3741_v60 = vld [vmem:[%s5515_s1] sm:$0xff]   ;;  %s3748_s1 = smov 24  }
  0x62   :  { %1176 = vrot.lane.b32.xlu0 %v415_v14, %s3743_s29  ;;  %v450_v14 = vld [vmem:[#allocation2 + $0x142] sm:$0xff]  ;;  %v4282_v57 = vpack.c.bf16 %v522_v52, %v521_v51  ;;  %3728 = vmatprep.subr.msk.bf16.mxu0 %vm2500_vm3, %v3739_v53  ;;  %v2502_v58 = vsel %vm2500_vm3, %v3739_v53, 0  ;;  %v238_v1 = vld [vmem:[#allocation2 + $0x50] sm:$0xff] }
  0x63   :  { %1178 = vrot.lane.b32.xlu1 %v416_v15, %s3743_s29  ;;  %v499_v15 = vpack.c.bf16 %v448_v12, %v447_v11  ;;  %v500_v16 = vpack.c.bf16 %v450_v14, %v449_v13  ;;  %3653 = vmatpush3.bf16.msra.mxu0 %v2502_v58  ;;  %v237_v0 = vld [vmem:[#allocation2 + $0x48] sm:$0xff]  ;;  %v239_v12 = vld [vmem:[#allocation2 + $0x60] sm:$0xff]  ;;  %v246_v47 = vld [vmem:[#allocation2 + $0xb0] sm:$0xff] }
  0x64   :  { %3729 = vmatprep.subr.msk.bf16.mxu1 %vm2500_vm3, %v3739_v53  ;;  %3654 = vmatprep.subr.bf16.mxu0 %v3740_v59  ;;  %v240_v13 = vld [vmem:[#allocation2 + $0x68] sm:$0xff]  ;;  %v915_v52 = vld [vmem:[#allocation2 + $0xb1] sm:$0xff] }
  0x65   :  { %3725 = vmatpush3.bf16.msra.mxu1 %v2502_v58  ;;  %v914_v51 = vld [vmem:[#allocation2 + $0xa9] sm:$0xff] }
  0x66   :  { %1180 = vrot.lane.b32.xlu0 %v417_v20, %s3743_s29  ;;  %v454_v20 = vld [vmem:[#allocation2 + $0x172] sm:$0xff]  ;;  %3723 = vmatprep.subr.bf16.mxu1 %v3740_v59 }
  0x67   :  { %1182 = vrot.lane.b32.xlu1 %v418_v21, %s3743_s29  ;;  %v501_v21 = vpack.c.bf16 %v452_v18, %v451_v17  ;;  %v502_v22 = vpack.c.bf16 %v454_v20, %v453_v19  ;;  %3655 = vmatpush3.bf16.msra.mxu0 %v3740_v59  ;;  %v44_v18 = vld [vmem:[%s5514_s0 + $0xf0] sm:$0xff]  ;;  %v45_v20 = vld [vmem:[%s5514_s0 + $0xf8] sm:$0xff] }
  0x68   :  { %3656 = vmatprep.subr.bf16.mxu0 %v3741_v60  ;;  %110 = vst.msk [vmem:[#allocation2 + $0x181] sm:$0xff] %vm79_vm0, %v44_v18  ;;  %111 = vst.msk [vmem:[#allocation2 + $0x189] sm:$0xff] %vm79_vm0, %v45_v20  ;;  %v629_v20 = vld [vmem:[#allocation2 + $0xc1] sm:$0xff] }
  0x69   :  { %3726 = vmatpush3.bf16.msra.mxu1 %v3740_v59  ;;  %v973_v59 = vpack.c.bf16 %v915_v52, %v914_v51 }
  0x6a   :  { %1184 = vrot.lane.b32.xlu0 %v419_v26, %s3743_s29  ;;  %v458_v26 = vld [vmem:[#allocation2 + $0x1d2] sm:$0xff]  ;;  %3724 = vmatprep.subr.bf16.mxu1 %v3741_v60 }
  0x6b   :  { %1186 = vrot.lane.b32.xlu1 %v420_v27, %s3743_s29  ;;  %v503_v27 = vpack.c.bf16 %v456_v24, %v455_v23  ;;  %v504_v28 = vpack.c.bf16 %v458_v26, %v457_v25  ;;  %3657 = vmatpush3.bf16.msra.mxu0 %v3741_v60 }
  0x6d   :  { %3727 = vmatpush3.bf16.msra.mxu1 %v3741_v60 }
  0x6e   :  { %1188 = vrot.lane.b32.xlu0 %v421_v35, %s3743_s29  ;;  %v462_v35 = vld [vmem:[#allocation2 + $0x202] sm:$0xff] }
  0x6f   :  { %1190 = vrot.lane.b32.xlu1 %v422_v36, %s3743_s29  ;;  %v505_v36 = vpack.c.bf16 %v460_v31, %v459_v30  ;;  %v506_v37 = vpack.c.bf16 %v462_v35, %v461_v32  ;;  %v244_v30 = vld [vmem:[#allocation2 + $0x98] sm:$0xff]  ;;  %v624_v32 = vld [vmem:[#allocation2 + $0x81] sm:$0xff] }
  0x70   :  { %v623_v31 = vld [vmem:[#allocation2 + $0x79] sm:$0xff] }
  0x71   :  { %v683_v38 = vpack.c.bf16 %v624_v32, %v623_v31 }
  0x72   :  { %1224 = vrot.lane.b32.xlu0 %v487_v42, %s3744_s27  ;;  %v466_v42 = vld [vmem:[#allocation2 + $0x232] sm:$0xff] }
  0x73   :  { %1226 = vrot.lane.b32.xlu1 %v4222_v44, %s3744_s27  ;;  %v508_v46 = vpack.c.bf16 %v466_v42, %v465_v41 }
  0x76   :  { %1228 = vrot.lane.b32.xlu0 %v4225_v49, %s3744_s27 }
  0x77   :  { %1230 = vrot.lane.b32.xlu1 %v4229_v50, %s3744_s27 }
  0x7a   :  { %1232 = vrot.lane.b32.xlu0 %v4233_v55, %s3744_s27 }
  0x7b   :  { %1234 = vrot.lane.b32.xlu1 %v4237_v56, %s3744_s27 }
  0x7e   :  { %1236 = vrot.lane.b32.xlu0 %v4241_v61, %s3744_s27 }
  0x7f   :  { %1238 = vrot.lane.b32.xlu1 %v4245_v62, %s3744_s27 }
  0x81   :  { %v4298_v63 = vpop.permute.xlu0 %1128 }
  0x82   :  { %1240 = vrot.lane.b32.xlu0 %v4249_v3, %s3744_s27 }
  0x83   :  { %1242 = vrot.lane.b32.xlu1 %v4253_v4, %s3744_s27 }
  0x86   :  { %1244 = vrot.lane.b32.xlu0 %v4257_v9, %s3744_s27 }
  0x87   :  { %1246 = vrot.lane.b32.xlu1 %v4261_v10, %s3744_s27 }
  0x8a   :  { %1248 = vrot.lane.b32.xlu0 %v499_v15, %s3744_s27  ;;  %v4334_v15 = vpack.c.bf16 %v240_v13, %v239_v12  ;;  %v247_v12 = vld [vmem:[#allocation2 + $0xc0] sm:$0xff]  ;;  %v248_v13 = vld [vmem:[#allocation2 + $0xc8] sm:$0xff] }
  0x8b   :  { %1250 = vrot.lane.b32.xlu1 %v500_v16, %s3744_s27 }
  0x8e   :  { %1252 = vrot.lane.b32.xlu0 %v501_v21, %s3744_s27  ;;  %v241_v21 = vld [vmem:[#allocation2 + $0x78] sm:$0xff] }
  0x8f   :  { %1254 = vrot.lane.b32.xlu1 %v502_v22, %s3744_s27  ;;  %v242_v22 = vld [vmem:[#allocation2 + $0x80] sm:$0xff] }
  0x90   :  { %v4368_v23 = vpack.c.bf16 %v242_v22, %v241_v21  ;;  %v630_v21 = vld [vmem:[#allocation2 + $0xc9] sm:$0xff]  ;;  %v4442_v22 = vpack.c.bf16 %v248_v13, %v247_v12 }
  0x92   :  { %1256 = vrot.lane.b32.xlu0 %v503_v27, %s3744_s27 }
  0x93   :  { %1258 = vrot.lane.b32.xlu1 %v504_v28, %s3744_s27  ;;  %v243_v28 = vld [vmem:[#allocation2 + $0x90] sm:$0xff] }
  0x96   :  { %1260 = vrot.lane.b32.xlu0 %v505_v36, %s3744_s27  ;;  %v626_v36 = vld [vmem:[#allocation2 + $0x99] sm:$0xff] }
  0x97   :  { %1262 = vrot.lane.b32.xlu1 %v506_v37, %s3744_s27  ;;  %v4394_v37 = vpack.c.bf16 %v244_v30, %v243_v28  ;;  %v686_v30 = vpack.c.bf16 %v630_v21, %v629_v20  ;;  %v251_v21 = vld [vmem:[#allocation2 + $0xf0] sm:$0xff] }
  0x9a   :  { %1264 = vrot.lane.b32.xlu0 %v507_v45, %s3744_s27 }
  0x9b   :  { %1266 = vrot.lane.b32.xlu1 %v508_v46, %s3744_s27  ;;  %v245_v46 = vld [vmem:[#allocation2 + $0xa8] sm:$0xff] }
  0x9c   :  { %v4418_v53 = vpack.c.bf16 %v246_v47, %v245_v46  ;;  %v918_v46 = vld [vmem:[#allocation2 + $0xd9] sm:$0xff]  ;;  %v919_v47 = vld [vmem:[#allocation2 + $0xe1] sm:$0xff] }
  0x9e   :  { %1320 = vrot.lane.b32.xlu0 %v4279_v54, %s3745_s5 }
  0x9f   :  { %1322 = vrot.lane.b32.xlu1 %v4282_v57, %s3745_s5 }
  0xa2   :  { %1416 = vrot.lane.b32.xlu0 %v4026_v33, %s3746_s8  ;;  %v4306_v33 = vpack.c.bf16 %v238_v1, %v237_v0 }
  0xa3   :  { %1418 = vrot.lane.b32.xlu1 %v4023_v29, %s3746_s8 }
  0xa4   :  { %v4300_v2 = vpop.permute.xlu1 %1132 }
  0xa6   :  { %1512 = vrot.lane.b32.xlu0 %v4222_v44, %s3747_s9 }
  0xa7   :  { %1514 = vrot.lane.b32.xlu1 %v4225_v49, %s3747_s9 }
  0xa8   :  { %v4308_v5 = vpop.permute.xlu0 %1130 }
  0xa9   :  { %v4310_v6 = vpop.permute.xlu1 %1134 }
  0xaa   :  { %1608 = vrot.lane.b32.xlu0 %v4282_v57, %s3748_s1 }
  0xab   :  { %1610 = vrot.lane.b32.xlu1 %v4306_v33, %s3748_s1 }
  0xac   :  { %v4316_v7 = vpop.permute.xlu0 %1136 }
  0xad   :  { %v4318_v8 = vpop.permute.xlu1 %1138 }
  0xae   :  { %1704 = vrot.lane.b32.xlu0 %v4023_v29, %s3749_s10 }
  0xaf   :  { %1706 = vrot.lane.b32.xlu1 %v4030_v34, %s3749_s10 }
  0xb0   :  { %v4324_v44 = vpop.permute.xlu0 %1140 }
  0xb1   :  { %v4326_v11 = vpop.permute.xlu1 %1142 }
  0xb2   :  { %1800 = vrot.lane.b32.xlu0 %v4225_v49, %s3750_s11 }
  0xb3   :  { %1802 = vrot.lane.b32.xlu1 %v4229_v50, %s3750_s11 }
  0xb4   :  { %v4332_v14 = vpop.permute.xlu0 %1144 }
  0xb5   :  { %v4336_v29 = vpop.permute.xlu1 %1146 }
  0xb6   :  { %1324 = vrot.lane.b32.xlu0 %v4306_v33, %s3745_s5 }
  0xb7   :  { %1326 = vrot.lane.b32.xlu1 %v4334_v15, %s3745_s5 }
  0xb8   :  { %v4342_v16 = vpop.permute.xlu0 %1148 }
  0xb9   :  { %v4344_v17 = vpop.permute.xlu1 %1150 }
  0xba   :  { %1420 = vrot.lane.b32.xlu0 %v4030_v34, %s3746_s8 }
  0xbb   :  { %1422 = vrot.lane.b32.xlu1 %v4034_v39, %s3746_s8 }
  0xbc   :  { %v4350_v49 = vpop.permute.xlu0 %1152 }
  0xbd   :  { %v4355_v19 = vpop.permute.xlu1 %1154 }
  0xbe   :  { %1516 = vrot.lane.b32.xlu0 %v4229_v50, %s3747_s9 }
  0xbf   :  { %1518 = vrot.lane.b32.xlu1 %v4233_v55, %s3747_s9 }
  0xc0   :  { %v4366_v34 = vpop.permute.xlu0 %1156 }
  0xc1   :  { %v4370_v24 = vpop.permute.xlu1 %1158 }
  0xc2   :  { %1612 = vrot.lane.b32.xlu0 %v4334_v15, %s3748_s1 }
  0xc3   :  { %1614 = vrot.lane.b32.xlu1 %v4368_v23, %s3748_s1 }
  0xc4   :  { %v4376_v25 = vpop.permute.xlu0 %1160 }
  0xc5   :  { %5518 = vst [vmem:[#allocation3_spill] sm:$0xff] %v4376_v25  ;;  %v4378_v50 = vpop.permute.xlu1 %1162 }
  0xc6   :  { %5519 = vst [vmem:[#allocation4_spill] sm:$0xff] %v4378_v50  ;;  %1708 = vrot.lane.b32.xlu0 %v4034_v39, %s3749_s10  ;;  %v625_v39 = vld [vmem:[#allocation2 + $0x91] sm:$0xff] }
  0xc7   :  { %1710 = vrot.lane.b32.xlu1 %v4038_v43, %s3749_s10 }
  0xc8   :  { %v4384_v26 = vpop.permute.xlu0 %1164 }
  0xc9   :  { %5520 = vst [vmem:[#allocation5_spill] sm:$0xff] %v4384_v26  ;;  %v4386_v27 = vpop.permute.xlu1 %1166 }
  0xca   :  { %5521 = vst [vmem:[#allocation6_spill] sm:$0xff] %v4386_v27  ;;  %1804 = vrot.lane.b32.xlu0 %v4233_v55, %s3750_s11  ;;  %v684_v55 = vpack.c.bf16 %v626_v36, %v625_v39  ;;  %v249_v36 = vld [vmem:[#allocation2 + $0xd8] sm:$0xff]  ;;  %v731_v27 = vld [vmem:[#allocation2 + $0x10a] sm:$0xff] }
  0xcb   :  { %1806 = vrot.lane.b32.xlu1 %v4237_v56, %s3750_s11 }
  0xcc   :  { %v4392_v35 = vpop.permute.xlu0 %1168 }
  0xcd   :  { %5522 = vst [vmem:[#allocation7_spill] sm:$0xff] %v4392_v35  ;;  %v4396_v43 = vpop.permute.xlu1 %1170 }
  0xce   :  { %5523 = vst [vmem:[#allocation8_spill] sm:$0xff] %v4396_v43  ;;  %1328 = vrot.lane.b32.xlu0 %v4368_v23, %s3745_s5  ;;  %v256_v43 = vld [vmem:[#allocation2 + $0x128] sm:$0xff] }
  0xcf   :  { %1330 = vrot.lane.b32.xlu1 %v4394_v37, %s3745_s5 }
  0xd0   :  { %v4402_v40 = vpop.permute.xlu0 %1172 }
  0xd1   :  { %5524 = vst [vmem:[#allocation9_spill] sm:$0xff] %v4402_v40  ;;  %v4404_v41 = vpop.permute.xlu1 %1174 }
  0xd2   :  { %5525 = vst [vmem:[#allocation10_spill] sm:$0xff] %v4404_v41  ;;  %1424 = vrot.lane.b32.xlu0 %v683_v38, %s3746_s8  ;;  %v250_v38 = vld [vmem:[#allocation2 + $0xe0] sm:$0xff] }
  0xd3   :  { %1426 = vrot.lane.b32.xlu1 %v684_v55, %s3746_s8  ;;  %v4466_v51 = vpack.c.bf16 %v250_v38, %v249_v36  ;;  %v252_v36 = vld [vmem:[#allocation2 + $0xf8] sm:$0xff] }
  0xd4   :  { %v4408_v42 = vpop.permute.xlu0 %1176 }
  0xd5   :  { %5526 = vst [vmem:[#allocation11_spill] sm:$0xff] %v4408_v42  ;;  %v4410_v45 = vpop.permute.xlu1 %1178 }
  0xd6   :  { %5527 = vst [vmem:[#allocation12_spill] sm:$0xff] %v4410_v45  ;;  %1520 = vrot.lane.b32.xlu0 %v4237_v56, %s3747_s9 }
  0xd7   :  { %1522 = vrot.lane.b32.xlu1 %v4241_v61, %s3747_s9 }
  0xd8   :  { %v4416_v48 = vpop.permute.xlu0 %1180 }
  0xd9   :  { %5528 = vst [vmem:[#allocation13_spill] sm:$0xff] %v4416_v48  ;;  %v4420_v58 = vpop.permute.xlu1 %1182  ;;  %v923_v48 = vld [vmem:[#allocation2 + $0x111] sm:$0xff] }
  0xda   :  { %5529 = vst [vmem:[#allocation14_spill] sm:$0xff] %v4420_v58  ;;  %1616 = vrot.lane.b32.xlu0 %v4394_v37, %s3748_s1  ;;  %v254_v58 = vld [vmem:[#allocation2 + $0x110] sm:$0xff] }
  0xdb   :  { %1618 = vrot.lane.b32.xlu1 %v4418_v53, %s3748_s1 }
  0xdc   :  { %v4426_v60 = vpop.permute.xlu0 %1184 }
  0xdd   :  { %5530 = vst [vmem:[#allocation15_spill] sm:$0xff] %v4426_v60  ;;  %v4428_v56 = vpop.permute.xlu1 %1186 }
  0xde   :  { %5531 = vst [vmem:[#allocation16_spill] sm:$0xff] %v4428_v56  ;;  %1712 = vrot.lane.b32.xlu0 %v684_v55, %s3749_s10 }
  0xdf   :  { %1714 = vrot.lane.b32.xlu1 %v973_v59, %s3749_s10 }
  0xe0   :  { %v4432_v0 = vpop.permute.xlu0 %1188 }
  0xe1   :  { %5532 = vst [vmem:[#allocation17_spill] sm:$0xff] %v4432_v0  ;;  %v4434_v1 = vpop.permute.xlu1 %1190 }
  0xe2   :  { %5533 = vst [vmem:[#allocation18_spill] sm:$0xff] %v4434_v1  ;;  %1808 = vrot.lane.b32.xlu0 %v4241_v61, %s3750_s11  ;;  %v4490_v1 = vpack.c.bf16 %v252_v36, %v251_v21  ;;  %v253_v36 = vld [vmem:[#allocation2 + $0x108] sm:$0xff] }
  0xe3   :  { %1810 = vrot.lane.b32.xlu1 %v4245_v62, %s3750_s11  ;;  %v4514_v45 = vpack.c.bf16 %v254_v58, %v253_v36  ;;  %v255_v36 = vld [vmem:[#allocation2 + $0x120] sm:$0xff] }
  0xe4   :  { %v4440_v18 = vpop.permute.xlu0 %1224 }
  0xe5   :  { %v4444_v28 = vpop.permute.xlu1 %1226 }
  0xe6   :  { %1332 = vrot.lane.b32.xlu0 %v4418_v53, %s3745_s5 }
  0xe7   :  { %1334 = vrot.lane.b32.xlu1 %v4442_v22, %s3745_s5 }
  0xe8   :  { %v4450_v31 = vpop.permute.xlu0 %1228 }
  0xe9   :  { %v4452_v61 = vpop.permute.xlu1 %1230 }
  0xea   :  { %1428 = vrot.lane.b32.xlu0 %v973_v59, %s3746_s8  ;;  %v975_v59 = vpack.c.bf16 %v919_v47, %v918_v46  ;;  %v633_v46 = vld [vmem:[#allocation2 + $0xf1] sm:$0xff]  ;;  %v634_v47 = vld [vmem:[#allocation2 + $0xf9] sm:$0xff] }
  0xeb   :  { %1430 = vrot.lane.b32.xlu1 %v686_v30, %s3746_s8  ;;  %v688_v0 = vpack.c.bf16 %v634_v47, %v633_v46  ;;  %v922_v47 = vld [vmem:[#allocation2 + $0x109] sm:$0xff] }
  0xec   :  { %v4456_v32 = vpop.permute.xlu0 %1232  ;;  %v977_v42 = vpack.c.bf16 %v923_v48, %v922_v47  ;;  %v637_v48 = vld [vmem:[#allocation2 + $0x121] sm:$0xff]  ;;  %v638_v47 = vld [vmem:[#allocation2 + $0x129] sm:$0xff] }
  0xed   :  { %v4458_v39 = vpop.permute.xlu1 %1234 }
  0xee   :  { %1524 = vrot.lane.b32.xlu0 %v4245_v62, %s3747_s9 }
  0xef   :  { %1526 = vrot.lane.b32.xlu1 %v4249_v3, %s3747_s9 }
  0xf0   :  { %v4464_v55 = vpop.permute.xlu0 %1236 }
  0xf1   :  { %v4468_v52 = vpop.permute.xlu1 %1238 }
  0xf2   :  { %1620 = vrot.lane.b32.xlu0 %v4442_v22, %s3748_s1 }
  0xf3   :  { %1622 = vrot.lane.b32.xlu1 %v4466_v51, %s3748_s1 }
  0xf4   :  { %v4474_v12 = vpop.permute.xlu0 %1240 }
  0xf5   :  { %v4476_v62 = vpop.permute.xlu1 %1242 }
  0xf6   :  { %1716 = vrot.lane.b32.xlu0 %v686_v30, %s3749_s10 }
  0xf7   :  { %1718 = vrot.lane.b32.xlu1 %v975_v59, %s3749_s10 }
  0xf8   :  { %v4480_v13 = vpop.permute.xlu0 %1244 }
  0xf9   :  { %v4482_v20 = vpop.permute.xlu1 %1246 }
  0xfa   :  { %1812 = vrot.lane.b32.xlu0 %v4249_v3, %s3750_s11 }
  0xfb   :  { %1814 = vrot.lane.b32.xlu1 %v4253_v4, %s3750_s11 }
  0xfc   :  { %v4488_v38 = vpop.permute.xlu0 %1248 }
  0xfd   :  { %v4492_v30 = vpop.permute.xlu1 %1250 }
  0xfe   :  { %1336 = vrot.lane.b32.xlu0 %v4466_v51, %s3745_s5 }
  0xff   :  { %1338 = vrot.lane.b32.xlu1 %v4490_v1, %s3745_s5 }
 0x100   :  { %v4498_v56 = vpop.permute.xlu0 %1252 }
 0x101   :  { %5534 = vst [vmem:[#allocation19_spill] sm:$0xff] %v4498_v56  ;;  %v4500_v3 = vpop.permute.xlu1 %1254  ;;  %v258_v56 = vld [vmem:[#allocation2 + $0x140] sm:$0xff] }
 0x102   :  { %5535 = vst [vmem:[#allocation20_spill] sm:$0xff] %v4500_v3  ;;  %1432 = vrot.lane.b32.xlu0 %v975_v59, %s3746_s8 }
 0x103   :  { %1434 = vrot.lane.b32.xlu1 %v688_v0, %s3746_s8 }
 0x104   :  { %v4504_v60 = vpop.permute.xlu0 %1256 }
 0x105   :  { %5536 = vst [vmem:[#allocation21_spill] sm:$0xff] %v4504_v60  ;;  %v4506_v21 = vpop.permute.xlu1 %1258 }
 0x106   :  { %5537 = vst [vmem:[#allocation22_spill] sm:$0xff] %v4506_v21  ;;  %1528 = vrot.lane.b32.xlu0 %v4253_v4, %s3747_s9  ;;  %v733_v21 = vld [vmem:[#allocation2 + $0x122] sm:$0xff] }
 0x107   :  { %1530 = vrot.lane.b32.xlu1 %v4257_v9, %s3747_s9 }
 0x108   :  { %v4512_v46 = vpop.permute.xlu0 %1260 }
 0x109   :  { %5538 = vst [vmem:[#allocation23_spill] sm:$0xff] %v4512_v46  ;;  %v4516_v59 = vpop.permute.xlu1 %1262  ;;  %v690_v46 = vpack.c.bf16 %v638_v47, %v637_v48  ;;  %v257_v47 = vld [vmem:[#allocation2 + $0x138] sm:$0xff] }
 0x10a   :  { %5539 = vst [vmem:[#allocation24_spill] sm:$0xff] %v4516_v59  ;;  %1624 = vrot.lane.b32.xlu0 %v4490_v1, %s3748_s1  ;;  %v232_v59 = vld [vmem:[#allocation2 + $0x8] sm:$0xff] }
 0x10b   :  { %1626 = vrot.lane.b32.xlu1 %v4514_v45, %s3748_s1 }
 0x10c   :  { %v4522_v41 = vpop.permute.xlu0 %1264 }
 0x10d   :  { %5540 = vst [vmem:[#allocation25_spill] sm:$0xff] %v4522_v41  ;;  %v4524_v4 = vpop.permute.xlu1 %1266  ;;  %v4532_v41 = vpack.c.bf16 %v256_v43, %v255_v36 }
 0x10e   :  { %5541 = vst [vmem:[#allocation26_spill] sm:$0xff] %v4524_v4  ;;  %1720 = vrot.lane.b32.xlu0 %v688_v0, %s3749_s10  ;;  %v231_v0 = vld [vmem:[#allocation2] sm:$0xff] }
 0x10f   :  { %1722 = vrot.lane.b32.xlu1 %v977_v42, %s3749_s10  ;;  %v295_v50 = vpack.c.bf16 %v232_v59, %v231_v0  ;;  %v926_v59 = vld [vmem:[#allocation2 + $0x139] sm:$0xff]  ;;  %v927_v0 = vld [vmem:[#allocation2 + $0x141] sm:$0xff] }
 0x110   :  { %v1321_v40 = vpop.permute.xlu0 %1320 }
 0x111   :  { %v1323_v58 = vpop.permute.xlu1 %1322  ;;  %v1866_v48 = vsel %vm79_vm0, %v295_v50, %v4298_v63 }
 0x112   :  { %1816 = vrot.lane.b32.xlu0 %v4257_v9, %s3750_s11  ;;  %v732_v9 = vld [vmem:[#allocation2 + $0x112] sm:$0xff] }
 0x113   :  { %1818 = vrot.lane.b32.xlu1 %v4261_v10, %s3750_s11  ;;  %v734_v10 = vld [vmem:[#allocation2 + $0x12a] sm:$0xff]  ;;  %v785_v43 = vpack.c.bf16 %v732_v9, %v731_v27  ;;  %v1962_v27 = vsel %vm1960_vm4, %v1866_v48, %v4440_v18  ;;  %v4552_v9 = vpack.c.bf16 %v258_v56, %v257_v47  ;;  %v979_v56 = vpack.c.bf16 %v927_v0, %v926_v59  ;;  %v1022_v48 = vld [vmem:[#allocation2 + $0x13a] sm:$0xff] }
 0x114   :  { %v1417_v35 = vpop.permute.xlu0 %1416  ;;  %v786_v36 = vpack.c.bf16 %v734_v10, %v733_v21  ;;  %v2027_v63 = vsel %vm2025_vm5, %v1962_v27, %v1321_v40  ;;  %v641_v0 = vld [vmem:[#allocation2 + $0x151] sm:$0xff] }
 0x115   :  { %v1419_v4 = vpop.permute.xlu1 %1418 }
 0x116   :  { %1340 = vrot.lane.b32.xlu0 %v4514_v45, %s3745_s5 }
 0x117   :  { %1342 = vrot.lane.b32.xlu1 %v4532_v41, %s3745_s5 }
 0x118   :  { %v1513_v26 = vpop.permute.xlu0 %1512 }
 0x119   :  { %v1515_v60 = vpop.permute.xlu1 %1514 }
 0x11a   :  { %1436 = vrot.lane.b32.xlu0 %v977_v42, %s3746_s8  ;;  %v1869_v42 = vsel %vm79_vm0, %v4279_v54, %v4308_v5  ;;  %v2092_v54 = vsel %vm2090_vm6, %v2027_v63, %v1417_v35  ;;  %v259_v63 = vld [vmem:[#allocation2 + $0x150] sm:$0xff] }
 0x11b   :  { %1438 = vrot.lane.b32.xlu1 %v690_v46, %s3746_s8  ;;  %v1964_v21 = vsel %vm1960_vm4, %v1869_v42, %v4444_v28 }
 0x11c   :  { %v1609_v25 = vpop.permute.xlu0 %1608  ;;  %v2029_v10 = vsel %vm2025_vm5, %v1964_v21, %v1323_v58 }
 0x11d   :  { %v1611_v3 = vpop.permute.xlu1 %1610  ;;  %v2094_v18 = vsel %vm2090_vm6, %v2029_v10, %v1419_v4  ;;  %v642_v10 = vld [vmem:[#allocation2 + $0x159] sm:$0xff] }
 0x11e   :  { %1532 = vrot.lane.b32.xlu0 %v785_v43, %s3747_s9  ;;  %v2157_v43 = vsel %vm2155_vm7, %v2092_v54, %v1513_v26  ;;  %v2159_v40 = vsel %vm2155_vm7, %v2094_v18, %v1515_v60  ;;  %v1023_v26 = vld [vmem:[#allocation2 + $0x142] sm:$0xff] }
 0x11f   :  { %1534 = vrot.lane.b32.xlu1 %v786_v36, %s3747_s9  ;;  %v2222_v28 = vsel %vm2220_vm8, %v2157_v43, %v1609_v25  ;;  %v2224_v35 = vsel %vm2220_vm8, %v2159_v40, %v1611_v3  ;;  %v1075_v25 = vpack.c.bf16 %v1023_v26, %v1022_v48  ;;  %v737_v43 = vld [vmem:[#allocation2 + $0x152] sm:$0xff]  ;;  %v738_v40 = vld [vmem:[#allocation2 + $0x15a] sm:$0xff]  ;;  %v261_v48 = vld [vmem:[#allocation2 + $0x168] sm:$0xff] }
 0x120   :  { %v1705_v50 = vpop.permute.xlu0 %1704  ;;  %v262_v26 = vld [vmem:[#allocation2 + $0x170] sm:$0xff] }
 0x121   :  { %v1707_v5 = vpop.permute.xlu1 %1706  ;;  %v2287_v58 = vsel %vm2285_vm9, %v2222_v28, %v1705_v50  ;;  %v260_v50 = vld [vmem:[#allocation2 + $0x158] sm:$0xff] }
 0x122   :  { %1628 = vrot.lane.b32.xlu0 %v4532_v41, %s3748_s1  ;;  %v2289_v47 = vsel %vm2285_vm9, %v2224_v35, %v1707_v5  ;;  %v4575_v54 = vpack.c.bf16 %v260_v50, %v259_v63  ;;  %v692_v5 = vpack.c.bf16 %v642_v10, %v641_v0  ;;  %v4596_v63 = vpack.c.bf16 %v262_v26, %v261_v48  ;;  %v549_v48 = vld [vmem:[#allocation2 + $0x180] sm:$0xff]  ;;  %v550_v26 = vld [vmem:[#allocation2 + $0x188] sm:$0xff] }
 0x123   :  { %1630 = vrot.lane.b32.xlu1 %v4552_v9, %s3748_s1 }
 0x124   :  { %v1801_v4 = vpop.permute.xlu0 %1800 }
 0x125   :  { %v1803_v42 = vpop.permute.xlu1 %1802  ;;  %v2352_v27 = vsel %vm2350_vm10, %v2287_v58, %v1801_v4  ;;  %v1872_v4 = vsel %vm79_vm0, %v4282_v57, %v4300_v2  ;;  %v930_v57 = vld [vmem:[#allocation2 + $0x169] sm:$0xff]  ;;  %v931_v2 = vld [vmem:[#allocation2 + $0x171] sm:$0xff] }
 0x126   :  { %v2354_v60 = vsel %vm2350_vm10, %v2289_v47, %v1803_v42  ;;  %1724 = vrot.lane.b32.xlu0 %v690_v46, %s3749_s10  ;;  %3658 = vmatprep.mubr.msk.bf16.mxu0 %vm2435_vm11, %v2352_v27  ;;  %v1875_v47 = vsel %vm79_vm0, %v4306_v33, %v4310_v6  ;;  %v981_v0 = vpack.c.bf16 %v931_v2, %v930_v57 }
 0x127   :  { %1726 = vrot.lane.b32.xlu1 %v979_v56, %s3749_s10  ;;  %3659 = vmatmul.mubr.msk.bf16.vlgmr.msra.gmra.mxu0 %vm2435_vm11, %v2354_v60  ;;  %v1968_v42 = vsel %vm1960_vm4, %v1875_v47, %v4452_v61 }
 0x128   :  { %v1325_v3 = vpop.permute.xlu0 %1324 }
 0x129   :  { %v1327_v21 = vpop.permute.xlu1 %1326 }
 0x12a   :  { %1820 = vrot.lane.b32.xlu0 %v786_v36, %s3750_s11  ;;  %v788_v36 = vpack.c.bf16 %v738_v40, %v737_v43  ;;  %v1026_v43 = vld [vmem:[#allocation2 + $0x16a] sm:$0xff] }
 0x12b   :  { %1822 = vrot.lane.b32.xlu1 %v1075_v25, %s3750_s11 }
 0x12c   :  { %v1421_v59 = vpop.permute.xlu0 %1420 }
 0x12d   :  { %v1423_v46 = vpop.permute.xlu1 %1422 }
 0x12e   :  { %1344 = vrot.lane.b32.xlu0 %v4552_v9, %s3745_s5 }
 0x12f   :  { %1346 = vrot.lane.b32.xlu1 %v4575_v54, %s3745_s5 }
 0x130   :  { %v1517_v18 = vpop.permute.xlu0 %1516 }
 0x131   :  { %v1519_v28 = vpop.permute.xlu1 %1518 }
 0x132   :  { %1440 = vrot.lane.b32.xlu0 %v979_v56, %s3746_s8  ;;  %v1966_v56 = vsel %vm1960_vm4, %v1872_v4, %v4450_v31 }
 0x133   :  { %1442 = vrot.lane.b32.xlu1 %v692_v5, %s3746_s8  ;;  %v2031_v27 = vsel %vm2025_vm5, %v1966_v56, %v1325_v3  ;;  %v598_v56 = vpack.c.bf16 %v550_v26, %v549_v48 }
 0x134   :  { %v1613_v35 = vpop.permute.xlu0 %1612  ;;  %v2096_v50 = vsel %vm2090_vm6, %v2031_v27, %v1421_v59  ;;  %v645_v27 = vld [vmem:[#allocation2 + $0x181] sm:$0xff] }
 0x135   :  { %v1615_v58 = vpop.permute.xlu1 %1614  ;;  %v2161_v31 = vsel %vm2155_vm7, %v2096_v50, %v1517_v18  ;;  %v742_v50 = vld [vmem:[#allocation2 + $0x18a] sm:$0xff] }
 0x136   :  { %1536 = vrot.lane.b32.xlu0 %v1075_v25, %s3747_s9  ;;  %v2033_v25 = vsel %vm2025_vm5, %v1968_v42, %v1327_v21  ;;  %v2226_v3 = vsel %vm2220_vm8, %v2161_v31, %v1613_v35  ;;  %v838_v31 = vld [vmem:[#allocation2 + $0x198] sm:$0xff] }
 0x137   :  { %1538 = vrot.lane.b32.xlu1 %v788_v36, %s3747_s9  ;;  %v2098_v6 = vsel %vm2090_vm6, %v2033_v25, %v1423_v46  ;;  %v1027_v46 = vld [vmem:[#allocation2 + $0x172] sm:$0xff]  ;;  %v741_v25 = vld [vmem:[#allocation2 + $0x182] sm:$0xff] }
 0x138   :  { %v1709_v60 = vpop.permute.xlu0 %1708  ;;  %v2163_v61 = vsel %vm2155_vm7, %v2098_v6, %v1519_v28  ;;  %v1077_v35 = vpack.c.bf16 %v1027_v46, %v1026_v43 }
 0x139   :  { %v1711_v33 = vpop.permute.xlu1 %1710  ;;  %v2228_v21 = vsel %vm2220_vm8, %v2163_v61, %v1615_v58  ;;  %v2291_v59 = vsel %vm2285_vm9, %v2226_v3, %v1709_v60  ;;  %v646_v60 = vld [vmem:[#allocation2 + $0x189] sm:$0xff]  ;;  %v839_v61 = vld [vmem:[#allocation2 + $0x1a0] sm:$0xff] }
 0x13a   :  { %1632 = vrot.lane.b32.xlu0 %v4575_v54, %s3748_s1  ;;  %v2293_v18 = vsel %vm2285_vm9, %v2228_v21, %v1711_v33  ;;  %v694_v57 = vpack.c.bf16 %v646_v60, %v645_v27  ;;  %v1878_v21 = vsel %vm79_vm0, %v4334_v15, %v4316_v7  ;;  %v935_v7 = vld [vmem:[#allocation2 + $0x1a1] sm:$0xff] }
 0x13b   :  { %1634 = vrot.lane.b32.xlu1 %v4596_v63, %s3748_s1 }
 0x13c   :  { %v1805_v10 = vpop.permute.xlu0 %1804 }
 0x13d   :  { %v2356_v40 = vsel %vm2350_vm10, %v2291_v59, %v1805_v10  ;;  %v1807_v4 = vpop.permute.xlu1 %1806  ;;  %v1881_v59 = vsel %vm79_vm0, %v4368_v23, %v4318_v8  ;;  %v887_v10 = vpack.c.bf16 %v839_v61, %v838_v31  ;;  %v554_v31 = vld [vmem:[#allocation2 + $0x1e8] sm:$0xff] }
 0x13e   :  { %v2358_v28 = vsel %vm2350_vm10, %v2293_v18, %v1807_v4  ;;  %1728 = vrot.lane.b32.xlu0 %v692_v5, %s3749_s10  ;;  %3662 = vmatprep.mubr.msk.bf16.mxu0 %vm2435_vm11, %v2356_v40  ;;  %v1972_v43 = vsel %vm1960_vm4, %v1881_v59, %v4458_v39  ;;  %v934_v40 = vld [vmem:[#allocation2 + $0x199] sm:$0xff]  ;;  %v648_v59 = vld [vmem:[#allocation2 + $0x1d1] sm:$0xff] }
 0x13f   :  { %1730 = vrot.lane.b32.xlu1 %v981_v0, %s3749_s10  ;;  %3663 = vmatmul.mubr.msk.bf16.gmra.mxu0 %vm2435_vm11, %v2358_v28 }
 0x140   :  { %v1329_v58 = vpop.permute.xlu0 %1328 }
 0x141   :  { %v1331_v47 = vpop.permute.xlu1 %1330 }
 0x142   :  { %1824 = vrot.lane.b32.xlu0 %v788_v36, %s3750_s11  ;;  %v790_v36 = vpack.c.bf16 %v742_v50, %v741_v25  ;;  %v2037_v15 = vsel %vm2025_vm5, %v1972_v43, %v1331_v47  ;;  %v1030_v47 = vld [vmem:[#allocation2 + $0x19a] sm:$0xff]  ;;  %v551_v25 = vld [vmem:[#allocation2 + $0x1c8] sm:$0xff]  ;;  %v552_v50 = vld [vmem:[#allocation2 + $0x1d0] sm:$0xff] }
 0x143   :  { %1826 = vrot.lane.b32.xlu1 %v1077_v35, %s3750_s11  ;;  %v650_v43 = vld [vmem:[#allocation2 + $0x1e9] sm:$0xff] }
 0x144   :  { %v1425_v42 = vpop.permute.xlu0 %1424 }
 0x145   :  { %v1427_v5 = vpop.permute.xlu1 %1426 }
 0x146   :  { %1348 = vrot.lane.b32.xlu0 %v4596_v63, %s3745_s5  ;;  %v2102_v8 = vsel %vm2090_vm6, %v2037_v15, %v1427_v5  ;;  %v744_v15 = vld [vmem:[#allocation2 + $0x1d2] sm:$0xff] }
 0x147   :  { %1350 = vrot.lane.b32.xlu1 %v598_v56, %s3745_s5 }
 0x148   :  { %v1521_v2 = vpop.permute.xlu0 %1520 }
 0x149   :  { %v1523_v33 = vpop.permute.xlu1 %1522 }
 0x14a   :  { %1444 = vrot.lane.b32.xlu0 %v981_v0, %s3746_s8  ;;  %v1970_v0 = vsel %vm1960_vm4, %v1878_v21, %v4456_v32  ;;  %v2167_v32 = vsel %vm2155_vm7, %v2102_v8, %v1523_v33 }
 0x14b   :  { %1446 = vrot.lane.b32.xlu1 %v694_v57, %s3746_s8  ;;  %v2035_v46 = vsel %vm2025_vm5, %v1970_v0, %v1329_v58 }
 0x14c   :  { %v1617_v6 = vpop.permute.xlu0 %1616  ;;  %v2100_v4 = vsel %vm2090_vm6, %v2035_v46, %v1425_v42  ;;  %v1031_v42 = vld [vmem:[#allocation2 + $0x1a2] sm:$0xff] }
 0x14d   :  { %v1619_v3 = vpop.permute.xlu1 %1618  ;;  %v2165_v23 = vsel %vm2155_vm7, %v2100_v4, %v1521_v2  ;;  %v1079_v2 = vpack.c.bf16 %v1031_v42, %v1030_v47  ;;  %v1887_v47 = vsel %vm79_vm0, %v4418_v53, %v4326_v11 }
 0x14e   :  { %1540 = vrot.lane.b32.xlu0 %v1077_v35, %s3747_s9  ;;  %v2230_v39 = vsel %vm2220_vm8, %v2165_v23, %v1617_v6  ;;  %v983_v35 = vpack.c.bf16 %v935_v7, %v934_v40  ;;  %v2232_v58 = vsel %vm2220_vm8, %v2167_v32, %v1619_v3  ;;  %v553_v6 = vld [vmem:[#allocation2 + $0x1e0] sm:$0xff]  ;;  %v599_v3 = vpack.c.bf16 %v552_v50, %v551_v25  ;;  %v743_v7 = vld [vmem:[#allocation2 + $0x1ca] sm:$0xff] }
 0x14f   :  { %1542 = vrot.lane.b32.xlu1 %v790_v36, %s3747_s9  ;;  %v600_v21 = vpack.c.bf16 %v554_v31, %v553_v6  ;;  %v791_v23 = vpack.c.bf16 %v744_v15, %v743_v7  ;;  %v558_v7 = vld [vmem:[#allocation2 + $0x218] sm:$0xff] }
 0x150   :  { %v1713_v18 = vpop.permute.xlu0 %1712 }
 0x151   :  { %v1715_v28 = vpop.permute.xlu1 %1714  ;;  %v2295_v48 = vsel %vm2285_vm9, %v2230_v39, %v1713_v18 }
 0x152   :  { %1636 = vrot.lane.b32.xlu0 %v598_v56, %s3748_s1  ;;  %v2297_v27 = vsel %vm2285_vm9, %v2232_v58, %v1715_v28  ;;  %v746_v28 = vld [vmem:[#allocation2 + $0x1ea] sm:$0xff]  ;;  %v843_v58 = vld [vmem:[#allocation2 + $0x200] sm:$0xff] }
 0x153   :  { %1638 = vrot.lane.b32.xlu1 %v887_v10, %s3748_s1  ;;  %v649_v10 = vld [vmem:[#allocation2 + $0x1e1] sm:$0xff] }
 0x154   :  { %v1809_v26 = vpop.permute.xlu0 %1808  ;;  %v696_v40 = vpack.c.bf16 %v650_v43, %v649_v10 }
 0x155   :  { %v2360_v60 = vsel %vm2350_vm10, %v2295_v48, %v1809_v26  ;;  %v1811_v5 = vpop.permute.xlu1 %1810  ;;  %v1884_v26 = vsel %vm79_vm0, %v4394_v37, %v4324_v44  ;;  %v939_v44 = vld [vmem:[#allocation2 + $0x201] sm:$0xff] }
 0x156   :  { %v2362_v56 = vsel %vm2350_vm10, %v2297_v27, %v1811_v5  ;;  %1732 = vrot.lane.b32.xlu0 %v694_v57, %s3749_s10  ;;  %3666 = vmatprep.mubr.msk.bf16.mxu0 %vm2435_vm11, %v2360_v60  ;;  %v647_v57 = vld [vmem:[#allocation2 + $0x1c9] sm:$0xff]  ;;  %v1974_v42 = vsel %vm1960_vm4, %v1884_v26, %v4464_v55  ;;  %v1976_v60 = vsel %vm1960_vm4, %v1887_v47, %v4468_v52 }
 0x157   :  { %1734 = vrot.lane.b32.xlu1 %v983_v35, %s3749_s10  ;;  %3667 = vmatmul.mubr.msk.bf16.gmra.mxu0 %vm2435_vm11, %v2362_v56  ;;  %v695_v18 = vpack.c.bf16 %v648_v59, %v647_v57  ;;  %v842_v35 = vld [vmem:[#allocation2 + $0x1f8] sm:$0xff]  ;;  %v1035_v57 = vld [vmem:[#allocation2 + $0x202] sm:$0xff] }
 0x158   :  { %v1333_v33 = vpop.permute.xlu0 %1332  ;;  %v889_v27 = vpack.c.bf16 %v843_v58, %v842_v35  ;;  %v749_v35 = vld [vmem:[#allocation2 + $0x212] sm:$0xff]  ;;  %v750_v58 = vld [vmem:[#allocation2 + $0x21a] sm:$0xff]  ;;  %v846_v47 = vld [vmem:[#allocation2 + $0x228] sm:$0xff] }
 0x159   :  { %v1335_v61 = vpop.permute.xlu1 %1334  ;;  %v2039_v5 = vsel %vm2025_vm5, %v1974_v42, %v1333_v33  ;;  %v847_v42 = vld [vmem:[#allocation2 + $0x230] sm:$0xff] }
 0x15a   :  { %1828 = vrot.lane.b32.xlu0 %v790_v36, %s3750_s11  ;;  %v745_v36 = vld [vmem:[#allocation2 + $0x1e2] sm:$0xff]  ;;  %v2041_v37 = vsel %vm2025_vm5, %v1976_v60, %v1335_v61 }
 0x15b   :  { %1830 = vrot.lane.b32.xlu1 %v1079_v2, %s3750_s11  ;;  %v792_v32 = vpack.c.bf16 %v746_v28, %v745_v36  ;;  %v938_v2 = vld [vmem:[#allocation2 + $0x1f9] sm:$0xff]  ;;  %v653_v28 = vld [vmem:[#allocation2 + $0x211] sm:$0xff] }
 0x15c   :  { %v1429_v0 = vpop.permute.xlu0 %1428  ;;  %v985_v33 = vpack.c.bf16 %v939_v44, %v938_v2  ;;  %v891_v2 = vpack.c.bf16 %v847_v42, %v846_v47  ;;  %v850_v47 = vld [vmem:[#allocation2 + $0x258] sm:$0xff]  ;;  %v851_v42 = vld [vmem:[#allocation2 + $0x260] sm:$0xff] }
 0x15d   :  { %v1431_v46 = vpop.permute.xlu1 %1430  ;;  %v2104_v25 = vsel %vm2090_vm6, %v2039_v5, %v1429_v0  ;;  %v1893_v5 = vsel %vm79_vm0, %v4466_v51, %v4336_v29 }
 0x15e   :  { %1352 = vrot.lane.b32.xlu0 %v599_v3, %s3745_s5  ;;  %v2106_v11 = vsel %vm2090_vm6, %v2041_v37, %v1431_v46  ;;  %v1034_v3 = vld [vmem:[#allocation2 + $0x1fa] sm:$0xff]  ;;  %v1980_v44 = vsel %vm1960_vm4, %v1893_v5, %v4476_v62  ;;  %v1899_v5 = vsel %vm79_vm0, %v4514_v45, %v4344_v17 }
 0x15f   :  { %1354 = vrot.lane.b32.xlu1 %v600_v21, %s3745_s5  ;;  %v1081_v43 = vpack.c.bf16 %v1035_v57, %v1034_v3 }
 0x160   :  { %v1525_v4 = vpop.permute.xlu0 %1524 }
 0x161   :  { %v1527_v8 = vpop.permute.xlu1 %1526  ;;  %v2169_v53 = vsel %vm2155_vm7, %v2104_v25, %v1525_v4 }
 0x162   :  { %1448 = vrot.lane.b32.xlu0 %v695_v18, %s3746_s8  ;;  %v2171_v55 = vsel %vm2155_vm7, %v2106_v11, %v1527_v8  ;;  %v557_v18 = vld [vmem:[#allocation2 + $0x210] sm:$0xff]  ;;  %v654_v8 = vld [vmem:[#allocation2 + $0x219] sm:$0xff] }
 0x163   :  { %1450 = vrot.lane.b32.xlu1 %v696_v40, %s3746_s8  ;;  %v602_v4 = vpack.c.bf16 %v558_v7, %v557_v18 }
 0x164   :  { %v1621_v39 = vpop.permute.xlu0 %1620 }
 0x165   :  { %v1623_v48 = vpop.permute.xlu1 %1622  ;;  %v2234_v52 = vsel %vm2220_vm8, %v2169_v53, %v1621_v39 }
 0x166   :  { %1544 = vrot.lane.b32.xlu0 %v791_v23, %s3747_s9  ;;  %v2236_v6 = vsel %vm2220_vm8, %v2171_v55, %v1623_v48  ;;  %v698_v23 = vpack.c.bf16 %v654_v8, %v653_v28 }
 0x167   :  { %1546 = vrot.lane.b32.xlu1 %v792_v32, %s3747_s9 }
 0x168   :  { %v1717_v56 = vpop.permute.xlu0 %1716 }
 0x169   :  { %v1719_v50 = vpop.permute.xlu1 %1718  ;;  %v2299_v31 = vsel %vm2285_vm9, %v2234_v52, %v1717_v56 }
 0x16a   :  { %1640 = vrot.lane.b32.xlu0 %v600_v21, %s3748_s1  ;;  %v2301_v59 = vsel %vm2285_vm9, %v2236_v6, %v1719_v50  ;;  %v942_v50 = vld [vmem:[#allocation2 + $0x229] sm:$0xff] }
 0x16b   :  { %1642 = vrot.lane.b32.xlu1 %v889_v27, %s3748_s1 }
 0x16c   :  { %v1813_v61 = vpop.permute.xlu0 %1812 }
 0x16d   :  { %v2364_v0 = vsel %vm2350_vm10, %v2299_v31, %v1813_v61  ;;  %v1815_v10 = vpop.permute.xlu1 %1814  ;;  %v1038_v31 = vld [vmem:[#allocation2 + $0x22a] sm:$0xff]  ;;  %v1039_v61 = vld [vmem:[#allocation2 + $0x232] sm:$0xff] }
 0x16e   :  { %v2366_v21 = vsel %vm2350_vm10, %v2301_v59, %v1815_v10  ;;  %1736 = vrot.lane.b32.xlu0 %v696_v40, %s3749_s10  ;;  %3670 = vmatprep.mubr.msk.bf16.mxu0 %vm2435_vm11, %v2364_v0  ;;  %v1083_v10 = vpack.c.bf16 %v1039_v61, %v1038_v31 }
 0x16f   :  { %1738 = vrot.lane.b32.xlu1 %v985_v33, %s3749_s10  ;;  %3671 = vmatmul.mubr.msk.bf16.gmra.mxu0 %vm2435_vm11, %v2366_v21 }
 0x170   :  { %v1337_v46 = vpop.permute.xlu0 %1336 }
 0x171   :  { %v1339_v15 = vpop.permute.xlu1 %1338 }
 0x172   :  { %1832 = vrot.lane.b32.xlu0 %v792_v32, %s3750_s11  ;;  %v794_v32 = vpack.c.bf16 %v750_v58, %v749_v35  ;;  %v76_v58 = vld [vmem:[%s5514_s0 + $0x1f0] sm:$0xff] }
 0x173   :  { %1834 = vrot.lane.b32.xlu1 %v1081_v43, %s3750_s11  ;;  %142 = vst.msk [vmem:[#allocation2 + $0x331] sm:$0xff] %vm79_vm0, %v76_v58 }
 0x174   :  { %v1433_v36 = vpop.permute.xlu0 %1432 }
 0x175   :  { %v1435_v40 = vpop.permute.xlu1 %1434 }
 0x176   :  { %1356 = vrot.lane.b32.xlu0 %v889_v27, %s3745_s5  ;;  %v1890_v27 = vsel %vm79_vm0, %v4442_v22, %v4332_v14  ;;  %v943_v14 = vld [vmem:[#allocation2 + $0x231] sm:$0xff]  ;;  %v2045_v22 = vsel %vm2025_vm5, %v1980_v44, %v1339_v15  ;;  %v1984_v44 = vsel %vm1960_vm4, %v1899_v5, %v4482_v20 }
 0x177   :  { %1358 = vrot.lane.b32.xlu1 %v602_v4, %s3745_s5  ;;  %v1978_v56 = vsel %vm1960_vm4, %v1890_v27, %v4474_v12  ;;  %v2110_v29 = vsel %vm2090_vm6, %v2045_v22, %v1435_v40  ;;  %v987_v55 = vpack.c.bf16 %v943_v14, %v942_v50  ;;  %v1896_v27 = vsel %vm79_vm0, %v4490_v1, %v4342_v16  ;;  %v946_v50 = vld [vmem:[#allocation2 + $0x259] sm:$0xff]  ;;  %v947_v16 = vld [vmem:[#allocation2 + $0x261] sm:$0xff] }
 0x178   :  { %v1529_v39 = vpop.permute.xlu0 %1528  ;;  %v2043_v37 = vsel %vm2025_vm5, %v1978_v56, %v1337_v46  ;;  %v562_v46 = vld [vmem:[#allocation2 + $0x248] sm:$0xff]  ;;  %v1982_v56 = vsel %vm1960_vm4, %v1896_v27, %v4480_v13 }
 0x179   :  { %v1531_v48 = vpop.permute.xlu1 %1530  ;;  %v2108_v11 = vsel %vm2090_vm6, %v2043_v37, %v1433_v36  ;;  %v658_v36 = vld [vmem:[#allocation2 + $0x249] sm:$0xff] }
 0x17a   :  { %1452 = vrot.lane.b32.xlu0 %v985_v33, %s3746_s8  ;;  %v2173_v51 = vsel %vm2155_vm7, %v2108_v11, %v1529_v39  ;;  %v2175_v12 = vsel %vm2155_vm7, %v2110_v29, %v1531_v48  ;;  %v754_v39 = vld [vmem:[#allocation2 + $0x24a] sm:$0xff]  ;;  %v77_v48 = vld [vmem:[%s5514_s0 + $0x1f8] sm:$0xff]  ;;  %v989_v11 = vpack.c.bf16 %v947_v16, %v946_v50 }
 0x17b   :  { %1454 = vrot.lane.b32.xlu1 %v698_v23, %s3746_s8  ;;  %143 = vst.msk [vmem:[#allocation2 + $0x339] sm:$0xff] %vm79_vm0, %v77_v48 }
 0x17c   :  { %v1625_v26 = vpop.permute.xlu0 %1624 }
 0x17d   :  { %v1627_v60 = vpop.permute.xlu1 %1626  ;;  %v2238_v62 = vsel %vm2220_vm8, %v2173_v51, %v1625_v26 }
 0x17e   :  { %1548 = vrot.lane.b32.xlu0 %v1081_v43, %s3747_s9  ;;  %v2240_v52 = vsel %vm2220_vm8, %v2175_v12, %v1627_v60  ;;  %v561_v43 = vld [vmem:[#allocation2 + $0x240] sm:$0xff] }
 0x17f   :  { %1550 = vrot.lane.b32.xlu1 %v794_v32, %s3747_s9  ;;  %v604_v7 = vpack.c.bf16 %v562_v46, %v561_v43  ;;  %v1042_v12 = vld [vmem:[#allocation2 + $0x25a] sm:$0xff]  ;;  %v661_v46 = vld [vmem:[#allocation2 + $0x271] sm:$0xff] }
 0x180   :  { %v1721_v25 = vpop.permute.xlu0 %1720 }
 0x181   :  { %v1723_v53 = vpop.permute.xlu1 %1722  ;;  %v2303_v33 = vsel %vm2285_vm9, %v2238_v62, %v1721_v25  ;;  %v1043_v62 = vld [vmem:[#allocation2 + $0x262] sm:$0xff] }
 0x182   :  { %1644 = vrot.lane.b32.xlu0 %v602_v4, %s3748_s1  ;;  %v2305_v3 = vsel %vm2285_vm9, %v2240_v52, %v1723_v53  ;;  %v657_v4 = vld [vmem:[#allocation2 + $0x241] sm:$0xff]  ;;  %v1085_v31 = vpack.c.bf16 %v1043_v62, %v1042_v12 }
 0x183   :  { %1646 = vrot.lane.b32.xlu1 %v891_v2, %s3748_s1  ;;  %v700_v8 = vpack.c.bf16 %v658_v36, %v657_v4  ;;  %v757_v36 = vld [vmem:[#allocation2 + $0x272] sm:$0xff] }
 0x184   :  { %v1817_v6 = vpop.permute.xlu0 %1816 }
 0x185   :  { %v2368_v57 = vsel %vm2350_vm10, %v2303_v33, %v1817_v6  ;;  %v1819_v59 = vpop.permute.xlu1 %1818 }
 0x186   :  { %v2370_v0 = vsel %vm2350_vm10, %v2305_v3, %v1819_v59  ;;  %1740 = vrot.lane.b32.xlu0 %v698_v23, %s3749_s10  ;;  %3674 = vmatprep.mubr.msk.bf16.mxu0 %vm2435_vm11, %v2368_v57  ;;  %v753_v23 = vld [vmem:[#allocation2 + $0x242] sm:$0xff]  ;;  %v565_v59 = vld [vmem:[#allocation2 + $0x270] sm:$0xff] }
 0x187   :  { %1742 = vrot.lane.b32.xlu1 %v987_v55, %s3749_s10  ;;  %3675 = vmatmul.mubr.msk.bf16.gmra.mxu0 %vm2435_vm11, %v2370_v0  ;;  %v566_v0 = vld [vmem:[#allocation2 + $0x278] sm:$0xff] }
 0x188   :  { %v1341_v21 = vpop.permute.xlu0 %1340 }
 0x189   :  { %v1343_v18 = vpop.permute.xlu1 %1342  ;;  %v2047_v37 = vsel %vm2025_vm5, %v1982_v56, %v1341_v21  ;;  %v606_v21 = vpack.c.bf16 %v566_v0, %v565_v59  ;;  %v5543_v0 = vld [vmem:[#allocation20_spill] sm:$0xff] }
 0x18a   :  { %1836 = vrot.lane.b32.xlu0 %v794_v32, %s3750_s11  ;;  %v796_v32 = vpack.c.bf16 %v754_v39, %v753_v23  ;;  %v2049_v1 = vsel %vm2025_vm5, %v1984_v44, %v1343_v18  ;;  %v662_v18 = vld [vmem:[#allocation2 + $0x279] sm:$0xff]  ;;  %v1905_v23 = vsel %vm79_vm0, %v4552_v9, %v4355_v19  ;;  %v951_v44 = vld [vmem:[#allocation2 + $0x291] sm:$0xff] }
 0x18b   :  { %1838 = vrot.lane.b32.xlu1 %v1083_v10, %s3750_s11  ;;  %v1988_v58 = vsel %vm1960_vm4, %v1905_v23, %v4492_v30  ;;  %v858_v23 = vld [vmem:[#allocation2 + $0x2b8] sm:$0xff] }
 0x18c   :  { %v1437_v15 = vpop.permute.xlu0 %1436 }
 0x18d   :  { %v1439_v28 = vpop.permute.xlu1 %1438  ;;  %v2112_v14 = vsel %vm2090_vm6, %v2047_v37, %v1437_v15  ;;  %v702_v15 = vpack.c.bf16 %v662_v18, %v661_v46  ;;  %v761_v46 = vld [vmem:[#allocation2 + $0x2a2] sm:$0xff] }
 0x18e   :  { %1360 = vrot.lane.b32.xlu0 %v891_v2, %s3745_s5  ;;  %v893_v2 = vpack.c.bf16 %v851_v42, %v850_v47  ;;  %v2114_v17 = vsel %vm2090_vm6, %v2049_v1, %v1439_v28  ;;  %v758_v28 = vld [vmem:[#allocation2 + $0x27a] sm:$0xff] }
 0x18f   :  { %1362 = vrot.lane.b32.xlu1 %v604_v7, %s3745_s5 }
 0x190   :  { %v1533_v40 = vpop.permute.xlu0 %1532 }
 0x191   :  { %v1535_v35 = vpop.permute.xlu1 %1534  ;;  %v2177_v45 = vsel %vm2155_vm7, %v2112_v14, %v1533_v40  ;;  %v1902_v40 = vsel %vm79_vm0, %v4532_v41, %v4350_v49  ;;  %v855_v49 = vld [vmem:[#allocation2 + $0x290] sm:$0xff] }
 0x192   :  { %1456 = vrot.lane.b32.xlu0 %v987_v55, %s3746_s8  ;;  %v2179_v13 = vsel %vm2155_vm7, %v2114_v17, %v1535_v35  ;;  %v1986_v39 = vsel %vm1960_vm4, %v1902_v40, %v4488_v38  ;;  %v798_v35 = vpack.c.bf16 %v758_v28, %v757_v36  ;;  %v1047_v17 = vld [vmem:[#allocation2 + $0x292] sm:$0xff] }
 0x193   :  { %1458 = vrot.lane.b32.xlu1 %v700_v8, %s3746_s8 }
 0x194   :  { %v1629_v26 = vpop.permute.xlu0 %1628 }
 0x195   :  { %v1631_v60 = vpop.permute.xlu1 %1630  ;;  %v2242_v20 = vsel %vm2220_vm8, %v2177_v45, %v1629_v26  ;;  %v854_v26 = vld [vmem:[#allocation2 + $0x288] sm:$0xff] }
 0x196   :  { %1552 = vrot.lane.b32.xlu0 %v1083_v10, %s3747_s9  ;;  %v2244_v53 = vsel %vm2220_vm8, %v2179_v13, %v1631_v60  ;;  %v895_v60 = vpack.c.bf16 %v855_v49, %v854_v26 }
 0x197   :  { %1554 = vrot.lane.b32.xlu1 %v796_v32, %s3747_s9 }
 0x198   :  { %v1725_v25 = vpop.permute.xlu0 %1724 }
 0x199   :  { %v1727_v22 = vpop.permute.xlu1 %1726  ;;  %v2307_v29 = vsel %vm2285_vm9, %v2242_v20, %v1725_v25 }
 0x19a   :  { %1648 = vrot.lane.b32.xlu0 %v604_v7, %s3748_s1  ;;  %v2309_v55 = vsel %vm2285_vm9, %v2244_v53, %v1727_v22  ;;  %v1046_v22 = vld [vmem:[#allocation2 + $0x28a] sm:$0xff] }
 0x19b   :  { %1650 = vrot.lane.b32.xlu1 %v893_v2, %s3748_s1  ;;  %v1087_v13 = vpack.c.bf16 %v1047_v17, %v1046_v22  ;;  %v574_v22 = vld [vmem:[#allocation2 + $0x2d8] sm:$0xff] }
 0x19c   :  { %v1821_v51 = vpop.permute.xlu0 %1820 }
 0x19d   :  { %v2372_v52 = vsel %vm2350_vm10, %v2307_v29, %v1821_v51  ;;  %v1823_v33 = vpop.permute.xlu1 %1822  ;;  %v569_v29 = vld [vmem:[#allocation2 + $0x2a0] sm:$0xff]  ;;  %v570_v51 = vld [vmem:[#allocation2 + $0x2a8] sm:$0xff] }
 0x19e   :  { %v2374_v6 = vsel %vm2350_vm10, %v2309_v55, %v1823_v33  ;;  %1744 = vrot.lane.b32.xlu0 %v700_v8, %s3749_s10  ;;  %3678 = vmatprep.mubr.msk.bf16.mxu0 %vm2435_vm11, %v2372_v52  ;;  %v608_v62 = vpack.c.bf16 %v570_v51, %v569_v29  ;;  %v665_v52 = vld [vmem:[#allocation2 + $0x2a1] sm:$0xff]  ;;  %v666_v33 = vld [vmem:[#allocation2 + $0x2a9] sm:$0xff] }
 0x19f   :  { %1746 = vrot.lane.b32.xlu1 %v989_v11, %s3749_s10  ;;  %3679 = vmatmul.mubr.msk.bf16.gmra.mxu0 %vm2435_vm11, %v2374_v6  ;;  %v704_v59 = vpack.c.bf16 %v666_v33, %v665_v52  ;;  %v669_v33 = vld [vmem:[#allocation2 + $0x2d1] sm:$0xff] }
 0x1a0   :  { %v1345_v61 = vpop.permute.xlu0 %1344 }
 0x1a1   :  { %v1347_v3 = vpop.permute.xlu1 %1346  ;;  %v2051_v48 = vsel %vm2025_vm5, %v1986_v39, %v1345_v61  ;;  %v1911_v61 = vsel %vm79_vm0, %v4596_v63, %v4370_v24  ;;  %v859_v39 = vld [vmem:[#allocation2 + $0x2c0] sm:$0xff] }
 0x1a2   :  { %1840 = vrot.lane.b32.xlu0 %v796_v32, %s3750_s11  ;;  %v2053_v41 = vsel %vm2025_vm5, %v1988_v58, %v1347_v3  ;;  %v5542_v3 = vld [vmem:[#allocation19_spill] sm:$0xff]  ;;  %v897_v26 = vpack.c.bf16 %v859_v39, %v858_v23  ;;  %v863_v23 = vld [vmem:[#allocation2 + $0x2f0] sm:$0xff] }
 0x1a3   :  { %1842 = vrot.lane.b32.xlu1 %v1085_v31, %s3750_s11 }
 0x1a4   :  { %v1441_v57 = vpop.permute.xlu0 %1440 }
 0x1a5   :  { %v1443_v10 = vpop.permute.xlu1 %1442  ;;  %v2116_v47 = vsel %vm2090_vm6, %v2051_v48, %v1441_v57 }
 0x1a6   :  { %1268 = vrot.lane.b32.xlu0 %v796_v32, %s3744_s27  ;;  %v2118_v19 = vsel %vm2090_vm6, %v2053_v41, %v1443_v10  ;;  %v1992_v10 = vsel %vm1960_vm4, %v1911_v61, %v5543_v0  ;;  %v954_v41 = vld [vmem:[#allocation2 + $0x2b9] sm:$0xff] }
 0x1a7   :  { %1270 = vrot.lane.b32.xlu1 %v1085_v31, %s3744_s27 }
 0x1a8   :  { %v1537_v43 = vpop.permute.xlu0 %1536 }
 0x1a9   :  { %v1539_v7 = vpop.permute.xlu1 %1538  ;;  %v2181_v38 = vsel %vm2155_vm7, %v2116_v47, %v1537_v43  ;;  %v955_v47 = vld [vmem:[#allocation2 + $0x2c1] sm:$0xff] }
 0x1aa   :  { %1364 = vrot.lane.b32.xlu0 %v893_v2, %s3745_s5  ;;  %v2183_v9 = vsel %vm2155_vm7, %v2118_v19, %v1539_v7  ;;  %v950_v2 = vld [vmem:[#allocation2 + $0x289] sm:$0xff]  ;;  %v993_v19 = vpack.c.bf16 %v955_v47, %v954_v41 }
 0x1ab   :  { %1366 = vrot.lane.b32.xlu1 %v606_v21, %s3745_s5  ;;  %v991_v1 = vpack.c.bf16 %v951_v44, %v950_v2  ;;  %v265_v2 = vld [vmem:[#allocation2 + $0x1c8] sm:$0xff]  ;;  %v266_v44 = vld [vmem:[#allocation2 + $0x1d0] sm:$0xff] }
 0x1ac   :  { %v1633_v4 = vpop.permute.xlu0 %1632  ;;  %v958_v47 = vld [vmem:[#allocation2 + $0x2e9] sm:$0xff] }
 0x1ad   :  { %v1635_v8 = vpop.permute.xlu1 %1634  ;;  %v2246_v30 = vsel %vm2220_vm8, %v2181_v38, %v1633_v4 }
 0x1ae   :  { %1460 = vrot.lane.b32.xlu0 %v989_v11, %s3746_s8  ;;  %v2248_v27 = vsel %vm2220_vm8, %v2183_v9, %v1635_v8  ;;  %v1050_v9 = vld [vmem:[#allocation2 + $0x2ba] sm:$0xff] }
 0x1af   :  { %1462 = vrot.lane.b32.xlu1 %v702_v15, %s3746_s8 }
 0x1b0   :  { %v1729_v32 = vpop.permute.xlu0 %1728 }
 0x1b1   :  { %v1731_v42 = vpop.permute.xlu1 %1730  ;;  %v2311_v5 = vsel %vm2285_vm9, %v2246_v30, %v1729_v32  ;;  %v1051_v30 = vld [vmem:[#allocation2 + $0x2c2] sm:$0xff] }
 0x1b2   :  { %1556 = vrot.lane.b32.xlu0 %v1085_v31, %s3747_s9  ;;  %v2313_v37 = vsel %vm2285_vm9, %v2248_v27, %v1731_v42  ;;  %v1908_v31 = vsel %vm79_vm0, %v4575_v54, %v4366_v34  ;;  %v762_v34 = vld [vmem:[#allocation2 + $0x2aa] sm:$0xff] }
 0x1b3   :  { %1558 = vrot.lane.b32.xlu1 %v798_v35, %s3747_s9  ;;  %v1990_v57 = vsel %vm1960_vm4, %v1908_v31, %v5542_v3  ;;  %v800_v36 = vpack.c.bf16 %v762_v34, %v761_v46  ;;  %v263_v27 = vld [vmem:[#allocation2 + $0x1b0] sm:$0xff] }
 0x1b4   :  { %v1825_v56 = vpop.permute.xlu0 %1824 }
 0x1b5   :  { %v2376_v25 = vsel %vm2350_vm10, %v2311_v5, %v1825_v56  ;;  %v1827_v50 = vpop.permute.xlu1 %1826  ;;  %v264_v5 = vld [vmem:[#allocation2 + $0x1b8] sm:$0xff]  ;;  %v1089_v56 = vpack.c.bf16 %v1051_v30, %v1050_v9 }
 0x1b6   :  { %v2378_v16 = vsel %vm2350_vm10, %v2313_v37, %v1827_v50  ;;  %1652 = vrot.lane.b32.xlu0 %v606_v21, %s3748_s1  ;;  %3682 = vmatprep.mubr.msk.bf16.mxu0 %vm2435_vm11, %v2376_v25  ;;  %v311_v50 = vpack.c.bf16 %v264_v5, %v263_v27  ;;  %v267_v5 = vld [vmem:[#allocation2 + $0x1e0] sm:$0xff] }
 0x1b7   :  { %1654 = vrot.lane.b32.xlu1 %v895_v60, %s3748_s1  ;;  %3683 = vmatmul.mubr.msk.bf16.gmra.mxu0 %vm2435_vm11, %v2378_v16  ;;  %v312_v16 = vpack.c.bf16 %v266_v44, %v265_v2  ;;  %v269_v2 = vld [vmem:[#allocation2 + $0x1f8] sm:$0xff] }
 0x1b8   :  { %v1349_v14 = vpop.permute.xlu0 %1348 }
 0x1b9   :  { %v1351_v45 = vpop.permute.xlu1 %1350  ;;  %v2055_v21 = vsel %vm2025_vm5, %v1990_v57, %v1349_v14  ;;  %v573_v14 = vld [vmem:[#allocation2 + $0x2d0] sm:$0xff] }
 0x1ba   :  { %1748 = vrot.lane.b32.xlu0 %v702_v15, %s3749_s10  ;;  %v2057_v54 = vsel %vm2025_vm5, %v1992_v10, %v1351_v45  ;;  %v5544_v45 = vld [vmem:[#allocation3_spill] sm:$0xff]  ;;  %v610_v51 = vpack.c.bf16 %v574_v22, %v573_v14 }
 0x1bb   :  { %1750 = vrot.lane.b32.xlu1 %v991_v1, %s3749_s10 }
 0x1bc   :  { %v1445_v20 = vpop.permute.xlu0 %1444 }
 0x1bd   :  { %v1447_v11 = vpop.permute.xlu1 %1446  ;;  %v2120_v18 = vsel %vm2090_vm6, %v2055_v21, %v1445_v20  ;;  %v5545_v20 = vld [vmem:[#allocation4_spill] sm:$0xff] }
 0x1be   :  { %1844 = vrot.lane.b32.xlu0 %v798_v35, %s3750_s11  ;;  %v2122_v24 = vsel %vm2090_vm6, %v2057_v54, %v1447_v11  ;;  %v1917_v11 = vsel %vm79_vm0, %v312_v16, %v5545_v20  ;;  %v765_v54 = vld [vmem:[#allocation2 + $0x2d2] sm:$0xff] }
 0x1bf   :  { %1846 = vrot.lane.b32.xlu1 %v1087_v13, %s3750_s11 }
 0x1c0   :  { %v1541_v53 = vpop.permute.xlu0 %1540 }
 0x1c1   :  { %v1543_v12 = vpop.permute.xlu1 %1542  ;;  %v2185_v63 = vsel %vm2155_vm7, %v2120_v18, %v1541_v53  ;;  %v5546_v53 = vld [vmem:[#allocation21_spill] sm:$0xff]  ;;  %v766_v18 = vld [vmem:[#allocation2 + $0x2da] sm:$0xff] }
 0x1c2   :  { %1272 = vrot.lane.b32.xlu0 %v798_v35, %s3744_s27  ;;  %v2187_v15 = vsel %vm2155_vm7, %v2122_v24, %v1543_v12  ;;  %v5547_v12 = vld [vmem:[#allocation22_spill] sm:$0xff] }
 0x1c3   :  { %1274 = vrot.lane.b32.xlu1 %v1087_v13, %s3744_s27 }
 0x1c4   :  { %v1637_v55 = vpop.permute.xlu0 %1636 }
 0x1c5   :  { %v1639_v6 = vpop.permute.xlu1 %1638  ;;  %v2250_v4 = vsel %vm2220_vm8, %v2185_v63, %v1637_v55 }
 0x1c6   :  { %1368 = vrot.lane.b32.xlu0 %v895_v60, %s3745_s5  ;;  %v2252_v28 = vsel %vm2220_vm8, %v2187_v15, %v1639_v6  ;;  %v670_v6 = vld [vmem:[#allocation2 + $0x2d9] sm:$0xff] }
 0x1c7   :  { %1370 = vrot.lane.b32.xlu1 %v608_v62, %s3745_s5  ;;  %v4867_v21 = vpack.c.bf16 %v670_v6, %v669_v33 }
 0x1c8   :  { %v1733_v43 = vpop.permute.xlu0 %1732 }
 0x1c9   :  { %v1735_v7 = vpop.permute.xlu1 %1734  ;;  %v2315_v8 = vsel %vm2285_vm9, %v2250_v4, %v1733_v43 }
 0x1ca   :  { %1464 = vrot.lane.b32.xlu0 %v991_v1, %s3746_s8  ;;  %v2317_v35 = vsel %vm2285_vm9, %v2252_v28, %v1735_v7 }
 0x1cb   :  { %1466 = vrot.lane.b32.xlu1 %v704_v59, %s3746_s8 }
 0x1cc   :  { %v1829_v40 = vpop.permute.xlu0 %1828 }
 0x1cd   :  { %v2380_v58 = vsel %vm2350_vm10, %v2315_v8, %v1829_v40  ;;  %v1831_v48 = vpop.permute.xlu1 %1830  ;;  %v862_v40 = vld [vmem:[#allocation2 + $0x2e8] sm:$0xff] }
 0x1ce   :  { %v2382_v32 = vsel %vm2350_vm10, %v2317_v35, %v1831_v48  ;;  %1560 = vrot.lane.b32.xlu0 %v1087_v13, %s3747_s9  ;;  %3686 = vmatprep.mubr.msk.bf16.mxu0 %vm2435_vm11, %v2380_v58  ;;  %v1914_v13 = vsel %vm79_vm0, %v311_v50, %v5544_v45  ;;  %v270_v50 = vld [vmem:[#allocation2 + $0x200] sm:$0xff]  ;;  %v1054_v45 = vld [vmem:[#allocation2 + $0x2ea] sm:$0xff] }
 0x1cf   :  { %1562 = vrot.lane.b32.xlu1 %v800_v36, %s3747_s9  ;;  %3687 = vmatmul.mubr.msk.bf16.gmra.mxu0 %vm2435_vm11, %v2382_v32  ;;  %v1994_v29 = vsel %vm1960_vm4, %v1914_v13, %v5546_v53  ;;  %v4892_v32 = vpack.c.bf16 %v863_v23, %v862_v40  ;;  %v1055_v13 = vld [vmem:[#allocation2 + $0x2f2] sm:$0xff] }
 0x1d0   :  { %v1353_v49 = vpop.permute.xlu0 %1352 }
 0x1d1   :  { %v1355_v42 = vpop.permute.xlu1 %1354  ;;  %v2059_v55 = vsel %vm2025_vm5, %v1994_v29, %v1353_v49 }
 0x1d2   :  { %1656 = vrot.lane.b32.xlu0 %v608_v62, %s3748_s1  ;;  %v1996_v62 = vsel %vm1960_vm4, %v1917_v11, %v5547_v12 }
 0x1d3   :  { %1658 = vrot.lane.b32.xlu1 %v897_v26, %s3748_s1  ;;  %v2061_v31 = vsel %vm2025_vm5, %v1996_v62, %v1355_v42  ;;  %v959_v42 = vld [vmem:[#allocation2 + $0x2f1] sm:$0xff]  ;;  %v314_v62 = vpack.c.bf16 %v270_v50, %v269_v2 }
 0x1d4   :  { %v1449_v38 = vpop.permute.xlu0 %1448 }
 0x1d5   :  { %v1451_v60 = vpop.permute.xlu1 %1450  ;;  %v2124_v61 = vsel %vm2090_vm6, %v2059_v55, %v1449_v38 }
 0x1d6   :  { %1752 = vrot.lane.b32.xlu0 %v704_v59, %s3749_s10  ;;  %v2126_v57 = vsel %vm2090_vm6, %v2061_v31, %v1451_v60 }
 0x1d7   :  { %1754 = vrot.lane.b32.xlu1 %v993_v19, %s3749_s10 }
 0x1d8   :  { %v1545_v37 = vpop.permute.xlu0 %1544 }
 0x1d9   :  { %v1547_v25 = vpop.permute.xlu1 %1546  ;;  %v2189_v59 = vsel %vm2155_vm7, %v2124_v61, %v1545_v37 }
 0x1da   :  { %1848 = vrot.lane.b32.xlu0 %v800_v36, %s3750_s11  ;;  %v2191_v0 = vsel %vm2155_vm7, %v2126_v57, %v1547_v25  ;;  %v4907_v25 = vpack.c.bf16 %v959_v42, %v958_v47  ;;  %v5548_v57 = vld [vmem:[#allocation5_spill] sm:$0xff] }
 0x1db   :  { %1850 = vrot.lane.b32.xlu1 %v1089_v56, %s3750_s11 }
 0x1dc   :  { %v1641_v1 = vpop.permute.xlu0 %1640 }
 0x1dd   :  { %v1643_v17 = vpop.permute.xlu1 %1642  ;;  %v2254_v10 = vsel %vm2220_vm8, %v2189_v59, %v1641_v1 }
 0x1de   :  { %1276 = vrot.lane.b32.xlu0 %v800_v36, %s3744_s27  ;;  %v2256_v43 = vsel %vm2220_vm8, %v2191_v0, %v1643_v17  ;;  %v4879_v36 = vpack.c.bf16 %v766_v18, %v765_v54  ;;  %v5549_v0 = vld [vmem:[#allocation6_spill] sm:$0xff] }
 0x1df   :  { %1278 = vrot.lane.b32.xlu1 %v1089_v56, %s3744_s27 }
 0x1e0   :  { %v1737_v52 = vpop.permute.xlu0 %1736 }
 0x1e1   :  { %v1739_v3 = vpop.permute.xlu1 %1738  ;;  %v2319_v46 = vsel %vm2285_vm9, %v2254_v10, %v1737_v52  ;;  %v4922_v52 = vpack.c.bf16 %v1055_v13, %v1054_v45  ;;  %v1923_v10 = vsel %vm79_vm0, %v314_v62, %v5549_v0  ;;  %v867_v45 = vld [vmem:[#allocation2 + $0x320] sm:$0xff]  ;;  %v273_v62 = vld [vmem:[#allocation2 + $0x228] sm:$0xff] }
 0x1e2   :  { %1372 = vrot.lane.b32.xlu0 %v897_v26, %s3745_s5  ;;  %v2321_v7 = vsel %vm2285_vm9, %v2256_v43, %v1739_v3  ;;  %v962_v0 = vld [vmem:[#allocation2 + $0x319] sm:$0xff] }
 0x1e3   :  { %1374 = vrot.lane.b32.xlu1 %v610_v51, %s3745_s5 }
 0x1e4   :  { %v1833_v34 = vpop.permute.xlu0 %1832 }
 0x1e5   :  { %v1835_v24 = vpop.permute.xlu1 %1834  ;;  %v2384_v63 = vsel %vm2350_vm10, %v2319_v46, %v1833_v34  ;;  %v5551_v46 = vld [vmem:[#allocation24_spill] sm:$0xff] }
 0x1e6   :  { %v2386_v15 = vsel %vm2350_vm10, %v2321_v7, %v1835_v24  ;;  %1468 = vrot.lane.b32.xlu0 %v993_v19, %s3746_s8  ;;  %3690 = vmatprep.mubr.msk.bf16.mxu1 %vm2435_vm11, %v2384_v63  ;;  %v2000_v34 = vsel %vm1960_vm4, %v1923_v10, %v5551_v46  ;;  %v577_v7 = vld [vmem:[#allocation2 + $0x300] sm:$0xff]  ;;  %v578_v24 = vld [vmem:[#allocation2 + $0x308] sm:$0xff] }
 0x1e7   :  { %1470 = vrot.lane.b32.xlu1 %v4867_v21, %s3746_s8  ;;  %v3660_v4 = vpop.f32.mrf.mxu0  ;;  %3691 = vmatmul.mubr.msk.bf16.vlgmr.msra.gmra.mxu1 %vm2435_vm11, %v2386_v15  ;;  %v963_v10 = vld [vmem:[#allocation2 + $0x321] sm:$0xff] }
 0x1e8   :  { %v3555_v28 = vpack.c.bf16 %v3660_v4, %v3660_v4  ;;  %v4881_v8 = vpop.permute.xlu0 %1356  ;;  %v2929_v9 = vmul.f32 %v3660_v4, %v3660_v4  ;;  %v2796_v16 = vsel %vm79_vm0, %v3660_v4, 0.0 }
 0x1e9   :  { %v4883_v39 = vpop.permute.xlu1 %1358  ;;  %v2538_v35 = vpop.f32.mrf.mxu0 }
 0x1ea   :  { %3384 = vst.msk [vmem:[%s5516_s2 + $0x8] sm:$0xf] %vm3381_vm12, %v3555_v28  ;;  %1564 = vrot.lane.b32.xlu0 %v1089_v56, %s3747_s9  ;;  %v3553_v58 = vpack.c.bf16 %v2538_v35, %v2538_v35  ;;  %v2927_v26 = vmul.f32 %v2538_v35, %v2538_v35  ;;  %v2793_v30 = vsel %vm79_vm0, %v2538_v35, 0.0  ;;  %v268_v56 = vld [vmem:[#allocation2 + $0x1e8] sm:$0xff]  ;;  %v2065_v63 = vsel %vm2025_vm5, %v2000_v34, %v4883_v39 }
 0x1eb   :  { %1566 = vrot.lane.b32.xlu1 %v4879_v36, %s3747_s9  ;;  %v3661_v48 = vpop.f32.mrf.mxu0  ;;  %v313_v29 = vpack.c.bf16 %v268_v56, %v267_v5  ;;  %v4950_v35 = vpack.c.bf16 %v578_v24, %v577_v7  ;;  %v5008_v24 = vpack.c.bf16 %v963_v10, %v962_v0  ;;  %v774_v0 = vld [vmem:[#allocation2 + $0x33a] sm:$0xff] }
 0x1ec   :  { %v3556_v49 = vpack.c.bf16 %v3661_v48, %v3661_v48  ;;  %v1453_v41 = vpop.permute.xlu0 %1452  ;;  %3382 = vst.msk [vmem:[%s5516_s2] sm:$0xf] %vm3381_vm12, %v3553_v58  ;;  %v2991_v1 = vsel %vm79_vm0, %v2927_v26, 0.0  ;;  %v2930_v14 = vmul.f32 %v3661_v48, %v3661_v48  ;;  %v2798_v12 = vsel %vm79_vm0, %v3661_v48, 0.0  ;;  %v673_v26 = vld [vmem:[#allocation2 + $0x301] sm:$0xff] }
 0x1ed   :  { %v1455_v19 = vpop.permute.xlu1 %1454  ;;  %v2541_v38 = vpop.f32.mrf.mxu0  ;;  %v1920_v59 = vsel %vm79_vm0, %v313_v29, %v5548_v57 }
 0x1ee   :  { %3385 = vst.msk [vmem:[%s5516_s2 + $0xc] sm:$0xf] %vm3381_vm12, %v3556_v49  ;;  %v2794_v60 = vsel %vm79_vm0, %v2541_v38, 0.0  ;;  %v2928_v27 = vmul.f32 %v2541_v38, %v2541_v38  ;;  %1660 = vrot.lane.b32.xlu0 %v610_v51, %s3748_s1  ;;  %v3554_v37 = vpack.c.bf16 %v2541_v38, %v2541_v38  ;;  %v2994_v51 = vsel %vm79_vm0, %v2929_v9, 0.0  ;;  %v674_v49 = vld [vmem:[#allocation2 + $0x309] sm:$0xff] }
 0x1ef   :  { %v2795_v44 = vadd.f32 %v2794_v60, %v2793_v30  ;;  %1662 = vrot.lane.b32.xlu1 %v4892_v32, %s3748_s1  ;;  %v2996_v6 = vsel %vm79_vm0, %v2930_v14, 0.0  ;;  %v2130_v28 = vsel %vm2090_vm6, %v2065_v63, %v1455_v19  ;;  %v4963_v38 = vpack.c.bf16 %v674_v49, %v673_v26  ;;  %v769_v60 = vld [vmem:[#allocation2 + $0x302] sm:$0xff]  ;;  %v5554_v26 = vld [vmem:[#allocation25_spill] sm:$0xff] }
 0x1f0   :  { %v2992_v22 = vsel %vm79_vm0, %v2928_v27, 0.0  ;;  %v1549_v17 = vpop.permute.xlu0 %1548  ;;  %3383 = vst.msk [vmem:[%s5516_s2 + $0x4] sm:$0xf] %vm3381_vm12, %v3554_v37  ;;  %v770_v27 = vld [vmem:[#allocation2 + $0x30a] sm:$0xff] }
 0x1f1   :  { %v2797_v20 = vadd.f32 %v2796_v16, %v2795_v44  ;;  %v2993_v11 = vadd.f32 %v2992_v22, %v2991_v1  ;;  %v1551_v53 = vpop.permute.xlu1 %1550  ;;  %v4978_v16 = vpack.c.bf16 %v770_v27, %v769_v60 }
 0x1f2   :  { %1756 = vrot.lane.b32.xlu0 %v4867_v21, %s3749_s10  ;;  %v5550_v21 = vld [vmem:[#allocation23_spill] sm:$0xff]  ;;  %v2195_v23 = vsel %vm2155_vm7, %v2130_v28, %v1551_v53 }
 0x1f3   :  { %v2995_v55 = vadd.f32 %v2994_v51, %v2993_v11  ;;  %1758 = vrot.lane.b32.xlu1 %v4907_v25, %s3749_s10  ;;  %v2799_v33 = vadd.f32 %v2798_v12, %v2797_v20  ;;  %v1998_v43 = vsel %vm1960_vm4, %v1920_v59, %v5550_v21  ;;  %v271_v51 = vld [vmem:[#allocation2 + $0x210] sm:$0xff]  ;;  %v272_v12 = vld [vmem:[#allocation2 + $0x218] sm:$0xff] }
 0x1f4   :  { %v1645_v31 = vpop.permute.xlu0 %1644  ;;  %v2063_v54 = vsel %vm2025_vm5, %v1998_v43, %v4881_v8  ;;  %v315_v46 = vpack.c.bf16 %v272_v12, %v271_v51  ;;  %v1058_v28 = vld [vmem:[#allocation2 + $0x31a] sm:$0xff] }
 0x1f5   :  { %v1647_v61 = vpop.permute.xlu1 %1646  ;;  %v2997_v3 = vadd.f32 %v2996_v6, %v2995_v55  ;;  %v2128_v15 = vsel %vm2090_vm6, %v2063_v54, %v1453_v41 }
 0x1f6   :  { %1852 = vrot.lane.b32.xlu0 %v4879_v36, %s3750_s11  ;;  %v2193_v40 = vsel %vm2155_vm7, %v2128_v15, %v1549_v17  ;;  %v2260_v39 = vsel %vm2220_vm8, %v2195_v23, %v1647_v61  ;;  %v866_v17 = vld [vmem:[#allocation2 + $0x318] sm:$0xff] }
 0x1f7   :  { %1854 = vrot.lane.b32.xlu1 %v4922_v52, %s3750_s11  ;;  %v2258_v8 = vsel %vm2220_vm8, %v2193_v40, %v1645_v31  ;;  %v4994_v6 = vpack.c.bf16 %v867_v45, %v866_v17  ;;  %v274_v31 = vld [vmem:[#allocation2 + $0x230] sm:$0xff]  ;;  %v1059_v40 = vld [vmem:[#allocation2 + $0x322] sm:$0xff] }
 0x1f8   :  { %v1741_v18 = vpop.permute.xlu0 %1740 }
 0x1f9   :  { %v1743_v4 = vpop.permute.xlu1 %1742  ;;  %v2323_v58 = vsel %vm2285_vm9, %v2258_v8, %v1741_v18  ;;  %v316_v18 = vpack.c.bf16 %v274_v31, %v273_v62 }
 0x1fa   :  { %1280 = vrot.lane.b32.xlu0 %v4879_v36, %s3744_s27  ;;  %v2325_v41 = vsel %vm2285_vm9, %v2260_v39, %v1743_v4  ;;  %v5552_v39 = vld [vmem:[#allocation7_spill] sm:$0xff] }
 0x1fb   :  { %1282 = vrot.lane.b32.xlu1 %v4922_v52, %s3744_s27 }
 0x1fc   :  { %v1837_v48 = vpop.permute.xlu0 %1836 }
 0x1fd   :  { %v2388_v36 = vsel %vm2350_vm10, %v2323_v58, %v1837_v48  ;;  %v1839_v47 = vpop.permute.xlu1 %1838  ;;  %v1926_v58 = vsel %vm79_vm0, %v315_v46, %v5552_v39 }
 0x1fe   :  { %v2390_v42 = vsel %vm2350_vm10, %v2325_v41, %v1839_v47  ;;  %1376 = vrot.lane.b32.xlu0 %v4892_v32, %s3745_s5  ;;  %3694 = vmatprep.mubr.msk.bf16.mxu1 %vm2435_vm11, %v2388_v36  ;;  %v2002_v49 = vsel %vm1960_vm4, %v1926_v58, %v5554_v26  ;;  %v5021_v41 = vpack.c.bf16 %v1059_v40, %v1058_v28  ;;  %v5555_v36 = vld [vmem:[#allocation26_spill] sm:$0xff]  ;;  %v870_v28 = vld [vmem:[#allocation2 + $0x348] sm:$0xff]  ;;  %v871_v40 = vld [vmem:[#allocation2 + $0x350] sm:$0xff] }
 0x1ff   :  { %1378 = vrot.lane.b32.xlu1 %v4950_v35, %s3745_s5  ;;  %v3664_v19 = vpop.f32.mrf.mxu0  ;;  %3695 = vmatmul.mubr.msk.bf16.gmra.mxu1 %vm2435_vm11, %v2390_v42  ;;  %v277_v26 = vld [vmem:[#allocation2 + $0x258] sm:$0xff] }
 0x200   :  { %v3559_v9 = vpack.c.bf16 %v3664_v19, %v3664_v19  ;;  %v4965_v30 = vpop.permute.xlu0 %1360  ;;  %v2933_v11 = vmul.f32 %v3664_v19, %v3664_v19  ;;  %v2804_v61 = vsel %vm79_vm0, %v3664_v19, 0.0 }
 0x201   :  { %v4967_v5 = vpop.permute.xlu1 %1362  ;;  %v2554_v56 = vpop.f32.mrf.mxu0  ;;  %v2067_v42 = vsel %vm2025_vm5, %v2002_v49, %v4965_v30 }
 0x202   :  { %3388 = vst.msk [vmem:[%s5516_s2 + $0x18] sm:$0xf] %vm3381_vm12, %v3559_v9  ;;  %v2800_v32 = vsel %vm79_vm0, %v2554_v56, 0.0  ;;  %v2931_v2 = vmul.f32 %v2554_v56, %v2554_v56  ;;  %1472 = vrot.lane.b32.xlu0 %v4907_v25, %s3746_s8  ;;  %v3557_v37 = vpack.c.bf16 %v2554_v56, %v2554_v56  ;;  %v3002_v34 = vsel %vm79_vm0, %v2933_v11, 0.0  ;;  %v677_v11 = vld [vmem:[#allocation2 + $0x331] sm:$0xff] }
 0x203   :  { %v2801_v44 = vadd.f32 %v2800_v32, %v2799_v33  ;;  %1474 = vrot.lane.b32.xlu1 %v4963_v38, %s3746_s8  ;;  %v3665_v50 = vpop.f32.mrf.mxu0 }
 0x204   :  { %v2998_v1 = vsel %vm79_vm0, %v2931_v2, 0.0  ;;  %v3560_v14 = vpack.c.bf16 %v3665_v50, %v3665_v50  ;;  %v1457_v22 = vpop.permute.xlu0 %1456  ;;  %3386 = vst.msk [vmem:[%s5516_s2 + $0x10] sm:$0xf] %vm3381_vm12, %v3557_v37  ;;  %v2806_v54 = vsel %vm79_vm0, %v3665_v50, 0.0  ;;  %v581_v37 = vld [vmem:[#allocation2 + $0x330] sm:$0xff] }
 0x205   :  { %v2999_v13 = vadd.f32 %v2998_v1, %v2997_v3  ;;  %v1459_v25 = vpop.permute.xlu1 %1458  ;;  %v2557_v20 = vpop.f32.mrf.mxu0  ;;  %v2934_v3 = vmul.f32 %v3665_v50, %v3665_v50  ;;  %v2132_v9 = vsel %vm2090_vm6, %v2067_v42, %v1457_v22  ;;  %v582_v50 = vld [vmem:[#allocation2 + $0x338] sm:$0xff]  ;;  %v278_v42 = vld [vmem:[#allocation2 + $0x260] sm:$0xff] }
 0x206   :  { %3389 = vst.msk [vmem:[%s5516_s2 + $0x1c] sm:$0xf] %vm3381_vm12, %v3560_v14  ;;  %v2802_v53 = vsel %vm79_vm0, %v2557_v20, 0.0  ;;  %v2932_v29 = vmul.f32 %v2557_v20, %v2557_v20  ;;  %1568 = vrot.lane.b32.xlu0 %v4922_v52, %s3747_s9  ;;  %v3558_v33 = vpack.c.bf16 %v2557_v20, %v2557_v20 }
 0x207   :  { %v2803_v55 = vadd.f32 %v2802_v53, %v2801_v44  ;;  %1570 = vrot.lane.b32.xlu1 %v4978_v16, %s3747_s9  ;;  %v3004_v15 = vsel %vm79_vm0, %v2934_v3, 0.0  ;;  %v678_v53 = vld [vmem:[#allocation2 + $0x339] sm:$0xff] }
 0x208   :  { %v3000_v57 = vsel %vm79_vm0, %v2932_v29, 0.0  ;;  %v1553_v59 = vpop.permute.xlu0 %1552  ;;  %3387 = vst.msk [vmem:[%s5516_s2 + $0x14] sm:$0xf] %vm3381_vm12, %v3558_v33  ;;  %v710_v31 = vpack.c.bf16 %v678_v53, %v677_v11 }
 0x209   :  { %v2805_v52 = vadd.f32 %v2804_v61, %v2803_v55  ;;  %v3001_v21 = vadd.f32 %v3000_v57, %v2999_v13  ;;  %v1555_v43 = vpop.permute.xlu1 %1554  ;;  %v2197_v56 = vsel %vm2155_vm7, %v2132_v9, %v1553_v59  ;;  %v614_v13 = vpack.c.bf16 %v582_v50, %v581_v37  ;;  %v773_v59 = vld [vmem:[#allocation2 + $0x332] sm:$0xff]  ;;  %v966_v9 = vld [vmem:[#allocation2 + $0x349] sm:$0xff] }
 0x20a   :  { %1664 = vrot.lane.b32.xlu0 %v4950_v35, %s3748_s1  ;;  %v5553_v35 = vld [vmem:[#allocation8_spill] sm:$0xff]  ;;  %v5556_v50 = vld [vmem:[#allocation9_spill] sm:$0xff] }
 0x20b   :  { %v3003_v7 = vadd.f32 %v3002_v34, %v3001_v21  ;;  %1666 = vrot.lane.b32.xlu1 %v4994_v6, %s3748_s1  ;;  %v2807_v63 = vadd.f32 %v2806_v54, %v2805_v52  ;;  %v1929_v48 = vsel %vm79_vm0, %v316_v18, %v5553_v35  ;;  %v806_v18 = vpack.c.bf16 %v774_v0, %v773_v59  ;;  %v275_v35 = vld [vmem:[#allocation2 + $0x240] sm:$0xff] }
 0x20c   :  { %v1649_v4 = vpop.permute.xlu0 %1648  ;;  %v2004_v47 = vsel %vm1960_vm4, %v1929_v48, %v5555_v36  ;;  %v276_v48 = vld [vmem:[#allocation2 + $0x248] sm:$0xff]  ;;  %v903_v36 = vpack.c.bf16 %v871_v40, %v870_v28 }
 0x20d   :  { %v1651_v23 = vpop.permute.xlu1 %1650  ;;  %v3005_v8 = vadd.f32 %v3004_v15, %v3003_v7  ;;  %v2262_v2 = vsel %vm2220_vm8, %v2197_v56, %v1649_v4 }
 0x20e   :  { %1760 = vrot.lane.b32.xlu0 %v4963_v38, %s3749_s10  ;;  %v2069_v38 = vsel %vm2025_vm5, %v2004_v47, %v4967_v5 }
 0x20f   :  { %1762 = vrot.lane.b32.xlu1 %v5008_v24, %s3749_s10  ;;  %v2134_v27 = vsel %vm2090_vm6, %v2069_v38, %v1459_v25 }
 0x210   :  { %v1745_v19 = vpop.permute.xlu0 %1744  ;;  %v2199_v32 = vsel %vm2155_vm7, %v2134_v27, %v1555_v43 }
 0x211   :  { %v1747_v60 = vpop.permute.xlu1 %1746  ;;  %v2264_v30 = vsel %vm2220_vm8, %v2199_v32, %v1651_v23  ;;  %v2327_v5 = vsel %vm2285_vm9, %v2262_v2, %v1745_v19  ;;  %v317_v32 = vpack.c.bf16 %v276_v48, %v275_v35 }
 0x212   :  { %1856 = vrot.lane.b32.xlu0 %v4978_v16, %s3750_s11  ;;  %v2329_v1 = vsel %vm2285_vm9, %v2264_v30, %v1747_v60  ;;  %v967_v60 = vld [vmem:[#allocation2 + $0x351] sm:$0xff] }
 0x213   :  { %1858 = vrot.lane.b32.xlu1 %v5021_v41, %s3750_s11  ;;  %v999_v2 = vpack.c.bf16 %v967_v60, %v966_v9 }
 0x214   :  { %v1841_v44 = vpop.permute.xlu0 %1840 }
 0x215   :  { %v2392_v14 = vsel %vm2350_vm10, %v2327_v5, %v1841_v44  ;;  %v1843_v22 = vpop.permute.xlu1 %1842  ;;  %v1062_v5 = vld [vmem:[#allocation2 + $0x34a] sm:$0xff]  ;;  %v1063_v44 = vld [vmem:[#allocation2 + $0x352] sm:$0xff] }
 0x216   :  { %v2394_v17 = vsel %vm2350_vm10, %v2329_v1, %v1843_v22  ;;  %1284 = vrot.lane.b32.xlu0 %v4978_v16, %s3744_s27  ;;  %3698 = vmatprep.mubr.msk.bf16.mxu1 %vm2435_vm11, %v2392_v14  ;;  %v1932_v1 = vsel %vm79_vm0, %v317_v32, %v5556_v50  ;;  %v5557_v14 = vld [vmem:[#allocation10_spill] sm:$0xff]  ;;  %v279_v32 = vld [vmem:[#allocation2 + $0x270] sm:$0xff] }
 0x217   :  { %1286 = vrot.lane.b32.xlu1 %v5021_v41, %s3744_s27  ;;  %v3668_v45 = vpop.f32.mrf.mxu0  ;;  %3699 = vmatmul.mubr.msk.bf16.gmra.mxu1 %vm2435_vm11, %v2394_v17 }
 0x218   :  { %v3563_v25 = vpack.c.bf16 %v3668_v45, %v3668_v45  ;;  %v5049_v20 = vpop.permute.xlu0 %1268  ;;  %v2937_v21 = vmul.f32 %v3668_v45, %v3668_v45  ;;  %v2812_v7 = vsel %vm79_vm0, %v3668_v45, 0.0  ;;  %v1095_v45 = vpack.c.bf16 %v1063_v44, %v1062_v5 }
 0x219   :  { %v5051_v29 = vpop.permute.xlu1 %1270  ;;  %v2570_v51 = vpop.f32.mrf.mxu0  ;;  %v2006_v17 = vsel %vm1960_vm4, %v1932_v1, %v5049_v20 }
 0x21a   :  { %3392 = vst.msk [vmem:[%s5516_s2 + $0x28] sm:$0xf] %vm3381_vm12, %v3563_v25  ;;  %v2808_v16 = vsel %vm79_vm0, %v2570_v51, 0.0  ;;  %v2935_v12 = vmul.f32 %v2570_v51, %v2570_v51  ;;  %1380 = vrot.lane.b32.xlu0 %v4994_v6, %s3745_s5  ;;  %v3561_v55 = vpack.c.bf16 %v2570_v51, %v2570_v51  ;;  %v3010_v39 = vsel %vm79_vm0, %v2937_v21, 0.0 }
 0x21b   :  { %v2809_v62 = vadd.f32 %v2808_v16, %v2807_v63  ;;  %1382 = vrot.lane.b32.xlu1 %v614_v13, %s3745_s5  ;;  %v3669_v33 = vpop.f32.mrf.mxu0 }
 0x21c   :  { %v3006_v61 = vsel %vm79_vm0, %v2935_v12, 0.0  ;;  %v3564_v3 = vpack.c.bf16 %v3669_v33, %v3669_v33  ;;  %v1365_v57 = vpop.permute.xlu0 %1364  ;;  %3390 = vst.msk [vmem:[%s5516_s2 + $0x20] sm:$0xf] %vm3381_vm12, %v3561_v55  ;;  %v2938_v63 = vmul.f32 %v3669_v33, %v3669_v33  ;;  %v2814_v58 = vsel %vm79_vm0, %v3669_v33, 0.0 }
 0x21d   :  { %v3007_v10 = vadd.f32 %v3006_v61, %v3005_v8  ;;  %v1367_v52 = vpop.permute.xlu1 %1366  ;;  %v2573_v6 = vpop.f32.mrf.mxu0  ;;  %v2071_v25 = vsel %vm2025_vm5, %v2006_v17, %v1365_v57 }
 0x21e   :  { %3393 = vst.msk [vmem:[%s5516_s2 + $0x2c] sm:$0xf] %vm3381_vm12, %v3564_v3  ;;  %v2810_v43 = vsel %vm79_vm0, %v2573_v6, 0.0  ;;  %v2936_v46 = vmul.f32 %v2573_v6, %v2573_v6  ;;  %1476 = vrot.lane.b32.xlu0 %v5008_v24, %s3746_s8  ;;  %v3562_v54 = vpack.c.bf16 %v2573_v6, %v2573_v6  ;;  %v3012_v19 = vsel %vm79_vm0, %v2938_v63, 0.0 }
 0x21f   :  { %v2811_v34 = vadd.f32 %v2810_v43, %v2809_v62  ;;  %1478 = vrot.lane.b32.xlu1 %v710_v31, %s3746_s8 }
 0x220   :  { %v3008_v15 = vsel %vm79_vm0, %v2936_v46, 0.0  ;;  %v1461_v4 = vpop.permute.xlu0 %1460  ;;  %3391 = vst.msk [vmem:[%s5516_s2 + $0x24] sm:$0xf] %vm3381_vm12, %v3562_v54 }
 0x221   :  { %v2813_v23 = vadd.f32 %v2812_v7, %v2811_v34  ;;  %v3009_v8 = vadd.f32 %v3008_v15, %v3007_v10  ;;  %v1463_v24 = vpop.permute.xlu1 %1462  ;;  %v2136_v51 = vsel %vm2090_vm6, %v2071_v25, %v1461_v4 }
 0x222   :  { %1572 = vrot.lane.b32.xlu0 %v5021_v41, %s3747_s9  ;;  %v318_v41 = vpack.c.bf16 %v278_v42, %v277_v26 }
 0x223   :  { %v3011_v49 = vadd.f32 %v3010_v39, %v3009_v8  ;;  %1574 = vrot.lane.b32.xlu1 %v806_v18, %s3747_s9  ;;  %v2815_v47 = vadd.f32 %v2814_v58, %v2813_v23 }
 0x224   :  { %v1557_v38 = vpop.permute.xlu0 %1556  ;;  %v1935_v22 = vsel %vm79_vm0, %v318_v41, %v5557_v14  ;;  %v280_v41 = vld [vmem:[#allocation2 + $0x278] sm:$0xff] }
 0x225   :  { %v1559_v27 = vpop.permute.xlu1 %1558  ;;  %v3013_v56 = vadd.f32 %v3012_v19, %v3011_v49  ;;  %v2201_v62 = vsel %vm2155_vm7, %v2136_v51, %v1557_v38 }
 0x226   :  { %1668 = vrot.lane.b32.xlu0 %v614_v13, %s3748_s1  ;;  %v2008_v13 = vsel %vm1960_vm4, %v1935_v22, %v5051_v29  ;;  %v5558_v22 = vld [vmem:[#allocation11_spill] sm:$0xff] }
 0x227   :  { %1670 = vrot.lane.b32.xlu1 %v903_v36, %s3748_s1  ;;  %v2073_v53 = vsel %vm2025_vm5, %v2008_v13, %v1367_v52 }
 0x228   :  { %v1653_v30 = vpop.permute.xlu0 %1652  ;;  %v2138_v12 = vsel %vm2090_vm6, %v2073_v53, %v1463_v24 }
 0x229   :  { %v1655_v37 = vpop.permute.xlu1 %1654  ;;  %v2203_v20 = vsel %vm2155_vm7, %v2138_v12, %v1559_v27  ;;  %v2266_v55 = vsel %vm2220_vm8, %v2201_v62, %v1653_v30  ;;  %v282_v30 = vld [vmem:[#allocation2 + $0x290] sm:$0xff] }
 0x22a   :  { %1764 = vrot.lane.b32.xlu0 %v710_v31, %s3749_s10  ;;  %v2268_v33 = vsel %vm2220_vm8, %v2203_v20, %v1655_v37  ;;  %v319_v37 = vpack.c.bf16 %v280_v41, %v279_v32 }
 0x22b   :  { %1766 = vrot.lane.b32.xlu1 %v999_v2, %s3749_s10  ;;  %v281_v2 = vld [vmem:[#allocation2 + $0x288] sm:$0xff] }
 0x22c   :  { %v1749_v11 = vpop.permute.xlu0 %1748  ;;  %v320_v50 = vpack.c.bf16 %v282_v30, %v281_v2  ;;  %v1938_v17 = vsel %vm79_vm0, %v319_v37, %v5558_v22  ;;  %v283_v2 = vld [vmem:[#allocation2 + $0x2a0] sm:$0xff]  ;;  %v284_v30 = vld [vmem:[#allocation2 + $0x2a8] sm:$0xff] }
 0x22d   :  { %v1751_v16 = vpop.permute.xlu1 %1750  ;;  %v2331_v31 = vsel %vm2285_vm9, %v2266_v55, %v1749_v11 }
 0x22e   :  { %1860 = vrot.lane.b32.xlu0 %v806_v18, %s3750_s11  ;;  %v2333_v57 = vsel %vm2285_vm9, %v2268_v33, %v1751_v16 }
 0x22f   :  { %1862 = vrot.lane.b32.xlu1 %v1095_v45, %s3750_s11  ;;  %v3672_v29 = vpop.f32.mrf.mxu0  ;;  %v5559_v45 = vld [vmem:[#allocation12_spill] sm:$0xff] }
 0x230   :  { %v3567_v61 = vpack.c.bf16 %v3672_v29, %v3672_v29  ;;  %v1845_v3 = vpop.permute.xlu0 %1844  ;;  %v2941_v28 = vmul.f32 %v3672_v29, %v3672_v29  ;;  %v2820_v39 = vsel %vm79_vm0, %v3672_v29, 0.0  ;;  %v1941_v13 = vsel %vm79_vm0, %v320_v50, %v5559_v45 }
 0x231   :  { %v2396_v59 = vsel %vm2350_vm10, %v2331_v31, %v1845_v3  ;;  %v1847_v0 = vpop.permute.xlu1 %1846  ;;  %v2586_v10 = vpop.f32.mrf.mxu0  ;;  %v321_v50 = vpack.c.bf16 %v284_v30, %v283_v2 }
 0x232   :  { %3396 = vst.msk [vmem:[%s5516_s2 + $0x38] sm:$0xf] %vm3381_vm12, %v3567_v61  ;;  %v2398_v52 = vsel %vm2350_vm10, %v2333_v57, %v1847_v0  ;;  %v2816_v6 = vsel %vm79_vm0, %v2586_v10, 0.0  ;;  %v2939_v21 = vmul.f32 %v2586_v10, %v2586_v10  ;;  %3702 = vmatprep.mubr.msk.bf16.mxu1 %vm2435_vm11, %v2396_v59  ;;  %v3565_v46 = vpack.c.bf16 %v2586_v10, %v2586_v10 }
 0x233   :  { %v2817_v43 = vadd.f32 %v2816_v6, %v2815_v47  ;;  %v3673_v34 = vpop.f32.mrf.mxu0  ;;  %3703 = vmatmul.mubr.msk.bf16.gmra.mxu1 %vm2435_vm11, %v2398_v52  ;;  %v3018_v47 = vsel %vm79_vm0, %v2941_v28, 0.0 }
 0x234   :  { %v3014_v54 = vsel %vm79_vm0, %v2939_v21, 0.0  ;;  %v3568_v18 = vpack.c.bf16 %v3673_v34, %v3673_v34  ;;  %v1273_v7 = vpop.permute.xlu0 %1272  ;;  %3394 = vst.msk [vmem:[%s5516_s2 + $0x30] sm:$0xf] %vm3381_vm12, %v3565_v46  ;;  %v2942_v58 = vmul.f32 %v3673_v34, %v3673_v34  ;;  %v2822_v42 = vsel %vm79_vm0, %v3673_v34, 0.0 }
 0x235   :  { %v3015_v63 = vadd.f32 %v3014_v54, %v3013_v56  ;;  %v1275_v15 = vpop.permute.xlu1 %1274  ;;  %v2589_v4 = vpop.f32.mrf.mxu0  ;;  %v2010_v25 = vsel %vm1960_vm4, %v1938_v17, %v1273_v7 }
 0x236   :  { %3397 = vst.msk [vmem:[%s5516_s2 + $0x3c] sm:$0xf] %vm3381_vm12, %v3568_v18  ;;  %v2818_v40 = vsel %vm79_vm0, %v2589_v4, 0.0  ;;  %v2940_v23 = vmul.f32 %v2589_v4, %v2589_v4  ;;  %v3566_v24 = vpack.c.bf16 %v2589_v4, %v2589_v4  ;;  %v3020_v9 = vsel %vm79_vm0, %v2942_v58, 0.0 }
 0x237   :  { %v2819_v8 = vadd.f32 %v2818_v40, %v2817_v43  ;;  %v2012_v53 = vsel %vm1960_vm4, %v1941_v13, %v1275_v15  ;;  %v5560_v13 = vld [vmem:[#allocation13_spill] sm:$0xff] }
 0x238   :  { %v3016_v35 = vsel %vm79_vm0, %v2940_v23, 0.0  ;;  %v1369_v48 = vpop.permute.xlu0 %1368  ;;  %3395 = vst.msk [vmem:[%s5516_s2 + $0x34] sm:$0xf] %vm3381_vm12, %v3566_v24 }
 0x239   :  { %v2821_v26 = vadd.f32 %v2820_v39, %v2819_v8  ;;  %v3017_v49 = vadd.f32 %v3016_v35, %v3015_v63  ;;  %v1371_v36 = vpop.permute.xlu1 %1370  ;;  %v2075_v51 = vsel %vm2025_vm5, %v2010_v25, %v1369_v48  ;;  %v1944_v25 = vsel %vm79_vm0, %v321_v50, %v5560_v13  ;;  %v290_v50 = vld [vmem:[#allocation2 + $0x2f0] sm:$0xff] }
 0x23a   :  { %v2077_v62 = vsel %vm2025_vm5, %v2012_v53, %v1371_v36 }
 0x23b   :  { %v3019_v19 = vadd.f32 %v3018_v47, %v3017_v49  ;;  %v2823_v38 = vadd.f32 %v2822_v42, %v2821_v26 }
 0x23c   :  { %v1465_v60 = vpop.permute.xlu0 %1464 }
 0x23d   :  { %v1467_v27 = vpop.permute.xlu1 %1466  ;;  %v3021_v56 = vadd.f32 %v3020_v9, %v3019_v19  ;;  %v2140_v20 = vsel %vm2090_vm6, %v2075_v51, %v1465_v60  ;;  %v5561_v51 = vld [vmem:[#allocation14_spill] sm:$0xff] }
 0x23e   :  { %v2142_v33 = vsel %vm2090_vm6, %v2077_v62, %v1467_v27 }
 0x240   :  { %v1561_v5 = vpop.permute.xlu0 %1560 }
 0x241   :  { %v1563_v44 = vpop.permute.xlu1 %1562  ;;  %v2205_v31 = vsel %vm2155_vm7, %v2140_v20, %v1561_v5  ;;  %v285_v5 = vld [vmem:[#allocation2 + $0x2b8] sm:$0xff] }
 0x242   :  { %v2207_v57 = vsel %vm2155_vm7, %v2142_v33, %v1563_v44  ;;  %v286_v44 = vld [vmem:[#allocation2 + $0x2c0] sm:$0xff] }
 0x244   :  { %v1657_v1 = vpop.permute.xlu0 %1656 }
 0x245   :  { %v1659_v14 = vpop.permute.xlu1 %1658  ;;  %v2270_v59 = vsel %vm2220_vm8, %v2205_v31, %v1657_v1 }
 0x246   :  { %v2272_v6 = vsel %vm2220_vm8, %v2207_v57, %v1659_v14  ;;  %v322_v14 = vpack.c.bf16 %v286_v44, %v285_v5  ;;  %v287_v5 = vld [vmem:[#allocation2 + $0x2d0] sm:$0xff]  ;;  %v288_v44 = vld [vmem:[#allocation2 + $0x2d8] sm:$0xff] }
 0x247   :  { %v3676_v11 = vpop.f32.mrf.mxu0 }
 0x248   :  { %v3571_v16 = vpack.c.bf16 %v3676_v11, %v3676_v11  ;;  %v1753_v12 = vpop.permute.xlu0 %1752  ;;  %v2945_v4 = vmul.f32 %v3676_v11, %v3676_v11  ;;  %v2828_v39 = vsel %vm79_vm0, %v3676_v11, 0.0 }
 0x249   :  { %v1755_v55 = vpop.permute.xlu1 %1754  ;;  %v2602_v29 = vpop.f32.mrf.mxu0  ;;  %v2335_v21 = vsel %vm2285_vm9, %v2270_v59, %v1753_v12 }
 0x24a   :  { %3400 = vst.msk [vmem:[%s5516_s2 + $0x48] sm:$0xf] %vm3381_vm12, %v3571_v16  ;;  %v2824_v61 = vsel %vm79_vm0, %v2602_v29, 0.0  ;;  %v2943_v3 = vmul.f32 %v2602_v29, %v2602_v29  ;;  %v3569_v10 = vpack.c.bf16 %v2602_v29, %v2602_v29  ;;  %v2337_v54 = vsel %vm2285_vm9, %v2272_v6, %v1755_v55 }
 0x24b   :  { %v2825_v0 = vadd.f32 %v2824_v61, %v2823_v38  ;;  %v3677_v52 = vpop.f32.mrf.mxu0  ;;  %v3026_v47 = vsel %vm79_vm0, %v2945_v4, 0.0  ;;  %v1947_v16 = vsel %vm79_vm0, %v322_v14, %v5561_v51 }
 0x24c   :  { %v3022_v43 = vsel %vm79_vm0, %v2943_v3, 0.0  ;;  %v3572_v46 = vpack.c.bf16 %v3677_v52, %v3677_v52  ;;  %v1849_v34 = vpop.permute.xlu0 %1848  ;;  %3398 = vst.msk [vmem:[%s5516_s2 + $0x40] sm:$0xf] %vm3381_vm12, %v3569_v10  ;;  %v2946_v58 = vmul.f32 %v3677_v52, %v3677_v52  ;;  %v2830_v42 = vsel %vm79_vm0, %v3677_v52, 0.0 }
 0x24d   :  { %v3023_v18 = vadd.f32 %v3022_v43, %v3021_v56  ;;  %v2400_v7 = vsel %vm2350_vm10, %v2335_v21, %v1849_v34  ;;  %v1851_v63 = vpop.permute.xlu1 %1850  ;;  %v2605_v15 = vpop.f32.mrf.mxu0 }
 0x24e   :  { %3401 = vst.msk [vmem:[%s5516_s2 + $0x4c] sm:$0xf] %vm3381_vm12, %v3572_v46  ;;  %v2402_v28 = vsel %vm2350_vm10, %v2337_v54, %v1851_v63  ;;  %v2826_v40 = vsel %vm79_vm0, %v2605_v15, 0.0  ;;  %v2944_v23 = vmul.f32 %v2605_v15, %v2605_v15  ;;  %3706 = vmatprep.mubr.msk.bf16.mxu1 %vm2435_vm11, %v2400_v7  ;;  %v3570_v24 = vpack.c.bf16 %v2605_v15, %v2605_v15 }
 0x24f   :  { %v2827_v8 = vadd.f32 %v2826_v40, %v2825_v0  ;;  %3707 = vmatmul.mubr.msk.bf16.gmra.mxu1 %vm2435_vm11, %v2402_v28  ;;  %v3028_v9 = vsel %vm79_vm0, %v2946_v58, 0.0 }
 0x250   :  { %v3024_v35 = vsel %vm79_vm0, %v2944_v23, 0.0  ;;  %v1277_v48 = vpop.permute.xlu0 %1276  ;;  %3399 = vst.msk [vmem:[%s5516_s2 + $0x44] sm:$0xf] %vm3381_vm12, %v3570_v24 }
 0x251   :  { %v2829_v26 = vadd.f32 %v2828_v39, %v2827_v8  ;;  %v3025_v49 = vadd.f32 %v3024_v35, %v3023_v18  ;;  %v1279_v36 = vpop.permute.xlu1 %1278  ;;  %v2014_v12 = vsel %vm1960_vm4, %v1944_v25, %v1277_v48 }
 0x252   :  { %v2016_v55 = vsel %vm1960_vm4, %v1947_v16, %v1279_v36 }
 0x253   :  { %v3027_v19 = vadd.f32 %v3026_v47, %v3025_v49  ;;  %v2831_v38 = vadd.f32 %v2830_v42, %v2829_v26 }
 0x254   :  { %v1373_v60 = vpop.permute.xlu0 %1372 }
 0x255   :  { %v1375_v27 = vpop.permute.xlu1 %1374  ;;  %v3029_v56 = vadd.f32 %v3028_v9, %v3027_v19  ;;  %v2079_v29 = vsel %vm2025_vm5, %v2014_v12, %v1373_v60 }
 0x256   :  { %v2081_v3 = vsel %vm2025_vm5, %v2016_v55, %v1375_v27 }
 0x258   :  { %v1469_v32 = vpop.permute.xlu0 %1468 }
 0x259   :  { %v1471_v41 = vpop.permute.xlu1 %1470  ;;  %v2144_v57 = vsel %vm2090_vm6, %v2079_v29, %v1469_v32  ;;  %v5562_v29 = vld [vmem:[#allocation15_spill] sm:$0xff] }
 0x25a   :  { %v2146_v52 = vsel %vm2090_vm6, %v2081_v3, %v1471_v41 }
 0x25c   :  { %v1565_v37 = vpop.permute.xlu0 %1564 }
 0x25d   :  { %v1567_v1 = vpop.permute.xlu1 %1566  ;;  %v2209_v6 = vsel %vm2155_vm7, %v2144_v57, %v1565_v37  ;;  %v289_v37 = vld [vmem:[#allocation2 + $0x2e8] sm:$0xff] }
 0x25e   :  { %v2211_v34 = vsel %vm2155_vm7, %v2146_v52, %v1567_v1  ;;  %v324_v25 = vpack.c.bf16 %v290_v50, %v289_v37  ;;  %v5563_v57 = vld [vmem:[#allocation16_spill] sm:$0xff] }
 0x25f   :  { %v3680_v22 = vpop.f32.mrf.mxu0 }
 0x260   :  { %v3575_v17 = vpack.c.bf16 %v3680_v22, %v3680_v22  ;;  %v1661_v45 = vpop.permute.xlu0 %1660  ;;  %v2949_v54 = vmul.f32 %v3680_v22, %v3680_v22  ;;  %v2836_v63 = vsel %vm79_vm0, %v3680_v22, 0.0 }
 0x261   :  { %v1663_v11 = vpop.permute.xlu1 %1662  ;;  %v2618_v53 = vpop.f32.mrf.mxu0  ;;  %v2274_v15 = vsel %vm2220_vm8, %v2209_v6, %v1661_v45 }
 0x262   :  { %3404 = vst.msk [vmem:[%s5516_s2 + $0x58] sm:$0xf] %vm3381_vm12, %v3575_v17  ;;  %v2832_v62 = vsel %vm79_vm0, %v2618_v53, 0.0  ;;  %v2947_v20 = vmul.f32 %v2618_v53, %v2618_v53  ;;  %v3573_v31 = vpack.c.bf16 %v2618_v53, %v2618_v53  ;;  %v2276_v40 = vsel %vm2220_vm8, %v2211_v34, %v1663_v11 }
 0x263   :  { %v2833_v33 = vadd.f32 %v2832_v62, %v2831_v38  ;;  %v3681_v61 = vpop.f32.mrf.mxu0  ;;  %v3034_v36 = vsel %vm79_vm0, %v2949_v54, 0.0  ;;  %v323_v17 = vpack.c.bf16 %v288_v44, %v287_v5 }
 0x264   :  { %v3030_v59 = vsel %vm79_vm0, %v2947_v20, 0.0  ;;  %v3576_v0 = vpack.c.bf16 %v3681_v61, %v3681_v61  ;;  %v1757_v10 = vpop.permute.xlu0 %1756  ;;  %3402 = vst.msk [vmem:[%s5516_s2 + $0x50] sm:$0xf] %vm3381_vm12, %v3573_v31  ;;  %v2950_v23 = vmul.f32 %v3681_v61, %v3681_v61  ;;  %v2838_v47 = vsel %vm79_vm0, %v3681_v61, 0.0 }
 0x265   :  { %v3031_v21 = vadd.f32 %v3030_v59, %v3029_v56  ;;  %v1759_v43 = vpop.permute.xlu1 %1758  ;;  %v2621_v46 = vpop.f32.mrf.mxu0  ;;  %v2339_v8 = vsel %vm2285_vm9, %v2274_v15, %v1757_v10  ;;  %v1953_v59 = vsel %vm79_vm0, %v324_v25, %v5563_v57 }
 0x266   :  { %3405 = vst.msk [vmem:[%s5516_s2 + $0x5c] sm:$0xf] %vm3381_vm12, %v3576_v0  ;;  %v2834_v18 = vsel %vm79_vm0, %v2621_v46, 0.0  ;;  %v2948_v7 = vmul.f32 %v2621_v46, %v2621_v46  ;;  %v3574_v28 = vpack.c.bf16 %v2621_v46, %v2621_v46  ;;  %v2341_v58 = vsel %vm2285_vm9, %v2276_v40, %v1759_v43 }
 0x267   :  { %v2835_v4 = vadd.f32 %v2834_v18, %v2833_v33  ;;  %v3036_v9 = vsel %vm79_vm0, %v2950_v23, 0.0  ;;  %v1950_v33 = vsel %vm79_vm0, %v323_v17, %v5562_v29  ;;  %v291_v17 = vld [vmem:[#allocation2 + $0x300] sm:$0xff] }
 0x268   :  { %v3032_v24 = vsel %vm79_vm0, %v2948_v7, 0.0  ;;  %v1853_v39 = vpop.permute.xlu0 %1852  ;;  %3403 = vst.msk [vmem:[%s5516_s2 + $0x54] sm:$0xf] %vm3381_vm12, %v3574_v28 }
 0x269   :  { %v2837_v35 = vadd.f32 %v2836_v63, %v2835_v4  ;;  %v3033_v48 = vadd.f32 %v3032_v24, %v3031_v21  ;;  %v2404_v26 = vsel %vm2350_vm10, %v2339_v8, %v1853_v39  ;;  %v1855_v49 = vpop.permute.xlu1 %1854 }
 0x26a   :  { %v2406_v42 = vsel %vm2350_vm10, %v2341_v58, %v1855_v49  ;;  %3710 = vmatprep.mubr.msk.bf16.mxu1 %vm2435_vm11, %v2404_v26 }
 0x26b   :  { %v3035_v19 = vadd.f32 %v3034_v36, %v3033_v48  ;;  %3711 = vmatmul.mubr.msk.bf16.gmra.mxu1 %vm2435_vm11, %v2406_v42  ;;  %v2839_v38 = vadd.f32 %v2838_v47, %v2837_v35 }
 0x26c   :  { %v1281_v60 = vpop.permute.xlu0 %1280 }
 0x26d   :  { %v1283_v27 = vpop.permute.xlu1 %1282  ;;  %v3037_v56 = vadd.f32 %v3036_v9, %v3035_v19  ;;  %v2018_v6 = vsel %vm1960_vm4, %v1950_v33, %v1281_v60 }
 0x26e   :  { %v2020_v21 = vsel %vm1960_vm4, %v1953_v59, %v1283_v27 }
 0x270   :  { %v1377_v32 = vpop.permute.xlu0 %1376 }
 0x271   :  { %v1379_v41 = vpop.permute.xlu1 %1378  ;;  %v2083_v34 = vsel %vm2025_vm5, %v2018_v6, %v1377_v32 }
 0x272   :  { %v2085_v15 = vsel %vm2025_vm5, %v2020_v21, %v1379_v41 }
 0x274   :  { %v1473_v2 = vpop.permute.xlu0 %1472 }
 0x275   :  { %v1475_v30 = vpop.permute.xlu1 %1474  ;;  %v2148_v4 = vsel %vm2090_vm6, %v2083_v34, %v1473_v2 }
 0x276   :  { %v2150_v8 = vsel %vm2090_vm6, %v2085_v15, %v1475_v30  ;;  %v5565_v15 = vld [vmem:[#allocation18_spill] sm:$0xff] }
 0x277   :  { %v3684_v1 = vpop.f32.mrf.mxu0 }
 0x278   :  { %v3579_v14 = vpack.c.bf16 %v3684_v1, %v3684_v1  ;;  %v1569_v22 = vpop.permute.xlu0 %1568  ;;  %v2953_v0 = vmul.f32 %v3684_v1, %v3684_v1  ;;  %v2844_v54 = vsel %vm79_vm0, %v3684_v1, 0.0 }
 0x279   :  { %v1571_v45 = vpop.permute.xlu1 %1570  ;;  %v2634_v13 = vpop.f32.mrf.mxu0  ;;  %v2213_v39 = vsel %vm2155_vm7, %v2148_v4, %v1569_v22 }
 0x27a   :  { %3408 = vst.msk [vmem:[%s5516_s2 + $0x68] sm:$0xf] %vm3381_vm12, %v3579_v14  ;;  %v2840_v11 = vsel %vm79_vm0, %v2634_v13, 0.0  ;;  %v2951_v53 = vmul.f32 %v2634_v13, %v2634_v13  ;;  %v3577_v16 = vpack.c.bf16 %v2634_v13, %v2634_v13  ;;  %v3042_v24 = vsel %vm79_vm0, %v2953_v0, 0.0 }
 0x27b   :  { %v2841_v51 = vadd.f32 %v2840_v11, %v2839_v38  ;;  %v3685_v12 = vpop.f32.mrf.mxu0  ;;  %v2215_v35 = vsel %vm2155_vm7, %v2150_v8, %v1571_v45  ;;  %v292_v45 = vld [vmem:[#allocation2 + $0x308] sm:$0xff] }
 0x27c   :  { %v3038_v62 = vsel %vm79_vm0, %v2951_v53, 0.0  ;;  %v3580_v20 = vpack.c.bf16 %v3685_v12, %v3685_v12  ;;  %v1665_v55 = vpop.permute.xlu0 %1664  ;;  %3406 = vst.msk [vmem:[%s5516_s2 + $0x60] sm:$0xf] %vm3381_vm12, %v3577_v16  ;;  %v2954_v18 = vmul.f32 %v3685_v12, %v3685_v12  ;;  %v2846_v58 = vsel %vm79_vm0, %v3685_v12, 0.0  ;;  %v293_v53 = vld [vmem:[#allocation2 + $0x318] sm:$0xff] }
 0x27d   :  { %v3039_v31 = vadd.f32 %v3038_v62, %v3037_v56  ;;  %v1667_v61 = vpop.permute.xlu1 %1666  ;;  %v2637_v3 = vpop.f32.mrf.mxu0  ;;  %v2278_v48 = vsel %vm2220_vm8, %v2213_v39, %v1665_v55  ;;  %v325_v33 = vpack.c.bf16 %v292_v45, %v291_v17 }
 0x27e   :  { %3409 = vst.msk [vmem:[%s5516_s2 + $0x6c] sm:$0xf] %vm3381_vm12, %v3580_v20  ;;  %v2842_v10 = vsel %vm79_vm0, %v2637_v3, 0.0  ;;  %v2952_v52 = vmul.f32 %v2637_v3, %v2637_v3  ;;  %v3578_v46 = vpack.c.bf16 %v2637_v3, %v2637_v3  ;;  %v3044_v36 = vsel %vm79_vm0, %v2954_v18, 0.0 }
 0x27f   :  { %v2843_v43 = vadd.f32 %v2842_v10, %v2841_v51  ;;  %v2280_v47 = vsel %vm2220_vm8, %v2215_v35, %v1667_v61  ;;  %v294_v51 = vld [vmem:[#allocation2 + $0x320] sm:$0xff] }
 0x280   :  { %v3040_v7 = vsel %vm79_vm0, %v2952_v52, 0.0  ;;  %v1761_v63 = vpop.permute.xlu0 %1760  ;;  %3407 = vst.msk [vmem:[%s5516_s2 + $0x64] sm:$0xf] %vm3381_vm12, %v3578_v46  ;;  %v326_v57 = vpack.c.bf16 %v294_v51, %v293_v53 }
 0x281   :  { %v2845_v28 = vadd.f32 %v2844_v54, %v2843_v43  ;;  %v3041_v40 = vadd.f32 %v3040_v7, %v3039_v31  ;;  %v1763_v23 = vpop.permute.xlu1 %1762  ;;  %v2343_v42 = vsel %vm2285_vm9, %v2278_v48, %v1761_v63  ;;  %v5564_v54 = vld [vmem:[#allocation17_spill] sm:$0xff] }
 0x282   :  { %v2345_v38 = vsel %vm2285_vm9, %v2280_v47, %v1763_v23  ;;  %v1956_v18 = vsel %vm79_vm0, %v325_v33, %v5564_v54  ;;  %v1959_v4 = vsel %vm79_vm0, %v326_v57, %v5565_v15 }
 0x283   :  { %v3043_v26 = vadd.f32 %v3042_v24, %v3041_v40  ;;  %v2847_v49 = vadd.f32 %v2846_v58, %v2845_v28 }
 0x284   :  { %v1857_v19 = vpop.permute.xlu0 %1856 }
 0x285   :  { %v2408_v9 = vsel %vm2350_vm10, %v2343_v42, %v1857_v19  ;;  %v1859_v60 = vpop.permute.xlu1 %1858  ;;  %v3045_v27 = vadd.f32 %v3044_v36, %v3043_v26 }
 0x286   :  { %v2410_v56 = vsel %vm2350_vm10, %v2345_v38, %v1859_v60  ;;  %3714 = vmatprep.mubr.msk.bf16.mxu1 %vm2435_vm11, %v2408_v9 }
 0x287   :  { %3715 = vmatmul.mubr.msk.bf16.gmra.mxu1 %vm2435_vm11, %v2410_v56 }
 0x288   :  { %v1285_v32 = vpop.permute.xlu0 %1284 }
 0x289   :  { %v1287_v41 = vpop.permute.xlu1 %1286  ;;  %v2022_v28 = vsel %vm1960_vm4, %v1956_v18, %v1285_v32 }
 0x28a   :  { %v2024_v8 = vsel %vm1960_vm4, %v1959_v4, %v1287_v41 }
 0x28c   :  { %v1381_v2 = vpop.permute.xlu0 %1380 }
 0x28d   :  { %v1383_v30 = vpop.permute.xlu1 %1382  ;;  %v2087_v24 = vsel %vm2025_vm5, %v2022_v28, %v1381_v2 }
 0x28e   :  { %v2089_v35 = vsel %vm2025_vm5, %v2024_v8, %v1383_v30 }
 0x28f   :  { %v3688_v5 = vpop.f32.mrf.mxu0 }
 0x290   :  { %v3583_v44 = vpack.c.bf16 %v3688_v5, %v3688_v5  ;;  %v1477_v37 = vpop.permute.xlu0 %1476  ;;  %v2957_v31 = vmul.f32 %v3688_v5, %v3688_v5  ;;  %v2852_v10 = vsel %vm79_vm0, %v3688_v5, 0.0 }
 0x291   :  { %v1479_v50 = vpop.permute.xlu1 %1478  ;;  %v2650_v1 = vpop.f32.mrf.mxu0  ;;  %v2152_v48 = vsel %vm2090_vm6, %v2087_v24, %v1477_v37 }
 0x292   :  { %3412 = vst.msk [vmem:[%s5516_s2 + $0x78] sm:$0xf] %vm3381_vm12, %v3583_v44  ;;  %v2848_v14 = vsel %vm79_vm0, %v2650_v1, 0.0  ;;  %v2955_v22 = vmul.f32 %v2650_v1, %v2650_v1  ;;  %v3581_v25 = vpack.c.bf16 %v2650_v1, %v2650_v1  ;;  %v3050_v7 = vsel %vm79_vm0, %v2957_v31, 0.0 }
 0x293   :  { %v2849_v13 = vadd.f32 %v2848_v14, %v2847_v49  ;;  %v3689_v11 = vpop.f32.mrf.mxu0  ;;  %v2154_v36 = vsel %vm2090_vm6, %v2089_v35, %v1479_v50 }
 0x294   :  { %v3046_v16 = vsel %vm79_vm0, %v2955_v22, 0.0  ;;  %v3584_v12 = vpack.c.bf16 %v3689_v11, %v3689_v11  ;;  %v1573_v62 = vpop.permute.xlu0 %1572  ;;  %3410 = vst.msk [vmem:[%s5516_s2 + $0x70] sm:$0xf] %vm3381_vm12, %v3581_v25  ;;  %v2958_v52 = vmul.f32 %v3689_v11, %v3689_v11  ;;  %v2854_v63 = vsel %vm79_vm0, %v3689_v11, 0.0 }
 0x295   :  { %v3047_v20 = vadd.f32 %v3046_v16, %v3045_v27  ;;  %v1575_v55 = vpop.permute.xlu1 %1574  ;;  %v2653_v29 = vpop.f32.mrf.mxu0  ;;  %v2217_v47 = vsel %vm2155_vm7, %v2152_v48, %v1573_v62 }
 0x296   :  { %3413 = vst.msk [vmem:[%s5516_s2 + $0x7c] sm:$0xf] %vm3381_vm12, %v3584_v12  ;;  %v2850_v61 = vsel %vm79_vm0, %v2653_v29, 0.0  ;;  %v2956_v3 = vmul.f32 %v2653_v29, %v2653_v29  ;;  %v3582_v0 = vpack.c.bf16 %v2653_v29, %v2653_v29  ;;  %v3052_v39 = vsel %vm79_vm0, %v2958_v52, 0.0 }
 0x297   :  { %v2851_v59 = vadd.f32 %v2850_v61, %v2849_v13  ;;  %v2219_v42 = vsel %vm2155_vm7, %v2154_v36, %v1575_v55 }
 0x298   :  { %v3048_v6 = vsel %vm79_vm0, %v2956_v3, 0.0  ;;  %v1669_v21 = vpop.permute.xlu0 %1668  ;;  %3411 = vst.msk [vmem:[%s5516_s2 + $0x74] sm:$0xf] %vm3381_vm12, %v3582_v0 }
 0x299   :  { %v2853_v43 = vadd.f32 %v2852_v10, %v2851_v59  ;;  %v3049_v46 = vadd.f32 %v3048_v6, %v3047_v20  ;;  %v1671_v34 = vpop.permute.xlu1 %1670  ;;  %v2282_v19 = vsel %vm2220_vm8, %v2217_v47, %v1669_v21 }
 0x29a   :  { %v2284_v38 = vsel %vm2220_vm8, %v2219_v42, %v1671_v34 }
 0x29b   :  { %v3051_v40 = vadd.f32 %v3050_v7, %v3049_v46  ;;  %v2855_v23 = vadd.f32 %v2854_v63, %v2853_v43 }
 0x29c   :  { %v1765_v58 = vpop.permute.xlu0 %1764 }
 0x29d   :  { %v1767_v26 = vpop.permute.xlu1 %1766  ;;  %v3053_v49 = vadd.f32 %v3052_v39, %v3051_v40  ;;  %v2347_v9 = vsel %vm2285_vm9, %v2282_v19, %v1765_v58 }
 0x29e   :  { %v2349_v27 = vsel %vm2285_vm9, %v2284_v38, %v1767_v26 }
 0x2a0   :  { %v1861_v60 = vpop.permute.xlu0 %1860 }
 0x2a1   :  { %v2412_v56 = vsel %vm2350_vm10, %v2347_v9, %v1861_v60  ;;  %v1863_v32 = vpop.permute.xlu1 %1862 }
 0x2a2   :  { %v2414_v41 = vsel %vm2350_vm10, %v2349_v27, %v1863_v32  ;;  %3718 = vmatprep.mubr.msk.bf16.mxu1 %vm2435_vm11, %v2412_v56 }
 0x2a3   :  { %3719 = vmatmul.mubr.msk.bf16.gmra.mxu1 %vm2435_vm11, %v2414_v41 }
 0x2a7   :  { %v3692_v2 = vpop.f32.mrf.mxu1 }
 0x2a8   :  { %v3587_v30 = vpack.c.bf16 %v3692_v2, %v3692_v2  ;;  %v2961_v25 = vmul.f32 %v3692_v2, %v3692_v2  ;;  %v2860_v12 = vsel %vm79_vm0, %v3692_v2, 0.0 }
 0x2a9   :  { %v2666_v5 = vpop.f32.mrf.mxu1 }
 0x2aa   :  { %3416 = vst.msk [vmem:[%s5516_s2 + $0x88] sm:$0xf] %vm3381_vm12, %v3587_v30  ;;  %v2856_v44 = vsel %vm79_vm0, %v2666_v5, 0.0  ;;  %v2959_v37 = vmul.f32 %v2666_v5, %v2666_v5  ;;  %v3585_v50 = vpack.c.bf16 %v2666_v5, %v2666_v5  ;;  %v3058_v33 = vsel %vm79_vm0, %v2961_v25, 0.0 }
 0x2ab   :  { %v2857_v1 = vadd.f32 %v2856_v44, %v2855_v23  ;;  %v3693_v14 = vpop.f32.mrf.mxu1 }
 0x2ac   :  { %v3054_v22 = vsel %vm79_vm0, %v2959_v37, 0.0  ;;  %3414 = vst.msk [vmem:[%s5516_s2 + $0x80] sm:$0xf] %vm3381_vm12, %v3585_v50  ;;  %v3588_v17 = vpack.c.bf16 %v3693_v14, %v3693_v14  ;;  %v2962_v62 = vmul.f32 %v3693_v14, %v3693_v14  ;;  %v2862_v31 = vsel %vm79_vm0, %v3693_v14, 0.0 }
 0x2ad   :  { %v3055_v45 = vadd.f32 %v3054_v22, %v3053_v49  ;;  %v2669_v13 = vpop.f32.mrf.mxu1 }
 0x2ae   :  { %3417 = vst.msk [vmem:[%s5516_s2 + $0x8c] sm:$0xf] %vm3381_vm12, %v3588_v17  ;;  %v2858_v11 = vsel %vm79_vm0, %v2669_v13, 0.0  ;;  %v2960_v53 = vmul.f32 %v2669_v13, %v2669_v13  ;;  %v3586_v51 = vpack.c.bf16 %v2669_v13, %v2669_v13  ;;  %v3060_v57 = vsel %vm79_vm0, %v2962_v62, 0.0 }
 0x2af   :  { %v2859_v16 = vadd.f32 %v2858_v11, %v2857_v1 }
 0x2b0   :  { %v3056_v20 = vsel %vm79_vm0, %v2960_v53, 0.0  ;;  %3415 = vst.msk [vmem:[%s5516_s2 + $0x84] sm:$0xf] %vm3381_vm12, %v3586_v51 }
 0x2b1   :  { %v2861_v55 = vadd.f32 %v2860_v12, %v2859_v16  ;;  %v3057_v29 = vadd.f32 %v3056_v20, %v3055_v45 }
 0x2b3   :  { %v3059_v61 = vadd.f32 %v3058_v33, %v3057_v29  ;;  %v2863_v3 = vadd.f32 %v2862_v31, %v2861_v55 }
 0x2b5   :  { %v3061_v59 = vadd.f32 %v3060_v57, %v3059_v61 }
 0x2bf   :  { %v3696_v0 = vpop.f32.mrf.mxu1 }
 0x2c0   :  { %v3591_v10 = vpack.c.bf16 %v3696_v0, %v3696_v0  ;;  %v2965_v15 = vmul.f32 %v3696_v0, %v3696_v0  ;;  %v2868_v8 = vsel %vm79_vm0, %v3696_v0, 0.0 }
 0x2c1   :  { %v2682_v52 = vpop.f32.mrf.mxu1 }
 0x2c2   :  { %3420 = vst.msk [vmem:[%s5516_s2 + $0x98] sm:$0xf] %vm3381_vm12, %v3591_v10  ;;  %v2864_v6 = vsel %vm79_vm0, %v2682_v52, 0.0  ;;  %v2963_v21 = vmul.f32 %v2682_v52, %v2682_v52  ;;  %v3589_v43 = vpack.c.bf16 %v2682_v52, %v2682_v52  ;;  %v3066_v48 = vsel %vm79_vm0, %v2965_v15, 0.0 }
 0x2c3   :  { %v2865_v46 = vadd.f32 %v2864_v6, %v2863_v3  ;;  %v3697_v34 = vpop.f32.mrf.mxu1 }
 0x2c4   :  { %v3062_v54 = vsel %vm79_vm0, %v2963_v21, 0.0  ;;  %3418 = vst.msk [vmem:[%s5516_s2 + $0x90] sm:$0xf] %vm3381_vm12, %v3589_v43  ;;  %v3592_v18 = vpack.c.bf16 %v3697_v34, %v3697_v34  ;;  %v2966_v24 = vmul.f32 %v3697_v34, %v3697_v34  ;;  %v2870_v26 = vsel %vm79_vm0, %v3697_v34, 0.0 }
 0x2c5   :  { %v3063_v7 = vadd.f32 %v3062_v54, %v3061_v59  ;;  %v2685_v63 = vpop.f32.mrf.mxu1 }
 0x2c6   :  { %3421 = vst.msk [vmem:[%s5516_s2 + $0x9c] sm:$0xf] %vm3381_vm12, %v3592_v18  ;;  %v2866_v4 = vsel %vm79_vm0, %v2685_v63, 0.0  ;;  %v2964_v28 = vmul.f32 %v2685_v63, %v2685_v63  ;;  %v3590_v40 = vpack.c.bf16 %v2685_v63, %v2685_v63  ;;  %v3068_v47 = vsel %vm79_vm0, %v2966_v24, 0.0 }
 0x2c7   :  { %v2867_v23 = vadd.f32 %v2866_v4, %v2865_v46 }
 0x2c8   :  { %v3064_v39 = vsel %vm79_vm0, %v2964_v28, 0.0  ;;  %3419 = vst.msk [vmem:[%s5516_s2 + $0x94] sm:$0xf] %vm3381_vm12, %v3590_v40 }
 0x2c9   :  { %v2869_v58 = vadd.f32 %v2868_v8, %v2867_v23  ;;  %v3065_v35 = vadd.f32 %v3064_v39, %v3063_v7 }
 0x2cb   :  { %v3067_v49 = vadd.f32 %v3066_v48, %v3065_v35  ;;  %v2871_v36 = vadd.f32 %v2870_v26, %v2869_v58 }
 0x2cd   :  { %v3069_v42 = vadd.f32 %v3068_v47, %v3067_v49 }
 0x2d7   :  { %v3700_v19 = vpop.f32.mrf.mxu1 }
 0x2d8   :  { %v3595_v38 = vpack.c.bf16 %v3700_v19, %v3700_v19  ;;  %v2969_v37 = vmul.f32 %v3700_v19, %v3700_v19  ;;  %v2876_v17 = vsel %vm79_vm0, %v3700_v19, 0.0 }
 0x2d9   :  { %v2698_v9 = vpop.f32.mrf.mxu1 }
 0x2da   :  { %3424 = vst.msk [vmem:[%s5516_s2 + $0xa8] sm:$0xf] %vm3381_vm12, %v3595_v38  ;;  %v2872_v60 = vsel %vm79_vm0, %v2698_v9, 0.0  ;;  %v2967_v27 = vmul.f32 %v2698_v9, %v2698_v9  ;;  %v3593_v56 = vpack.c.bf16 %v2698_v9, %v2698_v9  ;;  %v3074_v53 = vsel %vm79_vm0, %v2969_v37, 0.0 }
 0x2db   :  { %v2873_v32 = vadd.f32 %v2872_v60, %v2871_v36  ;;  %v3701_v41 = vpop.f32.mrf.mxu1 }
 0x2dc   :  { %v3070_v2 = vsel %vm79_vm0, %v2967_v27, 0.0  ;;  %3422 = vst.msk [vmem:[%s5516_s2 + $0xa0] sm:$0xf] %vm3381_vm12, %v3593_v56  ;;  %v3596_v30 = vpack.c.bf16 %v3701_v41, %v3701_v41  ;;  %v2970_v45 = vmul.f32 %v3701_v41, %v3701_v41  ;;  %v2878_v51 = vsel %vm79_vm0, %v3701_v41, 0.0 }
 0x2dd   :  { %v3071_v5 = vadd.f32 %v3070_v2, %v3069_v42  ;;  %v2701_v44 = vpop.f32.mrf.mxu1 }
 0x2de   :  { %3425 = vst.msk [vmem:[%s5516_s2 + $0xac] sm:$0xf] %vm3381_vm12, %v3596_v30  ;;  %v2874_v50 = vsel %vm79_vm0, %v2701_v44, 0.0  ;;  %v2968_v1 = vmul.f32 %v2701_v44, %v2701_v44  ;;  %v3594_v14 = vpack.c.bf16 %v2701_v44, %v2701_v44  ;;  %v3076_v62 = vsel %vm79_vm0, %v2970_v45, 0.0 }
 0x2df   :  { %v2875_v22 = vadd.f32 %v2874_v50, %v2873_v32 }
 0x2e0   :  { %v3072_v13 = vsel %vm79_vm0, %v2968_v1, 0.0  ;;  %3423 = vst.msk [vmem:[%s5516_s2 + $0xa4] sm:$0xf] %vm3381_vm12, %v3594_v14 }
 0x2e1   :  { %v2877_v25 = vadd.f32 %v2876_v17, %v2875_v22  ;;  %v3073_v11 = vadd.f32 %v3072_v13, %v3071_v5 }
 0x2e3   :  { %v3075_v16 = vadd.f32 %v3074_v53, %v3073_v11  ;;  %v2879_v12 = vadd.f32 %v2878_v51, %v2877_v25 }
 0x2e5   :  { %v3077_v20 = vadd.f32 %v3076_v62, %v3075_v16 }
 0x2f3   :  { %v3704_v55 = vpop.f32.mrf.mxu1 }
 0x2f4   :  { %v3599_v29 = vpack.c.bf16 %v3704_v55, %v3704_v55  ;;  %v2973_v21 = vmul.f32 %v3704_v55, %v3704_v55  ;;  %v2884_v18 = vsel %vm79_vm0, %v3704_v55, 0.0 }
 0x2f5   :  { %v2714_v33 = vpop.f32.mrf.mxu1 }
 0x2f6   :  { %3428 = vst.msk [vmem:[%s5516_s2 + $0xb8] sm:$0xf] %vm3381_vm12, %v3599_v29  ;;  %v2880_v31 = vsel %vm79_vm0, %v2714_v33, 0.0  ;;  %v2971_v61 = vmul.f32 %v2714_v33, %v2714_v33  ;;  %v3597_v3 = vpack.c.bf16 %v2714_v33, %v2714_v33  ;;  %v3082_v28 = vsel %vm79_vm0, %v2973_v21, 0.0 }
 0x2f7   :  { %v2881_v57 = vadd.f32 %v2880_v31, %v2879_v12  ;;  %v3705_v59 = vpop.f32.mrf.mxu1 }
 0x2f8   :  { %v3078_v0 = vsel %vm79_vm0, %v2971_v61, 0.0  ;;  %3426 = vst.msk [vmem:[%s5516_s2 + $0xb0] sm:$0xf] %vm3381_vm12, %v3597_v3  ;;  %v3600_v10 = vpack.c.bf16 %v3705_v59, %v3705_v59  ;;  %v2974_v7 = vmul.f32 %v3705_v59, %v3705_v59  ;;  %v2886_v40 = vsel %vm79_vm0, %v3705_v59, 0.0 }
 0x2f9   :  { %v3079_v52 = vadd.f32 %v3078_v0, %v3077_v20  ;;  %v2717_v6 = vpop.f32.mrf.mxu1 }
 0x2fa   :  { %3429 = vst.msk [vmem:[%s5516_s2 + $0xbc] sm:$0xf] %vm3381_vm12, %v3600_v10  ;;  %v2882_v43 = vsel %vm79_vm0, %v2717_v6, 0.0  ;;  %v2972_v46 = vmul.f32 %v2717_v6, %v2717_v6  ;;  %v3598_v34 = vpack.c.bf16 %v2717_v6, %v2717_v6  ;;  %v3084_v24 = vsel %vm79_vm0, %v2974_v7, 0.0 }
 0x2fb   :  { %v2883_v54 = vadd.f32 %v2882_v43, %v2881_v57 }
 0x2fc   :  { %v3080_v63 = vsel %vm79_vm0, %v2972_v46, 0.0  ;;  %3427 = vst.msk [vmem:[%s5516_s2 + $0xb4] sm:$0xf] %vm3381_vm12, %v3598_v34 }
 0x2fd   :  { %v2885_v15 = vadd.f32 %v2884_v18, %v2883_v54  ;;  %v3081_v4 = vadd.f32 %v3080_v63, %v3079_v52 }
 0x2ff   :  { %v3083_v23 = vadd.f32 %v3082_v28, %v3081_v4  ;;  %v2887_v8 = vadd.f32 %v2886_v40, %v2885_v15 }
 0x301   :  { %v3085_v39 = vadd.f32 %v3084_v24, %v3083_v23 }
 0x30f   :  { %v3708_v58 = vpop.f32.mrf.mxu1 }
 0x310   :  { %v3603_v35 = vpack.c.bf16 %v3708_v58, %v3708_v58  ;;  %v2977_v60 = vmul.f32 %v3708_v58, %v3708_v58  ;;  %v2892_v30 = vsel %vm79_vm0, %v3708_v58, 0.0 }
 0x311   :  { %v2730_v48 = vpop.f32.mrf.mxu1 }
 0x312   :  { %3432 = vst.msk [vmem:[%s5516_s2 + $0xc8] sm:$0xf] %vm3381_vm12, %v3603_v35  ;;  %v2888_v26 = vsel %vm79_vm0, %v2730_v48, 0.0  ;;  %v2975_v49 = vmul.f32 %v2730_v48, %v2730_v48  ;;  %v3601_v36 = vpack.c.bf16 %v2730_v48, %v2730_v48  ;;  %v3090_v1 = vsel %vm79_vm0, %v2977_v60, 0.0 }
 0x313   :  { %v3709_v47 = vpop.f32.mrf.mxu1  ;;  %v2889_v38 = vadd.f32 %v2888_v26, %v2887_v8 }
 0x314   :  { %v3086_v42 = vsel %vm79_vm0, %v2975_v49, 0.0  ;;  %3430 = vst.msk [vmem:[%s5516_s2 + $0xc0] sm:$0xf] %vm3381_vm12, %v3601_v36  ;;  %v3604_v19 = vpack.c.bf16 %v3709_v47, %v3709_v47  ;;  %v2978_v5 = vmul.f32 %v3709_v47, %v3709_v47  ;;  %v2894_v14 = vsel %vm79_vm0, %v3709_v47, 0.0 }
 0x315   :  { %v2733_v9 = vpop.f32.mrf.mxu1  ;;  %v3087_v41 = vadd.f32 %v3086_v42, %v3085_v39 }
 0x316   :  { %3433 = vst.msk [vmem:[%s5516_s2 + $0xcc] sm:$0xf] %vm3381_vm12, %v3604_v19  ;;  %v2890_v27 = vsel %vm79_vm0, %v2733_v9, 0.0  ;;  %v2976_v56 = vmul.f32 %v2733_v9, %v2733_v9  ;;  %v3602_v32 = vpack.c.bf16 %v2733_v9, %v2733_v9  ;;  %v3092_v45 = vsel %vm79_vm0, %v2978_v5, 0.0 }
 0x317   :  { %v2891_v2 = vadd.f32 %v2890_v27, %v2889_v38 }
 0x318   :  { %v3088_v44 = vsel %vm79_vm0, %v2976_v56, 0.0  ;;  %3431 = vst.msk [vmem:[%s5516_s2 + $0xc4] sm:$0xf] %vm3381_vm12, %v3602_v32 }
 0x319   :  { %v2893_v37 = vadd.f32 %v2892_v30, %v2891_v2  ;;  %v3089_v50 = vadd.f32 %v3088_v44, %v3087_v41 }
 0x31b   :  { %v3091_v22 = vadd.f32 %v3090_v1, %v3089_v50  ;;  %v2895_v17 = vadd.f32 %v2894_v14, %v2893_v37 }
 0x31d   :  { %v3093_v13 = vadd.f32 %v3092_v45, %v3091_v22 }
 0x32b   :  { %v3712_v25 = vpop.f32.mrf.mxu1 }
 0x32c   :  { %v3607_v11 = vpack.c.bf16 %v3712_v25, %v3712_v25  ;;  %v2981_v18 = vmul.f32 %v3712_v25, %v3712_v25  ;;  %v2900_v63 = vsel %vm79_vm0, %v3712_v25, 0.0 }
 0x32d   :  { %v2746_v53 = vpop.f32.mrf.mxu1 }
 0x32e   :  { %3436 = vst.msk [vmem:[%s5516_s2 + $0xd8] sm:$0xf] %vm3381_vm12, %v3607_v11  ;;  %v3605_v51 = vpack.c.bf16 %v2746_v53, %v2746_v53  ;;  %v2979_v3 = vmul.f32 %v2746_v53, %v2746_v53  ;;  %v2896_v0 = vsel %vm79_vm0, %v2746_v53, 0.0  ;;  %v3098_v4 = vsel %vm79_vm0, %v2981_v18, 0.0 }
 0x32f   :  { %v3713_v16 = vpop.f32.mrf.mxu1  ;;  %v2897_v43 = vadd.f32 %v2896_v0, %v2895_v17 }
 0x330   :  { %3434 = vst.msk [vmem:[%s5516_s2 + $0xd0] sm:$0xf] %vm3381_vm12, %v3605_v51  ;;  %v3608_v12 = vpack.c.bf16 %v3713_v16, %v3713_v16  ;;  %v3094_v6 = vsel %vm79_vm0, %v2979_v3, 0.0  ;;  %v2982_v28 = vmul.f32 %v3713_v16, %v3713_v16  ;;  %v2902_v8 = vsel %vm79_vm0, %v3713_v16, 0.0 }
 0x331   :  { %v2749_v62 = vpop.f32.mrf.mxu1  ;;  %v3095_v34 = vadd.f32 %v3094_v6, %v3093_v13 }
 0x332   :  { %3437 = vst.msk [vmem:[%s5516_s2 + $0xdc] sm:$0xf] %vm3381_vm12, %v3608_v12  ;;  %v3606_v20 = vpack.c.bf16 %v2749_v62, %v2749_v62  ;;  %v2980_v10 = vmul.f32 %v2749_v62, %v2749_v62  ;;  %v2898_v21 = vsel %vm79_vm0, %v2749_v62, 0.0  ;;  %v3100_v35 = vsel %vm79_vm0, %v2982_v28, 0.0 }
 0x333   :  { %v2899_v54 = vadd.f32 %v2898_v21, %v2897_v43 }
 0x334   :  { %3435 = vst.msk [vmem:[%s5516_s2 + $0xd4] sm:$0xf] %vm3381_vm12, %v3606_v20  ;;  %v3096_v46 = vsel %vm79_vm0, %v2980_v10, 0.0 }
 0x335   :  { %v3097_v7 = vadd.f32 %v3096_v46, %v3095_v34  ;;  %v2901_v15 = vadd.f32 %v2900_v63, %v2899_v54 }
 0x337   :  { %v3099_v23 = vadd.f32 %v3098_v4, %v3097_v7  ;;  %v2903_v58 = vadd.f32 %v2902_v8, %v2901_v15 }
 0x339   :  { %v3101_v36 = vadd.f32 %v3100_v35, %v3099_v23 }
 0x347   :  { %v3716_v55 = vpop.f32.mrf.mxu1 }
 0x348   :  { %v3611_v29 = vpack.c.bf16 %v3716_v55, %v3716_v55  ;;  %v2985_v38 = vmul.f32 %v3716_v55, %v3716_v55  ;;  %v2908_v60 = vsel %vm79_vm0, %v3716_v55, 0.0 }
 0x349   :  { %v2762_v33 = vpop.f32.mrf.mxu1 }
 0x34a   :  { %3440 = vst.msk [vmem:[%s5516_s2 + $0xe8] sm:$0xf] %vm3381_vm12, %v3611_v29  ;;  %v3609_v31 = vpack.c.bf16 %v2762_v33, %v2762_v33  ;;  %v2983_v40 = vmul.f32 %v2762_v33, %v2762_v33  ;;  %v2904_v24 = vsel %vm79_vm0, %v2762_v33, 0.0  ;;  %v3106_v32 = vsel %vm79_vm0, %v2985_v38, 0.0 }
 0x34b   :  { %v3717_v61 = vpop.f32.mrf.mxu1  ;;  %v2905_v49 = vadd.f32 %v2904_v24, %v2903_v58 }
 0x34c   :  { %3438 = vst.msk [vmem:[%s5516_s2 + $0xe0] sm:$0xf] %vm3381_vm12, %v3609_v31  ;;  %v3612_v57 = vpack.c.bf16 %v3717_v61, %v3717_v61  ;;  %v3102_v48 = vsel %vm79_vm0, %v2983_v40, 0.0  ;;  %v2986_v41 = vmul.f32 %v3717_v61, %v3717_v61  ;;  %v2910_v44 = vsel %vm79_vm0, %v3717_v61, 0.0 }
 0x34d   :  { %v2765_v59 = vpop.f32.mrf.mxu1  ;;  %v3103_v42 = vadd.f32 %v3102_v48, %v3101_v36 }
 0x34e   :  { %3441 = vst.msk [vmem:[%s5516_s2 + $0xec] sm:$0xf] %vm3381_vm12, %v3612_v57  ;;  %v3610_v52 = vpack.c.bf16 %v2765_v59, %v2765_v59  ;;  %v2984_v39 = vmul.f32 %v2765_v59, %v2765_v59  ;;  %v2906_v26 = vsel %vm79_vm0, %v2765_v59, 0.0  ;;  %v3108_v17 = vsel %vm79_vm0, %v2986_v41, 0.0 }
 0x34f   :  { %v2907_v19 = vadd.f32 %v2906_v26, %v2905_v49 }
 0x350   :  { %3439 = vst.msk [vmem:[%s5516_s2 + $0xe4] sm:$0xf] %vm3381_vm12, %v3610_v52  ;;  %v3104_v47 = vsel %vm79_vm0, %v2984_v39, 0.0 }
 0x351   :  { %v3105_v9 = vadd.f32 %v3104_v47, %v3103_v42  ;;  %v2909_v27 = vadd.f32 %v2908_v60, %v2907_v19 }
 0x353   :  { %v3107_v30 = vadd.f32 %v3106_v32, %v3105_v9  ;;  %v2911_v14 = vadd.f32 %v2910_v44, %v2909_v27 }
 0x355   :  { %v3109_v11 = vadd.f32 %v3108_v17, %v3107_v30 }
 0x363   :  { %v3720_v56 = vpop.f32.mrf.mxu1 }
 0x364   :  { %v3615_v2 = vpack.c.bf16 %v3720_v56, %v3720_v56  ;;  %v2989_v51 = vmul.f32 %v3720_v56, %v3720_v56  ;;  %v2916_v29 = vsel %vm79_vm0, %v3720_v56, 0.0 }
 0x365   :  { %v2778_v5 = vpop.f32.mrf.mxu1 }
 0x366   :  { %3444 = vst.msk [vmem:[%s5516_s2 + $0xf8] sm:$0xf] %vm3381_vm12, %v3615_v2  ;;  %v2912_v37 = vsel %vm79_vm0, %v2778_v5, 0.0  ;;  %v2987_v50 = vmul.f32 %v2778_v5, %v2778_v5  ;;  %v3613_v1 = vpack.c.bf16 %v2778_v5, %v2778_v5  ;;  %v3114_v57 = vsel %vm79_vm0, %v2989_v51, 0.0 }
 0x367   :  { %v3721_v22 = vpop.f32.mrf.mxu1  ;;  %v2913_v25 = vadd.f32 %v2912_v37, %v2911_v14 }
 0x368   :  { %v3110_v45 = vsel %vm79_vm0, %v2987_v50, 0.0  ;;  %3442 = vst.msk [vmem:[%s5516_s2 + $0xf0] sm:$0xf] %vm3381_vm12, %v3613_v1  ;;  %v3616_v13 = vpack.c.bf16 %v3721_v22, %v3721_v22  ;;  %v2990_v33 = vmul.f32 %v3721_v22, %v3721_v22  ;;  %v2918_v59 = vsel %vm79_vm0, %v3721_v22, 0.0 }
 0x369   :  { %v2781_v53 = vpop.f32.mrf.mxu1  ;;  %v3111_v20 = vadd.f32 %v3110_v45, %v3109_v11 }
 0x36a   :  { %3445 = vst.msk [vmem:[%s5516_s2 + $0xfc] sm:$0xf] %vm3381_vm12, %v3616_v13  ;;  %v2914_v16 = vsel %vm79_vm0, %v2781_v53, 0.0  ;;  %v2988_v12 = vmul.f32 %v2781_v53, %v2781_v53  ;;  %v3614_v62 = vpack.c.bf16 %v2781_v53, %v2781_v53  ;;  %v3116_v52 = vsel %vm79_vm0, %v2990_v33, 0.0 }
 0x36b   :  { %v2915_v55 = vadd.f32 %v2914_v16, %v2913_v25 }
 0x36c   :  { %v3112_v31 = vsel %vm79_vm0, %v2988_v12, 0.0  ;;  %3443 = vst.msk [vmem:[%s5516_s2 + $0xf4] sm:$0xf] %vm3381_vm12, %v3614_v62 }
 0x36d   :  { %v2917_v61 = vadd.f32 %v2916_v29, %v2915_v55  ;;  %v3113_v3 = vadd.f32 %v3112_v31, %v3111_v20 }
 0x36f   :  { %v2919_v0 = vadd.f32 %v2918_v59, %v2917_v61  ;;  %v3115_v10 = vadd.f32 %v3114_v57, %v3113_v3 }
 0x371   :  { %v2920_v6 = vrot.slane %v2919_v0, 4  ;;  %v3117_v21 = vadd.f32 %v3116_v52, %v3115_v10 }
 0x373   :  { %v2921_v43 = vadd.f32 %v2920_v6, %v2919_v0  ;;  %v3118_v46 = vrot.slane %v3117_v21, 4 }
 0x375   :  { %v2922_v34 = vrot.slane %v2921_v43, 2  ;;  %v3119_v54 = vadd.f32 %v3118_v46, %v3117_v21 }
 0x377   :  { %v2923_v18 = vadd.f32 %v2922_v34, %v2921_v43  ;;  %v3120_v7 = vrot.slane %v3119_v54, 2 }
 0x379   :  { %v2924_v63 = vrot.slane %v2923_v18, 1  ;;  %v3121_v15 = vadd.f32 %v3120_v7, %v3119_v54 }
 0x37b   :  { %v2925_v4 = vadd.f32 %v2924_v63, %v2923_v18  ;;  %v3122_v28 = vrot.slane %v3121_v15, 1 }
 0x37d   :  { %2926 = vst.msk [vmem:[%s5517_s3] sm:$0x1] %vm158_vm2, %v2925_v4  ;;  %v3123_v40 = vadd.f32 %v3122_v28, %v3121_v15 }
 0x37f   :  { %3124 = vst.msk [vmem:[%s5517_s3 + $0x1] sm:$0x1] %vm158_vm2, %v3123_v40 }

// kernel: _residual_forward.4
= control target key start
LH: loop header
LB: loop body
LE: loop exit
PB: predicated region body
PF: predicated region fallthrough
CT: control target
= control target key end

     0   :  { %vm355_vm0 = vcmask 31744   ;;  %vm422_vm1 = vcmask 25600   ;;  %vm434_vm2 = vcmask 24576   ;;  %v4181_v0 = vmov 0.0   ;;  %s4182_s13 = smov 4   ;;  %s4183_s9 = smov 8   ;;  %s6005_s0 = inlined_call_operand.vmem [shape: bf16[2,16,16,4], index: 0, kind: input, shape index: {}]   ;;  %s6006_s1 = inlined_call_operand.vmem [shape: f32[1,4], index: 1, kind: input, shape index: {}]   ;;  %s6007_s2 = inlined_call_operand.vmem [shape: f32[1,4], index: 2, kind: input, shape index: {}]   ;;  %s6008_s3 = inlined_call_operand.vmem [shape: bf16[36,4], index: 3, kind: input, shape index: {}]   ;;  %s6009_s4 = inlined_call_operand.vmem [shape: bf16[2,16,16,4], index: 4, kind: output, shape index: {0}]   ;;  %s6010_s5 = inlined_call_operand.vmem [shape: f32[1,2,4], index: 5, kind: output, shape index: {1}]  }
   0x1   :  { %420 = vst.msk [vmem:[#allocation2] sm:$0xff] %vm355_vm0, %v4181_v0  ;;  %421 = vst.msk [vmem:[#allocation2 + $0x8] sm:$0xff] %vm355_vm0, %v4181_v0  ;;  %v4023_v1 = vld [vmem:[%s6005_s0 + $0x8] sm:$0xff]   ;;  %v4378_v2 = vld [vmem:[%s6006_s1] ss:$0 sm:$0xff]  ;;  %vm2776_vm3 = vcmask 1041408  }
   0x2   :  { %423 = vst.msk [vmem:[#allocation2 + $0x10] sm:$0x3] %vm422_vm1, %v4181_v0  ;;  %426 = vst.msk [vmem:[#allocation2 + $0x1c0] sm:$0x3] %vm422_vm1, %v4181_v0  ;;  %v3901_v3 = vunpack.c.l.bf16 %v4023_v1  ;;  %v3902_v4 = vunpack.c.h.bf16 %v4023_v1  ;;  %v3896_v5 = vld [vmem:[%s6005_s0] sm:$0xff]   ;;  %v4024_v6 = vld [vmem:[%s6005_s0 + $0x10] sm:$0xff]  }
   0x3   :  { %424 = vst.msk [vmem:[#allocation2 + $0x1b0] sm:$0xff] %vm355_vm0, %v4181_v0  ;;  %425 = vst.msk [vmem:[#allocation2 + $0x1b8] sm:$0xff] %vm355_vm0, %v4181_v0  ;;  %v4025_v7 = vld [vmem:[%s6005_s0 + $0x18] sm:$0xff]   ;;  %v4408_v8 = vld [vmem:[%s6007_s2] ss:$0 sm:$0xff]  ;;  %v3897_v9 = vunpack.c.l.bf16 %v3896_v5  ;;  %v3898_v10 = vunpack.c.h.bf16 %v3896_v5  ;;  %v3905_v11 = vunpack.c.l.bf16 %v4024_v6  ;;  %v3906_v12 = vunpack.c.h.bf16 %v4024_v6  ;;  %s4184_s11 = smov 12  }
   0x4   :  { %428 = vst.msk [vmem:[#allocation2 + $0x198] sm:$0xff] %vm355_vm0, %v4181_v0  ;;  %429 = vst.msk [vmem:[#allocation2 + $0x1a0] sm:$0xff] %vm355_vm0, %v4181_v0  ;;  %v157_v13 = vmul.f32 %v3901_v3, %v4378_v2  ;;  %v158_v14 = vmul.f32 %v3902_v4, %v4378_v2  ;;  %v3909_v15 = vunpack.c.l.bf16 %v4025_v7  ;;  %v3910_v16 = vunpack.c.h.bf16 %v4025_v7  ;;  %v4026_v29 = vld [vmem:[%s6005_s0 + $0x20] sm:$0xff]   ;;  %v4027_v30 = vld [vmem:[%s6005_s0 + $0x28] sm:$0xff]   ;;  %s4185_s15 = smov 16   ;;  %s4186_s18 = smov 20  }
   0x5   :  { %430 = vst.msk [vmem:[#allocation2 + $0x1a8] sm:$0x3] %vm422_vm1, %v4181_v0  ;;  %433 = vst.msk [vmem:[#allocation2 + $0x358] sm:$0x3] %vm422_vm1, %v4181_v0  ;;  %v155_v17 = vmul.f32 %v3897_v9, %v4378_v2  ;;  %v156_v18 = vmul.f32 %v3898_v10, %v4378_v2  ;;  %v159_v19 = vmul.f32 %v3905_v11, %v4378_v2  ;;  %v4028_v37 = vld [vmem:[%s6005_s0 + $0x30] sm:$0xff]   ;;  %v4029_v42 = vld [vmem:[%s6005_s0 + $0x38] sm:$0xff]   ;;  %v3913_v46 = vunpack.c.l.bf16 %v4026_v29 }
   0x6   :  { %431 = vst.msk [vmem:[#allocation2 + $0x348] sm:$0xff] %vm355_vm0, %v4181_v0  ;;  %432 = vst.msk [vmem:[#allocation2 + $0x350] sm:$0xff] %vm355_vm0, %v4181_v0  ;;  %v160_v20 = vmul.f32 %v3906_v12, %v4378_v2  ;;  %v228_v21 = vadd.f32 %v4408_v8, %v157_v13  ;;  %v229_v22 = vadd.f32 %v4408_v8, %v158_v14  ;;  %v3914_v47 = vunpack.c.h.bf16 %v4026_v29  ;;  %v4030_v9 = vld [vmem:[%s6005_s0 + $0x40] sm:$0xff]   ;;  %v4031_v10 = vld [vmem:[%s6005_s0 + $0x48] sm:$0xff]   ;;  %s4188_s19 = smov 28   ;;  %s4189_s20 = smov 32  }
   0x7   :  { %436 = vst.msk [vmem:[#allocation2 + $0x18] sm:$0x1] %vm434_vm2, %v4181_v0  ;;  %437 = vst.msk [vmem:[#allocation2 + $0x30] sm:$0x1] %vm434_vm2, %v4181_v0  ;;  %v161_v23 = vmul.f32 %v3909_v15, %v4378_v2  ;;  %v162_v24 = vmul.f32 %v3910_v16, %v4378_v2  ;;  %v226_v25 = vadd.f32 %v4408_v8, %v155_v17  ;;  %v3917_v48 = vunpack.c.l.bf16 %v4027_v30  ;;  %v4032_v11 = vld [vmem:[%s6005_s0 + $0x50] sm:$0xff]  }
   0x8   :  { %438 = vst.msk [vmem:[#allocation2 + $0x48] sm:$0x1] %vm434_vm2, %v4181_v0  ;;  %439 = vst.msk [vmem:[#allocation2 + $0x60] sm:$0x1] %vm434_vm2, %v4181_v0  ;;  %v227_v26 = vadd.f32 %v4408_v8, %v156_v18  ;;  %v230_v27 = vadd.f32 %v4408_v8, %v159_v19  ;;  %v231_v28 = vadd.f32 %v4408_v8, %v160_v20  ;;  %v603_v31 = vld [vmem:[#allocation2 + $0x1] sm:$0xff]  ;;  %v292_v33 = vmax.f32 %v228_v21, 0.0 }
   0x9   :  { %440 = vst.msk [vmem:[#allocation2 + $0x78] sm:$0x1] %vm434_vm2, %v4181_v0  ;;  %441 = vst.msk [vmem:[#allocation2 + $0x90] sm:$0x1] %vm434_vm2, %v4181_v0  ;;  %v604_v32 = vld [vmem:[#allocation2 + $0x9] sm:$0xff]  ;;  %v293_v34 = vmax.f32 %v229_v22, 0.0  ;;  %v232_v35 = vadd.f32 %v4408_v8, %v161_v23  ;;  %v233_v36 = vadd.f32 %v4408_v8, %v162_v24  ;;  %v3918_v49 = vunpack.c.h.bf16 %v4027_v30 }
   0xa   :  { %442 = vst.msk [vmem:[#allocation2 + $0xa8] sm:$0x1] %vm434_vm2, %v4181_v0  ;;  %443 = vst.msk [vmem:[#allocation2 + $0xc0] sm:$0x1] %vm434_vm2, %v4181_v0  ;;  %v667_v38 = vpack.c.bf16 %v604_v32, %v603_v31  ;;  %v290_v39 = vmax.f32 %v226_v25, 0.0  ;;  %v291_v40 = vmax.f32 %v227_v26, 0.0  ;;  %v3921_v50 = vunpack.c.l.bf16 %v4028_v37 }
   0xb   :  { %444 = vst.msk [vmem:[#allocation2 + $0xd8] sm:$0x1] %vm434_vm2, %v4181_v0  ;;  %445 = vst.msk [vmem:[#allocation2 + $0xf0] sm:$0x1] %vm434_vm2, %v4181_v0  ;;  %v294_v41 = vmax.f32 %v230_v27, 0.0  ;;  %v295_v43 = vmax.f32 %v231_v28, 0.0  ;;  %v163_v51 = vmul.f32 %v3913_v46, %v4378_v2  ;;  %v3922_v52 = vunpack.c.h.bf16 %v4028_v37 }
   0xc   :  { %446 = vst.msk [vmem:[#allocation2 + $0x108] sm:$0x1] %vm434_vm2, %v4181_v0  ;;  %447 = vst.msk [vmem:[#allocation2 + $0x120] sm:$0x1] %vm434_vm2, %v4181_v0  ;;  %v296_v44 = vmax.f32 %v232_v35, 0.0  ;;  %v297_v45 = vmax.f32 %v233_v36, 0.0  ;;  %1404 = vrot.lane.b32.xlu0 %v667_v38, %s4182_s13  ;;  %v3925_v53 = vunpack.c.l.bf16 %v4029_v42  ;;  %v3926_v54 = vunpack.c.h.bf16 %v4029_v42 }
   0xd   :  { %448 = vst.msk [vmem:[#allocation2 + $0x138] sm:$0x1] %vm434_vm2, %v4181_v0  ;;  %449 = vst.msk [vmem:[#allocation2 + $0x150] sm:$0x1] %vm434_vm2, %v4181_v0  ;;  %v164_v55 = vmul.f32 %v3914_v47, %v4378_v2  ;;  %v165_v56 = vmul.f32 %v3917_v48, %v4378_v2  ;;  %v166_v57 = vmul.f32 %v3918_v49, %v4378_v2  ;;  %v4033_v18 = vld [vmem:[%s6005_s0 + $0x58] sm:$0xff]   ;;  %v3929_v30 = vunpack.c.l.bf16 %v4030_v9 }
   0xe   :  { %450 = vst.msk [vmem:[#allocation2 + $0x168] sm:$0x1] %vm434_vm2, %v4181_v0  ;;  %451 = vst.msk [vmem:[#allocation2 + $0x180] sm:$0x1] %vm434_vm2, %v4181_v0  ;;  %v167_v58 = vmul.f32 %v3921_v50, %v4378_v2  ;;  %v234_v59 = vadd.f32 %v4408_v8, %v163_v51  ;;  %v168_v60 = vmul.f32 %v3922_v52, %v4378_v2  ;;  %v3930_v31 = vunpack.c.h.bf16 %v4030_v9 }
   0xf   :  { %454 = vst.msk [vmem:[#allocation2 + $0x1c8] sm:$0x1] %vm434_vm2, %v4181_v0  ;;  %455 = vst.msk [vmem:[#allocation2 + $0x1e0] sm:$0x1] %vm434_vm2, %v4181_v0  ;;  %v169_v61 = vmul.f32 %v3925_v53, %v4378_v2  ;;  %v170_v62 = vmul.f32 %v3926_v54, %v4378_v2  ;;  %v235_v63 = vadd.f32 %v4408_v8, %v164_v55  ;;  %v3933_v32 = vunpack.c.l.bf16 %v4031_v10  ;;  %v4034_v53 = vld [vmem:[%s6005_s0 + $0x60] sm:$0xff]   ;;  %v4035_v54 = vld [vmem:[%s6005_s0 + $0x68] sm:$0xff]  }
  0x10   :  { %456 = vst.msk [vmem:[#allocation2 + $0x1f8] sm:$0x1] %vm434_vm2, %v4181_v0  ;;  %457 = vst.msk [vmem:[#allocation2 + $0x210] sm:$0x1] %vm434_vm2, %v4181_v0  ;;  %v237_v1 = vadd.f32 %v4408_v8, %v166_v57  ;;  %v238_v3 = vadd.f32 %v4408_v8, %v167_v58  ;;  %v298_v4 = vmax.f32 %v234_v59, 0.0  ;;  %v239_v5 = vadd.f32 %v4408_v8, %v168_v60  ;;  %v4036_v60 = vld [vmem:[%s6005_s0 + $0x70] sm:$0xff]  }
  0x11   :  { %458 = vst.msk [vmem:[#allocation2 + $0x228] sm:$0x1] %vm434_vm2, %v4181_v0  ;;  %459 = vst.msk [vmem:[#allocation2 + $0x240] sm:$0x1] %vm434_vm2, %v4181_v0  ;;  %v240_v6 = vadd.f32 %v4408_v8, %v169_v61  ;;  %v241_v7 = vadd.f32 %v4408_v8, %v170_v62  ;;  %v299_v14 = vmax.f32 %v235_v63, 0.0  ;;  %v3934_v35 = vunpack.c.h.bf16 %v4031_v10  ;;  %v4510_v61 = vld [vmem:[#allocation2 + $0x1b1] sm:$0xff] }
  0x12   :  { %460 = vst.msk [vmem:[#allocation2 + $0x258] sm:$0x1] %vm434_vm2, %v4181_v0  ;;  %461 = vst.msk [vmem:[#allocation2 + $0x270] sm:$0x1] %vm434_vm2, %v4181_v0  ;;  %v301_v16 = vmax.f32 %v237_v1, 0.0  ;;  %v302_v17 = vmax.f32 %v238_v3, 0.0  ;;  %v3937_v36 = vunpack.c.l.bf16 %v4032_v11  ;;  %v171_v37 = vmul.f32 %v3929_v30, %v4378_v2 }
  0x13   :  { %462 = vst.msk [vmem:[#allocation2 + $0x288] sm:$0x1] %vm434_vm2, %v4181_v0  ;;  %463 = vst.msk [vmem:[#allocation2 + $0x2a0] sm:$0x1] %vm434_vm2, %v4181_v0  ;;  %v303_v23 = vmax.f32 %v239_v5, 0.0  ;;  %v304_v24 = vmax.f32 %v240_v6, 0.0  ;;  %v172_v38 = vmul.f32 %v3930_v31, %v4378_v2 }
  0x14   :  { %464 = vst.msk [vmem:[#allocation2 + $0x2b8] sm:$0x1] %vm434_vm2, %v4181_v0  ;;  %465 = vst.msk [vmem:[#allocation2 + $0x2d0] sm:$0x1] %vm434_vm2, %v4181_v0  ;;  %v305_v25 = vmax.f32 %v241_v7, 0.0  ;;  %v175_v42 = vmul.f32 %v3937_v36, %v4378_v2  ;;  %v4512_v62 = vld [vmem:[#allocation2 + $0x1b9] sm:$0xff] }
  0x15   :  { %466 = vst.msk [vmem:[#allocation2 + $0x2e8] sm:$0x1] %vm434_vm2, %v4181_v0  ;;  %467 = vst.msk [vmem:[#allocation2 + $0x300] sm:$0x1] %vm434_vm2, %v4181_v0  ;;  %v243_v46 = vadd.f32 %v4408_v8, %v172_v38  ;;  %vm2236_vm4 = vcmask 64512   ;;  %vm2301_vm5 = vcmask 97280  }
  0x16   :  { %468 = vst.msk [vmem:[#allocation2 + $0x318] sm:$0x1] %vm434_vm2, %v4181_v0  ;;  %469 = vst.msk [vmem:[#allocation2 + $0x330] sm:$0x1] %vm434_vm2, %v4181_v0  ;;  %v246_v50 = vadd.f32 %v4408_v8, %v175_v42  ;;  %vm2366_vm6 = vcmask 130048   ;;  %vm2431_vm7 = vcmask 162816  }
  0x17   :  { %472 = vst.msk [vmem:[#allocation2 + $0x29] sm:$0x1] %vm434_vm2, %v4181_v0  ;;  %473 = vst.msk [vmem:[#allocation2 + $0x41] sm:$0x1] %vm434_vm2, %v4181_v0  ;;  %v307_v57 = vmax.f32 %v243_v46, 0.0  ;;  %vm2496_vm8 = vcmask 195584  }
  0x18   :  { %474 = vst.msk [vmem:[#allocation2 + $0x59] sm:$0x1] %vm434_vm2, %v4181_v0  ;;  %475 = vst.msk [vmem:[#allocation2 + $0x71] sm:$0x1] %vm434_vm2, %v4181_v0  ;;  %vm2561_vm9 = vcmask 228352   ;;  %vm2626_vm10 = vcmask 261120  }
  0x19   :  { %476 = vst.msk [vmem:[#allocation2 + $0x89] sm:$0x1] %vm434_vm2, %v4181_v0  ;;  %477 = vst.msk [vmem:[#allocation2 + $0xa1] sm:$0x1] %vm434_vm2, %v4181_v0  ;;  %vm2711_vm11 = vcmask 293888   ;;  %vm3657_vm12 = vcmask 27648  }
  0x1a   :  { %478 = vst.msk [vmem:[#allocation2 + $0xb9] sm:$0x1] %vm434_vm2, %v4181_v0  ;;  %479 = vst.msk [vmem:[#allocation2 + $0xd1] sm:$0x1] %vm434_vm2, %v4181_v0 }
  0x1b   :  { %480 = vst.msk [vmem:[#allocation2 + $0xe9] sm:$0x1] %vm434_vm2, %v4181_v0  ;;  %481 = vst.msk [vmem:[#allocation2 + $0x101] sm:$0x1] %vm434_vm2, %v4181_v0 }
  0x1c   :  { %482 = vst.msk [vmem:[#allocation2 + $0x119] sm:$0x1] %vm434_vm2, %v4181_v0  ;;  %483 = vst.msk [vmem:[#allocation2 + $0x131] sm:$0x1] %vm434_vm2, %v4181_v0 }
  0x1d   :  { %484 = vst.msk [vmem:[#allocation2 + $0x149] sm:$0x1] %vm434_vm2, %v4181_v0  ;;  %485 = vst.msk [vmem:[#allocation2 + $0x161] sm:$0x1] %vm434_vm2, %v4181_v0 }
  0x1e   :  { %486 = vst.msk [vmem:[#allocation2 + $0x179] sm:$0x1] %vm434_vm2, %v4181_v0  ;;  %487 = vst.msk [vmem:[#allocation2 + $0x191] sm:$0x1] %vm434_vm2, %v4181_v0 }
  0x1f   :  { %490 = vst.msk [vmem:[#allocation2 + $0x1d9] sm:$0x1] %vm434_vm2, %v4181_v0  ;;  %491 = vst.msk [vmem:[#allocation2 + $0x1f1] sm:$0x1] %vm434_vm2, %v4181_v0 }
  0x20   :  { %492 = vst.msk [vmem:[#allocation2 + $0x209] sm:$0x1] %vm434_vm2, %v4181_v0  ;;  %493 = vst.msk [vmem:[#allocation2 + $0x221] sm:$0x1] %vm434_vm2, %v4181_v0 }
  0x21   :  { %494 = vst.msk [vmem:[#allocation2 + $0x239] sm:$0x1] %vm434_vm2, %v4181_v0  ;;  %495 = vst.msk [vmem:[#allocation2 + $0x251] sm:$0x1] %vm434_vm2, %v4181_v0 }
  0x22   :  { %496 = vst.msk [vmem:[#allocation2 + $0x269] sm:$0x1] %vm434_vm2, %v4181_v0  ;;  %497 = vst.msk [vmem:[#allocation2 + $0x281] sm:$0x1] %vm434_vm2, %v4181_v0 }
  0x23   :  { %498 = vst.msk [vmem:[#allocation2 + $0x299] sm:$0x1] %vm434_vm2, %v4181_v0  ;;  %499 = vst.msk [vmem:[#allocation2 + $0x2b1] sm:$0x1] %vm434_vm2, %v4181_v0 }
  0x24   :  { %500 = vst.msk [vmem:[#allocation2 + $0x2c9] sm:$0x1] %vm434_vm2, %v4181_v0  ;;  %501 = vst.msk [vmem:[#allocation2 + $0x2e1] sm:$0x1] %vm434_vm2, %v4181_v0 }
  0x25   :  { %502 = vst.msk [vmem:[#allocation2 + $0x2f9] sm:$0x1] %vm434_vm2, %v4181_v0  ;;  %503 = vst.msk [vmem:[#allocation2 + $0x311] sm:$0x1] %vm434_vm2, %v4181_v0 }
  0x26   :  { %504 = vst.msk [vmem:[#allocation2 + $0x329] sm:$0x1] %vm434_vm2, %v4181_v0  ;;  %505 = vst.msk [vmem:[#allocation2 + $0x341] sm:$0x1] %vm434_vm2, %v4181_v0 }
  0x27   :  { %471 = vst.msk [vmem:[#allocation2 + $0x11] sm:$0x1] %vm434_vm2, %v4181_v0  ;;  %435 = vst.msk [vmem:[#allocation2] sm:$0x1] %vm434_vm2, %v4181_v0 }
  0x28   :  { %452 = vst.msk [vmem:[#allocation2 + $0x198] sm:$0x1] %vm434_vm2, %v4181_v0  ;;  %453 = vst.msk [vmem:[#allocation2 + $0x1b0] sm:$0x1] %vm434_vm2, %v4181_v0 }
  0x29   :  { %470 = vst.msk [vmem:[#allocation2 + $0x348] sm:$0x1] %vm434_vm2, %v4181_v0  ;;  %488 = vst.msk [vmem:[#allocation2 + $0x1a9] sm:$0x1] %vm434_vm2, %v4181_v0 }
  0x2a   :  { %489 = vst.msk [vmem:[#allocation2 + $0x1c1] sm:$0x1] %vm434_vm2, %v4181_v0  ;;  %506 = vst.msk [vmem:[#allocation2 + $0x359] sm:$0x1] %vm434_vm2, %v4181_v0  ;;  %v236_v0 = vadd.f32 %v4408_v8, %v165_v56 }
  0x2b   :  { %358 = vst.msk [vmem:[#allocation2 + $0x31] sm:$0xff] %vm355_vm0, %v292_v33  ;;  %359 = vst.msk [vmem:[#allocation2 + $0x39] sm:$0xff] %vm355_vm0, %v293_v34 }
  0x2c   :  { %356 = vst.msk [vmem:[#allocation2 + $0x19] sm:$0xff] %vm355_vm0, %v290_v39  ;;  %357 = vst.msk [vmem:[#allocation2 + $0x21] sm:$0xff] %vm355_vm0, %v291_v40  ;;  %v300_v15 = vmax.f32 %v236_v0, 0.0  ;;  %v173_v39 = vmul.f32 %v3933_v32, %v4378_v2  ;;  %v3938_v40 = vunpack.c.h.bf16 %v4032_v11 }
  0x2d   :  { %360 = vst.msk [vmem:[#allocation2 + $0x49] sm:$0xff] %vm355_vm0, %v294_v41  ;;  %361 = vst.msk [vmem:[#allocation2 + $0x51] sm:$0xff] %vm355_vm0, %v295_v43  ;;  %v174_v41 = vmul.f32 %v3934_v35, %v4378_v2  ;;  %v3941_v43 = vunpack.c.l.bf16 %v4033_v18 }
  0x2e   :  { %362 = vst.msk [vmem:[#allocation2 + $0x61] sm:$0xff] %vm355_vm0, %v296_v44  ;;  %363 = vst.msk [vmem:[#allocation2 + $0x69] sm:$0xff] %vm355_vm0, %v297_v45  ;;  %v3942_v44 = vunpack.c.h.bf16 %v4033_v18  ;;  %v242_v45 = vadd.f32 %v4408_v8, %v171_v37  ;;  %v244_v47 = vadd.f32 %v4408_v8, %v173_v39  ;;  %v176_v48 = vmul.f32 %v3938_v40, %v4378_v2 }
  0x2f   :  { %364 = vst.msk [vmem:[#allocation2 + $0x79] sm:$0xff] %vm355_vm0, %v298_v4  ;;  %365 = vst.msk [vmem:[#allocation2 + $0x81] sm:$0xff] %vm355_vm0, %v299_v14  ;;  %v245_v49 = vadd.f32 %v4408_v8, %v174_v41  ;;  %v177_v51 = vmul.f32 %v3941_v43, %v4378_v2  ;;  %v310_v4 = vmax.f32 %v246_v50, 0.0  ;;  %v3945_v14 = vunpack.c.l.bf16 %v4034_v53  ;;  %v4039_v41 = vld [vmem:[%s6005_s0 + $0x88] sm:$0xff]  }
  0x30   :  { %366 = vst.msk [vmem:[#allocation2 + $0x91] sm:$0xff] %vm355_vm0, %v300_v15  ;;  %367 = vst.msk [vmem:[#allocation2 + $0x99] sm:$0xff] %vm355_vm0, %v301_v16  ;;  %v178_v52 = vmul.f32 %v3942_v44, %v4378_v2  ;;  %v306_v56 = vmax.f32 %v242_v45, 0.0  ;;  %v308_v58 = vmax.f32 %v244_v47, 0.0  ;;  %v247_v59 = vadd.f32 %v4408_v8, %v176_v48 }
  0x31   :  { %368 = vst.msk [vmem:[#allocation2 + $0xa9] sm:$0xff] %vm355_vm0, %v302_v17  ;;  %369 = vst.msk [vmem:[#allocation2 + $0xb1] sm:$0xff] %vm355_vm0, %v303_v23  ;;  %v309_v3 = vmax.f32 %v245_v49, 0.0  ;;  %v248_v5 = vadd.f32 %v4408_v8, %v177_v51  ;;  %v3949_v23 = vunpack.c.l.bf16 %v4035_v54 }
  0x32   :  { %v607_v12 = vld [vmem:[#allocation2 + $0x31] sm:$0xff]  ;;  %v608_v13 = vld [vmem:[#allocation2 + $0x39] sm:$0xff]  ;;  %370 = vst.msk [vmem:[#allocation2 + $0xc1] sm:$0xff] %vm355_vm0, %v304_v24  ;;  %371 = vst.msk [vmem:[#allocation2 + $0xc9] sm:$0xff] %vm355_vm0, %v305_v25  ;;  %v249_v6 = vadd.f32 %v4408_v8, %v178_v52  ;;  %v3950_v24 = vunpack.c.h.bf16 %v4035_v54 }
  0x33   :  { %v669_v19 = vpack.c.bf16 %v608_v13, %v607_v12  ;;  %v605_v20 = vld [vmem:[#allocation2 + $0x19] sm:$0xff]  ;;  %v606_v21 = vld [vmem:[#allocation2 + $0x21] sm:$0xff]  ;;  %372 = vst.msk [vmem:[#allocation2 + $0xd9] sm:$0xff] %vm355_vm0, %v306_v56  ;;  %373 = vst.msk [vmem:[#allocation2 + $0xe1] sm:$0xff] %vm355_vm0, %v307_v57  ;;  %v311_v13 = vmax.f32 %v247_v59, 0.0  ;;  %v312_v17 = vmax.f32 %v248_v5, 0.0  ;;  %v181_v30 = vmul.f32 %v3949_v23, %v4378_v2 }
  0x34   :  { %v609_v22 = vld [vmem:[#allocation2 + $0x49] sm:$0xff]  ;;  %v668_v26 = vpack.c.bf16 %v606_v21, %v605_v20  ;;  %v610_v27 = vld [vmem:[#allocation2 + $0x51] sm:$0xff]  ;;  %374 = vst.msk [vmem:[#allocation2 + $0xf1] sm:$0xff] %vm355_vm0, %v308_v58  ;;  %375 = vst.msk [vmem:[#allocation2 + $0xf9] sm:$0xff] %vm355_vm0, %v309_v3  ;;  %v313_v18 = vmax.f32 %v249_v6, 0.0  ;;  %v182_v31 = vmul.f32 %v3950_v24, %v4378_v2  ;;  %v3965_v5 = vunpack.c.l.bf16 %v4039_v41 }
  0x35   :  { %v611_v28 = vld [vmem:[#allocation2 + $0x61] sm:$0xff]  ;;  %v612_v29 = vld [vmem:[#allocation2 + $0x69] sm:$0xff]  ;;  %1408 = vrot.lane.b32.xlu1 %v669_v19, %s4182_s13  ;;  %v670_v33 = vpack.c.bf16 %v610_v27, %v609_v22  ;;  %376 = vst.msk [vmem:[#allocation2 + $0x109] sm:$0xff] %vm355_vm0, %v310_v4  ;;  %v3946_v19 = vunpack.c.h.bf16 %v4034_v53  ;;  %377 = vst.msk [vmem:[#allocation2 + $0x111] sm:$0xff] %vm355_vm0, %v311_v13  ;;  %v179_v22 = vmul.f32 %v3945_v14, %v4378_v2  ;;  %v3954_v27 = vunpack.c.h.bf16 %v4036_v60 }
  0x36   :  { %v671_v34 = vpack.c.bf16 %v612_v29, %v611_v28  ;;  %1406 = vrot.lane.b32.xlu0 %v668_v26, %s4182_s13  ;;  %v613_v55 = vld [vmem:[#allocation2 + $0x79] sm:$0xff]  ;;  %v614_v63 = vld [vmem:[#allocation2 + $0x81] sm:$0xff]  ;;  %378 = vst.msk [vmem:[#allocation2 + $0x121] sm:$0xff] %vm355_vm0, %v312_v17  ;;  %379 = vst.msk [vmem:[#allocation2 + $0x129] sm:$0xff] %vm355_vm0, %v313_v18  ;;  %v3953_v26 = vunpack.c.l.bf16 %v4036_v60  ;;  %v683_v28 = vpack.c.bf16 %v4512_v62, %v4510_v61  ;;  %v3966_v6 = vunpack.c.h.bf16 %v4039_v41 }
  0x37   :  { %v615_v0 = vld [vmem:[#allocation2 + $0x91] sm:$0xff]  ;;  %v616_v1 = vld [vmem:[#allocation2 + $0x99] sm:$0xff]  ;;  %v672_v7 = vpack.c.bf16 %v614_v63, %v613_v55  ;;  %v180_v25 = vmul.f32 %v3946_v19, %v4378_v2  ;;  %v250_v29 = vadd.f32 %v4408_v8, %v179_v22  ;;  %v184_v35 = vmul.f32 %v3954_v27, %v4378_v2 }
  0x38   :  { %v673_v9 = vpack.c.bf16 %v616_v1, %v615_v0  ;;  %v617_v10 = vld [vmem:[#allocation2 + $0xa9] sm:$0xff]  ;;  %v618_v11 = vld [vmem:[#allocation2 + $0xb1] sm:$0xff]  ;;  %v4038_v20 = vld [vmem:[%s6005_s0 + $0x80] sm:$0xff]   ;;  %v252_v38 = vadd.f32 %v4408_v8, %v181_v30  ;;  %v253_v39 = vadd.f32 %v4408_v8, %v182_v31  ;;  %v189_v13 = vmul.f32 %v3965_v5, %v4378_v2 }
  0x39   :  { %1410 = vrot.lane.b32.xlu1 %v670_v33, %s4182_s13  ;;  %v619_v12 = vld [vmem:[#allocation2 + $0xc1] sm:$0xff]  ;;  %v674_v15 = vpack.c.bf16 %v618_v11, %v617_v10  ;;  %v620_v16 = vld [vmem:[#allocation2 + $0xc9] sm:$0xff]  ;;  %v3961_v32 = vunpack.c.l.bf16 %v4038_v20  ;;  %v251_v33 = vadd.f32 %v4408_v8, %v180_v25  ;;  %v3962_v36 = vunpack.c.h.bf16 %v4038_v20  ;;  %v4041_v63 = vld [vmem:[%s6005_s0 + $0x98] sm:$0xff]  }
  0x3a   :  { %1412 = vrot.lane.b32.xlu0 %v671_v34, %s4182_s13  ;;  %v675_v21 = vpack.c.bf16 %v620_v16, %v619_v12  ;;  %v183_v34 = vmul.f32 %v3953_v26, %v4378_v2  ;;  %v314_v37 = vmax.f32 %v250_v29, 0.0  ;;  %v621_v42 = vld [vmem:[#allocation2 + $0xd9] sm:$0xff]  ;;  %v622_v43 = vld [vmem:[#allocation2 + $0xe1] sm:$0xff]  ;;  %v255_v47 = vadd.f32 %v4408_v8, %v184_v35  ;;  %v4040_v55 = vld [vmem:[%s6005_s0 + $0x90] sm:$0xff]  }
  0x3b   :  { %v187_v40 = vmul.f32 %v3961_v32, %v4378_v2  ;;  %v623_v44 = vld [vmem:[#allocation2 + $0xf1] sm:$0xff]  ;;  %v315_v45 = vmax.f32 %v251_v33, 0.0  ;;  %v188_v48 = vmul.f32 %v3962_v36, %v4378_v2  ;;  %v676_v49 = vpack.c.bf16 %v622_v43, %v621_v42  ;;  %v624_v50 = vld [vmem:[#allocation2 + $0xf9] sm:$0xff]  ;;  %v4043_v36 = vld [vmem:[%s6005_s0 + $0xa8] sm:$0xff]  }
  0x3c   :  { %v254_v46 = vadd.f32 %v4408_v8, %v183_v34  ;;  %v625_v51 = vld [vmem:[#allocation2 + $0x109] sm:$0xff]  ;;  %380 = vst.msk [vmem:[#allocation2 + $0x139] sm:$0xff] %vm355_vm0, %v314_v37  ;;  %v316_v52 = vmax.f32 %v252_v38, 0.0  ;;  %v317_v53 = vmax.f32 %v253_v39, 0.0  ;;  %v677_v56 = vpack.c.bf16 %v624_v50, %v623_v44  ;;  %v626_v57 = vld [vmem:[#allocation2 + $0x111] sm:$0xff] }
  0x3d   :  { %1414 = vrot.lane.b32.xlu1 %v672_v7, %s4182_s13  ;;  %v258_v54 = vadd.f32 %v4408_v8, %v187_v40  ;;  %381 = vst.msk [vmem:[#allocation2 + $0x141] sm:$0xff] %vm355_vm0, %v315_v45  ;;  %v319_v59 = vmax.f32 %v255_v47, 0.0  ;;  %v259_v60 = vadd.f32 %v4408_v8, %v188_v48  ;;  %v678_v0 = vpack.c.bf16 %v626_v57, %v625_v51  ;;  %v627_v1 = vld [vmem:[#allocation2 + $0x121] sm:$0xff]  ;;  %v628_v3 = vld [vmem:[#allocation2 + $0x129] sm:$0xff]  ;;  %v4045_v44 = vld [vmem:[%s6005_s0 + $0xb8] sm:$0xff]  }
  0x3e   :  { %1416 = vrot.lane.b32.xlu0 %v673_v9, %s4182_s13  ;;  %v318_v58 = vmax.f32 %v254_v46, 0.0  ;;  %382 = vst.msk [vmem:[#allocation2 + $0x151] sm:$0xff] %vm355_vm0, %v316_v52  ;;  %383 = vst.msk [vmem:[#allocation2 + $0x159] sm:$0xff] %vm355_vm0, %v317_v53  ;;  %v4042_v7 = vld [vmem:[%s6005_s0 + $0xa0] sm:$0xff]   ;;  %v679_v9 = vpack.c.bf16 %v628_v3, %v627_v1  ;;  %v3969_v11 = vunpack.c.l.bf16 %v4040_v55  ;;  %v3970_v12 = vunpack.c.h.bf16 %v4040_v55  ;;  %v4044_v37 = vld [vmem:[%s6005_s0 + $0xb0] sm:$0xff]  }
  0x3f   :  { %v322_v4 = vmax.f32 %v258_v54, 0.0  ;;  %385 = vst.msk [vmem:[#allocation2 + $0x171] sm:$0xff] %vm355_vm0, %v319_v59  ;;  %v323_v10 = vmax.f32 %v259_v60, 0.0  ;;  %v190_v14 = vmul.f32 %v3966_v6, %v4378_v2  ;;  %v3974_v16 = vunpack.c.h.bf16 %v4041_v63  ;;  %v4048_v62 = vld [vmem:[%s6005_s0 + $0xd0] sm:$0xff]  }
  0x40   :  { %384 = vst.msk [vmem:[#allocation2 + $0x169] sm:$0xff] %vm355_vm0, %v318_v58  ;;  %v191_v17 = vmul.f32 %v3969_v11, %v4378_v2  ;;  %v192_v18 = vmul.f32 %v3970_v12, %v4378_v2  ;;  %v3977_v19 = vunpack.c.l.bf16 %v4042_v7  ;;  %v3978_v20 = vunpack.c.h.bf16 %v4042_v7 }
  0x41   :  { %1418 = vrot.lane.b32.xlu1 %v674_v15, %s4182_s13  ;;  %388 = vst.msk [vmem:[#allocation2 + $0x1c9] sm:$0xff] %vm355_vm0, %v322_v4  ;;  %v3973_v15 = vunpack.c.l.bf16 %v4041_v63  ;;  %389 = vst.msk [vmem:[#allocation2 + $0x1d1] sm:$0xff] %vm355_vm0, %v323_v10  ;;  %v261_v22 = vadd.f32 %v4408_v8, %v190_v14  ;;  %v194_v24 = vmul.f32 %v3974_v16, %v4378_v2  ;;  %v3981_v54 = vunpack.c.l.bf16 %v4043_v36 }
  0x42   :  { %1420 = vrot.lane.b32.xlu0 %v675_v21, %s4182_s13  ;;  %v260_v21 = vadd.f32 %v4408_v8, %v189_v13  ;;  %v262_v26 = vadd.f32 %v4408_v8, %v191_v17  ;;  %v263_v27 = vadd.f32 %v4408_v8, %v192_v18  ;;  %v195_v29 = vmul.f32 %v3977_v19, %v4378_v2  ;;  %v4047_v18 = vld [vmem:[%s6005_s0 + $0xc8] sm:$0xff]  }
  0x43   :  { %v193_v23 = vmul.f32 %v3973_v15, %v4378_v2  ;;  %v629_v25 = vld [vmem:[#allocation2 + $0x139] sm:$0xff]  ;;  %v196_v30 = vmul.f32 %v3978_v20, %v4378_v2  ;;  %v325_v33 = vmax.f32 %v261_v22, 0.0  ;;  %v265_v35 = vadd.f32 %v4408_v8, %v194_v24 }
  0x44   :  { %v630_v31 = vld [vmem:[#allocation2 + $0x141] sm:$0xff]  ;;  %v324_v32 = vmax.f32 %v260_v21, 0.0  ;;  %v326_v41 = vmax.f32 %v262_v26, 0.0  ;;  %v327_v42 = vmax.f32 %v263_v27, 0.0  ;;  %v266_v43 = vadd.f32 %v4408_v8, %v195_v29 }
  0x45   :  { %1422 = vrot.lane.b32.xlu1 %v676_v49, %s4182_s13  ;;  %v264_v34 = vadd.f32 %v4408_v8, %v193_v23  ;;  %v680_v38 = vpack.c.bf16 %v630_v31, %v629_v25  ;;  %v631_v39 = vld [vmem:[#allocation2 + $0x151] sm:$0xff]  ;;  %v632_v40 = vld [vmem:[#allocation2 + $0x159] sm:$0xff]  ;;  %391 = vst.msk [vmem:[#allocation2 + $0x1e9] sm:$0xff] %vm355_vm0, %v325_v33  ;;  %v329_v49 = vmax.f32 %v265_v35, 0.0  ;;  %v267_v50 = vadd.f32 %v4408_v8, %v196_v30 }
  0x46   :  { %1424 = vrot.lane.b32.xlu0 %v677_v56, %s4182_s13  ;;  %v681_v45 = vpack.c.bf16 %v632_v40, %v631_v39  ;;  %v634_v47 = vld [vmem:[#allocation2 + $0x171] sm:$0xff]  ;;  %390 = vst.msk [vmem:[#allocation2 + $0x1e1] sm:$0xff] %vm355_vm0, %v324_v32  ;;  %392 = vst.msk [vmem:[#allocation2 + $0x1f9] sm:$0xff] %vm355_vm0, %v326_v41  ;;  %v330_v53 = vmax.f32 %v266_v43, 0.0  ;;  %v3982_v55 = vunpack.c.h.bf16 %v4043_v36  ;;  %v4046_v56 = vld [vmem:[%s6005_s0 + $0xc0] sm:$0xff]   ;;  %v3985_v59 = vunpack.c.l.bf16 %v4044_v37 }
  0x47   :  { %v633_v46 = vld [vmem:[#allocation2 + $0x169] sm:$0xff]  ;;  %v328_v48 = vmax.f32 %v264_v34, 0.0  ;;  %393 = vst.msk [vmem:[#allocation2 + $0x201] sm:$0xff] %vm355_vm0, %v327_v42  ;;  %395 = vst.msk [vmem:[#allocation2 + $0x219] sm:$0xff] %vm355_vm0, %v329_v49  ;;  %v331_v58 = vmax.f32 %v267_v50, 0.0  ;;  %v3986_v60 = vunpack.c.h.bf16 %v4044_v37  ;;  %v3989_v63 = vunpack.c.l.bf16 %v4045_v44  ;;  %v4049_v30 = vld [vmem:[%s6005_s0 + $0xd8] sm:$0xff]  }
  0x48   :  { %v682_v51 = vpack.c.bf16 %v634_v47, %v633_v46  ;;  %v637_v52 = vld [vmem:[#allocation2 + $0x1c9] sm:$0xff]  ;;  %v638_v57 = vld [vmem:[#allocation2 + $0x1d1] sm:$0xff]  ;;  %396 = vst.msk [vmem:[#allocation2 + $0x229] sm:$0xff] %vm355_vm0, %v330_v53  ;;  %v197_v1 = vmul.f32 %v3981_v54, %v4378_v2  ;;  %v198_v3 = vmul.f32 %v3982_v55, %v4378_v2  ;;  %v3990_v4 = vunpack.c.h.bf16 %v4045_v44  ;;  %v4050_v42 = vld [vmem:[%s6005_s0 + $0xe0] sm:$0xff]  }
  0x49   :  { %1426 = vrot.lane.b32.xlu1 %v678_v0, %s4182_s13  ;;  %394 = vst.msk [vmem:[#allocation2 + $0x211] sm:$0xff] %vm355_vm0, %v328_v48  ;;  %v684_v0 = vpack.c.bf16 %v638_v57, %v637_v52  ;;  %397 = vst.msk [vmem:[#allocation2 + $0x231] sm:$0xff] %vm355_vm0, %v331_v58  ;;  %v199_v5 = vmul.f32 %v3985_v59, %v4378_v2  ;;  %v200_v6 = vmul.f32 %v3986_v60, %v4378_v2 }
  0x4a   :  { %1428 = vrot.lane.b32.xlu0 %v679_v9, %s4182_s13  ;;  %v201_v7 = vmul.f32 %v3989_v63, %v4378_v2  ;;  %v3993_v9 = vunpack.c.l.bf16 %v4046_v56  ;;  %v268_v10 = vadd.f32 %v4408_v8, %v197_v1  ;;  %v269_v11 = vadd.f32 %v4408_v8, %v198_v3  ;;  %v4051_v3 = vld [vmem:[%s6005_s0 + $0xe8] sm:$0xff]  }
  0x4b   :  { %v202_v12 = vmul.f32 %v3990_v4, %v4378_v2  ;;  %v3994_v13 = vunpack.c.h.bf16 %v4046_v56  ;;  %v270_v14 = vadd.f32 %v4408_v8, %v199_v5  ;;  %v271_v15 = vadd.f32 %v4408_v8, %v200_v6 }
  0x4c   :  { %v272_v16 = vadd.f32 %v4408_v8, %v201_v7  ;;  %v203_v17 = vmul.f32 %v3993_v9, %v4378_v2  ;;  %v640_v20 = vld [vmem:[#allocation2 + $0x1e9] sm:$0xff]  ;;  %v332_v21 = vmax.f32 %v268_v10, 0.0  ;;  %v333_v22 = vmax.f32 %v269_v11, 0.0 }
  0x4d   :  { %1430 = vrot.lane.b32.xlu1 %v680_v38, %s4182_s13  ;;  %v639_v19 = vld [vmem:[#allocation2 + $0x1e1] sm:$0xff]  ;;  %v273_v23 = vadd.f32 %v4408_v8, %v202_v12  ;;  %v204_v61 = vmul.f32 %v3994_v13, %v4378_v2  ;;  %v641_v24 = vld [vmem:[#allocation2 + $0x1f9] sm:$0xff]  ;;  %v334_v26 = vmax.f32 %v270_v14, 0.0  ;;  %v335_v27 = vmax.f32 %v271_v15, 0.0  ;;  %v4052_v11 = vld [vmem:[%s6005_s0 + $0xf0] sm:$0xff]  }
  0x4e   :  { %1432 = vrot.lane.b32.xlu0 %v681_v45, %s4182_s13  ;;  %v642_v25 = vld [vmem:[#allocation2 + $0x201] sm:$0xff]  ;;  %v336_v29 = vmax.f32 %v272_v16, 0.0  ;;  %v644_v33 = vld [vmem:[#allocation2 + $0x219] sm:$0xff]  ;;  %398 = vst.msk [vmem:[#allocation2 + $0x241] sm:$0xff] %vm355_vm0, %v332_v21  ;;  %399 = vst.msk [vmem:[#allocation2 + $0x249] sm:$0xff] %vm355_vm0, %v333_v22  ;;  %v274_v35 = vadd.f32 %v4408_v8, %v203_v17  ;;  %v3997_v39 = vunpack.c.l.bf16 %v4047_v18  ;;  %v3998_v40 = vunpack.c.h.bf16 %v4047_v18 }
  0x4f   :  { %v686_v31 = vpack.c.bf16 %v642_v25, %v641_v24  ;;  %v337_v34 = vmax.f32 %v273_v23, 0.0  ;;  %v275_v36 = vadd.f32 %v4408_v8, %v204_v61  ;;  %v645_v38 = vld [vmem:[#allocation2 + $0x229] sm:$0xff]  ;;  %400 = vst.msk [vmem:[#allocation2 + $0x259] sm:$0xff] %vm355_vm0, %v334_v26  ;;  %401 = vst.msk [vmem:[#allocation2 + $0x261] sm:$0xff] %vm355_vm0, %v335_v27  ;;  %v4001_v41 = vunpack.c.l.bf16 %v4048_v62 }
  0x50   :  { %v643_v32 = vld [vmem:[#allocation2 + $0x211] sm:$0xff]  ;;  %402 = vst.msk [vmem:[#allocation2 + $0x271] sm:$0xff] %vm355_vm0, %v336_v29  ;;  %v338_v44 = vmax.f32 %v274_v35, 0.0  ;;  %v4002_v46 = vunpack.c.h.bf16 %v4048_v62  ;;  %v4005_v47 = vunpack.c.l.bf16 %v4049_v30  ;;  %v205_v49 = vmul.f32 %v3997_v39, %v4378_v2 }
  0x51   :  { %1434 = vrot.lane.b32.xlu1 %v682_v51, %s4182_s13  ;;  %v687_v37 = vpack.c.bf16 %v644_v33, %v643_v32  ;;  %v646_v43 = vld [vmem:[#allocation2 + $0x231] sm:$0xff]  ;;  %403 = vst.msk [vmem:[#allocation2 + $0x279] sm:$0xff] %vm355_vm0, %v337_v34  ;;  %v339_v45 = vmax.f32 %v275_v36, 0.0  ;;  %v206_v50 = vmul.f32 %v3998_v40, %v4378_v2  ;;  %v207_v51 = vmul.f32 %v4001_v41, %v4378_v2 }
  0x52   :  { %1436 = vrot.lane.b32.xlu0 %v683_v28, %s4182_s13  ;;  %v685_v28 = vpack.c.bf16 %v640_v20, %v639_v19  ;;  %v688_v48 = vpack.c.bf16 %v646_v43, %v645_v38  ;;  %404 = vst.msk [vmem:[#allocation2 + $0x289] sm:$0xff] %vm355_vm0, %v338_v44  ;;  %v208_v52 = vmul.f32 %v4002_v46, %v4378_v2  ;;  %v4006_v53 = vunpack.c.h.bf16 %v4049_v30 }
  0x53   :  { %405 = vst.msk [vmem:[#allocation2 + $0x291] sm:$0xff] %vm355_vm0, %v339_v45  ;;  %v209_v54 = vmul.f32 %v4005_v47, %v4378_v2  ;;  %v4009_v55 = vunpack.c.l.bf16 %v4050_v42  ;;  %v276_v56 = vadd.f32 %v4408_v8, %v205_v49  ;;  %v277_v57 = vadd.f32 %v4408_v8, %v206_v50 }
  0x54   :  { %v278_v58 = vadd.f32 %v4408_v8, %v207_v51  ;;  %v4010_v59 = vunpack.c.h.bf16 %v4050_v42  ;;  %v279_v60 = vadd.f32 %v4408_v8, %v208_v52  ;;  %v210_v63 = vmul.f32 %v4006_v53, %v4378_v2 }
  0x55   :  { %1438 = vrot.lane.b32.xlu1 %v684_v0, %s4182_s13  ;;  %v280_v0 = vadd.f32 %v4408_v8, %v209_v54  ;;  %v211_v1 = vmul.f32 %v4009_v55, %v4378_v2  ;;  %v647_v4 = vld [vmem:[#allocation2 + $0x241] sm:$0xff]  ;;  %v648_v5 = vld [vmem:[#allocation2 + $0x249] sm:$0xff]  ;;  %v340_v6 = vmax.f32 %v276_v56, 0.0  ;;  %v341_v7 = vmax.f32 %v277_v57, 0.0 }
  0x56   :  { %1440 = vrot.lane.b32.xlu0 %v685_v28, %s4182_s13  ;;  %v342_v9 = vmax.f32 %v278_v58, 0.0  ;;  %v212_v10 = vmul.f32 %v4010_v59, %v4378_v2  ;;  %v689_v12 = vpack.c.bf16 %v648_v5, %v647_v4  ;;  %v649_v13 = vld [vmem:[#allocation2 + $0x259] sm:$0xff]  ;;  %v650_v14 = vld [vmem:[#allocation2 + $0x261] sm:$0xff]  ;;  %v343_v16 = vmax.f32 %v279_v60, 0.0  ;;  %v700_v58 = vld [vmem:[#allocation2 + $0xa] sm:$0xff] }
  0x57   :  { %v651_v15 = vld [vmem:[#allocation2 + $0x271] sm:$0xff]  ;;  %v281_v17 = vadd.f32 %v4408_v8, %v210_v63  ;;  %v344_v18 = vmax.f32 %v280_v0, 0.0  ;;  %v690_v19 = vpack.c.bf16 %v650_v14, %v649_v13  ;;  %406 = vst.msk [vmem:[#allocation2 + $0x2a1] sm:$0xff] %vm355_vm0, %v340_v6  ;;  %407 = vst.msk [vmem:[#allocation2 + $0x2a9] sm:$0xff] %vm355_vm0, %v341_v7  ;;  %v282_v21 = vadd.f32 %v4408_v8, %v211_v1  ;;  %v699_v55 = vld [vmem:[#allocation2 + $0x2] sm:$0xff] }
  0x58   :  { %v652_v20 = vld [vmem:[#allocation2 + $0x279] sm:$0xff]  ;;  %408 = vst.msk [vmem:[#allocation2 + $0x2b9] sm:$0xff] %vm355_vm0, %v342_v9  ;;  %v283_v22 = vadd.f32 %v4408_v8, %v212_v10  ;;  %v4013_v23 = vunpack.c.l.bf16 %v4051_v3  ;;  %409 = vst.msk [vmem:[#allocation2 + $0x2c1] sm:$0xff] %vm355_vm0, %v343_v16  ;;  %v4014_v28 = vunpack.c.h.bf16 %v4051_v3  ;;  %v4017_v24 = vunpack.c.l.bf16 %v4052_v11  ;;  %v702_v0 = vld [vmem:[#allocation2 + $0x22] sm:$0xff] }
  0x59   :  { %1442 = vrot.lane.b32.xlu1 %v686_v31, %s4182_s13  ;;  %v691_v61 = vpack.c.bf16 %v652_v20, %v651_v15  ;;  %v345_v62 = vmax.f32 %v281_v17, 0.0  ;;  %410 = vst.msk [vmem:[#allocation2 + $0x2d1] sm:$0xff] %vm355_vm0, %v344_v18  ;;  %v653_v25 = vld [vmem:[#allocation2 + $0x289] sm:$0xff]  ;;  %v346_v27 = vmax.f32 %v282_v21, 0.0  ;;  %v4018_v31 = vunpack.c.h.bf16 %v4052_v11  ;;  %v701_v63 = vld [vmem:[#allocation2 + $0x1a] sm:$0xff]  ;;  %v703_v5 = vld [vmem:[#allocation2 + $0x32] sm:$0xff] }
  0x5a   :  { %1444 = vrot.lane.b32.xlu0 %v687_v37, %s4182_s13  ;;  %v654_v26 = vld [vmem:[#allocation2 + $0x291] sm:$0xff]  ;;  %v347_v29 = vmax.f32 %v283_v22, 0.0  ;;  %v213_v30 = vmul.f32 %v4013_v23, %v4378_v2  ;;  %v214_v33 = vmul.f32 %v4014_v28, %v4378_v2  ;;  %v215_v34 = vmul.f32 %v4017_v24, %v4378_v2  ;;  %v704_v6 = vld [vmem:[#allocation2 + $0x3a] sm:$0xff]  ;;  %v710_v15 = vld [vmem:[#allocation2 + $0x82] sm:$0xff] }
  0x5b   :  { %v692_v32 = vpack.c.bf16 %v654_v26, %v653_v25  ;;  %411 = vst.msk [vmem:[#allocation2 + $0x2d9] sm:$0xff] %vm355_vm0, %v345_v62  ;;  %412 = vst.msk [vmem:[#allocation2 + $0x2e9] sm:$0xff] %vm355_vm0, %v346_v27  ;;  %v216_v36 = vmul.f32 %v4018_v31, %v4378_v2  ;;  %v763_v3 = vpack.c.bf16 %v700_v58, %v699_v55  ;;  %v705_v7 = vld [vmem:[#allocation2 + $0x4a] sm:$0xff]  ;;  %v706_v9 = vld [vmem:[#allocation2 + $0x52] sm:$0xff] }
  0x5c   :  { %413 = vst.msk [vmem:[#allocation2 + $0x2f1] sm:$0xff] %vm355_vm0, %v347_v29  ;;  %v284_v35 = vadd.f32 %v4408_v8, %v213_v30  ;;  %v285_v37 = vadd.f32 %v4408_v8, %v214_v33  ;;  %v286_v38 = vadd.f32 %v4408_v8, %v215_v34  ;;  %v4709_v4 = vpack.c.bf16 %v702_v0, %v701_v63  ;;  %v708_v13 = vld [vmem:[#allocation2 + $0x6a] sm:$0xff]  ;;  %v709_v14 = vld [vmem:[#allocation2 + $0x7a] sm:$0xff]  ;;  %v711_v18 = vld [vmem:[#allocation2 + $0x92] sm:$0xff] }
  0x5d   :  { %1446 = vrot.lane.b32.xlu1 %v688_v48, %s4182_s13  ;;  %v287_v40 = vadd.f32 %v4408_v8, %v216_v36  ;;  %v4712_v10 = vpack.c.bf16 %v704_v6, %v703_v5  ;;  %v4716_v11 = vpack.c.bf16 %v706_v9, %v705_v7  ;;  %v4724_v17 = vpack.c.bf16 %v710_v15, %v709_v14  ;;  %v713_v20 = vld [vmem:[#allocation2 + $0xaa] sm:$0xff]  ;;  %v714_v21 = vld [vmem:[#allocation2 + $0xb2] sm:$0xff]  ;;  %v717_v28 = vld [vmem:[#allocation2 + $0xda] sm:$0xff] }
  0x5e   :  { %1448 = vrot.lane.b32.xlu0 %v689_v12, %s4182_s13  ;;  %v348_v39 = vmax.f32 %v284_v35, 0.0  ;;  %v655_v41 = vld [vmem:[#allocation2 + $0x2a1] sm:$0xff]  ;;  %v656_v42 = vld [vmem:[#allocation2 + $0x2a9] sm:$0xff]  ;;  %v349_v44 = vmax.f32 %v285_v37, 0.0  ;;  %v350_v45 = vmax.f32 %v286_v38, 0.0  ;;  %v4732_v23 = vpack.c.bf16 %v714_v21, %v713_v20  ;;  %v719_v27 = vld [vmem:[#allocation2 + $0xf2] sm:$0xff] }
  0x5f   :  { %v657_v43 = vld [vmem:[#allocation2 + $0x2b9] sm:$0xff]  ;;  %v693_v46 = vpack.c.bf16 %v656_v42, %v655_v41  ;;  %v658_v47 = vld [vmem:[#allocation2 + $0x2c1] sm:$0xff]  ;;  %v351_v2 = vmax.f32 %v287_v40, 0.0  ;;  %v716_v62 = vld [vmem:[#allocation2 + $0xca] sm:$0xff] }
  0x60   :  { %v659_v48 = vld [vmem:[#allocation2 + $0x2d1] sm:$0xff]  ;;  %414 = vst.msk [vmem:[#allocation2 + $0x301] sm:$0xff] %vm355_vm0, %v348_v39  ;;  %v694_v49 = vpack.c.bf16 %v658_v47, %v657_v43  ;;  %415 = vst.msk [vmem:[#allocation2 + $0x309] sm:$0xff] %vm355_vm0, %v349_v44  ;;  %v707_v12 = vld [vmem:[#allocation2 + $0x62] sm:$0xff] }
  0x61   :  { %1450 = vrot.lane.b32.xlu1 %v690_v19, %s4182_s13  ;;  %416 = vst.msk [vmem:[#allocation2 + $0x319] sm:$0xff] %vm355_vm0, %v350_v45  ;;  %417 = vst.msk [vmem:[#allocation2 + $0x321] sm:$0xff] %vm355_vm0, %v351_v2  ;;  %v4720_v16 = vpack.c.bf16 %v708_v13, %v707_v12  ;;  %v712_v19 = vld [vmem:[#allocation2 + $0x9a] sm:$0xff]  ;;  %v718_v24 = vld [vmem:[#allocation2 + $0xe2] sm:$0xff] }
  0x62   :  { %1452 = vrot.lane.b32.xlu0 %v691_v61, %s4182_s13  ;;  %v660_v8 = vld [vmem:[#allocation2 + $0x2d9] sm:$0xff]  ;;  %v661_v51 = vld [vmem:[#allocation2 + $0x2e9] sm:$0xff]  ;;  %v4728_v22 = vpack.c.bf16 %v712_v19, %v711_v18  ;;  %v4740_v26 = vpack.c.bf16 %v718_v24, %v717_v28  ;;  %v892_v12 = vld [vmem:[#allocation2 + $0x21] sm:$0xff] }
  0x63   :  { %v695_v50 = vpack.c.bf16 %v660_v8, %v659_v48  ;;  %v662_v52 = vld [vmem:[#allocation2 + $0x2f1] sm:$0xff]  ;;  %v715_v61 = vld [vmem:[#allocation2 + $0xc2] sm:$0xff]  ;;  %v720_v29 = vld [vmem:[#allocation2 + $0xfa] sm:$0xff] }
  0x64   :  { %v696_v53 = vpack.c.bf16 %v662_v52, %v661_v51  ;;  %v4736_v25 = vpack.c.bf16 %v716_v62, %v715_v61  ;;  %v721_v30 = vld [vmem:[#allocation2 + $0x10a] sm:$0xff]  ;;  %v722_v31 = vld [vmem:[#allocation2 + $0x112] sm:$0xff]  ;;  %v723_v34 = vld [vmem:[#allocation2 + $0x122] sm:$0xff] }
  0x65   :  { %1454 = vrot.lane.b32.xlu1 %v692_v32, %s4182_s13  ;;  %v4744_v32 = vpack.c.bf16 %v720_v29, %v719_v27  ;;  %v4748_v33 = vpack.c.bf16 %v722_v31, %v721_v30  ;;  %v724_v35 = vld [vmem:[#allocation2 + $0x12a] sm:$0xff]  ;;  %v725_v36 = vld [vmem:[#allocation2 + $0x13a] sm:$0xff]  ;;  %v726_v37 = vld [vmem:[#allocation2 + $0x142] sm:$0xff] }
  0x66   :  { %1456 = vrot.lane.b32.xlu0 %v693_v46, %s4182_s13  ;;  %v775_v38 = vpack.c.bf16 %v724_v35, %v723_v34  ;;  %v776_v39 = vpack.c.bf16 %v726_v37, %v725_v36  ;;  %v727_v40 = vld [vmem:[#allocation2 + $0x152] sm:$0xff]  ;;  %v728_v41 = vld [vmem:[#allocation2 + $0x15a] sm:$0xff]  ;;  %v729_v42 = vld [vmem:[#allocation2 + $0x16a] sm:$0xff] }
  0x67   :  { %v663_v54 = vld [vmem:[#allocation2 + $0x301] sm:$0xff]  ;;  %v664_v56 = vld [vmem:[#allocation2 + $0x309] sm:$0xff]  ;;  %v730_v43 = vld [vmem:[#allocation2 + $0x172] sm:$0xff]  ;;  %v777_v44 = vpack.c.bf16 %v728_v41, %v727_v40 }
  0x68   :  { %v665_v57 = vld [vmem:[#allocation2 + $0x319] sm:$0xff]  ;;  %v697_v59 = vpack.c.bf16 %v664_v56, %v663_v54  ;;  %v666_v60 = vld [vmem:[#allocation2 + $0x321] sm:$0xff]  ;;  %v778_v45 = vpack.c.bf16 %v730_v43, %v729_v42  ;;  %v733_v48 = vld [vmem:[#allocation2 + $0x1ca] sm:$0xff] }
  0x69   :  { %1458 = vrot.lane.b32.xlu1 %v694_v49, %s4182_s13  ;;  %v698_v1 = vpack.c.bf16 %v666_v60, %v665_v57  ;;  %v731_v46 = vld [vmem:[#allocation2 + $0x1b2] sm:$0xff]  ;;  %v732_v47 = vld [vmem:[#allocation2 + $0x1ba] sm:$0xff]  ;;  %v736_v51 = vld [vmem:[#allocation2 + $0x1ea] sm:$0xff] }
  0x6a   :  { %1460 = vrot.lane.b32.xlu0 %v695_v50, %s4182_s13  ;;  %v734_v2 = vld [vmem:[#allocation2 + $0x1d2] sm:$0xff]  ;;  %v779_v49 = vpack.c.bf16 %v732_v47, %v731_v46  ;;  %v735_v50 = vld [vmem:[#allocation2 + $0x1e2] sm:$0xff]  ;;  %v737_v52 = vld [vmem:[#allocation2 + $0x1fa] sm:$0xff] }
  0x6b   :  { %v780_v8 = vpack.c.bf16 %v734_v2, %v733_v48  ;;  %v781_v54 = vpack.c.bf16 %v736_v51, %v735_v50  ;;  %v739_v56 = vld [vmem:[#allocation2 + $0x212] sm:$0xff]  ;;  %v740_v57 = vld [vmem:[#allocation2 + $0x21a] sm:$0xff]  ;;  %v741_v58 = vld [vmem:[#allocation2 + $0x22a] sm:$0xff] }
  0x6c   :  { %v783_v60 = vpack.c.bf16 %v740_v57, %v739_v56  ;;  %v795_v0 = vld [vmem:[#allocation2 + $0x18] sm:$0xff]  ;;  %v4176_v15 = vld [vmem:[%s6008_s3 + $0x10] ss:$0 sps:$4 sm:$0x33]   ;;  %v4177_v61 = vld [vmem:[%s6008_s3 + $0x8] sm:$0xff]  }
  0x6d   :  { %1462 = vrot.lane.b32.xlu1 %v696_v53, %s4182_s13  ;;  %v738_v53 = vld [vmem:[#allocation2 + $0x202] sm:$0xff]  ;;  %v798_v5 = vld [vmem:[#allocation2 + $0x38] sm:$0xff]  ;;  %4165 = vmatprep.subr.msk.bf16.mxu0 %vm2776_vm3, %v4176_v15  ;;  %v2778_v20 = vsel %vm2776_vm3, %v4176_v15, 0  ;;  %v514_v27 = vld [vmem:[#allocation2 + $0x50] sm:$0xff] }
  0x6e   :  { %1464 = vrot.lane.b32.xlu0 %v697_v59, %s4182_s13  ;;  %v782_v55 = vpack.c.bf16 %v738_v53, %v737_v52  ;;  %v742_v59 = vld [vmem:[#allocation2 + $0x232] sm:$0xff]  ;;  %4090 = vmatpush3.bf16.msra.mxu0 %v2778_v20  ;;  %v513_v24 = vld [vmem:[#allocation2 + $0x48] sm:$0xff]  ;;  %v4178_v29 = vld [vmem:[%s6008_s3] sm:$0xff]   ;;  %s4187_s3 = smov 24  }
  0x6f   :  { %v784_v63 = vpack.c.bf16 %v742_v59, %v741_v58  ;;  %v891_v9 = vld [vmem:[#allocation2 + $0x19] sm:$0xff]  ;;  %v893_v13 = vld [vmem:[#allocation2 + $0x31] sm:$0xff]  ;;  %4166 = vmatprep.subr.msk.bf16.mxu1 %vm2776_vm3, %v4176_v15  ;;  %4091 = vmatprep.subr.bf16.mxu0 %v4177_v61  ;;  %v4795_v31 = vpack.c.bf16 %v514_v27, %v513_v24  ;;  %v1182_v35 = vld [vmem:[#allocation2 + $0x49] sm:$0xff] }
  0x70   :  { %v894_v14 = vld [vmem:[#allocation2 + $0x39] sm:$0xff]  ;;  %v955_v19 = vpack.c.bf16 %v892_v12, %v891_v9  ;;  %4162 = vmatpush3.bf16.msra.mxu1 %v2778_v20  ;;  %v1183_v36 = vld [vmem:[#allocation2 + $0x51] sm:$0xff]  ;;  %v516_v42 = vld [vmem:[#allocation2 + $0x68] sm:$0xff] }
  0x71   :  { %1466 = vrot.lane.b32.xlu1 %v698_v1, %s4182_s13  ;;  %v796_v1 = vld [vmem:[#allocation2 + $0x20] sm:$0xff]  ;;  %v956_v21 = vpack.c.bf16 %v894_v14, %v893_v13  ;;  %4160 = vmatprep.subr.bf16.mxu1 %v4177_v61  ;;  %v898_v46 = vld [vmem:[#allocation2 + $0x69] sm:$0xff]  ;;  %v4037_v2 = vld [vmem:[%s6005_s0 + $0x78] sm:$0xff]  }
  0x72   :  { %1500 = vrot.lane.b32.xlu0 %v763_v3, %s4183_s9  ;;  %v797_v3 = vld [vmem:[#allocation2 + $0x30] sm:$0xff]  ;;  %v4763_v6 = vpack.c.bf16 %v796_v1, %v795_v0  ;;  %4092 = vmatpush3.bf16.msra.mxu0 %v4177_v61  ;;  %v515_v41 = vld [vmem:[#allocation2 + $0x60] sm:$0xff]  ;;  %v3958_v50 = vunpack.c.h.bf16 %v4037_v2  ;;  %v517_v59 = vld [vmem:[#allocation2 + $0x78] sm:$0xff] }
  0x73   :  { %v4766_v7 = vpack.c.bf16 %v798_v5, %v797_v3  ;;  %4093 = vmatprep.subr.bf16.mxu0 %v4178_v29  ;;  %v4821_v47 = vpack.c.bf16 %v516_v42, %v515_v41  ;;  %v4838_v51 = vld [vmem:[%s6006_s1] ss:$0 sm:$0xff]  ;;  %v1187_v5 = vld [vmem:[#allocation2 + $0x81] sm:$0xff]  ;;  %v519_v20 = vld [vmem:[#allocation2 + $0x90] sm:$0xff] }
  0x74   :  { %4163 = vmatpush3.bf16.msra.mxu1 %v4177_v61  ;;  %v186_v53 = vmul.f32 %v4838_v51, %v3958_v50  ;;  %v1186_v3 = vld [vmem:[#allocation2 + $0x79] sm:$0xff]  ;;  %v901_v24 = vld [vmem:[#allocation2 + $0x91] sm:$0xff]  ;;  %v521_v42 = vld [vmem:[#allocation2 + $0xa8] sm:$0xff] }
  0x75   :  { %1502 = vrot.lane.b32.xlu1 %v4709_v4, %s4183_s9  ;;  %4161 = vmatprep.subr.bf16.mxu1 %v4178_v29  ;;  %v902_v27 = vld [vmem:[#allocation2 + $0x99] sm:$0xff] }
  0x76   :  { %1504 = vrot.lane.b32.xlu0 %v4712_v10, %s4183_s9  ;;  %4094 = vmatpush3.bf16.msra.mxu0 %v4178_v29 }
  0x78   :  { %4164 = vmatpush3.bf16.msra.mxu1 %v4178_v29 }
  0x79   :  { %1506 = vrot.lane.b32.xlu1 %v4716_v11, %s4183_s9 }
  0x7a   :  { %1508 = vrot.lane.b32.xlu0 %v4720_v16, %s4183_s9 }
  0x7d   :  { %1510 = vrot.lane.b32.xlu1 %v4724_v17, %s4183_s9 }
  0x7e   :  { %1512 = vrot.lane.b32.xlu0 %v4728_v22, %s4183_s9  ;;  %v4771_v18 = vpop.permute.xlu0 %1404 }
  0x81   :  { %1514 = vrot.lane.b32.xlu1 %v4732_v23, %s4183_s9 }
  0x82   :  { %1516 = vrot.lane.b32.xlu0 %v4736_v25, %s4183_s9 }
  0x85   :  { %1518 = vrot.lane.b32.xlu1 %v4740_v26, %s4183_s9 }
  0x86   :  { %1520 = vrot.lane.b32.xlu0 %v4744_v32, %s4183_s9 }
  0x89   :  { %1522 = vrot.lane.b32.xlu1 %v4748_v33, %s4183_s9 }
  0x8a   :  { %1524 = vrot.lane.b32.xlu0 %v775_v38, %s4183_s9  ;;  %v1245_v38 = vpack.c.bf16 %v1183_v36, %v1182_v35  ;;  %v960_v36 = vpack.c.bf16 %v902_v27, %v901_v24 }
  0x8d   :  { %1526 = vrot.lane.b32.xlu1 %v776_v39, %s4183_s9 }
  0x8e   :  { %1528 = vrot.lane.b32.xlu0 %v777_v44, %s4183_s9 }
  0x91   :  { %1530 = vrot.lane.b32.xlu1 %v778_v45, %s4183_s9  ;;  %v897_v45 = vld [vmem:[#allocation2 + $0x61] sm:$0xff] }
  0x92   :  { %1532 = vrot.lane.b32.xlu0 %v779_v49, %s4183_s9 }
  0x95   :  { %1534 = vrot.lane.b32.xlu1 %v780_v8, %s4183_s9  ;;  %v3957_v8 = vunpack.c.l.bf16 %v4037_v2  ;;  %v1190_v2 = vld [vmem:[#allocation2 + $0xa9] sm:$0xff] }
  0x96   :  { %1536 = vrot.lane.b32.xlu0 %v781_v54, %s4183_s9 }
  0x97   :  { %v185_v52 = vmul.f32 %v4838_v51, %v3957_v8  ;;  %v1191_v8 = vld [vmem:[#allocation2 + $0xb1] sm:$0xff] }
  0x99   :  { %1538 = vrot.lane.b32.xlu1 %v782_v55, %s4183_s9  ;;  %v4848_v55 = vld [vmem:[%s6007_s2] ss:$0 sm:$0xff] }
  0x9a   :  { %1540 = vrot.lane.b32.xlu0 %v783_v60, %s4183_s9  ;;  %v256_v56 = vadd.f32 %v4848_v55, %v185_v52  ;;  %v257_v57 = vadd.f32 %v4848_v55, %v186_v53  ;;  %v518_v60 = vld [vmem:[#allocation2 + $0x80] sm:$0xff] }
  0x9b   :  { %v4862_v9 = vpack.c.bf16 %v518_v60, %v517_v59  ;;  %v523_v59 = vld [vmem:[#allocation2 + $0xc0] sm:$0xff]  ;;  %v524_v60 = vld [vmem:[#allocation2 + $0xc8] sm:$0xff] }
  0x9c   :  { %v321_v0 = vmax.f32 %v257_v57, 0.0 }
  0x9d   :  { %1542 = vrot.lane.b32.xlu1 %v784_v63, %s4183_s9  ;;  %v320_v63 = vmax.f32 %v256_v56, 0.0 }
  0x9e   :  { %1596 = vrot.lane.b32.xlu0 %v4763_v6, %s4184_s11  ;;  %387 = vst.msk [vmem:[#allocation2 + $0x189] sm:$0xff] %vm355_vm0, %v321_v0  ;;  %v905_v0 = vld [vmem:[#allocation2 + $0xc1] sm:$0xff] }
  0x9f   :  { %386 = vst.msk [vmem:[#allocation2 + $0x181] sm:$0xff] %vm355_vm0, %v320_v63 }
  0xa1   :  { %1598 = vrot.lane.b32.xlu1 %v4766_v7, %s4184_s11 }
  0xa2   :  { %1692 = vrot.lane.b32.xlu0 %v955_v19, %s4185_s15 }
  0xa5   :  { %1694 = vrot.lane.b32.xlu1 %v956_v21, %s4185_s15 }
  0xa6   :  { %1788 = vrot.lane.b32.xlu0 %v4709_v4, %s4186_s18 }
  0xa7   :  { %v4781_v62 = vpop.permute.xlu1 %1408 }
  0xa8   :  { %v4784_v28 = vpop.permute.xlu0 %1406 }
  0xa9   :  { %1790 = vrot.lane.b32.xlu1 %v4712_v10, %s4186_s18 }
  0xaa   :  { %1884 = vrot.lane.b32.xlu0 %v4766_v7, %s4187_s3 }
  0xab   :  { %v4791_v30 = vpop.permute.xlu1 %1410 }
  0xac   :  { %v4797_v34 = vpop.permute.xlu0 %1412 }
  0xad   :  { %1886 = vrot.lane.b32.xlu1 %v4795_v31, %s4187_s3 }
  0xae   :  { %1980 = vrot.lane.b32.xlu0 %v956_v21, %s4188_s19  ;;  %v520_v21 = vld [vmem:[#allocation2 + $0x98] sm:$0xff] }
  0xaf   :  { %v4803_v4 = vpop.permute.xlu1 %1414  ;;  %v4886_v29 = vpack.c.bf16 %v520_v21, %v519_v20 }
  0xb0   :  { %v4805_v37 = vpop.permute.xlu0 %1416 }
  0xb1   :  { %1982 = vrot.lane.b32.xlu1 %v1245_v38, %s4188_s19 }
  0xb2   :  { %2076 = vrot.lane.b32.xlu0 %v4712_v10, %s4189_s20  ;;  %v958_v10 = vpack.c.bf16 %v898_v46, %v897_v45  ;;  %v522_v45 = vld [vmem:[#allocation2 + $0xb0] sm:$0xff] }
  0xb3   :  { %v4809_v39 = vpop.permute.xlu1 %1418  ;;  %v4910_v50 = vpack.c.bf16 %v522_v45, %v521_v42  ;;  %v526_v42 = vld [vmem:[#allocation2 + $0xe0] sm:$0xff] }
  0xb4   :  { %v4811_v40 = vpop.permute.xlu0 %1420 }
  0xb5   :  { %2078 = vrot.lane.b32.xlu1 %v4716_v11, %s4189_s20 }
  0xb6   :  { %1600 = vrot.lane.b32.xlu0 %v4795_v31, %s4184_s11 }
  0xb7   :  { %v4817_v43 = vpop.permute.xlu1 %1422 }
  0xb8   :  { %v4819_v44 = vpop.permute.xlu0 %1424 }
  0xb9   :  { %1602 = vrot.lane.b32.xlu1 %v4821_v47, %s4184_s11 }
  0xba   :  { %1696 = vrot.lane.b32.xlu0 %v1245_v38, %s4185_s15 }
  0xbb   :  { %v4827_v48 = vpop.permute.xlu1 %1426 }
  0xbc   :  { %v4832_v49 = vpop.permute.xlu0 %1428 }
  0xbd   :  { %1698 = vrot.lane.b32.xlu1 %v958_v10, %s4185_s15 }
  0xbe   :  { %1792 = vrot.lane.b32.xlu0 %v4716_v11, %s4186_s18  ;;  %v1247_v11 = vpack.c.bf16 %v1187_v5, %v1186_v3  ;;  %v906_v3 = vld [vmem:[#allocation2 + $0xc9] sm:$0xff]  ;;  %v4932_v5 = vpack.c.bf16 %v524_v60, %v523_v59 }
  0xbf   :  { %v4843_v54 = vpop.permute.xlu1 %1430  ;;  %v962_v20 = vpack.c.bf16 %v906_v3, %v905_v0 }
  0xc0   :  { %v4852_v58 = vpop.permute.xlu0 %1432 }
  0xc1   :  { %6011 = vst [vmem:[#allocation3_spill] sm:$0xff] %v4852_v58  ;;  %1794 = vrot.lane.b32.xlu1 %v4720_v16, %s4186_s18  ;;  %v534_v58 = vld [vmem:[#allocation2 + $0x140] sm:$0xff] }
  0xc2   :  { %1888 = vrot.lane.b32.xlu0 %v4821_v47, %s4187_s3 }
  0xc3   :  { %v4858_v1 = vpop.permute.xlu1 %1434 }
  0xc4   :  { %6012 = vst [vmem:[#allocation4_spill] sm:$0xff] %v4858_v1  ;;  %v4864_v12 = vpop.permute.xlu0 %1436 }
  0xc5   :  { %6013 = vst [vmem:[#allocation5_spill] sm:$0xff] %v4864_v12  ;;  %1890 = vrot.lane.b32.xlu1 %v4862_v9, %s4187_s3 }
  0xc6   :  { %1984 = vrot.lane.b32.xlu0 %v958_v10, %s4188_s19 }
  0xc7   :  { %v4870_v13 = vpop.permute.xlu1 %1438 }
  0xc8   :  { %6014 = vst [vmem:[#allocation6_spill] sm:$0xff] %v4870_v13  ;;  %v4872_v14 = vpop.permute.xlu0 %1440  ;;  %v1009_v13 = vld [vmem:[#allocation2 + $0x122] sm:$0xff] }
  0xc9   :  { %6015 = vst [vmem:[#allocation7_spill] sm:$0xff] %v4872_v14  ;;  %1986 = vrot.lane.b32.xlu1 %v1247_v11, %s4188_s19 }
  0xca   :  { %2080 = vrot.lane.b32.xlu0 %v4720_v16, %s4189_s20 }
  0xcb   :  { %v4876_v15 = vpop.permute.xlu1 %1442 }
  0xcc   :  { %6016 = vst [vmem:[#allocation8_spill] sm:$0xff] %v4876_v15  ;;  %v4878_v19 = vpop.permute.xlu0 %1444  ;;  %v508_v15 = vld [vmem:[#allocation2 + $0x8] sm:$0xff] }
  0xcd   :  { %6017 = vst [vmem:[#allocation9_spill] sm:$0xff] %v4878_v19  ;;  %2082 = vrot.lane.b32.xlu1 %v4724_v17, %s4189_s20 }
  0xce   :  { %1604 = vrot.lane.b32.xlu0 %v4862_v9, %s4184_s11 }
  0xcf   :  { %v4884_v61 = vpop.permute.xlu1 %1446 }
  0xd0   :  { %6018 = vst [vmem:[#allocation10_spill] sm:$0xff] %v4884_v61  ;;  %v4890_v35 = vpop.permute.xlu0 %1448 }
  0xd1   :  { %6019 = vst [vmem:[#allocation11_spill] sm:$0xff] %v4890_v35  ;;  %1606 = vrot.lane.b32.xlu1 %v4886_v29, %s4184_s11 }
  0xd2   :  { %1700 = vrot.lane.b32.xlu0 %v1247_v11, %s4185_s15 }
  0xd3   :  { %v4894_v38 = vpop.permute.xlu1 %1450 }
  0xd4   :  { %6020 = vst [vmem:[#allocation12_spill] sm:$0xff] %v4894_v38  ;;  %v4897_v16 = vpop.permute.xlu0 %1452 }
  0xd5   :  { %6021 = vst [vmem:[#allocation13_spill] sm:$0xff] %v4897_v16  ;;  %1702 = vrot.lane.b32.xlu1 %v960_v36, %s4185_s15  ;;  %v1199_v16 = vld [vmem:[#allocation2 + $0x111] sm:$0xff] }
  0xd6   :  { %1796 = vrot.lane.b32.xlu0 %v4724_v17, %s4186_s18  ;;  %v1249_v17 = vpack.c.bf16 %v1191_v8, %v1190_v2  ;;  %v1194_v2 = vld [vmem:[#allocation2 + $0xd9] sm:$0xff]  ;;  %v1195_v8 = vld [vmem:[#allocation2 + $0xe1] sm:$0xff] }
  0xd7   :  { %v4900_v41 = vpop.permute.xlu1 %1454  ;;  %v1251_v60 = vpack.c.bf16 %v1195_v8, %v1194_v2  ;;  %v909_v8 = vld [vmem:[#allocation2 + $0xf1] sm:$0xff] }
  0xd8   :  { %6022 = vst [vmem:[#allocation14_spill] sm:$0xff] %v4900_v41  ;;  %v4904_v46 = vpop.permute.xlu0 %1456  ;;  %v530_v41 = vld [vmem:[#allocation2 + $0x110] sm:$0xff] }
  0xd9   :  { %6023 = vst [vmem:[#allocation15_spill] sm:$0xff] %v4904_v46  ;;  %1798 = vrot.lane.b32.xlu1 %v4728_v22, %s4186_s18 }
  0xda   :  { %1892 = vrot.lane.b32.xlu0 %v4886_v29, %s4187_s3 }
  0xdb   :  { %v4908_v10 = vpop.permute.xlu1 %1458 }
  0xdc   :  { %6024 = vst [vmem:[#allocation16_spill] sm:$0xff] %v4908_v10  ;;  %v4914_v52 = vpop.permute.xlu0 %1460 }
  0xdd   :  { %6025 = vst [vmem:[#allocation17_spill] sm:$0xff] %v4914_v52  ;;  %1894 = vrot.lane.b32.xlu1 %v4910_v50, %s4187_s3 }
  0xde   :  { %1988 = vrot.lane.b32.xlu0 %v960_v36, %s4188_s19  ;;  %v525_v36 = vld [vmem:[#allocation2 + $0xd8] sm:$0xff] }
  0xdf   :  { %v4918_v53 = vpop.permute.xlu1 %1462  ;;  %v4956_v59 = vpack.c.bf16 %v526_v42, %v525_v36  ;;  %v527_v42 = vld [vmem:[#allocation2 + $0xf0] sm:$0xff] }
  0xe0   :  { %6026 = vst [vmem:[#allocation18_spill] sm:$0xff] %v4918_v53  ;;  %v4922_v56 = vpop.permute.xlu0 %1464 }
  0xe1   :  { %1990 = vrot.lane.b32.xlu1 %v1249_v17, %s4188_s19  ;;  %6027 = vst [vmem:[#allocation19_spill] sm:$0xff] %v4922_v56  ;;  %v910_v56 = vld [vmem:[#allocation2 + $0xf9] sm:$0xff] }
  0xe2   :  { %2084 = vrot.lane.b32.xlu0 %v4728_v22, %s4189_s20  ;;  %v964_v52 = vpack.c.bf16 %v910_v56, %v909_v8  ;;  %v1198_v8 = vld [vmem:[#allocation2 + $0x109] sm:$0xff] }
  0xe3   :  { %v4924_v57 = vpop.permute.xlu1 %1466  ;;  %v1253_v35 = vpack.c.bf16 %v1199_v16, %v1198_v8  ;;  %v913_v16 = vld [vmem:[#allocation2 + $0x121] sm:$0xff]  ;;  %v914_v8 = vld [vmem:[#allocation2 + $0x129] sm:$0xff] }
  0xe4   :  { %6028 = vst [vmem:[#allocation20_spill] sm:$0xff] %v4924_v57  ;;  %v4930_v63 = vpop.permute.xlu0 %1500  ;;  %v528_v57 = vld [vmem:[#allocation2 + $0xf8] sm:$0xff]  ;;  %v966_v14 = vpack.c.bf16 %v914_v8, %v913_v16 }
  0xe5   :  { %2086 = vrot.lane.b32.xlu1 %v4732_v23, %s4189_s20  ;;  %v4980_v53 = vpack.c.bf16 %v528_v57, %v527_v42  ;;  %v529_v42 = vld [vmem:[#allocation2 + $0x108] sm:$0xff]  ;;  %v533_v8 = vld [vmem:[#allocation2 + $0x138] sm:$0xff] }
  0xe6   :  { %1608 = vrot.lane.b32.xlu0 %v4910_v50, %s4184_s11  ;;  %v5004_v38 = vpack.c.bf16 %v530_v41, %v529_v42  ;;  %v531_v42 = vld [vmem:[#allocation2 + $0x120] sm:$0xff] }
  0xe7   :  { %v4934_v11 = vpop.permute.xlu1 %1502 }
  0xe8   :  { %v4940_v21 = vpop.permute.xlu0 %1504 }
  0xe9   :  { %1610 = vrot.lane.b32.xlu1 %v4932_v5, %s4184_s11 }
  0xea   :  { %1704 = vrot.lane.b32.xlu0 %v1249_v17, %s4185_s15 }
  0xeb   :  { %v4942_v22 = vpop.permute.xlu1 %1506 }
  0xec   :  { %v4946_v24 = vpop.permute.xlu0 %1508 }
  0xed   :  { %1706 = vrot.lane.b32.xlu1 %v962_v20, %s4185_s15 }
  0xee   :  { %1800 = vrot.lane.b32.xlu0 %v4732_v23, %s4186_s18 }
  0xef   :  { %v4948_v27 = vpop.permute.xlu1 %1510 }
  0xf0   :  { %v4954_v45 = vpop.permute.xlu0 %1512 }
  0xf1   :  { %1802 = vrot.lane.b32.xlu1 %v4736_v25, %s4186_s18 }
  0xf2   :  { %1896 = vrot.lane.b32.xlu0 %v4932_v5, %s4187_s3 }
  0xf3   :  { %v4958_v17 = vpop.permute.xlu1 %1514 }
  0xf4   :  { %v4964_v0 = vpop.permute.xlu0 %1516 }
  0xf5   :  { %1898 = vrot.lane.b32.xlu1 %v4956_v59, %s4187_s3 }
  0xf6   :  { %1992 = vrot.lane.b32.xlu0 %v962_v20, %s4188_s19 }
  0xf7   :  { %v4966_v23 = vpop.permute.xlu1 %1518 }
  0xf8   :  { %v4970_v3 = vpop.permute.xlu0 %1520 }
  0xf9   :  { %1994 = vrot.lane.b32.xlu1 %v1251_v60, %s4188_s19 }
  0xfa   :  { %2088 = vrot.lane.b32.xlu0 %v4736_v25, %s4189_s20 }
  0xfb   :  { %v4972_v36 = vpop.permute.xlu1 %1522 }
  0xfc   :  { %v4978_v2 = vpop.permute.xlu0 %1524 }
  0xfd   :  { %2090 = vrot.lane.b32.xlu1 %v4740_v26, %s4189_s20 }
  0xfe   :  { %1612 = vrot.lane.b32.xlu0 %v4956_v59, %s4184_s11 }
  0xff   :  { %v4982_v20 = vpop.permute.xlu1 %1526 }
 0x100   :  { %v4988_v10 = vpop.permute.xlu0 %1528 }
 0x101   :  { %1614 = vrot.lane.b32.xlu1 %v4980_v53, %s4184_s11  ;;  %6029 = vst [vmem:[#allocation21_spill] sm:$0xff] %v4988_v10 }
 0x102   :  { %1708 = vrot.lane.b32.xlu0 %v1251_v60, %s4185_s15 }
 0x103   :  { %v4990_v25 = vpop.permute.xlu1 %1530 }
 0x104   :  { %6030 = vst [vmem:[#allocation22_spill] sm:$0xff] %v4990_v25  ;;  %v4994_v46 = vpop.permute.xlu0 %1532 }
 0x105   :  { %1710 = vrot.lane.b32.xlu1 %v964_v52, %s4185_s15  ;;  %6031 = vst [vmem:[#allocation23_spill] sm:$0xff] %v4994_v46 }
 0x106   :  { %1804 = vrot.lane.b32.xlu0 %v4740_v26, %s4186_s18 }
 0x107   :  { %v4996_v57 = vpop.permute.xlu1 %1534 }
 0x108   :  { %6032 = vst [vmem:[#allocation24_spill] sm:$0xff] %v4996_v57  ;;  %v5002_v56 = vpop.permute.xlu0 %1536  ;;  %v1007_v57 = vld [vmem:[#allocation2 + $0x10a] sm:$0xff] }
 0x109   :  { %1806 = vrot.lane.b32.xlu1 %v4744_v32, %s4186_s18  ;;  %6033 = vst [vmem:[#allocation25_spill] sm:$0xff] %v5002_v56  ;;  %v532_v56 = vld [vmem:[#allocation2 + $0x128] sm:$0xff] }
 0x10a   :  { %1900 = vrot.lane.b32.xlu0 %v4980_v53, %s4187_s3 }
 0x10b   :  { %v5006_v60 = vpop.permute.xlu1 %1538 }
 0x10c   :  { %6034 = vst [vmem:[#allocation26_spill] sm:$0xff] %v5006_v60  ;;  %v5012_v61 = vpop.permute.xlu0 %1540 }
 0x10d   :  { %1902 = vrot.lane.b32.xlu1 %v5004_v38, %s4187_s3  ;;  %6035 = vst [vmem:[#allocation27_spill] sm:$0xff] %v5012_v61  ;;  %v5022_v61 = vpack.c.bf16 %v532_v56, %v531_v42 }
 0x10e   :  { %1996 = vrot.lane.b32.xlu0 %v964_v52, %s4188_s19  ;;  %v507_v52 = vld [vmem:[#allocation2] sm:$0xff] }
 0x10f   :  { %v5014_v26 = vpop.permute.xlu1 %1542  ;;  %v571_v25 = vpack.c.bf16 %v508_v15, %v507_v52  ;;  %v2145_v15 = vsel %vm355_vm0, %v4763_v6, %v4784_v28  ;;  %v1203_v52 = vld [vmem:[#allocation2 + $0x141] sm:$0xff] }
 0x110   :  { %6036 = vst [vmem:[#allocation28_spill] sm:$0xff] %v5014_v26  ;;  %v1597_v19 = vpop.permute.xlu0 %1596 }
 0x111   :  { %1998 = vrot.lane.b32.xlu1 %v1253_v35, %s4188_s19  ;;  %v2142_v16 = vsel %vm355_vm0, %v571_v25, %v4771_v18 }
 0x112   :  { %2092 = vrot.lane.b32.xlu0 %v4744_v32, %s4189_s20  ;;  %v1008_v32 = vld [vmem:[#allocation2 + $0x112] sm:$0xff] }
 0x113   :  { %v1599_v41 = vpop.permute.xlu1 %1598  ;;  %v1061_v56 = vpack.c.bf16 %v1008_v32, %v1007_v57  ;;  %v1202_v57 = vld [vmem:[#allocation2 + $0x139] sm:$0xff]  ;;  %v5042_v32 = vpack.c.bf16 %v534_v58, %v533_v8 }
 0x114   :  { %v1693_v60 = vpop.permute.xlu0 %1692  ;;  %v1255_v58 = vpack.c.bf16 %v1203_v52, %v1202_v57  ;;  %v917_v52 = vld [vmem:[#allocation2 + $0x151] sm:$0xff] }
 0x115   :  { %2094 = vrot.lane.b32.xlu1 %v4748_v33, %s4189_s20  ;;  %v1010_v33 = vld [vmem:[#allocation2 + $0x12a] sm:$0xff] }
 0x116   :  { %1616 = vrot.lane.b32.xlu0 %v5004_v38, %s4184_s11  ;;  %v1062_v42 = vpack.c.bf16 %v1010_v33, %v1009_v13  ;;  %v2240_v13 = vsel %vm2236_vm4, %v2145_v15, %v4934_v11 }
 0x117   :  { %v1695_v26 = vpop.permute.xlu1 %1694  ;;  %v2305_v33 = vsel %vm2301_vm5, %v2240_v13, %v1599_v41 }
 0x118   :  { %v1789_v46 = vpop.permute.xlu0 %1788 }
 0x119   :  { %1618 = vrot.lane.b32.xlu1 %v5022_v61, %s4184_s11 }
 0x11a   :  { %1712 = vrot.lane.b32.xlu0 %v1253_v35, %s4185_s15  ;;  %v2238_v35 = vsel %vm2236_vm4, %v2142_v16, %v4930_v63  ;;  %v2370_v63 = vsel %vm2366_vm6, %v2305_v33, %v1695_v26  ;;  %v1298_v16 = vld [vmem:[#allocation2 + $0x13a] sm:$0xff] }
 0x11b   :  { %v1791_v12 = vpop.permute.xlu1 %1790  ;;  %v2303_v18 = vsel %vm2301_vm5, %v2238_v35, %v1597_v19 }
 0x11c   :  { %v1885_v10 = vpop.permute.xlu0 %1884  ;;  %v2368_v6 = vsel %vm2366_vm6, %v2303_v18, %v1693_v60  ;;  %v2435_v19 = vsel %vm2431_vm7, %v2370_v63, %v1791_v12  ;;  %v535_v18 = vld [vmem:[#allocation2 + $0x150] sm:$0xff] }
 0x11d   :  { %1714 = vrot.lane.b32.xlu1 %v966_v14, %s4185_s15 }
 0x11e   :  { %1808 = vrot.lane.b32.xlu0 %v1061_v56, %s4186_s18  ;;  %v2433_v56 = vsel %vm2431_vm7, %v2368_v6, %v1789_v46  ;;  %v1299_v46 = vld [vmem:[#allocation2 + $0x142] sm:$0xff] }
 0x11f   :  { %v1887_v1 = vpop.permute.xlu1 %1886  ;;  %v2498_v11 = vsel %vm2496_vm8, %v2433_v56, %v1885_v10  ;;  %v1013_v56 = vld [vmem:[#allocation2 + $0x152] sm:$0xff] }
 0x120   :  { %v1981_v25 = vpop.permute.xlu0 %1980  ;;  %v2500_v60 = vsel %vm2496_vm8, %v2435_v19, %v1887_v1  ;;  %v1351_v1 = vpack.c.bf16 %v1299_v46, %v1298_v16  ;;  %v1014_v19 = vld [vmem:[#allocation2 + $0x15a] sm:$0xff]  ;;  %v537_v16 = vld [vmem:[#allocation2 + $0x168] sm:$0xff]  ;;  %v538_v46 = vld [vmem:[#allocation2 + $0x170] sm:$0xff] }
 0x121   :  { %1810 = vrot.lane.b32.xlu1 %v1062_v42, %s4186_s18  ;;  %v2563_v41 = vsel %vm2561_vm9, %v2498_v11, %v1981_v25  ;;  %v536_v25 = vld [vmem:[#allocation2 + $0x158] sm:$0xff] }
 0x122   :  { %1904 = vrot.lane.b32.xlu0 %v5022_v61, %s4187_s3  ;;  %v5065_v33 = vpack.c.bf16 %v536_v25, %v535_v18  ;;  %v5086_v18 = vpack.c.bf16 %v538_v46, %v537_v16  ;;  %v825_v16 = vld [vmem:[#allocation2 + $0x180] sm:$0xff]  ;;  %v826_v46 = vld [vmem:[#allocation2 + $0x188] sm:$0xff] }
 0x123   :  { %v1983_v28 = vpop.permute.xlu1 %1982 }
 0x124   :  { %v2077_v26 = vpop.permute.xlu0 %2076  ;;  %v2565_v8 = vsel %vm2561_vm9, %v2500_v60, %v1983_v28 }
 0x125   :  { %1906 = vrot.lane.b32.xlu1 %v5042_v32, %s4187_s3  ;;  %v2628_v15 = vsel %vm2626_vm10, %v2563_v41, %v2077_v26  ;;  %v2148_v26 = vsel %vm355_vm0, %v4766_v7, %v4781_v62  ;;  %v1206_v7 = vld [vmem:[#allocation2 + $0x169] sm:$0xff]  ;;  %v1207_v62 = vld [vmem:[#allocation2 + $0x171] sm:$0xff] }
 0x126   :  { %2000 = vrot.lane.b32.xlu0 %v966_v14, %s4188_s19  ;;  %4095 = vmatprep.mubr.msk.bf16.mxu0 %vm2711_vm11, %v2628_v15  ;;  %v918_v14 = vld [vmem:[#allocation2 + $0x159] sm:$0xff] }
 0x127   :  { %v2079_v35 = vpop.permute.xlu1 %2078  ;;  %v968_v28 = vpack.c.bf16 %v918_v14, %v917_v52  ;;  %v1257_v52 = vpack.c.bf16 %v1207_v62, %v1206_v7 }
 0x128   :  { %v2630_v12 = vsel %vm2626_vm10, %v2565_v8, %v2079_v35  ;;  %v1601_v10 = vpop.permute.xlu0 %1600  ;;  %v2151_v8 = vsel %vm355_vm0, %v4795_v31, %v4791_v30 }
 0x129   :  { %2002 = vrot.lane.b32.xlu1 %v1255_v58, %s4188_s19  ;;  %4096 = vmatmul.mubr.msk.bf16.vlgmr.msra.gmra.mxu0 %vm2711_vm11, %v2630_v12  ;;  %v2244_v15 = vsel %vm2236_vm4, %v2151_v8, %v4942_v22 }
 0x12a   :  { %2096 = vrot.lane.b32.xlu0 %v1062_v42, %s4189_s20  ;;  %v1064_v42 = vpack.c.bf16 %v1014_v19, %v1013_v56  ;;  %v1302_v56 = vld [vmem:[#allocation2 + $0x16a] sm:$0xff] }
 0x12b   :  { %v1603_v13 = vpop.permute.xlu1 %1602 }
 0x12c   :  { %v1697_v57 = vpop.permute.xlu0 %1696 }
 0x12d   :  { %2098 = vrot.lane.b32.xlu1 %v1351_v1, %s4189_s20 }
 0x12e   :  { %1620 = vrot.lane.b32.xlu0 %v5042_v32, %s4184_s11 }
 0x12f   :  { %v1699_v6 = vpop.permute.xlu1 %1698 }
 0x130   :  { %v1793_v63 = vpop.permute.xlu0 %1792 }
 0x131   :  { %1622 = vrot.lane.b32.xlu1 %v5065_v33, %s4184_s11 }
 0x132   :  { %1716 = vrot.lane.b32.xlu0 %v1255_v58, %s4185_s15  ;;  %v2242_v58 = vsel %vm2236_vm4, %v2148_v26, %v4940_v21 }
 0x133   :  { %v1795_v11 = vpop.permute.xlu1 %1794  ;;  %v2307_v35 = vsel %vm2301_vm5, %v2242_v58, %v1601_v10  ;;  %v874_v58 = vpack.c.bf16 %v826_v46, %v825_v16 }
 0x134   :  { %v1889_v60 = vpop.permute.xlu0 %1888  ;;  %v2372_v25 = vsel %vm2366_vm6, %v2307_v35, %v1697_v57  ;;  %v922_v35 = vld [vmem:[#allocation2 + $0x189] sm:$0xff] }
 0x135   :  { %1718 = vrot.lane.b32.xlu1 %v968_v28, %s4185_s15  ;;  %v2437_v21 = vsel %vm2431_vm7, %v2372_v25, %v1793_v63  ;;  %v1018_v25 = vld [vmem:[#allocation2 + $0x18a] sm:$0xff] }
 0x136   :  { %1812 = vrot.lane.b32.xlu0 %v1351_v1, %s4186_s18  ;;  %v2309_v1 = vsel %vm2301_vm5, %v2244_v15, %v1603_v13  ;;  %v2502_v10 = vsel %vm2496_vm8, %v2437_v21, %v1889_v60  ;;  %v1114_v21 = vld [vmem:[#allocation2 + $0x198] sm:$0xff] }
 0x137   :  { %v1891_v41 = vpop.permute.xlu1 %1890  ;;  %v2374_v31 = vsel %vm2366_vm6, %v2309_v1, %v1699_v6  ;;  %v1303_v6 = vld [vmem:[#allocation2 + $0x172] sm:$0xff]  ;;  %v1017_v1 = vld [vmem:[#allocation2 + $0x182] sm:$0xff] }
 0x138   :  { %v1985_v12 = vpop.permute.xlu0 %1984  ;;  %v2439_v22 = vsel %vm2431_vm7, %v2374_v31, %v1795_v11  ;;  %v1353_v60 = vpack.c.bf16 %v1303_v6, %v1302_v56 }
 0x139   :  { %1814 = vrot.lane.b32.xlu1 %v1064_v42, %s4186_s18  ;;  %v2504_v13 = vsel %vm2496_vm8, %v2439_v22, %v1891_v41  ;;  %v2567_v57 = vsel %vm2561_vm9, %v2502_v10, %v1985_v12  ;;  %v1115_v22 = vld [vmem:[#allocation2 + $0x1a0] sm:$0xff] }
 0x13a   :  { %1908 = vrot.lane.b32.xlu0 %v5065_v33, %s4187_s3 }
 0x13b   :  { %v1987_v30 = vpop.permute.xlu1 %1986 }
 0x13c   :  { %v2081_v14 = vpop.permute.xlu0 %2080  ;;  %v2569_v63 = vsel %vm2561_vm9, %v2504_v13, %v1987_v30  ;;  %v2154_v13 = vsel %vm355_vm0, %v4821_v47, %v4797_v34  ;;  %v1211_v34 = vld [vmem:[#allocation2 + $0x1a1] sm:$0xff] }
 0x13d   :  { %1910 = vrot.lane.b32.xlu1 %v5086_v18, %s4187_s3  ;;  %v2632_v19 = vsel %vm2626_vm10, %v2567_v57, %v2081_v14  ;;  %v2157_v57 = vsel %vm355_vm0, %v4862_v9, %v4803_v4  ;;  %v1163_v14 = vpack.c.bf16 %v1115_v22, %v1114_v21  ;;  %v830_v21 = vld [vmem:[#allocation2 + $0x1e8] sm:$0xff] }
 0x13e   :  { %2004 = vrot.lane.b32.xlu0 %v968_v28, %s4188_s19  ;;  %4099 = vmatprep.mubr.msk.bf16.mxu0 %vm2711_vm11, %v2632_v19  ;;  %v921_v28 = vld [vmem:[#allocation2 + $0x181] sm:$0xff]  ;;  %v2248_v56 = vsel %vm2236_vm4, %v2157_v57, %v4948_v27  ;;  %v1210_v19 = vld [vmem:[#allocation2 + $0x199] sm:$0xff]  ;;  %v924_v57 = vld [vmem:[#allocation2 + $0x1d1] sm:$0xff] }
 0x13f   :  { %v2083_v26 = vpop.permute.xlu1 %2082  ;;  %v970_v7 = vpack.c.bf16 %v922_v35, %v921_v28 }
 0x140   :  { %v2634_v11 = vsel %vm2626_vm10, %v2569_v63, %v2083_v26  ;;  %v1605_v41 = vpop.permute.xlu0 %1604 }
 0x141   :  { %2006 = vrot.lane.b32.xlu1 %v1257_v52, %s4188_s19  ;;  %4100 = vmatmul.mubr.msk.bf16.gmra.mxu0 %vm2711_vm11, %v2634_v11 }
 0x142   :  { %2100 = vrot.lane.b32.xlu0 %v1064_v42, %s4189_s20  ;;  %v1066_v42 = vpack.c.bf16 %v1018_v25, %v1017_v1  ;;  %v827_v1 = vld [vmem:[#allocation2 + $0x1c8] sm:$0xff]  ;;  %v828_v25 = vld [vmem:[#allocation2 + $0x1d0] sm:$0xff] }
 0x143   :  { %v1607_v8 = vpop.permute.xlu1 %1606 }
 0x144   :  { %v1701_v15 = vpop.permute.xlu0 %1700  ;;  %v2313_v47 = vsel %vm2301_vm5, %v2248_v56, %v1607_v8  ;;  %v1306_v8 = vld [vmem:[#allocation2 + $0x19a] sm:$0xff]  ;;  %v926_v56 = vld [vmem:[#allocation2 + $0x1e9] sm:$0xff] }
 0x145   :  { %2102 = vrot.lane.b32.xlu1 %v1353_v60, %s4189_s20 }
 0x146   :  { %1624 = vrot.lane.b32.xlu0 %v5086_v18, %s4184_s11 }
 0x147   :  { %v1703_v12 = vpop.permute.xlu1 %1702 }
 0x148   :  { %v1797_v62 = vpop.permute.xlu0 %1796  ;;  %v2378_v4 = vsel %vm2366_vm6, %v2313_v47, %v1703_v12  ;;  %v1020_v47 = vld [vmem:[#allocation2 + $0x1d2] sm:$0xff] }
 0x149   :  { %1626 = vrot.lane.b32.xlu1 %v874_v58, %s4184_s11 }
 0x14a   :  { %1720 = vrot.lane.b32.xlu0 %v1257_v52, %s4185_s15  ;;  %v2246_v52 = vsel %vm2236_vm4, %v2154_v13, %v4946_v24  ;;  %v923_v13 = vld [vmem:[#allocation2 + $0x1c9] sm:$0xff] }
 0x14b   :  { %v1799_v30 = vpop.permute.xlu1 %1798  ;;  %v2311_v6 = vsel %vm2301_vm5, %v2246_v52, %v1605_v41 }
 0x14c   :  { %v1893_v31 = vpop.permute.xlu0 %1892  ;;  %v2376_v26 = vsel %vm2366_vm6, %v2311_v6, %v1701_v15  ;;  %v2443_v24 = vsel %vm2431_vm7, %v2378_v4, %v1799_v30  ;;  %v1307_v15 = vld [vmem:[#allocation2 + $0x1a2] sm:$0xff] }
 0x14d   :  { %1722 = vrot.lane.b32.xlu1 %v970_v7, %s4185_s15  ;;  %v2441_v9 = vsel %vm2431_vm7, %v2376_v26, %v1797_v62  ;;  %v1355_v62 = vpack.c.bf16 %v1307_v15, %v1306_v8  ;;  %v2163_v8 = vsel %vm355_vm0, %v4910_v50, %v4809_v39 }
 0x14e   :  { %1816 = vrot.lane.b32.xlu0 %v1353_v60, %s4186_s18  ;;  %v2506_v27 = vsel %vm2496_vm8, %v2441_v9, %v1893_v31  ;;  %v1259_v60 = vpack.c.bf16 %v1211_v34, %v1210_v19  ;;  %v829_v31 = vld [vmem:[#allocation2 + $0x1e0] sm:$0xff]  ;;  %v1019_v34 = vld [vmem:[#allocation2 + $0x1ca] sm:$0xff] }
 0x14f   :  { %v1895_v10 = vpop.permute.xlu1 %1894  ;;  %v1067_v9 = vpack.c.bf16 %v1020_v47, %v1019_v34  ;;  %v834_v34 = vld [vmem:[#allocation2 + $0x218] sm:$0xff] }
 0x150   :  { %v1989_v63 = vpop.permute.xlu0 %1988  ;;  %v2508_v41 = vsel %vm2496_vm8, %v2443_v24, %v1895_v10  ;;  %v875_v10 = vpack.c.bf16 %v828_v25, %v827_v1 }
 0x151   :  { %1818 = vrot.lane.b32.xlu1 %v1066_v42, %s4186_s18  ;;  %v2571_v16 = vsel %vm2561_vm9, %v2506_v27, %v1989_v63  ;;  %v971_v63 = vpack.c.bf16 %v924_v57, %v923_v13  ;;  %v1311_v13 = vld [vmem:[#allocation2 + $0x202] sm:$0xff] }
 0x152   :  { %1912 = vrot.lane.b32.xlu0 %v874_v58, %s4187_s3 }
 0x153   :  { %v1991_v11 = vpop.permute.xlu1 %1990 }
 0x154   :  { %v2085_v46 = vpop.permute.xlu0 %2084  ;;  %v2573_v28 = vsel %vm2561_vm9, %v2508_v41, %v1991_v11  ;;  %v1022_v11 = vld [vmem:[#allocation2 + $0x1ea] sm:$0xff]  ;;  %v1119_v41 = vld [vmem:[#allocation2 + $0x200] sm:$0xff] }
 0x155   :  { %1914 = vrot.lane.b32.xlu1 %v1163_v14, %s4187_s3  ;;  %v2636_v35 = vsel %vm2626_vm10, %v2571_v16, %v2085_v46  ;;  %v925_v14 = vld [vmem:[#allocation2 + $0x1e1] sm:$0xff]  ;;  %v2160_v46 = vsel %vm355_vm0, %v4886_v29, %v4805_v37 }
 0x156   :  { %2008 = vrot.lane.b32.xlu0 %v970_v7, %s4188_s19  ;;  %4103 = vmatprep.mubr.msk.bf16.mxu0 %vm2711_vm11, %v2636_v35  ;;  %v876_v7 = vpack.c.bf16 %v830_v21, %v829_v31  ;;  %v972_v19 = vpack.c.bf16 %v926_v56, %v925_v14  ;;  %v2250_v15 = vsel %vm2236_vm4, %v2160_v46, %v4954_v45  ;;  %v1215_v37 = vld [vmem:[#allocation2 + $0x201] sm:$0xff] }
 0x157   :  { %v2087_v12 = vpop.permute.xlu1 %2086  ;;  %v2252_v35 = vsel %vm2236_vm4, %v2163_v8, %v4958_v17  ;;  %v1122_v8 = vld [vmem:[#allocation2 + $0x228] sm:$0xff] }
 0x158   :  { %v2638_v58 = vsel %vm2626_vm10, %v2573_v28, %v2087_v12  ;;  %v1609_v30 = vpop.permute.xlu0 %1608 }
 0x159   :  { %2010 = vrot.lane.b32.xlu1 %v1259_v60, %s4188_s19  ;;  %4104 = vmatmul.mubr.msk.bf16.gmra.mxu0 %vm2711_vm11, %v2638_v58  ;;  %v1118_v60 = vld [vmem:[#allocation2 + $0x1f8] sm:$0xff]  ;;  %v2315_v12 = vsel %vm2301_vm5, %v2250_v15, %v1609_v30  ;;  %v1123_v15 = vld [vmem:[#allocation2 + $0x230] sm:$0xff] }
 0x15a   :  { %2104 = vrot.lane.b32.xlu0 %v1066_v42, %s4189_s20  ;;  %v1021_v42 = vld [vmem:[#allocation2 + $0x1e2] sm:$0xff]  ;;  %v1165_v28 = vpack.c.bf16 %v1119_v41, %v1118_v60  ;;  %v1025_v60 = vld [vmem:[#allocation2 + $0x212] sm:$0xff]  ;;  %v1026_v41 = vld [vmem:[#allocation2 + $0x21a] sm:$0xff] }
 0x15b   :  { %v1611_v22 = vpop.permute.xlu1 %1610  ;;  %v1068_v24 = vpack.c.bf16 %v1022_v11, %v1021_v42  ;;  %v930_v11 = vld [vmem:[#allocation2 + $0x219] sm:$0xff] }
 0x15c   :  { %v1705_v52 = vpop.permute.xlu0 %1704  ;;  %v2317_v29 = vsel %vm2301_vm5, %v2252_v35, %v1611_v22 }
 0x15d   :  { %2106 = vrot.lane.b32.xlu1 %v1355_v62, %s4189_s20  ;;  %v1214_v62 = vld [vmem:[#allocation2 + $0x1f9] sm:$0xff]  ;;  %v2380_v1 = vsel %vm2366_vm6, %v2315_v12, %v1705_v52  ;;  %v2169_v12 = vsel %vm355_vm0, %v4956_v59, %v4817_v43 }
 0x15e   :  { %1628 = vrot.lane.b32.xlu0 %v875_v10, %s4184_s11  ;;  %v1261_v30 = vpack.c.bf16 %v1215_v37, %v1214_v62  ;;  %v1310_v10 = vld [vmem:[#allocation2 + $0x1fa] sm:$0xff]  ;;  %v1167_v62 = vpack.c.bf16 %v1123_v15, %v1122_v8  ;;  %v2256_v37 = vsel %vm2236_vm4, %v2169_v12, %v4966_v23 }
 0x15f   :  { %v1707_v6 = vpop.permute.xlu1 %1706  ;;  %v1357_v56 = vpack.c.bf16 %v1311_v13, %v1310_v10 }
 0x160   :  { %v1801_v26 = vpop.permute.xlu0 %1800  ;;  %v2382_v39 = vsel %vm2366_vm6, %v2317_v29, %v1707_v6 }
 0x161   :  { %1630 = vrot.lane.b32.xlu1 %v876_v7, %s4184_s11  ;;  %v2445_v50 = vsel %vm2431_vm7, %v2380_v1, %v1801_v26 }
 0x162   :  { %1724 = vrot.lane.b32.xlu0 %v971_v63, %s4185_s15  ;;  %v833_v63 = vld [vmem:[#allocation2 + $0x210] sm:$0xff] }
 0x163   :  { %v1803_v4 = vpop.permute.xlu1 %1802  ;;  %v878_v26 = vpack.c.bf16 %v834_v34, %v833_v63 }
 0x164   :  { %v1897_v27 = vpop.permute.xlu0 %1896  ;;  %v2447_v45 = vsel %vm2431_vm7, %v2382_v39, %v1803_v4 }
 0x165   :  { %1726 = vrot.lane.b32.xlu1 %v972_v19, %s4185_s15  ;;  %v2510_v17 = vsel %vm2496_vm8, %v2445_v50, %v1897_v27 }
 0x166   :  { %1820 = vrot.lane.b32.xlu0 %v1067_v9, %s4186_s18 }
 0x167   :  { %v1899_v16 = vpop.permute.xlu1 %1898 }
 0x168   :  { %v1993_v58 = vpop.permute.xlu0 %1992  ;;  %v2512_v31 = vsel %vm2496_vm8, %v2447_v45, %v1899_v16 }
 0x169   :  { %1822 = vrot.lane.b32.xlu1 %v1068_v24, %s4186_s18  ;;  %v2575_v21 = vsel %vm2561_vm9, %v2510_v17, %v1993_v58 }
 0x16a   :  { %1916 = vrot.lane.b32.xlu0 %v876_v7, %s4187_s3 }
 0x16b   :  { %v1995_v25 = vpop.permute.xlu1 %1994 }
 0x16c   :  { %v2089_v22 = vpop.permute.xlu0 %2088  ;;  %v2577_v57 = vsel %vm2561_vm9, %v2512_v31, %v1995_v25  ;;  %v1218_v25 = vld [vmem:[#allocation2 + $0x229] sm:$0xff] }
 0x16d   :  { %1918 = vrot.lane.b32.xlu1 %v1165_v28, %s4187_s3  ;;  %v2640_v52 = vsel %vm2626_vm10, %v2575_v21, %v2089_v22  ;;  %v1314_v21 = vld [vmem:[#allocation2 + $0x22a] sm:$0xff]  ;;  %v1315_v22 = vld [vmem:[#allocation2 + $0x232] sm:$0xff] }
 0x16e   :  { %2012 = vrot.lane.b32.xlu0 %v972_v19, %s4188_s19  ;;  %4107 = vmatprep.mubr.msk.bf16.mxu0 %vm2711_vm11, %v2640_v52  ;;  %v929_v19 = vld [vmem:[#allocation2 + $0x211] sm:$0xff] }
 0x16f   :  { %v2091_v14 = vpop.permute.xlu1 %2090  ;;  %v974_v9 = vpack.c.bf16 %v930_v11, %v929_v19  ;;  %v934_v19 = vld [vmem:[#allocation2 + $0x249] sm:$0xff] }
 0x170   :  { %v2642_v7 = vsel %vm2626_vm10, %v2577_v57, %v2091_v14  ;;  %v1613_v6 = vpop.permute.xlu0 %1612  ;;  %v1359_v14 = vpack.c.bf16 %v1315_v22, %v1314_v21  ;;  %v1319_v21 = vld [vmem:[#allocation2 + $0x262] sm:$0xff] }
 0x171   :  { %2014 = vrot.lane.b32.xlu1 %v1261_v30, %s4188_s19  ;;  %4108 = vmatmul.mubr.msk.bf16.gmra.mxu0 %vm2711_vm11, %v2642_v7 }
 0x172   :  { %2108 = vrot.lane.b32.xlu0 %v1068_v24, %s4189_s20  ;;  %v1070_v24 = vpack.c.bf16 %v1026_v41, %v1025_v60 }
 0x173   :  { %v1615_v47 = vpop.permute.xlu1 %1614 }
 0x174   :  { %v1709_v42 = vpop.permute.xlu0 %1708 }
 0x175   :  { %2110 = vrot.lane.b32.xlu1 %v1357_v56, %s4189_s20 }
 0x176   :  { %1632 = vrot.lane.b32.xlu0 %v1165_v28, %s4184_s11  ;;  %v2166_v28 = vsel %vm355_vm0, %v4932_v5, %v4811_v40  ;;  %v1219_v40 = vld [vmem:[#allocation2 + $0x231] sm:$0xff]  ;;  %v2321_v5 = vsel %vm2301_vm5, %v2256_v37, %v1615_v47  ;;  %v1127_v37 = vld [vmem:[#allocation2 + $0x260] sm:$0xff] }
 0x177   :  { %v1711_v4 = vpop.permute.xlu1 %1710  ;;  %v2254_v58 = vsel %vm2236_vm4, %v2166_v28, %v4964_v0  ;;  %v1263_v45 = vpack.c.bf16 %v1219_v40, %v1218_v25  ;;  %v4053_v47 = vld [vmem:[%s6005_s0 + $0xf8] sm:$0xff]  }
 0x178   :  { %v1805_v27 = vpop.permute.xlu0 %1804  ;;  %v2319_v29 = vsel %vm2301_vm5, %v2254_v58, %v1613_v6  ;;  %v2386_v43 = vsel %vm2366_vm6, %v2321_v5, %v1711_v4  ;;  %v838_v6 = vld [vmem:[#allocation2 + $0x248] sm:$0xff]  ;;  %v4021_v11 = vunpack.c.l.bf16 %v4053_v47  ;;  %v4022_v4 = vunpack.c.h.bf16 %v4053_v47 }
 0x179   :  { %1634 = vrot.lane.b32.xlu1 %v878_v26, %s4184_s11  ;;  %v2384_v39 = vsel %vm2366_vm6, %v2319_v29, %v1709_v42  ;;  %v933_v42 = vld [vmem:[#allocation2 + $0x241] sm:$0xff] }
 0x17a   :  { %1728 = vrot.lane.b32.xlu0 %v1261_v30, %s4185_s15  ;;  %v2449_v59 = vsel %vm2431_vm7, %v2384_v39, %v1805_v27  ;;  %v217_v27 = vmul.f32 %v4838_v51, %v4021_v11  ;;  %v218_v60 = vmul.f32 %v4838_v51, %v4022_v4  ;;  %v976_v41 = vpack.c.bf16 %v934_v19, %v933_v42  ;;  %v1126_v51 = vld [vmem:[#allocation2 + $0x258] sm:$0xff] }
 0x17b   :  { %v1807_v16 = vpop.permute.xlu1 %1806  ;;  %v1169_v40 = vpack.c.bf16 %v1127_v37, %v1126_v51  ;;  %v937_v42 = vld [vmem:[#allocation2 + $0x271] sm:$0xff]  ;;  %v938_v19 = vld [vmem:[#allocation2 + $0x279] sm:$0xff] }
 0x17c   :  { %v1901_v46 = vpop.permute.xlu0 %1900  ;;  %v2451_v0 = vsel %vm2431_vm7, %v2386_v43, %v1807_v16  ;;  %v288_v8 = vadd.f32 %v4848_v55, %v217_v27  ;;  %v289_v15 = vadd.f32 %v4848_v55, %v218_v60  ;;  %v2172_v55 = vsel %vm355_vm0, %v4980_v53, %v4819_v44  ;;  %v1222_v43 = vld [vmem:[#allocation2 + $0x259] sm:$0xff]  ;;  %v1223_v44 = vld [vmem:[#allocation2 + $0x261] sm:$0xff] }
 0x17d   :  { %1730 = vrot.lane.b32.xlu1 %v974_v9, %s4185_s15  ;;  %v2514_v23 = vsel %vm2496_vm8, %v2449_v59, %v1901_v46  ;;  %v1030_v46 = vld [vmem:[#allocation2 + $0x24a] sm:$0xff]  ;;  %v2258_v25 = vsel %vm2236_vm4, %v2172_v55, %v4970_v3  ;;  %v978_v4 = vpack.c.bf16 %v938_v19, %v937_v42  ;;  %v1033_v27 = vld [vmem:[#allocation2 + $0x272] sm:$0xff]  ;;  %v1034_v60 = vld [vmem:[#allocation2 + $0x27a] sm:$0xff] }
 0x17e   :  { %1824 = vrot.lane.b32.xlu0 %v1357_v56, %s4186_s18  ;;  %v837_v56 = vld [vmem:[#allocation2 + $0x240] sm:$0xff]  ;;  %v352_v28 = vmax.f32 %v288_v8, 0.0  ;;  %v353_v12 = vmax.f32 %v289_v15, 0.0  ;;  %v1074_v8 = vpack.c.bf16 %v1034_v60, %v1033_v27 }
 0x17f   :  { %v1903_v35 = vpop.permute.xlu1 %1902  ;;  %v880_v34 = vpack.c.bf16 %v838_v6, %v837_v56  ;;  %v841_v6 = vld [vmem:[#allocation2 + $0x270] sm:$0xff]  ;;  %v1037_v42 = vld [vmem:[#allocation2 + $0x2a2] sm:$0xff] }
 0x180   :  { %v1997_v1 = vpop.permute.xlu0 %1996  ;;  %v2516_v17 = vsel %vm2496_vm8, %v2451_v0, %v1903_v35  ;;  %418 = vst.msk [vmem:[#allocation2 + $0x331] sm:$0xff] %vm355_vm0, %v352_v28  ;;  %419 = vst.msk [vmem:[#allocation2 + $0x339] sm:$0xff] %vm355_vm0, %v353_v12  ;;  %v1130_v12 = vld [vmem:[#allocation2 + $0x288] sm:$0xff] }
 0x181   :  { %1826 = vrot.lane.b32.xlu1 %v1070_v24, %s4186_s18  ;;  %v2579_v30 = vsel %vm2561_vm9, %v2514_v23, %v1997_v1  ;;  %v2175_v1 = vsel %vm355_vm0, %v5004_v38, %v4827_v48  ;;  %v1265_v23 = vpack.c.bf16 %v1223_v44, %v1222_v43 }
 0x182   :  { %1920 = vrot.lane.b32.xlu0 %v878_v26, %s4187_s3  ;;  %v2260_v5 = vsel %vm2236_vm4, %v2175_v1, %v4972_v36  ;;  %v1226_v1 = vld [vmem:[#allocation2 + $0x289] sm:$0xff] }
 0x183   :  { %v1999_v50 = vpop.permute.xlu1 %1998 }
 0x184   :  { %v2093_v31 = vpop.permute.xlu0 %2092  ;;  %v2581_v10 = vsel %vm2561_vm9, %v2516_v17, %v1999_v50 }
 0x185   :  { %1922 = vrot.lane.b32.xlu1 %v1167_v62, %s4187_s3  ;;  %v2644_v13 = vsel %vm2626_vm10, %v2579_v30, %v2093_v31  ;;  %v1318_v31 = vld [vmem:[#allocation2 + $0x25a] sm:$0xff] }
 0x186   :  { %2016 = vrot.lane.b32.xlu0 %v974_v9, %s4188_s19  ;;  %4111 = vmatprep.mubr.msk.bf16.mxu0 %vm2711_vm11, %v2644_v13 }
 0x187   :  { %v2095_v57 = vpop.permute.xlu1 %2094 }
 0x188   :  { %v2646_v52 = vsel %vm2626_vm10, %v2581_v10, %v2095_v57  ;;  %v1617_v7 = vpop.permute.xlu0 %1616 }
 0x189   :  { %2018 = vrot.lane.b32.xlu1 %v1263_v45, %s4188_s19  ;;  %4112 = vmatmul.mubr.msk.bf16.gmra.mxu0 %vm2711_vm11, %v2646_v52  ;;  %v2323_v39 = vsel %vm2301_vm5, %v2258_v25, %v1617_v7  ;;  %v1361_v52 = vpack.c.bf16 %v1319_v21, %v1318_v31  ;;  %v1227_v25 = vld [vmem:[#allocation2 + $0x291] sm:$0xff]  ;;  %v941_v21 = vld [vmem:[#allocation2 + $0x2a1] sm:$0xff] }
 0x18a   :  { %2112 = vrot.lane.b32.xlu0 %v1070_v24, %s4189_s20  ;;  %v1029_v24 = vld [vmem:[#allocation2 + $0x242] sm:$0xff]  ;;  %v1267_v43 = vpack.c.bf16 %v1227_v25, %v1226_v1  ;;  %v540_v1 = vld [vmem:[#allocation2 + $0x1b8] sm:$0xff] }
 0x18b   :  { %v1619_v63 = vpop.permute.xlu1 %1618  ;;  %v1072_v58 = vpack.c.bf16 %v1030_v46, %v1029_v24  ;;  %v2181_v24 = vsel %vm355_vm0, %v5042_v32, %v4843_v54 }
 0x18c   :  { %v1713_v26 = vpop.permute.xlu0 %1712  ;;  %v2325_v53 = vsel %vm2301_vm5, %v2260_v5, %v1619_v63  ;;  %v842_v63 = vld [vmem:[#allocation2 + $0x278] sm:$0xff]  ;;  %v2264_v15 = vsel %vm2236_vm4, %v2181_v24, %v4982_v20 }
 0x18d   :  { %2114 = vrot.lane.b32.xlu1 %v1359_v14, %s4189_s20  ;;  %v2388_v59 = vsel %vm2366_vm6, %v2323_v39, %v1713_v26  ;;  %v882_v47 = vpack.c.bf16 %v842_v63, %v841_v6  ;;  %v6040_v63 = vld [vmem:[#allocation22_spill] sm:$0xff] }
 0x18e   :  { %1636 = vrot.lane.b32.xlu0 %v1167_v62, %s4184_s11 }
 0x18f   :  { %v1715_v9 = vpop.permute.xlu1 %1714 }
 0x190   :  { %v1809_v16 = vpop.permute.xlu0 %1808  ;;  %v2390_v48 = vsel %vm2366_vm6, %v2325_v53, %v1715_v9  ;;  %v1322_v53 = vld [vmem:[#allocation2 + $0x28a] sm:$0xff] }
 0x191   :  { %1638 = vrot.lane.b32.xlu1 %v880_v34, %s4184_s11  ;;  %v2453_v38 = vsel %vm2431_vm7, %v2388_v59, %v1809_v16  ;;  %v2178_v16 = vsel %vm355_vm0, %v5022_v61, %v4832_v49  ;;  %v1131_v49 = vld [vmem:[#allocation2 + $0x290] sm:$0xff] }
 0x192   :  { %1732 = vrot.lane.b32.xlu0 %v1263_v45, %s4185_s15  ;;  %v2262_v46 = vsel %vm2236_vm4, %v2178_v16, %v4978_v2  ;;  %v1171_v51 = vpack.c.bf16 %v1131_v49, %v1130_v12  ;;  %v1323_v59 = vld [vmem:[#allocation2 + $0x292] sm:$0xff] }
 0x193   :  { %v1811_v35 = vpop.permute.xlu1 %1810 }
 0x194   :  { %v1905_v62 = vpop.permute.xlu0 %1904  ;;  %v2455_v3 = vsel %vm2431_vm7, %v2390_v48, %v1811_v35  ;;  %v1363_v48 = vpack.c.bf16 %v1323_v59, %v1322_v53  ;;  %v849_v59 = vld [vmem:[#allocation2 + $0x2d0] sm:$0xff] }
 0x195   :  { %1734 = vrot.lane.b32.xlu1 %v976_v41, %s4185_s15  ;;  %v2518_v36 = vsel %vm2496_vm8, %v2453_v38, %v1905_v62 }
 0x196   :  { %1828 = vrot.lane.b32.xlu0 %v1359_v14, %s4186_s18 }
 0x197   :  { %v1907_v29 = vpop.permute.xlu1 %1906 }
 0x198   :  { %v2001_v50 = vpop.permute.xlu0 %2000  ;;  %v2520_v45 = vsel %vm2496_vm8, %v2455_v3, %v1907_v29 }
 0x199   :  { %1830 = vrot.lane.b32.xlu1 %v1072_v58, %s4186_s18  ;;  %v2583_v17 = vsel %vm2561_vm9, %v2518_v36, %v2001_v50 }
 0x19a   :  { %1924 = vrot.lane.b32.xlu0 %v880_v34, %s4187_s3 }
 0x19b   :  { %v2003_v0 = vpop.permute.xlu1 %2002 }
 0x19c   :  { %v2097_v30 = vpop.permute.xlu0 %2096  ;;  %v2585_v22 = vsel %vm2561_vm9, %v2520_v45, %v2003_v0  ;;  %v846_v45 = vld [vmem:[#allocation2 + $0x2a8] sm:$0xff] }
 0x19d   :  { %1926 = vrot.lane.b32.xlu1 %v1169_v40, %s4187_s3  ;;  %v2648_v10 = vsel %vm2626_vm10, %v2583_v17, %v2097_v30 }
 0x19e   :  { %2020 = vrot.lane.b32.xlu0 %v976_v41, %s4188_s19  ;;  %4115 = vmatprep.mubr.msk.bf16.mxu0 %vm2711_vm11, %v2648_v10 }
 0x19f   :  { %v2099_v13 = vpop.permute.xlu1 %2098 }
 0x1a0   :  { %v2650_v57 = vsel %vm2626_vm10, %v2585_v22, %v2099_v13  ;;  %v1621_v14 = vpop.permute.xlu0 %1620  ;;  %v942_v22 = vld [vmem:[#allocation2 + $0x2a9] sm:$0xff]  ;;  %v6037_v13 = vld [vmem:[#allocation3_spill] sm:$0xff] }
 0x1a1   :  { %2022 = vrot.lane.b32.xlu1 %v1265_v23, %s4188_s19  ;;  %4116 = vmatmul.mubr.msk.bf16.gmra.mxu0 %vm2711_vm11, %v2650_v57  ;;  %v2327_v35 = vsel %vm2301_vm5, %v2262_v46, %v1621_v14  ;;  %v2184_v57 = vsel %vm355_vm0, %v5065_v33, %v6037_v13  ;;  %v980_v6 = vpack.c.bf16 %v942_v22, %v941_v21  ;;  %v1038_v33 = vld [vmem:[#allocation2 + $0x2aa] sm:$0xff] }
 0x1a2   :  { %2116 = vrot.lane.b32.xlu0 %v1072_v58, %s4189_s20  ;;  %v945_v13 = vld [vmem:[#allocation2 + $0x2d1] sm:$0xff] }
 0x1a3   :  { %v1623_v7 = vpop.permute.xlu1 %1622 }
 0x1a4   :  { %v1717_v56 = vpop.permute.xlu0 %1716  ;;  %v2329_v61 = vsel %vm2301_vm5, %v2264_v15, %v1623_v7  ;;  %v6039_v7 = vld [vmem:[#allocation21_spill] sm:$0xff]  ;;  %v1135_v15 = vld [vmem:[#allocation2 + $0x2c0] sm:$0xff] }
 0x1a5   :  { %2118 = vrot.lane.b32.xlu1 %v1361_v52, %s4189_s20 }
 0x1a6   :  { %1544 = vrot.lane.b32.xlu0 %v1072_v58, %s4183_s9  ;;  %v2392_v58 = vsel %vm2366_vm6, %v2327_v35, %v1717_v56  ;;  %v2266_v56 = vsel %vm2236_vm4, %v2184_v57, %v6039_v7  ;;  %v946_v57 = vld [vmem:[#allocation2 + $0x2d9] sm:$0xff] }
 0x1a7   :  { %v1719_v34 = vpop.permute.xlu1 %1718 }
 0x1a8   :  { %v1813_v26 = vpop.permute.xlu0 %1812  ;;  %v2394_v54 = vsel %vm2366_vm6, %v2329_v61, %v1719_v34 }
 0x1a9   :  { %1546 = vrot.lane.b32.xlu1 %v1361_v52, %s4183_s9  ;;  %v2457_v2 = vsel %vm2431_vm7, %v2392_v58, %v1813_v26 }
 0x1aa   :  { %1640 = vrot.lane.b32.xlu0 %v1169_v40, %s4184_s11 }
 0x1ab   :  { %v1815_v11 = vpop.permute.xlu1 %1814 }
 0x1ac   :  { %v1909_v9 = vpop.permute.xlu0 %1908  ;;  %v2459_v32 = vsel %vm2431_vm7, %v2394_v54, %v1815_v11  ;;  %v1231_v54 = vld [vmem:[#allocation2 + $0x2c1] sm:$0xff] }
 0x1ad   :  { %1642 = vrot.lane.b32.xlu1 %v882_v47, %s4184_s11  ;;  %v2522_v20 = vsel %vm2496_vm8, %v2457_v2, %v1909_v9 }
 0x1ae   :  { %1736 = vrot.lane.b32.xlu0 %v1265_v23, %s4185_s15  ;;  %v845_v23 = vld [vmem:[#allocation2 + $0x2a0] sm:$0xff] }
 0x1af   :  { %v1911_v41 = vpop.permute.xlu1 %1910  ;;  %v884_v30 = vpack.c.bf16 %v846_v45, %v845_v23  ;;  %v6043_v45 = vld [vmem:[#allocation23_spill] sm:$0xff] }
 0x1b0   :  { %v2005_v28 = vpop.permute.xlu0 %2004  ;;  %v2524_v37 = vsel %vm2496_vm8, %v2459_v32, %v1911_v41  ;;  %v1076_v41 = vpack.c.bf16 %v1038_v33, %v1037_v42 }
 0x1b1   :  { %1738 = vrot.lane.b32.xlu1 %v978_v4, %s4185_s15  ;;  %v2587_v29 = vsel %vm2561_vm9, %v2522_v20, %v2005_v28 }
 0x1b2   :  { %1832 = vrot.lane.b32.xlu0 %v1361_v52, %s4186_s18  ;;  %v6038_v52 = vld [vmem:[#allocation4_spill] sm:$0xff] }
 0x1b3   :  { %v2007_v62 = vpop.permute.xlu1 %2006  ;;  %v2187_v14 = vsel %vm355_vm0, %v5086_v18, %v6038_v52 }
 0x1b4   :  { %v2101_v55 = vpop.permute.xlu0 %2100  ;;  %v2589_v40 = vsel %vm2561_vm9, %v2524_v37, %v2007_v62  ;;  %v2268_v34 = vsel %vm2236_vm4, %v2187_v14, %v6040_v63  ;;  %v1230_v62 = vld [vmem:[#allocation2 + $0x2b9] sm:$0xff]  ;;  %v1327_v37 = vld [vmem:[#allocation2 + $0x2c2] sm:$0xff] }
 0x1b5   :  { %1834 = vrot.lane.b32.xlu1 %v1074_v8, %s4186_s18  ;;  %v2652_v5 = vsel %vm2626_vm10, %v2587_v29, %v2101_v55  ;;  %v1269_v32 = vpack.c.bf16 %v1231_v54, %v1230_v62  ;;  %v539_v55 = vld [vmem:[#allocation2 + $0x1b0] sm:$0xff] }
 0x1b6   :  { %1928 = vrot.lane.b32.xlu0 %v882_v47, %s4187_s3  ;;  %4119 = vmatprep.mubr.msk.bf16.mxu0 %vm2711_vm11, %v2652_v5  ;;  %v542_v5 = vld [vmem:[#allocation2 + $0x1d0] sm:$0xff] }
 0x1b7   :  { %v2103_v39 = vpop.permute.xlu1 %2102  ;;  %v1234_v54 = vld [vmem:[#allocation2 + $0x2e9] sm:$0xff] }
 0x1b8   :  { %v2654_v50 = vsel %vm2626_vm10, %v2589_v40, %v2103_v39  ;;  %v1625_v44 = vpop.permute.xlu0 %1624  ;;  %v541_v40 = vld [vmem:[#allocation2 + $0x1c8] sm:$0xff] }
 0x1b9   :  { %1930 = vrot.lane.b32.xlu1 %v1171_v51, %s4187_s3  ;;  %4120 = vmatmul.mubr.msk.bf16.gmra.mxu0 %vm2711_vm11, %v2654_v50  ;;  %v2331_v47 = vsel %vm2301_vm5, %v2266_v56, %v1625_v44  ;;  %v588_v44 = vpack.c.bf16 %v542_v5, %v541_v40  ;;  %v545_v40 = vld [vmem:[#allocation2 + $0x1f8] sm:$0xff] }
 0x1ba   :  { %2024 = vrot.lane.b32.xlu0 %v978_v4, %s4188_s19 }
 0x1bb   :  { %v1627_v0 = vpop.permute.xlu1 %1626 }
 0x1bc   :  { %v1721_v38 = vpop.permute.xlu0 %1720  ;;  %v2333_v19 = vsel %vm2301_vm5, %v2268_v34, %v1627_v0  ;;  %v850_v0 = vld [vmem:[#allocation2 + $0x2d8] sm:$0xff] }
 0x1bd   :  { %2026 = vrot.lane.b32.xlu1 %v1267_v43, %s4188_s19  ;;  %v2396_v11 = vsel %vm2366_vm6, %v2331_v47, %v1721_v38  ;;  %v6041_v38 = vld [vmem:[#allocation5_spill] sm:$0xff]  ;;  %v5358_v47 = vpack.c.bf16 %v946_v57, %v945_v13 }
 0x1be   :  { %2120 = vrot.lane.b32.xlu0 %v1074_v8, %s4189_s20 }
 0x1bf   :  { %v1723_v3 = vpop.permute.xlu1 %1722 }
 0x1c0   :  { %v1817_v36 = vpop.permute.xlu0 %1816  ;;  %v2398_v18 = vsel %vm2366_vm6, %v2333_v19, %v1723_v3  ;;  %v1041_v19 = vld [vmem:[#allocation2 + $0x2d2] sm:$0xff] }
 0x1c1   :  { %2122 = vrot.lane.b32.xlu1 %v1363_v48, %s4189_s20  ;;  %v2461_v9 = vsel %vm2431_vm7, %v2396_v11, %v1817_v36  ;;  %v6042_v36 = vld [vmem:[#allocation6_spill] sm:$0xff] }
 0x1c2   :  { %1548 = vrot.lane.b32.xlu0 %v1074_v8, %s4183_s9  ;;  %v1134_v8 = vld [vmem:[#allocation2 + $0x2b8] sm:$0xff]  ;;  %v2193_v23 = vsel %vm355_vm0, %v588_v44, %v6042_v36 }
 0x1c3   :  { %v1819_v17 = vpop.permute.xlu1 %1818  ;;  %v1173_v61 = vpack.c.bf16 %v1135_v15, %v1134_v8  ;;  %v1042_v11 = vld [vmem:[#allocation2 + $0x2da] sm:$0xff]  ;;  %v1139_v8 = vld [vmem:[#allocation2 + $0x2f0] sm:$0xff] }
 0x1c4   :  { %v1913_v31 = vpop.permute.xlu0 %1912  ;;  %v2463_v27 = vsel %vm2431_vm7, %v2398_v18, %v1819_v17 }
 0x1c5   :  { %1550 = vrot.lane.b32.xlu1 %v1363_v48, %s4183_s9  ;;  %v2526_v60 = vsel %vm2496_vm8, %v2461_v9, %v1913_v31  ;;  %v6044_v31 = vld [vmem:[#allocation24_spill] sm:$0xff] }
 0x1c6   :  { %1644 = vrot.lane.b32.xlu0 %v1171_v51, %s4184_s11  ;;  %v1326_v51 = vld [vmem:[#allocation2 + $0x2ba] sm:$0xff]  ;;  %v2272_v21 = vsel %vm2236_vm4, %v2193_v23, %v6044_v31 }
 0x1c7   :  { %v1915_v10 = vpop.permute.xlu1 %1914  ;;  %v1365_v25 = vpack.c.bf16 %v1327_v37, %v1326_v51 }
 0x1c8   :  { %v2009_v26 = vpop.permute.xlu0 %2008  ;;  %v2528_v16 = vsel %vm2496_vm8, %v2463_v27, %v1915_v10 }
 0x1c9   :  { %1646 = vrot.lane.b32.xlu1 %v884_v30, %s4184_s11  ;;  %v2591_v24 = vsel %vm2561_vm9, %v2526_v60, %v2009_v26 }
 0x1ca   :  { %1740 = vrot.lane.b32.xlu0 %v1267_v43, %s4185_s15  ;;  %v587_v43 = vpack.c.bf16 %v540_v1, %v539_v55  ;;  %v543_v1 = vld [vmem:[#allocation2 + $0x1e0] sm:$0xff] }
 0x1cb   :  { %v2011_v4 = vpop.permute.xlu1 %2010 }
 0x1cc   :  { %v2105_v46 = vpop.permute.xlu0 %2104  ;;  %v2593_v35 = vsel %vm2561_vm9, %v2528_v16, %v2011_v4  ;;  %v2190_v3 = vsel %vm355_vm0, %v587_v43, %v6041_v38  ;;  %v546_v43 = vld [vmem:[#allocation2 + $0x200] sm:$0xff]  ;;  %v1330_v38 = vld [vmem:[#allocation2 + $0x2ea] sm:$0xff] }
 0x1cd   :  { %1742 = vrot.lane.b32.xlu1 %v980_v6, %s4185_s15  ;;  %v2656_v28 = vsel %vm2626_vm10, %v2591_v24, %v2105_v46  ;;  %v2270_v17 = vsel %vm2236_vm4, %v2190_v3, %v6043_v45  ;;  %v1138_v46 = vld [vmem:[#allocation2 + $0x2e8] sm:$0xff]  ;;  %v1331_v3 = vld [vmem:[#allocation2 + $0x2f2] sm:$0xff] }
 0x1ce   :  { %1836 = vrot.lane.b32.xlu0 %v1363_v48, %s4186_s18  ;;  %4123 = vmatprep.mubr.msk.bf16.mxu0 %vm2711_vm11, %v2656_v28 }
 0x1cf   :  { %v2107_v12 = vpop.permute.xlu1 %2106 }
 0x1d0   :  { %v2658_v49 = vsel %vm2626_vm10, %v2593_v35, %v2107_v12  ;;  %v1629_v58 = vpop.permute.xlu0 %1628 }
 0x1d1   :  { %1838 = vrot.lane.b32.xlu1 %v1076_v41, %s4186_s18  ;;  %4124 = vmatmul.mubr.msk.bf16.gmra.mxu0 %vm2711_vm11, %v2658_v49  ;;  %v2335_v22 = vsel %vm2301_vm5, %v2270_v17, %v1629_v58  ;;  %v5383_v49 = vpack.c.bf16 %v1139_v8, %v1138_v46 }
 0x1d2   :  { %1932 = vrot.lane.b32.xlu0 %v884_v30, %s4187_s3  ;;  %v886_v30 = vpack.c.bf16 %v850_v0, %v849_v59 }
 0x1d3   :  { %v1631_v2 = vpop.permute.xlu1 %1630 }
 0x1d4   :  { %v1725_v20 = vpop.permute.xlu0 %1724  ;;  %v2337_v52 = vsel %vm2301_vm5, %v2272_v21, %v1631_v2  ;;  %v1235_v2 = vld [vmem:[#allocation2 + $0x2f1] sm:$0xff]  ;;  %v590_v21 = vpack.c.bf16 %v546_v43, %v545_v40 }
 0x1d5   :  { %1934 = vrot.lane.b32.xlu1 %v1173_v61, %s4187_s3  ;;  %v2400_v14 = vsel %vm2366_vm6, %v2335_v22, %v1725_v20 }
 0x1d6   :  { %2028 = vrot.lane.b32.xlu0 %v980_v6, %s4188_s19 }
 0x1d7   :  { %v1727_v29 = vpop.permute.xlu1 %1726 }
 0x1d8   :  { %v1821_v39 = vpop.permute.xlu0 %1820  ;;  %v2402_v56 = vsel %vm2366_vm6, %v2337_v52, %v1727_v29 }
 0x1d9   :  { %2030 = vrot.lane.b32.xlu1 %v1269_v32, %s4188_s19  ;;  %v2465_v6 = vsel %vm2431_vm7, %v2400_v14, %v1821_v39 }
 0x1da   :  { %2124 = vrot.lane.b32.xlu0 %v1076_v41, %s4189_s20 }
 0x1db   :  { %v1823_v50 = vpop.permute.xlu1 %1822 }
 0x1dc   :  { %v1917_v53 = vpop.permute.xlu0 %1916  ;;  %v2467_v63 = vsel %vm2431_vm7, %v2402_v56, %v1823_v50  ;;  %v5398_v50 = vpack.c.bf16 %v1235_v2, %v1234_v54  ;;  %v6045_v56 = vld [vmem:[#allocation7_spill] sm:$0xff] }
 0x1dd   :  { %2126 = vrot.lane.b32.xlu1 %v1365_v25, %s4189_s20  ;;  %v2530_v34 = vsel %vm2496_vm8, %v2465_v6, %v1917_v53 }
 0x1de   :  { %1552 = vrot.lane.b32.xlu0 %v1076_v41, %s4183_s9  ;;  %v5370_v41 = vpack.c.bf16 %v1042_v11, %v1041_v19 }
 0x1df   :  { %v1919_v48 = vpop.permute.xlu1 %1918 }
 0x1e0   :  { %v2013_v10 = vpop.permute.xlu0 %2012  ;;  %v2532_v26 = vsel %vm2496_vm8, %v2467_v63, %v1919_v48  ;;  %v6046_v63 = vld [vmem:[#allocation8_spill] sm:$0xff] }
 0x1e1   :  { %1554 = vrot.lane.b32.xlu1 %v1365_v25, %s4183_s9  ;;  %v2595_v42 = vsel %vm2561_vm9, %v2530_v34, %v2013_v10  ;;  %v5413_v10 = vpack.c.bf16 %v1331_v3, %v1330_v38  ;;  %v2199_v34 = vsel %vm355_vm0, %v590_v21, %v6046_v63  ;;  %v549_v21 = vld [vmem:[#allocation2 + $0x228] sm:$0xff] }
 0x1e2   :  { %1648 = vrot.lane.b32.xlu0 %v1173_v61, %s4184_s11  ;;  %v1239_v63 = vld [vmem:[#allocation2 + $0x321] sm:$0xff] }
 0x1e3   :  { %v2015_v7 = vpop.permute.xlu1 %2014 }
 0x1e4   :  { %v2109_v33 = vpop.permute.xlu0 %2108  ;;  %v2597_v4 = vsel %vm2561_vm9, %v2532_v26, %v2015_v7 }
 0x1e5   :  { %1650 = vrot.lane.b32.xlu1 %v886_v30, %s4184_s11  ;;  %v2660_v18 = vsel %vm2626_vm10, %v2595_v42, %v2109_v33  ;;  %v6048_v42 = vld [vmem:[#allocation26_spill] sm:$0xff] }
 0x1e6   :  { %1744 = vrot.lane.b32.xlu0 %v1269_v32, %s4185_s15  ;;  %4127 = vmatprep.mubr.msk.bf16.mxu1 %vm2711_vm11, %v2660_v18  ;;  %v2276_v33 = vsel %vm2236_vm4, %v2199_v34, %v6048_v42  ;;  %v854_v18 = vld [vmem:[#allocation2 + $0x308] sm:$0xff] }
 0x1e7   :  { %v2111_v9 = vpop.permute.xlu1 %2110 }
 0x1e8   :  { %v2662_v27 = vsel %vm2626_vm10, %v2597_v4, %v2111_v9  ;;  %v5372_v16 = vpop.permute.xlu0 %1632  ;;  %v853_v4 = vld [vmem:[#allocation2 + $0x300] sm:$0xff] }
 0x1e9   :  { %1746 = vrot.lane.b32.xlu1 %v5358_v47, %s4185_s15  ;;  %v4097_v60 = vpop.f32.mrf.mxu0  ;;  %4128 = vmatmul.mubr.msk.bf16.vlgmr.msra.gmra.mxu1 %vm2711_vm11, %v2662_v27 }
 0x1ea   :  { %v3833_v24 = vpack.c.bf16 %v4097_v60, %v4097_v60  ;;  %1840 = vrot.lane.b32.xlu0 %v1365_v25, %s4186_s18  ;;  %v3205_v51 = vmul.f32 %v4097_v60, %v4097_v60  ;;  %v544_v25 = vld [vmem:[#allocation2 + $0x1e8] sm:$0xff]  ;;  %v3072_v44 = vsel %vm355_vm0, %v4097_v60, 0.0 }
 0x1eb   :  { %v5374_v15 = vpop.permute.xlu1 %1634  ;;  %v2814_v35 = vpop.f32.mrf.mxu0  ;;  %v589_v17 = vpack.c.bf16 %v544_v25, %v543_v1 }
 0x1ec   :  { %3660 = vst.msk [vmem:[%s6009_s4 + $0x8] sm:$0xf] %vm3657_vm12, %v3833_v24  ;;  %v3831_v28 = vpack.c.bf16 %v2814_v35, %v2814_v35  ;;  %v1729_v61 = vpop.permute.xlu0 %1728  ;;  %v3203_v58 = vmul.f32 %v2814_v35, %v2814_v35  ;;  %v3069_v37 = vsel %vm355_vm0, %v2814_v35, 0.0  ;;  %v2341_v9 = vsel %vm2301_vm5, %v2276_v33, %v5374_v15 }
 0x1ed   :  { %1842 = vrot.lane.b32.xlu1 %v5370_v41, %s4186_s18  ;;  %v4098_v12 = vpop.f32.mrf.mxu0  ;;  %v2196_v6 = vsel %vm355_vm0, %v589_v17, %v6045_v56  ;;  %v5441_v35 = vpack.c.bf16 %v854_v18, %v853_v4 }
 0x1ee   :  { %v3834_v62 = vpack.c.bf16 %v4098_v12, %v4098_v12  ;;  %3658 = vst.msk [vmem:[%s6009_s4] sm:$0xf] %vm3657_vm12, %v3831_v28  ;;  %1936 = vrot.lane.b32.xlu0 %v886_v30, %s4187_s3  ;;  %v3267_v53 = vsel %vm355_vm0, %v3203_v58, 0.0  ;;  %v3206_v59 = vmul.f32 %v4098_v12, %v4098_v12  ;;  %v3270_v30 = vsel %vm355_vm0, %v3205_v51, 0.0  ;;  %v950_v58 = vld [vmem:[#allocation2 + $0x309] sm:$0xff] }
 0x1ef   :  { %v1731_v32 = vpop.permute.xlu1 %1730  ;;  %v2817_v20 = vpop.f32.mrf.mxu0  ;;  %v3074_v31 = vsel %vm355_vm0, %v4098_v12, 0.0 }
 0x1f0   :  { %3661 = vst.msk [vmem:[%s6009_s4 + $0xc] sm:$0xf] %vm3657_vm12, %v3834_v62  ;;  %v3070_v29 = vsel %vm355_vm0, %v2817_v20, 0.0  ;;  %v3204_v55 = vmul.f32 %v2817_v20, %v2817_v20  ;;  %v3832_v39 = vpack.c.bf16 %v2817_v20, %v2817_v20  ;;  %v1825_v0 = vpop.permute.xlu0 %1824  ;;  %v3272_v57 = vsel %vm355_vm0, %v3206_v59, 0.0 }
 0x1f1   :  { %v3071_v5 = vadd.f32 %v3070_v29, %v3069_v37  ;;  %1938 = vrot.lane.b32.xlu1 %v5383_v49, %s4187_s3  ;;  %v2406_v24 = vsel %vm2366_vm6, %v2341_v9, %v1731_v32  ;;  %v1045_v29 = vld [vmem:[#allocation2 + $0x302] sm:$0xff] }
 0x1f2   :  { %v3268_v48 = vsel %vm355_vm0, %v3204_v55, 0.0  ;;  %3659 = vst.msk [vmem:[%s6009_s4 + $0x4] sm:$0xf] %vm3657_vm12, %v3832_v39  ;;  %2032 = vrot.lane.b32.xlu0 %v5358_v47, %s4188_s19  ;;  %v6047_v47 = vld [vmem:[#allocation25_spill] sm:$0xff] }
 0x1f3   :  { %v3073_v36 = vadd.f32 %v3072_v44, %v3071_v5  ;;  %v3269_v23 = vadd.f32 %v3268_v48, %v3267_v53  ;;  %v1827_v45 = vpop.permute.xlu1 %1826  ;;  %v2274_v26 = vsel %vm2236_vm4, %v2196_v6, %v6047_v47  ;;  %v1046_v55 = vld [vmem:[#allocation2 + $0x30a] sm:$0xff]  ;;  %v1143_v48 = vld [vmem:[#allocation2 + $0x320] sm:$0xff] }
 0x1f4   :  { %v1921_v52 = vpop.permute.xlu0 %1920  ;;  %v2339_v19 = vsel %vm2301_vm5, %v2274_v26, %v5372_v16  ;;  %v2471_v8 = vsel %vm2431_vm7, %v2406_v24, %v1827_v45  ;;  %v5469_v44 = vpack.c.bf16 %v1046_v55, %v1045_v29  ;;  %v1238_v6 = vld [vmem:[#allocation2 + $0x319] sm:$0xff] }
 0x1f5   :  { %v3271_v22 = vadd.f32 %v3270_v30, %v3269_v23  ;;  %2034 = vrot.lane.b32.xlu1 %v5398_v50, %s4188_s19  ;;  %v3075_v13 = vadd.f32 %v3074_v31, %v3073_v36  ;;  %v2404_v27 = vsel %vm2366_vm6, %v2339_v19, %v1729_v61  ;;  %v949_v61 = vld [vmem:[#allocation2 + $0x301] sm:$0xff]  ;;  %v547_v30 = vld [vmem:[#allocation2 + $0x210] sm:$0xff]  ;;  %v548_v31 = vld [vmem:[#allocation2 + $0x218] sm:$0xff]  ;;  %v5499_v18 = vpack.c.bf16 %v1239_v63, %v1238_v6 }
 0x1f6   :  { %2128 = vrot.lane.b32.xlu0 %v5370_v41, %s4189_s20  ;;  %v2469_v46 = vsel %vm2431_vm7, %v2404_v27, %v1825_v0  ;;  %v5454_v20 = vpack.c.bf16 %v950_v58, %v949_v61  ;;  %v1142_v0 = vld [vmem:[#allocation2 + $0x318] sm:$0xff]  ;;  %v591_v42 = vpack.c.bf16 %v548_v31, %v547_v30  ;;  %v6051_v61 = vld [vmem:[#allocation27_spill] sm:$0xff] }
 0x1f7   :  { %v1923_v14 = vpop.permute.xlu1 %1922  ;;  %v3273_v7 = vadd.f32 %v3272_v57, %v3271_v22  ;;  %v2534_v16 = vsel %vm2496_vm8, %v2469_v46, %v1921_v52  ;;  %v5485_v57 = vpack.c.bf16 %v1143_v48, %v1142_v0  ;;  %v550_v52 = vld [vmem:[#allocation2 + $0x230] sm:$0xff]  ;;  %v1334_v24 = vld [vmem:[#allocation2 + $0x31a] sm:$0xff]  ;;  %v1335_v46 = vld [vmem:[#allocation2 + $0x322] sm:$0xff] }
 0x1f8   :  { %v2017_v11 = vpop.permute.xlu0 %2016  ;;  %v2536_v15 = vsel %vm2496_vm8, %v2471_v8, %v1923_v14 }
 0x1f9   :  { %2130 = vrot.lane.b32.xlu1 %v5413_v10, %s4189_s20  ;;  %v2599_v28 = vsel %vm2561_vm9, %v2534_v16, %v2017_v11  ;;  %v592_v11 = vpack.c.bf16 %v550_v52, %v549_v21 }
 0x1fa   :  { %1556 = vrot.lane.b32.xlu0 %v5370_v41, %s4183_s9 }
 0x1fb   :  { %v2019_v60 = vpop.permute.xlu1 %2018 }
 0x1fc   :  { %v2113_v12 = vpop.permute.xlu0 %2112  ;;  %v2601_v62 = vsel %vm2561_vm9, %v2536_v15, %v2019_v60  ;;  %v6049_v15 = vld [vmem:[#allocation9_spill] sm:$0xff] }
 0x1fd   :  { %1558 = vrot.lane.b32.xlu1 %v5413_v10, %s4183_s9  ;;  %v2664_v41 = vsel %vm2626_vm10, %v2599_v28, %v2113_v12  ;;  %v2202_v28 = vsel %vm355_vm0, %v591_v42, %v6049_v15 }
 0x1fe   :  { %1652 = vrot.lane.b32.xlu0 %v5383_v49, %s4184_s11  ;;  %4131 = vmatprep.mubr.msk.bf16.mxu1 %vm2711_vm11, %v2664_v41  ;;  %v2278_v58 = vsel %vm2236_vm4, %v2202_v28, %v6051_v61  ;;  %v6052_v41 = vld [vmem:[#allocation28_spill] sm:$0xff]  ;;  %v553_v61 = vld [vmem:[#allocation2 + $0x258] sm:$0xff] }
 0x1ff   :  { %v2115_v54 = vpop.permute.xlu1 %2114 }
 0x200   :  { %v2666_v2 = vsel %vm2626_vm10, %v2601_v62, %v2115_v54  ;;  %v5456_v51 = vpop.permute.xlu0 %1636  ;;  %v5512_v62 = vpack.c.bf16 %v1335_v46, %v1334_v24  ;;  %v1147_v24 = vld [vmem:[#allocation2 + $0x350] sm:$0xff] }
 0x201   :  { %1654 = vrot.lane.b32.xlu1 %v5441_v35, %s4184_s11  ;;  %v4101_v32 = vpop.f32.mrf.mxu0  ;;  %4132 = vmatmul.mubr.msk.bf16.gmra.mxu1 %vm2711_vm11, %v2666_v2  ;;  %v2343_v2 = vsel %vm2301_vm5, %v2278_v58, %v5456_v51 }
 0x202   :  { %v3837_v37 = vpack.c.bf16 %v4101_v32, %v4101_v32  ;;  %1748 = vrot.lane.b32.xlu0 %v5398_v50, %s4185_s15  ;;  %v3209_v23 = vmul.f32 %v4101_v32, %v4101_v32 }
 0x203   :  { %v5458_v1 = vpop.permute.xlu1 %1638  ;;  %v2830_v49 = vpop.f32.mrf.mxu0 }
 0x204   :  { %3664 = vst.msk [vmem:[%s6009_s4 + $0x18] sm:$0xf] %vm3657_vm12, %v3837_v37  ;;  %v3076_v25 = vsel %vm355_vm0, %v2830_v49, 0.0  ;;  %v3207_v40 = vmul.f32 %v2830_v49, %v2830_v49  ;;  %v3835_v39 = vpack.c.bf16 %v2830_v49, %v2830_v49  ;;  %v1733_v53 = vpop.permute.xlu0 %1732  ;;  %v3278_v33 = vsel %vm355_vm0, %v3209_v23, 0.0  ;;  %v953_v23 = vld [vmem:[#allocation2 + $0x331] sm:$0xff] }
 0x205   :  { %v3077_v5 = vadd.f32 %v3076_v25, %v3075_v13  ;;  %1750 = vrot.lane.b32.xlu1 %v5454_v20, %s4185_s15  ;;  %v4102_v43 = vpop.f32.mrf.mxu0  ;;  %v2408_v37 = vsel %vm2366_vm6, %v2343_v2, %v1733_v53  ;;  %v554_v2 = vld [vmem:[#allocation2 + $0x260] sm:$0xff] }
 0x206   :  { %v3274_v59 = vsel %vm355_vm0, %v3207_v40, 0.0  ;;  %v3838_v50 = vpack.c.bf16 %v4102_v43, %v4102_v43  ;;  %3662 = vst.msk [vmem:[%s6009_s4 + $0x10] sm:$0xf] %vm3657_vm12, %v3835_v39  ;;  %1844 = vrot.lane.b32.xlu0 %v5413_v10, %s4186_s18  ;;  %v3080_v10 = vsel %vm355_vm0, %v4101_v32, 0.0  ;;  %v3210_v14 = vmul.f32 %v4102_v43, %v4102_v43  ;;  %v857_v39 = vld [vmem:[#allocation2 + $0x330] sm:$0xff] }
 0x207   :  { %v3275_v38 = vadd.f32 %v3274_v59, %v3273_v7  ;;  %v1735_v3 = vpop.permute.xlu1 %1734  ;;  %v2833_v36 = vpop.f32.mrf.mxu0  ;;  %v3082_v19 = vsel %vm355_vm0, %v4102_v43, 0.0  ;;  %v858_v43 = vld [vmem:[#allocation2 + $0x338] sm:$0xff] }
 0x208   :  { %3665 = vst.msk [vmem:[%s6009_s4 + $0x1c] sm:$0xf] %vm3657_vm12, %v3838_v50  ;;  %v3078_v45 = vsel %vm355_vm0, %v2833_v36, 0.0  ;;  %v3208_v17 = vmul.f32 %v2833_v36, %v2833_v36  ;;  %v3836_v13 = vpack.c.bf16 %v2833_v36, %v2833_v36  ;;  %v1829_v7 = vpop.permute.xlu0 %1828  ;;  %v3280_v27 = vsel %vm355_vm0, %v3210_v14, 0.0 }
 0x209   :  { %v3079_v22 = vadd.f32 %v3078_v45, %v3077_v5  ;;  %1846 = vrot.lane.b32.xlu1 %v5469_v44, %s4186_s18  ;;  %v2473_v49 = vsel %vm2431_vm7, %v2408_v37, %v1829_v7  ;;  %v954_v45 = vld [vmem:[#allocation2 + $0x339] sm:$0xff]  ;;  %v1242_v37 = vld [vmem:[#allocation2 + $0x349] sm:$0xff] }
 0x20a   :  { %v3276_v56 = vsel %vm355_vm0, %v3208_v17, 0.0  ;;  %3663 = vst.msk [vmem:[%s6009_s4 + $0x14] sm:$0xf] %vm3657_vm12, %v3836_v13  ;;  %1940 = vrot.lane.b32.xlu0 %v5441_v35, %s4187_s3  ;;  %v6050_v35 = vld [vmem:[#allocation10_spill] sm:$0xff]  ;;  %v986_v52 = vpack.c.bf16 %v954_v45, %v953_v23 }
 0x20b   :  { %v3081_v34 = vadd.f32 %v3080_v10, %v3079_v22  ;;  %v3277_v47 = vadd.f32 %v3276_v56, %v3275_v38  ;;  %v1831_v26 = vpop.permute.xlu1 %1830  ;;  %v2205_v12 = vsel %vm355_vm0, %v592_v11, %v6050_v35  ;;  %v890_v38 = vpack.c.bf16 %v858_v43, %v857_v39  ;;  %v1049_v56 = vld [vmem:[#allocation2 + $0x332] sm:$0xff]  ;;  %v551_v35 = vld [vmem:[#allocation2 + $0x240] sm:$0xff] }
 0x20c   :  { %v1925_v60 = vpop.permute.xlu0 %1924  ;;  %v2280_v54 = vsel %vm2236_vm4, %v2205_v12, %v6052_v41  ;;  %v552_v12 = vld [vmem:[#allocation2 + $0x248] sm:$0xff]  ;;  %v6053_v43 = vld [vmem:[#allocation11_spill] sm:$0xff] }
 0x20d   :  { %v3279_v4 = vadd.f32 %v3278_v33, %v3277_v47  ;;  %1942 = vrot.lane.b32.xlu1 %v5485_v57, %s4187_s3  ;;  %v3083_v9 = vadd.f32 %v3082_v19, %v3081_v34  ;;  %v2538_v40 = vsel %vm2496_vm8, %v2473_v49, %v1925_v60 }
 0x20e   :  { %2036 = vrot.lane.b32.xlu0 %v5454_v20, %s4188_s19  ;;  %v2345_v20 = vsel %vm2301_vm5, %v2280_v54, %v5458_v1 }
 0x20f   :  { %v1927_v8 = vpop.permute.xlu1 %1926  ;;  %v3281_v16 = vadd.f32 %v3280_v27, %v3279_v4  ;;  %v2410_v55 = vsel %vm2366_vm6, %v2345_v20, %v1735_v3 }
 0x210   :  { %v2021_v32 = vpop.permute.xlu0 %2020  ;;  %v2475_v25 = vsel %vm2431_vm7, %v2410_v55, %v1831_v26 }
 0x211   :  { %2038 = vrot.lane.b32.xlu1 %v5499_v18, %s4188_s19  ;;  %v2540_v51 = vsel %vm2496_vm8, %v2475_v25, %v1927_v8  ;;  %v2603_v1 = vsel %vm2561_vm9, %v2538_v40, %v2021_v32  ;;  %v593_v25 = vpack.c.bf16 %v552_v12, %v551_v35 }
 0x212   :  { %2132 = vrot.lane.b32.xlu0 %v5469_v44, %s4189_s20 }
 0x213   :  { %v2023_v29 = vpop.permute.xlu1 %2022 }
 0x214   :  { %v2117_v5 = vpop.permute.xlu0 %2116  ;;  %v2605_v53 = vsel %vm2561_vm9, %v2540_v51, %v2023_v29  ;;  %v1243_v29 = vld [vmem:[#allocation2 + $0x351] sm:$0xff] }
 0x215   :  { %2134 = vrot.lane.b32.xlu1 %v5512_v62, %s4189_s20  ;;  %v2668_v59 = vsel %vm2626_vm10, %v2603_v1, %v2117_v5  ;;  %v1275_v40 = vpack.c.bf16 %v1243_v29, %v1242_v37  ;;  %v1338_v1 = vld [vmem:[#allocation2 + $0x34a] sm:$0xff]  ;;  %v1339_v5 = vld [vmem:[#allocation2 + $0x352] sm:$0xff] }
 0x216   :  { %1560 = vrot.lane.b32.xlu0 %v5469_v44, %s4183_s9  ;;  %4135 = vmatprep.mubr.msk.bf16.mxu1 %vm2711_vm11, %v2668_v59  ;;  %v6054_v59 = vld [vmem:[#allocation12_spill] sm:$0xff] }
 0x217   :  { %v2119_v50 = vpop.permute.xlu1 %2118 }
 0x218   :  { %v2670_v0 = vsel %vm2626_vm10, %v2605_v53, %v2119_v50  ;;  %v5540_v3 = vpop.permute.xlu0 %1544  ;;  %v2208_v53 = vsel %vm355_vm0, %v593_v25, %v6053_v43  ;;  %v555_v25 = vld [vmem:[#allocation2 + $0x270] sm:$0xff] }
 0x219   :  { %1562 = vrot.lane.b32.xlu1 %v5512_v62, %s4183_s9  ;;  %v4105_v48 = vpop.f32.mrf.mxu0  ;;  %4136 = vmatmul.mubr.msk.bf16.gmra.mxu1 %vm2711_vm11, %v2670_v0  ;;  %v2282_v0 = vsel %vm2236_vm4, %v2208_v53, %v5540_v3 }
 0x21a   :  { %v3841_v36 = vpack.c.bf16 %v4105_v48, %v4105_v48  ;;  %1656 = vrot.lane.b32.xlu0 %v5485_v57, %s4184_s11  ;;  %v1050_v57 = vld [vmem:[#allocation2 + $0x33a] sm:$0xff]  ;;  %v3213_v47 = vmul.f32 %v4105_v48, %v4105_v48  ;;  %v3088_v4 = vsel %vm355_vm0, %v4105_v48, 0.0  ;;  %v1371_v48 = vpack.c.bf16 %v1339_v5, %v1338_v1 }
 0x21b   :  { %v5542_v17 = vpop.permute.xlu1 %1546  ;;  %v2846_v30 = vpop.f32.mrf.mxu0  ;;  %v1082_v11 = vpack.c.bf16 %v1050_v57, %v1049_v56 }
 0x21c   :  { %3668 = vst.msk [vmem:[%s6009_s4 + $0x28] sm:$0xf] %vm3657_vm12, %v3841_v36  ;;  %v3084_v44 = vsel %vm355_vm0, %v2846_v30, 0.0  ;;  %v3211_v31 = vmul.f32 %v2846_v30, %v2846_v30  ;;  %v3839_v22 = vpack.c.bf16 %v2846_v30, %v2846_v30  ;;  %v1641_v10 = vpop.permute.xlu0 %1640  ;;  %v3286_v15 = vsel %vm355_vm0, %v3213_v47, 0.0 }
 0x21d   :  { %v3085_v21 = vadd.f32 %v3084_v44, %v3083_v9  ;;  %1658 = vrot.lane.b32.xlu1 %v890_v38, %s4184_s11  ;;  %v4106_v13 = vpop.f32.mrf.mxu0  ;;  %v2347_v36 = vsel %vm2301_vm5, %v2282_v0, %v1641_v10 }
 0x21e   :  { %v3282_v14 = vsel %vm355_vm0, %v3211_v31, 0.0  ;;  %v3842_v7 = vpack.c.bf16 %v4106_v13, %v4106_v13  ;;  %3666 = vst.msk [vmem:[%s6009_s4 + $0x20] sm:$0xf] %vm3657_vm12, %v3839_v22  ;;  %1752 = vrot.lane.b32.xlu0 %v5499_v18, %s4185_s15  ;;  %v3214_v9 = vmul.f32 %v4106_v13, %v4106_v13  ;;  %v1146_v18 = vld [vmem:[#allocation2 + $0x348] sm:$0xff]  ;;  %v3090_v28 = vsel %vm355_vm0, %v4106_v13, 0.0 }
 0x21f   :  { %v3283_v6 = vadd.f32 %v3282_v14, %v3281_v16  ;;  %v1643_v63 = vpop.permute.xlu1 %1642  ;;  %v2849_v34 = vpop.f32.mrf.mxu0  ;;  %v1179_v41 = vpack.c.bf16 %v1147_v24, %v1146_v18 }
 0x220   :  { %3669 = vst.msk [vmem:[%s6009_s4 + $0x2c] sm:$0xf] %vm3657_vm12, %v3842_v7  ;;  %v3086_v26 = vsel %vm355_vm0, %v2849_v34, 0.0  ;;  %v3212_v42 = vmul.f32 %v2849_v34, %v2849_v34  ;;  %v3840_v19 = vpack.c.bf16 %v2849_v34, %v2849_v34  ;;  %v1737_v27 = vpop.permute.xlu0 %1736  ;;  %v3288_v32 = vsel %vm355_vm0, %v3214_v9, 0.0 }
 0x221   :  { %v3087_v33 = vadd.f32 %v3086_v26, %v3085_v21  ;;  %1754 = vrot.lane.b32.xlu1 %v986_v52, %s4185_s15  ;;  %v2412_v30 = vsel %vm2366_vm6, %v2347_v36, %v1737_v27 }
 0x222   :  { %v3284_v60 = vsel %vm355_vm0, %v3212_v42, 0.0  ;;  %3667 = vst.msk [vmem:[%s6009_s4 + $0x24] sm:$0xf] %vm3657_vm12, %v3840_v19  ;;  %1848 = vrot.lane.b32.xlu0 %v5512_v62, %s4186_s18  ;;  %v594_v62 = vpack.c.bf16 %v554_v2, %v553_v61 }
 0x223   :  { %v3089_v46 = vadd.f32 %v3088_v4, %v3087_v33  ;;  %v3285_v8 = vadd.f32 %v3284_v60, %v3283_v6  ;;  %v1739_v16 = vpop.permute.xlu1 %1738 }
 0x224   :  { %v1833_v20 = vpop.permute.xlu0 %1832  ;;  %v2211_v50 = vsel %vm355_vm0, %v594_v62, %v6054_v59  ;;  %v556_v62 = vld [vmem:[#allocation2 + $0x278] sm:$0xff] }
 0x225   :  { %v3287_v58 = vadd.f32 %v3286_v15, %v3285_v8  ;;  %1850 = vrot.lane.b32.xlu1 %v1082_v11, %s4186_s18  ;;  %v3091_v54 = vadd.f32 %v3090_v28, %v3089_v46  ;;  %v2477_v21 = vsel %vm2431_vm7, %v2412_v30, %v1833_v20 }
 0x226   :  { %1944 = vrot.lane.b32.xlu0 %v890_v38, %s4187_s3  ;;  %v2284_v38 = vsel %vm2236_vm4, %v2211_v50, %v5542_v17  ;;  %v6055_v50 = vld [vmem:[#allocation13_spill] sm:$0xff] }
 0x227   :  { %v1835_v55 = vpop.permute.xlu1 %1834  ;;  %v3289_v49 = vadd.f32 %v3288_v32, %v3287_v58  ;;  %v2349_v45 = vsel %vm2301_vm5, %v2284_v38, %v1643_v63 }
 0x228   :  { %v1929_v51 = vpop.permute.xlu0 %1928  ;;  %v2414_v31 = vsel %vm2366_vm6, %v2349_v45, %v1739_v16 }
 0x229   :  { %1946 = vrot.lane.b32.xlu1 %v1179_v41, %s4187_s3  ;;  %v2479_v3 = vsel %vm2431_vm7, %v2414_v31, %v1835_v55  ;;  %v2542_v22 = vsel %vm2496_vm8, %v2477_v21, %v1929_v51  ;;  %v558_v51 = vld [vmem:[#allocation2 + $0x290] sm:$0xff] }
 0x22a   :  { %2040 = vrot.lane.b32.xlu0 %v986_v52, %s4188_s19 }
 0x22b   :  { %v1931_v39 = vpop.permute.xlu1 %1930 }
 0x22c   :  { %v2025_v23 = vpop.permute.xlu0 %2024  ;;  %v2544_v13 = vsel %vm2496_vm8, %v2479_v3, %v1931_v39  ;;  %v595_v39 = vpack.c.bf16 %v556_v62, %v555_v25 }
 0x22d   :  { %2042 = vrot.lane.b32.xlu1 %v1275_v40, %s4188_s19  ;;  %v2607_v52 = vsel %vm2561_vm9, %v2542_v22, %v2025_v23  ;;  %v557_v40 = vld [vmem:[#allocation2 + $0x288] sm:$0xff] }
 0x22e   :  { %2136 = vrot.lane.b32.xlu0 %v1082_v11, %s4189_s20  ;;  %v596_v43 = vpack.c.bf16 %v558_v51, %v557_v40  ;;  %v2214_v0 = vsel %vm355_vm0, %v595_v39, %v6055_v50  ;;  %v559_v40 = vld [vmem:[#allocation2 + $0x2a0] sm:$0xff]  ;;  %v560_v51 = vld [vmem:[#allocation2 + $0x2a8] sm:$0xff] }
 0x22f   :  { %v2027_v44 = vpop.permute.xlu1 %2026 }
 0x230   :  { %v2121_v10 = vpop.permute.xlu0 %2120  ;;  %v2609_v7 = vsel %vm2561_vm9, %v2544_v13, %v2027_v44 }
 0x231   :  { %2138 = vrot.lane.b32.xlu1 %v1371_v48, %s4189_s20  ;;  %v4109_v17 = vpop.f32.mrf.mxu0  ;;  %v2672_v56 = vsel %vm2626_vm10, %v2607_v52, %v2121_v10  ;;  %v6056_v48 = vld [vmem:[#allocation14_spill] sm:$0xff] }
 0x232   :  { %v3845_v14 = vpack.c.bf16 %v4109_v17, %v4109_v17  ;;  %4139 = vmatprep.mubr.msk.bf16.mxu1 %vm2711_vm11, %v2672_v56  ;;  %v3217_v18 = vmul.f32 %v4109_v17, %v4109_v17  ;;  %v3096_v15 = vsel %vm355_vm0, %v4109_v17, 0.0  ;;  %v2217_v38 = vsel %vm355_vm0, %v596_v43, %v6056_v48 }
 0x233   :  { %v2123_v57 = vpop.permute.xlu1 %2122  ;;  %v2862_v6 = vpop.f32.mrf.mxu0  ;;  %v597_v43 = vpack.c.bf16 %v560_v51, %v559_v40 }
 0x234   :  { %3672 = vst.msk [vmem:[%s6009_s4 + $0x38] sm:$0xf] %vm3657_vm12, %v3845_v14  ;;  %v2674_v63 = vsel %vm2626_vm10, %v2609_v7, %v2123_v57  ;;  %v3092_v34 = vsel %vm355_vm0, %v2862_v6, 0.0  ;;  %v3215_v47 = vmul.f32 %v2862_v6, %v2862_v6  ;;  %v3843_v42 = vpack.c.bf16 %v2862_v6, %v2862_v6  ;;  %v1549_v19 = vpop.permute.xlu0 %1548 }
 0x235   :  { %v3093_v26 = vadd.f32 %v3092_v34, %v3091_v54  ;;  %v4110_v33 = vpop.f32.mrf.mxu0  ;;  %4140 = vmatmul.mubr.msk.bf16.gmra.mxu1 %vm2711_vm11, %v2674_v63  ;;  %v3294_v54 = vsel %vm355_vm0, %v3217_v18, 0.0  ;;  %v2286_v36 = vsel %vm2236_vm4, %v2214_v0, %v1549_v19 }
 0x236   :  { %v3290_v11 = vsel %vm355_vm0, %v3215_v47, 0.0  ;;  %v3846_v4 = vpack.c.bf16 %v4110_v33, %v4110_v33  ;;  %3670 = vst.msk [vmem:[%s6009_s4 + $0x30] sm:$0xf] %vm3657_vm12, %v3843_v42  ;;  %v3218_v28 = vmul.f32 %v4110_v33, %v4110_v33  ;;  %v3098_v2 = vsel %vm355_vm0, %v4110_v33, 0.0 }
 0x237   :  { %v3291_v9 = vadd.f32 %v3290_v11, %v3289_v49  ;;  %v1551_v27 = vpop.permute.xlu1 %1550  ;;  %v2865_v60 = vpop.f32.mrf.mxu0 }
 0x238   :  { %3673 = vst.msk [vmem:[%s6009_s4 + $0x3c] sm:$0xf] %vm3657_vm12, %v3846_v4  ;;  %v3094_v24 = vsel %vm355_vm0, %v2865_v60, 0.0  ;;  %v3216_v46 = vmul.f32 %v2865_v60, %v2865_v60  ;;  %v3844_v16 = vpack.c.bf16 %v2865_v60, %v2865_v60  ;;  %v1645_v35 = vpop.permute.xlu0 %1644  ;;  %v3296_v37 = vsel %vm355_vm0, %v3218_v28, 0.0 }
 0x239   :  { %v3095_v8 = vadd.f32 %v3094_v24, %v3093_v26  ;;  %v2288_v45 = vsel %vm2236_vm4, %v2217_v38, %v1551_v27  ;;  %v2351_v30 = vsel %vm2301_vm5, %v2286_v36, %v1645_v35  ;;  %v6057_v38 = vld [vmem:[#allocation15_spill] sm:$0xff] }
 0x23a   :  { %v3292_v12 = vsel %vm355_vm0, %v3216_v46, 0.0  ;;  %3671 = vst.msk [vmem:[%s6009_s4 + $0x34] sm:$0xf] %vm3657_vm12, %v3844_v16  ;;  %v2220_v36 = vsel %vm355_vm0, %v597_v43, %v6057_v38  ;;  %v566_v43 = vld [vmem:[#allocation2 + $0x2f0] sm:$0xff] }
 0x23b   :  { %v3097_v61 = vadd.f32 %v3096_v15, %v3095_v8  ;;  %v3293_v58 = vadd.f32 %v3292_v12, %v3291_v9  ;;  %v1647_v41 = vpop.permute.xlu1 %1646 }
 0x23c   :  { %v1741_v29 = vpop.permute.xlu0 %1740  ;;  %v2353_v21 = vsel %vm2301_vm5, %v2288_v45, %v1647_v41 }
 0x23d   :  { %v3295_v32 = vadd.f32 %v3294_v54, %v3293_v58  ;;  %v3099_v20 = vadd.f32 %v3098_v2, %v3097_v61  ;;  %v2416_v3 = vsel %vm2366_vm6, %v2351_v30, %v1741_v29  ;;  %v6058_v30 = vld [vmem:[#allocation16_spill] sm:$0xff] }
 0x23f   :  { %v1743_v55 = vpop.permute.xlu1 %1742  ;;  %v3297_v49 = vadd.f32 %v3296_v37, %v3295_v32 }
 0x240   :  { %v1837_v1 = vpop.permute.xlu0 %1836  ;;  %v2418_v13 = vsel %vm2366_vm6, %v2353_v21, %v1743_v55 }
 0x241   :  { %v2481_v52 = vsel %vm2431_vm7, %v2416_v3, %v1837_v1  ;;  %v561_v1 = vld [vmem:[#allocation2 + $0x2b8] sm:$0xff] }
 0x243   :  { %v1839_v5 = vpop.permute.xlu1 %1838 }
 0x244   :  { %v1933_v53 = vpop.permute.xlu0 %1932  ;;  %v2483_v7 = vsel %vm2431_vm7, %v2418_v13, %v1839_v5  ;;  %v562_v5 = vld [vmem:[#allocation2 + $0x2c0] sm:$0xff] }
 0x245   :  { %v2546_v56 = vsel %vm2496_vm8, %v2481_v52, %v1933_v53 }
 0x247   :  { %v1935_v59 = vpop.permute.xlu1 %1934 }
 0x248   :  { %v2029_v44 = vpop.permute.xlu0 %2028  ;;  %v2548_v34 = vsel %vm2496_vm8, %v2483_v7, %v1935_v59  ;;  %v598_v59 = vpack.c.bf16 %v562_v5, %v561_v1  ;;  %v563_v1 = vld [vmem:[#allocation2 + $0x2d0] sm:$0xff]  ;;  %v564_v5 = vld [vmem:[#allocation2 + $0x2d8] sm:$0xff] }
 0x249   :  { %v4113_v23 = vpop.f32.mrf.mxu0  ;;  %v2611_v47 = vsel %vm2561_vm9, %v2546_v56, %v2029_v44 }
 0x24a   :  { %v3849_v31 = vpack.c.bf16 %v4113_v23, %v4113_v23  ;;  %v3221_v60 = vmul.f32 %v4113_v23, %v4113_v23  ;;  %v3104_v15 = vsel %vm355_vm0, %v4113_v23, 0.0  ;;  %v2223_v44 = vsel %vm355_vm0, %v598_v59, %v6058_v30 }
 0x24b   :  { %v2031_v22 = vpop.permute.xlu1 %2030  ;;  %v2878_v17 = vpop.f32.mrf.mxu0 }
 0x24c   :  { %3676 = vst.msk [vmem:[%s6009_s4 + $0x48] sm:$0xf] %vm3657_vm12, %v3849_v31  ;;  %v3100_v10 = vsel %vm355_vm0, %v2878_v17, 0.0  ;;  %v3219_v14 = vmul.f32 %v2878_v17, %v2878_v17  ;;  %v3847_v6 = vpack.c.bf16 %v2878_v17, %v2878_v17  ;;  %v2125_v26 = vpop.permute.xlu0 %2124  ;;  %v2613_v19 = vsel %vm2561_vm9, %v2548_v34, %v2031_v22 }
 0x24d   :  { %v3101_v57 = vadd.f32 %v3100_v10, %v3099_v20  ;;  %v4114_v63 = vpop.f32.mrf.mxu0  ;;  %v2676_v11 = vsel %vm2626_vm10, %v2611_v47, %v2125_v26  ;;  %v3302_v54 = vsel %vm355_vm0, %v3221_v60, 0.0 }
 0x24e   :  { %v3298_v42 = vsel %vm355_vm0, %v3219_v14, 0.0  ;;  %v3850_v33 = vpack.c.bf16 %v4114_v63, %v4114_v63  ;;  %3674 = vst.msk [vmem:[%s6009_s4 + $0x40] sm:$0xf] %vm3657_vm12, %v3847_v6  ;;  %4143 = vmatprep.mubr.msk.bf16.mxu1 %vm2711_vm11, %v2676_v11  ;;  %v3222_v28 = vmul.f32 %v4114_v63, %v4114_v63  ;;  %v3106_v2 = vsel %vm355_vm0, %v4114_v63, 0.0 }
 0x24f   :  { %v3299_v4 = vadd.f32 %v3298_v42, %v3297_v49  ;;  %v2127_v9 = vpop.permute.xlu1 %2126  ;;  %v2881_v27 = vpop.f32.mrf.mxu0 }
 0x250   :  { %3677 = vst.msk [vmem:[%s6009_s4 + $0x4c] sm:$0xf] %vm3657_vm12, %v3850_v33  ;;  %v2678_v18 = vsel %vm2626_vm10, %v2613_v19, %v2127_v9  ;;  %v3102_v24 = vsel %vm355_vm0, %v2881_v27, 0.0  ;;  %v3220_v46 = vmul.f32 %v2881_v27, %v2881_v27  ;;  %v3848_v16 = vpack.c.bf16 %v2881_v27, %v2881_v27  ;;  %v1553_v35 = vpop.permute.xlu0 %1552 }
 0x251   :  { %v3103_v8 = vadd.f32 %v3102_v24, %v3101_v57  ;;  %4144 = vmatmul.mubr.msk.bf16.gmra.mxu1 %vm2711_vm11, %v2678_v18  ;;  %v3304_v37 = vsel %vm355_vm0, %v3222_v28, 0.0  ;;  %v2290_v31 = vsel %vm2236_vm4, %v2220_v36, %v1553_v35 }
 0x252   :  { %v3300_v12 = vsel %vm355_vm0, %v3220_v46, 0.0  ;;  %3675 = vst.msk [vmem:[%s6009_s4 + $0x44] sm:$0xf] %vm3657_vm12, %v3848_v16 }
 0x253   :  { %v3105_v61 = vadd.f32 %v3104_v15, %v3103_v8  ;;  %v3301_v58 = vadd.f32 %v3300_v12, %v3299_v4  ;;  %v1555_v41 = vpop.permute.xlu1 %1554 }
 0x254   :  { %v1649_v29 = vpop.permute.xlu0 %1648  ;;  %v2292_v22 = vsel %vm2236_vm4, %v2223_v44, %v1555_v41 }
 0x255   :  { %v3303_v32 = vadd.f32 %v3302_v54, %v3301_v58  ;;  %v3107_v20 = vadd.f32 %v3106_v2, %v3105_v61  ;;  %v2355_v17 = vsel %vm2301_vm5, %v2290_v31, %v1649_v29 }
 0x257   :  { %v1651_v55 = vpop.permute.xlu1 %1650  ;;  %v3305_v49 = vadd.f32 %v3304_v37, %v3303_v32 }
 0x258   :  { %v1745_v25 = vpop.permute.xlu0 %1744  ;;  %v2357_v14 = vsel %vm2301_vm5, %v2292_v22, %v1651_v55 }
 0x259   :  { %v2420_v7 = vsel %vm2366_vm6, %v2355_v17, %v1745_v25  ;;  %v6059_v17 = vld [vmem:[#allocation17_spill] sm:$0xff] }
 0x25b   :  { %v1747_v62 = vpop.permute.xlu1 %1746 }
 0x25c   :  { %v1841_v39 = vpop.permute.xlu0 %1840  ;;  %v2422_v63 = vsel %vm2366_vm6, %v2357_v14, %v1747_v62 }
 0x25d   :  { %v2485_v34 = vsel %vm2431_vm7, %v2420_v7, %v1841_v39  ;;  %v565_v39 = vld [vmem:[#allocation2 + $0x2e8] sm:$0xff]  ;;  %v6060_v7 = vld [vmem:[#allocation18_spill] sm:$0xff] }
 0x25e   :  { %v600_v36 = vpack.c.bf16 %v566_v43, %v565_v39 }
 0x25f   :  { %v1843_v53 = vpop.permute.xlu1 %1842 }
 0x260   :  { %v1937_v0 = vpop.permute.xlu0 %1936  ;;  %v2487_v33 = vsel %vm2431_vm7, %v2422_v63, %v1843_v53 }
 0x261   :  { %v4117_v50 = vpop.f32.mrf.mxu0  ;;  %v2550_v9 = vsel %vm2496_vm8, %v2485_v34, %v1937_v0  ;;  %v599_v0 = vpack.c.bf16 %v564_v5, %v563_v1 }
 0x262   :  { %v3853_v48 = vpack.c.bf16 %v4117_v50, %v4117_v50  ;;  %v3225_v19 = vmul.f32 %v4117_v50, %v4117_v50  ;;  %v3112_v27 = vsel %vm355_vm0, %v4117_v50, 0.0 }
 0x263   :  { %v1939_v23 = vpop.permute.xlu1 %1938  ;;  %v2894_v45 = vpop.f32.mrf.mxu0 }
 0x264   :  { %3680 = vst.msk [vmem:[%s6009_s4 + $0x58] sm:$0xf] %vm3657_vm12, %v3853_v48  ;;  %v3108_v21 = vsel %vm355_vm0, %v2894_v45, 0.0  ;;  %v3223_v3 = vmul.f32 %v2894_v45, %v2894_v45  ;;  %v3851_v52 = vpack.c.bf16 %v2894_v45, %v2894_v45  ;;  %v2033_v56 = vpop.permute.xlu0 %2032  ;;  %v2552_v24 = vsel %vm2496_vm8, %v2487_v33, %v1939_v23 }
 0x265   :  { %v3109_v13 = vadd.f32 %v3108_v21, %v3107_v20  ;;  %v4118_v10 = vpop.f32.mrf.mxu0  ;;  %v2615_v46 = vsel %vm2561_vm9, %v2550_v9, %v2033_v56  ;;  %v3310_v41 = vsel %vm355_vm0, %v3225_v19, 0.0  ;;  %v2229_v56 = vsel %vm355_vm0, %v600_v36, %v6060_v7 }
 0x266   :  { %v3306_v57 = vsel %vm355_vm0, %v3223_v3, 0.0  ;;  %v3854_v6 = vpack.c.bf16 %v4118_v10, %v4118_v10  ;;  %3678 = vst.msk [vmem:[%s6009_s4 + $0x50] sm:$0xf] %vm3657_vm12, %v3851_v52  ;;  %v3226_v8 = vmul.f32 %v4118_v10, %v4118_v10  ;;  %v3114_v54 = vsel %vm355_vm0, %v4118_v10, 0.0 }
 0x267   :  { %v3307_v47 = vadd.f32 %v3306_v57, %v3305_v49  ;;  %v2035_v26 = vpop.permute.xlu1 %2034  ;;  %v2897_v42 = vpop.f32.mrf.mxu0 }
 0x268   :  { %3681 = vst.msk [vmem:[%s6009_s4 + $0x5c] sm:$0xf] %vm3657_vm12, %v3854_v6  ;;  %v3110_v11 = vsel %vm355_vm0, %v2897_v42, 0.0  ;;  %v3224_v4 = vmul.f32 %v2897_v42, %v2897_v42  ;;  %v3852_v18 = vpack.c.bf16 %v2897_v42, %v2897_v42  ;;  %v2129_v16 = vpop.permute.xlu0 %2128  ;;  %v2617_v28 = vsel %vm2561_vm9, %v2552_v24, %v2035_v26 }
 0x269   :  { %v3111_v60 = vadd.f32 %v3110_v11, %v3109_v13  ;;  %v2680_v35 = vsel %vm2626_vm10, %v2615_v46, %v2129_v16  ;;  %v3312_v37 = vsel %vm355_vm0, %v3226_v8, 0.0  ;;  %v2226_v13 = vsel %vm355_vm0, %v599_v0, %v6059_v17  ;;  %v567_v0 = vld [vmem:[#allocation2 + $0x300] sm:$0xff] }
 0x26a   :  { %v3308_v15 = vsel %vm355_vm0, %v3224_v4, 0.0  ;;  %3679 = vst.msk [vmem:[%s6009_s4 + $0x54] sm:$0xf] %vm3657_vm12, %v3852_v18  ;;  %4147 = vmatprep.mubr.msk.bf16.mxu1 %vm2711_vm11, %v2680_v35 }
 0x26b   :  { %v3113_v12 = vadd.f32 %v3112_v27, %v3111_v60  ;;  %v3309_v61 = vadd.f32 %v3308_v15, %v3307_v47  ;;  %v2131_v58 = vpop.permute.xlu1 %2130 }
 0x26c   :  { %v2682_v2 = vsel %vm2626_vm10, %v2617_v28, %v2131_v58  ;;  %v1557_v29 = vpop.permute.xlu0 %1556 }
 0x26d   :  { %v3311_v32 = vadd.f32 %v3310_v41, %v3309_v61  ;;  %4148 = vmatmul.mubr.msk.bf16.gmra.mxu1 %vm2711_vm11, %v2682_v2  ;;  %v3115_v20 = vadd.f32 %v3114_v54, %v3113_v12  ;;  %v2294_v34 = vsel %vm2236_vm4, %v2226_v13, %v1557_v29 }
 0x26f   :  { %v1559_v55 = vpop.permute.xlu1 %1558  ;;  %v3313_v49 = vadd.f32 %v3312_v37, %v3311_v32 }
 0x270   :  { %v1653_v25 = vpop.permute.xlu0 %1652  ;;  %v2296_v47 = vsel %vm2236_vm4, %v2229_v56, %v1559_v55 }
 0x271   :  { %v2359_v33 = vsel %vm2301_vm5, %v2294_v34, %v1653_v25 }
 0x273   :  { %v1655_v62 = vpop.permute.xlu1 %1654 }
 0x274   :  { %v1749_v40 = vpop.permute.xlu0 %1748  ;;  %v2361_v27 = vsel %vm2301_vm5, %v2296_v47, %v1655_v62 }
 0x275   :  { %v2424_v60 = vsel %vm2366_vm6, %v2359_v33, %v1749_v40 }
 0x277   :  { %v1751_v51 = vpop.permute.xlu1 %1750 }
 0x278   :  { %v1845_v59 = vpop.permute.xlu0 %1844  ;;  %v2426_v8 = vsel %vm2366_vm6, %v2361_v27, %v1751_v51  ;;  %v6062_v27 = vld [vmem:[#allocation20_spill] sm:$0xff] }
 0x279   :  { %v4121_v53 = vpop.f32.mrf.mxu0  ;;  %v2489_v16 = vsel %vm2431_vm7, %v2424_v60, %v1845_v59 }
 0x27a   :  { %v3857_v50 = vpack.c.bf16 %v4121_v53, %v4121_v53  ;;  %v3229_v57 = vmul.f32 %v4121_v53, %v4121_v53  ;;  %v3120_v19 = vsel %vm355_vm0, %v4121_v53, 0.0 }
 0x27b   :  { %v1847_v48 = vpop.permute.xlu1 %1846  ;;  %v2910_v38 = vpop.f32.mrf.mxu0 }
 0x27c   :  { %3684 = vst.msk [vmem:[%s6009_s4 + $0x68] sm:$0xf] %vm3657_vm12, %v3857_v50  ;;  %v3116_v23 = vsel %vm355_vm0, %v2910_v38, 0.0  ;;  %v3227_v45 = vmul.f32 %v2910_v38, %v2910_v38  ;;  %v3855_v44 = vpack.c.bf16 %v2910_v38, %v2910_v38  ;;  %v1941_v21 = vpop.permute.xlu0 %1940  ;;  %v3318_v15 = vsel %vm355_vm0, %v3229_v57, 0.0 }
 0x27d   :  { %v3117_v30 = vadd.f32 %v3116_v23, %v3115_v20  ;;  %v4122_v31 = vpop.f32.mrf.mxu0  ;;  %v2491_v35 = vsel %vm2431_vm7, %v2426_v8, %v1847_v48  ;;  %v2554_v12 = vsel %vm2496_vm8, %v2489_v16, %v1941_v21  ;;  %v568_v48 = vld [vmem:[#allocation2 + $0x308] sm:$0xff] }
 0x27e   :  { %v3314_v3 = vsel %vm355_vm0, %v3227_v45, 0.0  ;;  %v3858_v22 = vpack.c.bf16 %v4122_v31, %v4122_v31  ;;  %3682 = vst.msk [vmem:[%s6009_s4 + $0x60] sm:$0xf] %vm3657_vm12, %v3855_v44  ;;  %v3230_v11 = vmul.f32 %v4122_v31, %v4122_v31  ;;  %v3122_v28 = vsel %vm355_vm0, %v4122_v31, 0.0  ;;  %v569_v45 = vld [vmem:[#allocation2 + $0x318] sm:$0xff] }
 0x27f   :  { %v3315_v52 = vadd.f32 %v3314_v3, %v3313_v49  ;;  %v1943_v10 = vpop.permute.xlu1 %1942  ;;  %v2913_v14 = vpop.f32.mrf.mxu0  ;;  %v601_v13 = vpack.c.bf16 %v568_v48, %v567_v0 }
 0x280   :  { %3685 = vst.msk [vmem:[%s6009_s4 + $0x6c] sm:$0xf] %vm3657_vm12, %v3858_v22  ;;  %v3118_v6 = vsel %vm355_vm0, %v2913_v14, 0.0  ;;  %v3228_v63 = vmul.f32 %v2913_v14, %v2913_v14  ;;  %v3856_v42 = vpack.c.bf16 %v2913_v14, %v2913_v14  ;;  %v2037_v4 = vpop.permute.xlu0 %2036  ;;  %v3320_v41 = vsel %vm355_vm0, %v3230_v11, 0.0 }
 0x281   :  { %v3119_v26 = vadd.f32 %v3118_v6, %v3117_v30  ;;  %v2556_v54 = vsel %vm2496_vm8, %v2491_v35, %v1943_v10  ;;  %v2619_v2 = vsel %vm2561_vm9, %v2554_v12, %v2037_v4  ;;  %v570_v30 = vld [vmem:[#allocation2 + $0x320] sm:$0xff] }
 0x282   :  { %v3316_v9 = vsel %vm355_vm0, %v3228_v63, 0.0  ;;  %3683 = vst.msk [vmem:[%s6009_s4 + $0x64] sm:$0xf] %vm3657_vm12, %v3856_v42  ;;  %v602_v7 = vpack.c.bf16 %v570_v30, %v569_v45 }
 0x283   :  { %v3121_v18 = vadd.f32 %v3120_v19, %v3119_v26  ;;  %v3317_v24 = vadd.f32 %v3316_v9, %v3315_v52  ;;  %v2039_v46 = vpop.permute.xlu1 %2038  ;;  %v6061_v19 = vld [vmem:[#allocation19_spill] sm:$0xff] }
 0x284   :  { %v2133_v32 = vpop.permute.xlu0 %2132  ;;  %v2621_v20 = vsel %vm2561_vm9, %v2556_v54, %v2039_v46  ;;  %v2232_v11 = vsel %vm355_vm0, %v601_v13, %v6061_v19  ;;  %v2235_v60 = vsel %vm355_vm0, %v602_v7, %v6062_v27 }
 0x285   :  { %v3319_v61 = vadd.f32 %v3318_v15, %v3317_v24  ;;  %v3123_v58 = vadd.f32 %v3122_v28, %v3121_v18  ;;  %v2684_v37 = vsel %vm2626_vm10, %v2619_v2, %v2133_v32 }
 0x286   :  { %4151 = vmatprep.mubr.msk.bf16.mxu1 %vm2711_vm11, %v2684_v37 }
 0x287   :  { %v2135_v29 = vpop.permute.xlu1 %2134  ;;  %v3321_v55 = vadd.f32 %v3320_v41, %v3319_v61 }
 0x288   :  { %v2686_v49 = vsel %vm2626_vm10, %v2621_v20, %v2135_v29  ;;  %v1561_v25 = vpop.permute.xlu0 %1560 }
 0x289   :  { %4152 = vmatmul.mubr.msk.bf16.gmra.mxu1 %vm2711_vm11, %v2686_v49  ;;  %v2298_v18 = vsel %vm2236_vm4, %v2232_v11, %v1561_v25 }
 0x28b   :  { %v1563_v62 = vpop.permute.xlu1 %1562 }
 0x28c   :  { %v1657_v40 = vpop.permute.xlu0 %1656  ;;  %v2300_v8 = vsel %vm2236_vm4, %v2235_v60, %v1563_v62 }
 0x28d   :  { %v2363_v16 = vsel %vm2301_vm5, %v2298_v18, %v1657_v40 }
 0x28f   :  { %v1659_v51 = vpop.permute.xlu1 %1658 }
 0x290   :  { %v1753_v5 = vpop.permute.xlu0 %1752  ;;  %v2365_v35 = vsel %vm2301_vm5, %v2300_v8, %v1659_v51 }
 0x291   :  { %v4125_v1 = vpop.f32.mrf.mxu0  ;;  %v2428_v12 = vsel %vm2366_vm6, %v2363_v16, %v1753_v5 }
 0x292   :  { %v3861_v39 = vpack.c.bf16 %v4125_v1, %v4125_v1  ;;  %v3233_v52 = vmul.f32 %v4125_v1, %v4125_v1  ;;  %v3128_v6 = vsel %vm355_vm0, %v4125_v1, 0.0 }
 0x293   :  { %v1755_v43 = vpop.permute.xlu1 %1754  ;;  %v2926_v53 = vpop.f32.mrf.mxu0 }
 0x294   :  { %3688 = vst.msk [vmem:[%s6009_s4 + $0x78] sm:$0xf] %vm3657_vm12, %v3861_v39  ;;  %v3124_v59 = vsel %vm355_vm0, %v2926_v53, 0.0  ;;  %v3231_v50 = vmul.f32 %v2926_v53, %v2926_v53  ;;  %v3859_v36 = vpack.c.bf16 %v2926_v53, %v2926_v53  ;;  %v1849_v44 = vpop.permute.xlu0 %1848  ;;  %v3326_v4 = vsel %vm355_vm0, %v3233_v52, 0.0 }
 0x295   :  { %v3125_v38 = vadd.f32 %v3124_v59, %v3123_v58  ;;  %v4126_v23 = vpop.f32.mrf.mxu0  ;;  %v2430_v41 = vsel %vm2366_vm6, %v2365_v35, %v1755_v43  ;;  %v2493_v54 = vsel %vm2431_vm7, %v2428_v12, %v1849_v44 }
 0x296   :  { %v3322_v31 = vsel %vm355_vm0, %v3231_v50, 0.0  ;;  %v3862_v21 = vpack.c.bf16 %v4126_v23, %v4126_v23  ;;  %3686 = vst.msk [vmem:[%s6009_s4 + $0x70] sm:$0xf] %vm3657_vm12, %v3859_v36  ;;  %v3234_v63 = vmul.f32 %v4126_v23, %v4126_v23  ;;  %v3130_v9 = vsel %vm355_vm0, %v4126_v23, 0.0 }
 0x297   :  { %v3323_v3 = vadd.f32 %v3322_v31, %v3321_v55  ;;  %v1851_v22 = vpop.permute.xlu1 %1850  ;;  %v2929_v17 = vpop.f32.mrf.mxu0 }
 0x298   :  { %3689 = vst.msk [vmem:[%s6009_s4 + $0x7c] sm:$0xf] %vm3657_vm12, %v3862_v21  ;;  %v3126_v10 = vsel %vm355_vm0, %v2929_v17, 0.0  ;;  %v3232_v14 = vmul.f32 %v2929_v17, %v2929_v17  ;;  %v3860_v57 = vpack.c.bf16 %v2929_v17, %v2929_v17  ;;  %v1945_v34 = vpop.permute.xlu0 %1944  ;;  %v3328_v15 = vsel %vm355_vm0, %v3234_v63, 0.0 }
 0x299   :  { %v3127_v56 = vadd.f32 %v3126_v10, %v3125_v38  ;;  %v2495_v2 = vsel %vm2431_vm7, %v2430_v41, %v1851_v22  ;;  %v2558_v32 = vsel %vm2496_vm8, %v2493_v54, %v1945_v34 }
 0x29a   :  { %v3324_v47 = vsel %vm355_vm0, %v3232_v14, 0.0  ;;  %3687 = vst.msk [vmem:[%s6009_s4 + $0x74] sm:$0xf] %vm3657_vm12, %v3860_v57 }
 0x29b   :  { %v3129_v26 = vadd.f32 %v3128_v6, %v3127_v56  ;;  %v3325_v42 = vadd.f32 %v3324_v47, %v3323_v3  ;;  %v1947_v33 = vpop.permute.xlu1 %1946 }
 0x29c   :  { %v2041_v28 = vpop.permute.xlu0 %2040  ;;  %v2560_v20 = vsel %vm2496_vm8, %v2495_v2, %v1947_v33 }
 0x29d   :  { %v3327_v24 = vadd.f32 %v3326_v4, %v3325_v42  ;;  %v3131_v46 = vadd.f32 %v3130_v9, %v3129_v26  ;;  %v2623_v37 = vsel %vm2561_vm9, %v2558_v32, %v2041_v28 }
 0x29f   :  { %v2043_v61 = vpop.permute.xlu1 %2042  ;;  %v3329_v58 = vadd.f32 %v3328_v15, %v3327_v24 }
 0x2a0   :  { %v2137_v29 = vpop.permute.xlu0 %2136  ;;  %v2625_v55 = vsel %vm2561_vm9, %v2560_v20, %v2043_v61 }
 0x2a1   :  { %v2688_v49 = vsel %vm2626_vm10, %v2623_v37, %v2137_v29 }
 0x2a2   :  { %4155 = vmatprep.mubr.msk.bf16.mxu1 %vm2711_vm11, %v2688_v49 }
 0x2a3   :  { %v2139_v25 = vpop.permute.xlu1 %2138 }
 0x2a4   :  { %v2690_v62 = vsel %vm2626_vm10, %v2625_v55, %v2139_v25 }
 0x2a5   :  { %4156 = vmatmul.mubr.msk.bf16.gmra.mxu1 %vm2711_vm11, %v2690_v62 }
 0x2a9   :  { %v4129_v40 = vpop.f32.mrf.mxu1 }
 0x2aa   :  { %v3865_v51 = vpack.c.bf16 %v4129_v40, %v4129_v40  ;;  %v3237_v36 = vmul.f32 %v4129_v40, %v4129_v40  ;;  %v3136_v31 = vsel %vm355_vm0, %v4129_v40, 0.0 }
 0x2ab   :  { %v2942_v1 = vpop.f32.mrf.mxu1 }
 0x2ac   :  { %3692 = vst.msk [vmem:[%s6009_s4 + $0x88] sm:$0xf] %vm3657_vm12, %v3865_v51  ;;  %v3132_v5 = vsel %vm355_vm0, %v2942_v1, 0.0  ;;  %v3235_v39 = vmul.f32 %v2942_v1, %v2942_v1  ;;  %v3863_v43 = vpack.c.bf16 %v2942_v1, %v2942_v1  ;;  %v3334_v13 = vsel %vm355_vm0, %v3237_v36, 0.0 }
 0x2ad   :  { %v3133_v53 = vadd.f32 %v3132_v5, %v3131_v46  ;;  %v4130_v59 = vpop.f32.mrf.mxu1 }
 0x2ae   :  { %v3330_v50 = vsel %vm355_vm0, %v3235_v39, 0.0  ;;  %3690 = vst.msk [vmem:[%s6009_s4 + $0x80] sm:$0xf] %vm3657_vm12, %v3863_v43  ;;  %v3866_v0 = vpack.c.bf16 %v4130_v59, %v4130_v59  ;;  %v3238_v21 = vmul.f32 %v4130_v59, %v4130_v59  ;;  %v3138_v52 = vsel %vm355_vm0, %v4130_v59, 0.0 }
 0x2af   :  { %v3331_v48 = vadd.f32 %v3330_v50, %v3329_v58  ;;  %v2945_v38 = vpop.f32.mrf.mxu1 }
 0x2b0   :  { %3693 = vst.msk [vmem:[%s6009_s4 + $0x8c] sm:$0xf] %vm3657_vm12, %v3866_v0  ;;  %v3134_v23 = vsel %vm355_vm0, %v2945_v38, 0.0  ;;  %v3236_v45 = vmul.f32 %v2945_v38, %v2945_v38  ;;  %v3864_v30 = vpack.c.bf16 %v2945_v38, %v2945_v38  ;;  %v3336_v7 = vsel %vm355_vm0, %v3238_v21, 0.0 }
 0x2b1   :  { %v3135_v44 = vadd.f32 %v3134_v23, %v3133_v53 }
 0x2b2   :  { %v3332_v3 = vsel %vm355_vm0, %v3236_v45, 0.0  ;;  %3691 = vst.msk [vmem:[%s6009_s4 + $0x84] sm:$0xf] %vm3657_vm12, %v3864_v30 }
 0x2b3   :  { %v3137_v22 = vadd.f32 %v3136_v31, %v3135_v44  ;;  %v3333_v17 = vadd.f32 %v3332_v3, %v3331_v48 }
 0x2b5   :  { %v3335_v10 = vadd.f32 %v3334_v13, %v3333_v17  ;;  %v3139_v14 = vadd.f32 %v3138_v52, %v3137_v22 }
 0x2b7   :  { %v3337_v56 = vadd.f32 %v3336_v7, %v3335_v10 }
 0x2c1   :  { %v4133_v57 = vpop.f32.mrf.mxu1 }
 0x2c2   :  { %v3869_v6 = vpack.c.bf16 %v4133_v57, %v4133_v57  ;;  %v3241_v27 = vmul.f32 %v4133_v57, %v4133_v57  ;;  %v3144_v8 = vsel %vm355_vm0, %v4133_v57, 0.0 }
 0x2c3   :  { %v2958_v63 = vpop.f32.mrf.mxu1 }
 0x2c4   :  { %3696 = vst.msk [vmem:[%s6009_s4 + $0x98] sm:$0xf] %vm3657_vm12, %v3869_v6  ;;  %v3140_v34 = vsel %vm355_vm0, %v2958_v63, 0.0  ;;  %v3239_v47 = vmul.f32 %v2958_v63, %v2958_v63  ;;  %v3867_v26 = vpack.c.bf16 %v2958_v63, %v2958_v63  ;;  %v3342_v12 = vsel %vm355_vm0, %v3241_v27, 0.0 }
 0x2c5   :  { %v3141_v42 = vadd.f32 %v3140_v34, %v3139_v14  ;;  %v4134_v33 = vpop.f32.mrf.mxu1 }
 0x2c6   :  { %v3338_v19 = vsel %vm355_vm0, %v3239_v47, 0.0  ;;  %3694 = vst.msk [vmem:[%s6009_s4 + $0x90] sm:$0xf] %vm3657_vm12, %v3867_v26  ;;  %v3870_v11 = vpack.c.bf16 %v4134_v33, %v4134_v33  ;;  %v3242_v16 = vmul.f32 %v4134_v33, %v4134_v33  ;;  %v3146_v61 = vsel %vm355_vm0, %v4134_v33, 0.0 }
 0x2c7   :  { %v3339_v4 = vadd.f32 %v3338_v19, %v3337_v56  ;;  %v2961_v9 = vpop.f32.mrf.mxu1 }
 0x2c8   :  { %3697 = vst.msk [vmem:[%s6009_s4 + $0x9c] sm:$0xf] %vm3657_vm12, %v3870_v11  ;;  %v3142_v60 = vsel %vm355_vm0, %v2961_v9, 0.0  ;;  %v3240_v18 = vmul.f32 %v2961_v9, %v2961_v9  ;;  %v3868_v24 = vpack.c.bf16 %v2961_v9, %v2961_v9  ;;  %v3344_v54 = vsel %vm355_vm0, %v3242_v16, 0.0 }
 0x2c9   :  { %v3143_v46 = vadd.f32 %v3142_v60, %v3141_v42 }
 0x2ca   :  { %v3340_v15 = vsel %vm355_vm0, %v3240_v18, 0.0  ;;  %3695 = vst.msk [vmem:[%s6009_s4 + $0x94] sm:$0xf] %vm3657_vm12, %v3868_v24 }
 0x2cb   :  { %v3145_v28 = vadd.f32 %v3144_v8, %v3143_v46  ;;  %v3341_v35 = vadd.f32 %v3340_v15, %v3339_v4 }
 0x2cd   :  { %v3343_v58 = vadd.f32 %v3342_v12, %v3341_v35  ;;  %v3147_v41 = vadd.f32 %v3146_v61, %v3145_v28 }
 0x2cf   :  { %v3345_v2 = vadd.f32 %v3344_v54, %v3343_v58 }
 0x2d9   :  { %v4137_v32 = vpop.f32.mrf.mxu1 }
 0x2da   :  { %v3873_v20 = vpack.c.bf16 %v4137_v32, %v4137_v32  ;;  %v3245_v39 = vmul.f32 %v4137_v32, %v4137_v32  ;;  %v3152_v0 = vsel %vm355_vm0, %v4137_v32, 0.0 }
 0x2db   :  { %v2974_v37 = vpop.f32.mrf.mxu1 }
 0x2dc   :  { %3700 = vst.msk [vmem:[%s6009_s4 + $0xa8] sm:$0xf] %vm3657_vm12, %v3873_v20  ;;  %v3148_v29 = vsel %vm355_vm0, %v2974_v37, 0.0  ;;  %v3243_v55 = vmul.f32 %v2974_v37, %v2974_v37  ;;  %v3871_v49 = vpack.c.bf16 %v2974_v37, %v2974_v37  ;;  %v3350_v45 = vsel %vm355_vm0, %v3245_v39, 0.0 }
 0x2dd   :  { %v3149_v25 = vadd.f32 %v3148_v29, %v3147_v41  ;;  %v4138_v62 = vpop.f32.mrf.mxu1 }
 0x2de   :  { %v3346_v40 = vsel %vm355_vm0, %v3243_v55, 0.0  ;;  %3698 = vst.msk [vmem:[%s6009_s4 + $0xa0] sm:$0xf] %vm3657_vm12, %v3871_v49  ;;  %v3874_v51 = vpack.c.bf16 %v4138_v62, %v4138_v62  ;;  %v3246_v48 = vmul.f32 %v4138_v62, %v4138_v62  ;;  %v3154_v30 = vsel %vm355_vm0, %v4138_v62, 0.0 }
 0x2df   :  { %v3347_v1 = vadd.f32 %v3346_v40, %v3345_v2  ;;  %v2977_v5 = vpop.f32.mrf.mxu1 }
 0x2e0   :  { %3701 = vst.msk [vmem:[%s6009_s4 + $0xac] sm:$0xf] %vm3657_vm12, %v3874_v51  ;;  %v3150_v43 = vsel %vm355_vm0, %v2977_v5, 0.0  ;;  %v3244_v53 = vmul.f32 %v2977_v5, %v2977_v5  ;;  %v3872_v59 = vpack.c.bf16 %v2977_v5, %v2977_v5  ;;  %v3352_v21 = vsel %vm355_vm0, %v3246_v48, 0.0 }
 0x2e1   :  { %v3151_v50 = vadd.f32 %v3150_v43, %v3149_v25 }
 0x2e2   :  { %v3348_v38 = vsel %vm355_vm0, %v3244_v53, 0.0  ;;  %3699 = vst.msk [vmem:[%s6009_s4 + $0xa4] sm:$0xf] %vm3657_vm12, %v3872_v59 }
 0x2e3   :  { %v3153_v36 = vadd.f32 %v3152_v0, %v3151_v50  ;;  %v3349_v23 = vadd.f32 %v3348_v38, %v3347_v1 }
 0x2e5   :  { %v3351_v44 = vadd.f32 %v3350_v45, %v3349_v23  ;;  %v3155_v31 = vadd.f32 %v3154_v30, %v3153_v36 }
 0x2e7   :  { %v3353_v3 = vadd.f32 %v3352_v21, %v3351_v44 }
 0x2f5   :  { %v4141_v22 = vpop.f32.mrf.mxu1 }
 0x2f6   :  { %v3877_v17 = vpack.c.bf16 %v4141_v22, %v4141_v22  ;;  %v3249_v47 = vmul.f32 %v4141_v22, %v4141_v22  ;;  %v3160_v11 = vsel %vm355_vm0, %v4141_v22, 0.0 }
 0x2f7   :  { %v2990_v13 = vpop.f32.mrf.mxu1 }
 0x2f8   :  { %3704 = vst.msk [vmem:[%s6009_s4 + $0xb8] sm:$0xf] %vm3657_vm12, %v3877_v17  ;;  %v3156_v52 = vsel %vm355_vm0, %v2990_v13, 0.0  ;;  %v3247_v10 = vmul.f32 %v2990_v13, %v2990_v13  ;;  %v3875_v14 = vpack.c.bf16 %v2990_v13, %v2990_v13  ;;  %v3358_v18 = vsel %vm355_vm0, %v3249_v47, 0.0 }
 0x2f9   :  { %v3157_v7 = vadd.f32 %v3156_v52, %v3155_v31  ;;  %v4142_v56 = vpop.f32.mrf.mxu1 }
 0x2fa   :  { %v3354_v57 = vsel %vm355_vm0, %v3247_v10, 0.0  ;;  %3702 = vst.msk [vmem:[%s6009_s4 + $0xb0] sm:$0xf] %vm3657_vm12, %v3875_v14  ;;  %v3878_v6 = vpack.c.bf16 %v4142_v56, %v4142_v56  ;;  %v3250_v4 = vmul.f32 %v4142_v56, %v4142_v56  ;;  %v3162_v24 = vsel %vm355_vm0, %v4142_v56, 0.0 }
 0x2fb   :  { %v3355_v63 = vadd.f32 %v3354_v57, %v3353_v3  ;;  %v2993_v34 = vpop.f32.mrf.mxu1 }
 0x2fc   :  { %3705 = vst.msk [vmem:[%s6009_s4 + $0xbc] sm:$0xf] %vm3657_vm12, %v3878_v6  ;;  %v3158_v26 = vsel %vm355_vm0, %v2993_v34, 0.0  ;;  %v3248_v42 = vmul.f32 %v2993_v34, %v2993_v34  ;;  %v3876_v33 = vpack.c.bf16 %v2993_v34, %v2993_v34  ;;  %v3360_v16 = vsel %vm355_vm0, %v3250_v4, 0.0 }
 0x2fd   :  { %v3159_v19 = vadd.f32 %v3158_v26, %v3157_v7 }
 0x2fe   :  { %v3356_v9 = vsel %vm355_vm0, %v3248_v42, 0.0  ;;  %3703 = vst.msk [vmem:[%s6009_s4 + $0xb4] sm:$0xf] %vm3657_vm12, %v3876_v33 }
 0x2ff   :  { %v3161_v27 = vadd.f32 %v3160_v11, %v3159_v19  ;;  %v3357_v60 = vadd.f32 %v3356_v9, %v3355_v63 }
 0x301   :  { %v3359_v46 = vadd.f32 %v3358_v18, %v3357_v60  ;;  %v3163_v8 = vadd.f32 %v3162_v24, %v3161_v27 }
 0x303   :  { %v3361_v15 = vadd.f32 %v3360_v16, %v3359_v46 }
 0x311   :  { %v4145_v28 = vpop.f32.mrf.mxu1 }
 0x312   :  { %v3881_v35 = vpack.c.bf16 %v4145_v28, %v4145_v28  ;;  %v3253_v29 = vmul.f32 %v4145_v28, %v4145_v28  ;;  %v3168_v51 = vsel %vm355_vm0, %v4145_v28, 0.0 }
 0x313   :  { %v3006_v12 = vpop.f32.mrf.mxu1 }
 0x314   :  { %3708 = vst.msk [vmem:[%s6009_s4 + $0xc8] sm:$0xf] %vm3657_vm12, %v3881_v35  ;;  %v3164_v61 = vsel %vm355_vm0, %v3006_v12, 0.0  ;;  %v3251_v58 = vmul.f32 %v3006_v12, %v3006_v12  ;;  %v3879_v41 = vpack.c.bf16 %v3006_v12, %v3006_v12  ;;  %v3366_v53 = vsel %vm355_vm0, %v3253_v29, 0.0 }
 0x315   :  { %v4146_v54 = vpop.f32.mrf.mxu1  ;;  %v3165_v20 = vadd.f32 %v3164_v61, %v3163_v8 }
 0x316   :  { %v3362_v2 = vsel %vm355_vm0, %v3251_v58, 0.0  ;;  %3706 = vst.msk [vmem:[%s6009_s4 + $0xc0] sm:$0xf] %vm3657_vm12, %v3879_v41  ;;  %v3882_v32 = vpack.c.bf16 %v4146_v54, %v4146_v54  ;;  %v3254_v1 = vmul.f32 %v4146_v54, %v4146_v54  ;;  %v3170_v59 = vsel %vm355_vm0, %v4146_v54, 0.0 }
 0x317   :  { %v3009_v37 = vpop.f32.mrf.mxu1  ;;  %v3363_v62 = vadd.f32 %v3362_v2, %v3361_v15 }
 0x318   :  { %3709 = vst.msk [vmem:[%s6009_s4 + $0xcc] sm:$0xf] %vm3657_vm12, %v3882_v32  ;;  %v3166_v55 = vsel %vm355_vm0, %v3009_v37, 0.0  ;;  %v3252_v49 = vmul.f32 %v3009_v37, %v3009_v37  ;;  %v3880_v25 = vpack.c.bf16 %v3009_v37, %v3009_v37  ;;  %v3368_v48 = vsel %vm355_vm0, %v3254_v1, 0.0 }
 0x319   :  { %v3167_v40 = vadd.f32 %v3166_v55, %v3165_v20 }
 0x31a   :  { %v3364_v5 = vsel %vm355_vm0, %v3252_v49, 0.0  ;;  %3707 = vst.msk [vmem:[%s6009_s4 + $0xc4] sm:$0xf] %vm3657_vm12, %v3880_v25 }
 0x31b   :  { %v3169_v39 = vadd.f32 %v3168_v51, %v3167_v40  ;;  %v3365_v43 = vadd.f32 %v3364_v5, %v3363_v62 }
 0x31d   :  { %v3367_v50 = vadd.f32 %v3366_v53, %v3365_v43  ;;  %v3171_v0 = vadd.f32 %v3170_v59, %v3169_v39 }
 0x31f   :  { %v3369_v38 = vadd.f32 %v3368_v48, %v3367_v50 }
 0x32d   :  { %v4149_v36 = vpop.f32.mrf.mxu1 }
 0x32e   :  { %v3885_v23 = vpack.c.bf16 %v4149_v36, %v4149_v36  ;;  %v3257_v11 = vmul.f32 %v4149_v36, %v4149_v36  ;;  %v3176_v9 = vsel %vm355_vm0, %v4149_v36, 0.0 }
 0x32f   :  { %v3022_v45 = vpop.f32.mrf.mxu1 }
 0x330   :  { %3712 = vst.msk [vmem:[%s6009_s4 + $0xd8] sm:$0xf] %vm3657_vm12, %v3885_v23  ;;  %v3883_v30 = vpack.c.bf16 %v3022_v45, %v3022_v45  ;;  %v3255_v14 = vmul.f32 %v3022_v45, %v3022_v45  ;;  %v3172_v57 = vsel %vm355_vm0, %v3022_v45, 0.0  ;;  %v3374_v60 = vsel %vm355_vm0, %v3257_v11, 0.0 }
 0x331   :  { %v4150_v44 = vpop.f32.mrf.mxu1  ;;  %v3173_v26 = vadd.f32 %v3172_v57, %v3171_v0 }
 0x332   :  { %3710 = vst.msk [vmem:[%s6009_s4 + $0xd0] sm:$0xf] %vm3657_vm12, %v3883_v30  ;;  %v3886_v31 = vpack.c.bf16 %v4150_v44, %v4150_v44  ;;  %v3370_v34 = vsel %vm355_vm0, %v3255_v14, 0.0  ;;  %v3258_v18 = vmul.f32 %v4150_v44, %v4150_v44  ;;  %v3178_v8 = vsel %vm355_vm0, %v4150_v44, 0.0 }
 0x333   :  { %v3025_v21 = vpop.f32.mrf.mxu1  ;;  %v3371_v33 = vadd.f32 %v3370_v34, %v3369_v38 }
 0x334   :  { %3713 = vst.msk [vmem:[%s6009_s4 + $0xdc] sm:$0xf] %vm3657_vm12, %v3886_v31  ;;  %v3884_v3 = vpack.c.bf16 %v3025_v21, %v3025_v21  ;;  %v3256_v6 = vmul.f32 %v3025_v21, %v3025_v21  ;;  %v3174_v47 = vsel %vm355_vm0, %v3025_v21, 0.0  ;;  %v3376_v35 = vsel %vm355_vm0, %v3258_v18, 0.0 }
 0x335   :  { %v3175_v19 = vadd.f32 %v3174_v47, %v3173_v26 }
 0x336   :  { %3711 = vst.msk [vmem:[%s6009_s4 + $0xd4] sm:$0xf] %vm3657_vm12, %v3884_v3  ;;  %v3372_v42 = vsel %vm355_vm0, %v3256_v6, 0.0 }
 0x337   :  { %v3373_v4 = vadd.f32 %v3372_v42, %v3371_v33  ;;  %v3177_v27 = vadd.f32 %v3176_v9, %v3175_v19 }
 0x339   :  { %v3375_v46 = vadd.f32 %v3374_v60, %v3373_v4  ;;  %v3179_v28 = vadd.f32 %v3178_v8, %v3177_v27 }
 0x33b   :  { %v3377_v41 = vadd.f32 %v3376_v35, %v3375_v46 }
 0x349   :  { %v4153_v22 = vpop.f32.mrf.mxu1 }
 0x34a   :  { %v3889_v17 = vpack.c.bf16 %v4153_v22, %v4153_v22  ;;  %v3261_v20 = vmul.f32 %v4153_v22, %v4153_v22  ;;  %v3184_v29 = vsel %vm355_vm0, %v4153_v22, 0.0 }
 0x34b   :  { %v3038_v13 = vpop.f32.mrf.mxu1 }
 0x34c   :  { %3716 = vst.msk [vmem:[%s6009_s4 + $0xe8] sm:$0xf] %vm3657_vm12, %v3889_v17  ;;  %v3887_v52 = vpack.c.bf16 %v3038_v13, %v3038_v13  ;;  %v3259_v24 = vmul.f32 %v3038_v13, %v3038_v13  ;;  %v3180_v16 = vsel %vm355_vm0, %v3038_v13, 0.0  ;;  %v3382_v25 = vsel %vm355_vm0, %v3261_v20, 0.0 }
 0x34d   :  { %v4154_v10 = vpop.f32.mrf.mxu1  ;;  %v3181_v58 = vadd.f32 %v3180_v16, %v3179_v28 }
 0x34e   :  { %3714 = vst.msk [vmem:[%s6009_s4 + $0xe0] sm:$0xf] %vm3657_vm12, %v3887_v52  ;;  %v3890_v7 = vpack.c.bf16 %v4154_v10, %v4154_v10  ;;  %v3378_v12 = vsel %vm355_vm0, %v3259_v24, 0.0  ;;  %v3262_v62 = vmul.f32 %v4154_v10, %v4154_v10  ;;  %v3186_v5 = vsel %vm355_vm0, %v4154_v10, 0.0 }
 0x34f   :  { %v3041_v56 = vpop.f32.mrf.mxu1  ;;  %v3379_v2 = vadd.f32 %v3378_v12, %v3377_v41 }
 0x350   :  { %3717 = vst.msk [vmem:[%s6009_s4 + $0xec] sm:$0xf] %vm3657_vm12, %v3890_v7  ;;  %v3888_v63 = vpack.c.bf16 %v3041_v56, %v3041_v56  ;;  %v3260_v15 = vmul.f32 %v3041_v56, %v3041_v56  ;;  %v3182_v61 = vsel %vm355_vm0, %v3041_v56, 0.0  ;;  %v3384_v0 = vsel %vm355_vm0, %v3262_v62, 0.0 }
 0x351   :  { %v3183_v32 = vadd.f32 %v3182_v61, %v3181_v58 }
 0x352   :  { %3715 = vst.msk [vmem:[%s6009_s4 + $0xe4] sm:$0xf] %vm3657_vm12, %v3888_v63  ;;  %v3380_v54 = vsel %vm355_vm0, %v3260_v15, 0.0 }
 0x353   :  { %v3381_v37 = vadd.f32 %v3380_v54, %v3379_v2  ;;  %v3185_v55 = vadd.f32 %v3184_v29, %v3183_v32 }
 0x355   :  { %v3383_v51 = vadd.f32 %v3382_v25, %v3381_v37  ;;  %v3187_v59 = vadd.f32 %v3186_v5, %v3185_v55 }
 0x357   :  { %v3385_v23 = vadd.f32 %v3384_v0, %v3383_v51 }
 0x365   :  { %v4157_v49 = vpop.f32.mrf.mxu1 }
 0x366   :  { %v3893_v40 = vpack.c.bf16 %v4157_v49, %v4157_v49  ;;  %v3265_v30 = vmul.f32 %v4157_v49, %v4157_v49  ;;  %v3192_v17 = vsel %vm355_vm0, %v4157_v49, 0.0 }
 0x367   :  { %v3054_v1 = vpop.f32.mrf.mxu1 }
 0x368   :  { %3720 = vst.msk [vmem:[%s6009_s4 + $0xf8] sm:$0xf] %vm3657_vm12, %v3893_v40  ;;  %v3188_v39 = vsel %vm355_vm0, %v3054_v1, 0.0  ;;  %v3263_v43 = vmul.f32 %v3054_v1, %v3054_v1  ;;  %v3891_v53 = vpack.c.bf16 %v3054_v1, %v3054_v1  ;;  %v3390_v7 = vsel %vm355_vm0, %v3265_v30, 0.0 }
 0x369   :  { %v4158_v50 = vpop.f32.mrf.mxu1  ;;  %v3189_v36 = vadd.f32 %v3188_v39, %v3187_v59 }
 0x36a   :  { %v3386_v48 = vsel %vm355_vm0, %v3263_v43, 0.0  ;;  %3718 = vst.msk [vmem:[%s6009_s4 + $0xf0] sm:$0xf] %vm3657_vm12, %v3891_v53  ;;  %v3894_v38 = vpack.c.bf16 %v4158_v50, %v4158_v50  ;;  %v3266_v13 = vmul.f32 %v4158_v50, %v4158_v50  ;;  %v3194_v56 = vsel %vm355_vm0, %v4158_v50, 0.0 }
 0x36b   :  { %v3057_v45 = vpop.f32.mrf.mxu1  ;;  %v3387_v3 = vadd.f32 %v3386_v48, %v3385_v23 }
 0x36c   :  { %3721 = vst.msk [vmem:[%s6009_s4 + $0xfc] sm:$0xf] %vm3657_vm12, %v3894_v38  ;;  %v3190_v44 = vsel %vm355_vm0, %v3057_v45, 0.0  ;;  %v3264_v31 = vmul.f32 %v3057_v45, %v3057_v45  ;;  %v3892_v21 = vpack.c.bf16 %v3057_v45, %v3057_v45  ;;  %v3392_v63 = vsel %vm355_vm0, %v3266_v13, 0.0 }
 0x36d   :  { %v3191_v22 = vadd.f32 %v3190_v44, %v3189_v36 }
 0x36e   :  { %v3388_v52 = vsel %vm355_vm0, %v3264_v31, 0.0  ;;  %3719 = vst.msk [vmem:[%s6009_s4 + $0xf4] sm:$0xf] %vm3657_vm12, %v3892_v21 }
 0x36f   :  { %v3193_v10 = vadd.f32 %v3192_v17, %v3191_v22  ;;  %v3389_v14 = vadd.f32 %v3388_v52, %v3387_v3 }
 0x371   :  { %v3195_v57 = vadd.f32 %v3194_v56, %v3193_v10  ;;  %v3391_v6 = vadd.f32 %v3390_v7, %v3389_v14 }
 0x373   :  { %v3196_v34 = vrot.slane %v3195_v57, 4  ;;  %v3393_v47 = vadd.f32 %v3392_v63, %v3391_v6 }
 0x375   :  { %v3197_v26 = vadd.f32 %v3196_v34, %v3195_v57  ;;  %v3394_v42 = vrot.slane %v3393_v47, 4 }
 0x377   :  { %v3198_v33 = vrot.slane %v3197_v26, 2  ;;  %v3395_v19 = vadd.f32 %v3394_v42, %v3393_v47 }
 0x379   :  { %v3199_v11 = vadd.f32 %v3198_v33, %v3197_v26  ;;  %v3396_v4 = vrot.slane %v3395_v19, 2 }
 0x37b   :  { %v3200_v9 = vrot.slane %v3199_v11, 1  ;;  %v3397_v27 = vadd.f32 %v3396_v4, %v3395_v19 }
 0x37d   :  { %v3201_v60 = vadd.f32 %v3200_v9, %v3199_v11  ;;  %v3398_v18 = vrot.slane %v3397_v27, 1 }
 0x37f   :  { %3202 = vst.msk [vmem:[%s6010_s5] sm:$0x1] %vm434_vm2, %v3201_v60  ;;  %v3399_v24 = vadd.f32 %v3398_v18, %v3397_v27 }
 0x381   :  { %3400 = vst.msk [vmem:[%s6010_s5 + $0x1] sm:$0x1] %vm434_vm2, %v3399_v24 }

</bundles_post_ra>
